<compile_context>
chip_gen: v7x
topology: tpu7x:2x2x1
jax: 0.10.0
libtpu: 0.0.40
codegen_flags: <defaults>
</compile_context>

<pallas_src>
import functools

import jax
import jax.numpy as jnp
from jax import lax
from jax.experimental import pallas as pl
from jax.experimental.pallas import tpu as pltpu


_VMEM_LIMIT = 48 * 1024 * 1024  # explicit scoped-VMEM limit (safe on v7x's 64 MiB)
_TM_CAP = 256                   # row-tile; keeps largest layer (K=8192) ~12 MiB/call


def _round_up(x, m):
    return (x + m - 1) // m * m


# ----------------------------- Pallas kernels ------------------------------ #

def _conv_act_kernel(p_ref, w_ref, b_ref, o_ref, *, act):
    """One M-tile of: out = act(patches @ W + b).  act in {'lrelu','sigmoid','none'}."""
    y = jnp.dot(p_ref[...], w_ref[...], preferred_element_type=jnp.float32)
    y = y + b_ref[...]
    if act == "lrelu":
        y = jnp.where(y > 0, y, 0.2 * y)
    elif act == "sigmoid":
        # exp + reciprocal live on the EUP slot (free while MXU is busy).
        y = pl.reciprocal(1.0 + jnp.exp(-y), approx=True)
    o_ref[...] = y


def _conv_stats_kernel(p_ref, w_ref, b_ref, o_ref, s_ref, q_ref, *, m_valid, tm):
    """One M-tile of conv (no activation) + per-tile partial sum / sum-of-squares
    over the valid rows (for fused train-mode BatchNorm statistics)."""
    y = jnp.dot(p_ref[...], w_ref[...], preferred_element_type=jnp.float32)
    y = y + b_ref[...]
    o_ref[...] = y
    rows = pl.program_id(0) * tm + lax.broadcasted_iota(jnp.int32, (tm, 1), 0)
    ym = jnp.where(rows < m_valid, y, 0.0)          # mask zero-padded rows
    s_ref[...] = jnp.sum(ym, axis=0).reshape(1, 1, -1)
    q_ref[...] = jnp.sum(ym * ym, axis=0).reshape(1, 1, -1)


def _bn_apply_kernel(x_ref, sc_ref, sh_ref, o_ref):
    """y = x * scale + shift, then LeakyReLU(0.2).  scale/shift are (1, C)."""
    y = x_ref[...] * sc_ref[...] + sh_ref[...]
    o_ref[...] = jnp.where(y > 0, y, 0.2 * y)


# ------------------------------ JAX glue ----------------------------------- #

def _extract_patches(x_nhwc, k, s, p):
    """im2col: (N,H,W,C) -> (N*Ho*Wo, k*k*C), patch order (kh, kw, cin)."""
    N, H, W, C = x_nhwc.shape
    xp = jnp.pad(x_nhwc, ((0, 0), (p, p), (p, p), (0, 0)))
    Ho = (H + 2 * p - k) // s + 1
    Wo = (W + 2 * p - k) // s + 1
    cols = []
    for kh in range(k):
        for kw in range(k):
            cols.append(xp[:, kh:kh + s * (Ho - 1) + 1:s,
                            kw:kw + s * (Wo - 1) + 1:s, :])
    patches = jnp.stack(cols, axis=3)  # (N, Ho, Wo, k*k, C)
    return patches.reshape(N * Ho * Wo, k * k * C), (N, Ho, Wo)


def _conv_layer(x_nhwc, w_oihw, b, stride, act, *, with_stats=False):
    cout, cin, k, _ = w_oihw.shape
    patches, (N, Ho, Wo) = _extract_patches(x_nhwc, k, stride, 1)  # (M, K) f32
    M, K = patches.shape

    Kp = _round_up(K, 128)                       # lane-align contraction dim
    cout_p = _round_up(cout, 128) if cout < 64 else cout  # lane-dense head (Cout=1 -> 128)
    TM = min(_TM_CAP, _round_up(M, 8))
    Mp = _round_up(M, TM)
    nm = Mp // TM

    # bf16 inputs, f32 accumulation (native MXU rate); zero-pad M and K.
    patches = jnp.pad(patches, ((0, Mp - M), (0, Kp - K))).astype(jnp.bfloat16)
    # (Cout, Cin, kH, kW) -> (kH, kW, Cin, Cout) -> (K, Cout), pad to (Kp, cout_p)
    w_mat = jnp.transpose(w_oihw, (2, 3, 1, 0)).reshape(K, cout)
    w_mat = jnp.pad(w_mat, ((0, Kp - K), (0, cout_p - cout))).astype(jnp.bfloat16)
    b_row = jnp.pad(b, (0, cout_p - cout)).reshape(1, cout_p).astype(jnp.float32)

    cparams = pltpu.CompilerParams(
        dimension_semantics=("parallel",),
        vmem_limit_bytes=_VMEM_LIMIT,
    )
    cost = pl.CostEstimate(
        flops=2 * Mp * Kp * cout_p,
        transcendentals=Mp * cout_p if act == "sigmoid" else 0,
        bytes_accessed=Mp * Kp * 2 + Kp * cout_p * 2 + Mp * cout_p * 4,
    )

    p_spec = pl.BlockSpec((TM, Kp), lambda i: (i, 0))
    w_spec = pl.BlockSpec((Kp, cout_p), lambda i: (0, 0))     # weight stays resident
    b_spec = pl.BlockSpec((1, cout_p), lambda i: (0, 0))
    o_spec = pl.BlockSpec((TM, cout_p), lambda i: (i, 0))

    if with_stats:
        kern = functools.partial(_conv_stats_kernel, m_valid=M, tm=TM)
        y, psum, pssq = pl.pallas_call(
            kern,
            out_shape=(
                jax.ShapeDtypeStruct((Mp, cout_p), jnp.float32),
                jax.ShapeDtypeStruct((nm, 1, cout_p), jnp.float32),
                jax.ShapeDtypeStruct((nm, 1, cout_p), jnp.float32),
            ),
            grid=(nm,),
            in_specs=[p_spec, w_spec, b_spec],
            out_specs=(
                o_spec,
                pl.BlockSpec((1, 1, cout_p), lambda i: (i, 0, 0)),
                pl.BlockSpec((1, 1, cout_p), lambda i: (i, 0, 0)),
            ),
            compiler_params=cparams,
            cost_estimate=cost,
        )(patches, w_mat, b_row)
        ssum = jnp.sum(psum[:, 0, :cout], axis=0)   # (cout,) f32
        ssq = jnp.sum(pssq[:, 0, :cout], axis=0)    # (cout,) f32
        return y, (ssum, ssq), (N, Ho, Wo, M, Mp, TM, cout, cout_p)

    kern = functools.partial(_conv_act_kernel, act=act)
    y = pl.pallas_call(
        kern,
        out_shape=jax.ShapeDtypeStruct((Mp, cout_p), jnp.float32),
        grid=(nm,),
        in_specs=[p_spec, w_spec, b_spec],
        out_specs=o_spec,
        compiler_params=cparams,
        cost_estimate=cost,
    )(patches, w_mat, b_row)
    return y[:M, :cout].reshape(N, Ho, Wo, cout)


def _conv_bn_lrelu(x_nhwc, w, b, gamma, beta, stride):
    """Conv (stats fused in the epilogue) -> train-mode BatchNorm -> LeakyReLU."""
    y, (ssum, ssq), meta = _conv_layer(x_nhwc, w, b, stride, "none", with_stats=True)
    N, Ho, Wo, M, Mp, TM, cout, cout_p = meta

    # Per-channel affine from the fused statistics (tiny arrays, plain JAX).
    mean = ssum / M
    var = jnp.maximum(ssq / M - mean * mean, 0.0)   # biased (training-mode) variance
    scale = gamma * lax.rsqrt(var + 1e-5)
    shift = beta - mean * scale
    scale_row = jnp.pad(scale, (0, cout_p - cout)).reshape(1, cout_p).astype(jnp.float32)
    shift_row = jnp.pad(shift, (0, cout_p - cout)).reshape(1, cout_p).astype(jnp.float32)

    nm = Mp // TM
    out = pl.pallas_call(
        _bn_apply_kernel,
        out_shape=jax.ShapeDtypeStruct((Mp, cout_p), jnp.float32),
        grid=(nm,),
        in_specs=[pl.BlockSpec((TM, cout_p), lambda i: (i, 0)),
                  pl.BlockSpec((1, cout_p), lambda i: (0, 0)),
                  pl.BlockSpec((1, cout_p), lambda i: (0, 0))],
        out_specs=pl.BlockSpec((TM, cout_p), lambda i: (i, 0)),
        compiler_params=pltpu.CompilerParams(
            dimension_semantics=("parallel",), vmem_limit_bytes=_VMEM_LIMIT),
        cost_estimate=pl.CostEstimate(
            flops=2 * Mp * cout_p, transcendentals=0,
            bytes_accessed=2 * Mp * cout_p * 4),
    )(y, scale_row, shift_row)
    return out[:M, :cout].reshape(N, Ho, Wo, cout)


def discriminator_forward(x_nchw, params):
    """Pallas forward pass. x_nchw: (N, 6, H, W) -> (N, 1, ~H/16, ~W/16)."""
    y = jnp.transpose(x_nchw, (0, 2, 3, 1))  # NCHW -> NHWC
    y = _conv_layer(y, params["w0"], params["b0"], 2, "lrelu")
    y = _conv_bn_lrelu(y, params["w1"], params["b1"], params["g0"], params["bb0"], 2)
    y = _conv_bn_lrelu(y, params["w2"], params["b2"], params["g1"], params["bb1"], 2)
    y = _conv_bn_lrelu(y, params["w3"], params["b3"], params["g2"], params["bb2"], 2)
    y = _conv_layer(y, params["w4"], params["b4"], 1, "sigmoid")
    return jnp.transpose(y, (0, 3, 1, 2))  # NHWC -> NCHW


# --------------------------- parameters & reference ------------------------- #

def init_params(key):
    conv_specs = [(64, 6), (128, 64), (256, 128), (512, 256), (1, 512)]
    bn_channels = [128, 256, 512]
    params = {}
    keys = jax.random.split(key, len(conv_specs) + len(bn_channels))
    for i, (co, ci) in enumerate(conv_specs):
        wkey, _ = jax.random.split(keys[i])
        params[f"w{i}"] = (0.02 * jax.random.normal(wkey, (co, ci, 4, 4))).astype(jnp.float32)
        params[f"b{i}"] = jnp.zeros((co,), jnp.float32)
    for j, c in enumerate(bn_channels):
        gkey, bkey = jax.random.split(keys[len(conv_specs) + j])
        params[f"g{j}"] = (1.0 + 0.1 * jax.random.normal(gkey, (c,))).astype(jnp.float32)
        params[f"bb{j}"] = (0.1 * jax.random.normal(bkey, (c,))).astype(jnp.float32)
    # TODO(synk): running_mean/running_var buffer updates (in-place state) are
    # not part of the functional forward pass and are omitted.
    return params


def ref_forward(x, params, *, bf16_matmul=True):
    """Pure-JAX reference (lax.conv).  bf16_matmul=True mirrors the kernel's
    bf16-input / f32-accumulate MXU math; False is the full-f32 reference."""
    dn = ("NCHW", "OIHW", "NCHW")

    def conv(h, w, b, s):
        if bf16_matmul:
            h = h.astype(jnp.bfloat16)
            w = w.astype(jnp.bfloat16)
            prec = None
        else:
            prec = lax.Precision.HIGHEST
        y = lax.conv_general_dilated(
            h, w, (s, s), [(1, 1), (1, 1)], dimension_numbers=dn,
            preferred_element_type=jnp.float32, precision=prec)
        return y + b[None, :, None, None]

    def bn_lrelu(h, g, b):
        mean = jnp.mean(h, axis=(0, 2, 3), keepdims=True)
        var = jnp.mean((h - mean) ** 2, axis=(0, 2, 3), keepdims=True)
        y = (h - mean) * lax.rsqrt(var + 1e-5) * g[None, :, None, None] \
            + b[None, :, None, None]
        return jnp.where(y > 0, y, 0.2 * y)

    lrelu = lambda y: jnp.where(y > 0, y, 0.2 * y)
    y = lrelu(conv(x, params["w0"], params["b0"], 2))
    y = bn_lrelu(conv(y, params["w1"], params["b1"], 2), params["g0"], params["bb0"])
    y = bn_lrelu(conv(y, params["w2"], params["b2"], 2), params["g1"], params["bb1"])
    y = bn_lrelu(conv(y, params["w3"], params["b3"], 2), params["g2"], params["bb2"])
    y = jax.nn.sigmoid(conv(y, params["w4"], params["b4"], 1))
    return y


# --------------------------------- main ------------------------------------ #

if __name__ == "__main__":
    key = jax.random.PRNGKey(0)
    pkey, xkey = jax.random.split(key)
    params = init_params(pkey)

    # Small but valid input: 32x32 -> 16 -> 8 -> 4 -> 2 -> 1 patch output.
    x = jax.random.normal(xkey, (2, 6, 32, 32), dtype=jnp.float32)

    fwd = jax.jit(discriminator_forward)
    out = jax.block_until_ready(fwd(x, params))

    ref_bf16 = jax.block_until_ready(ref_forward(x, params, bf16_matmul=True))
    ref_f32 = jax.block_until_ready(ref_forward(x, params, bf16_matmul=False))

    assert out.shape == (2, 1, 1, 1), out.shape
    err_bf16 = float(jnp.max(jnp.abs(out - ref_bf16)))
    err_f32 = float(jnp.max(jnp.abs(out - ref_f32)))
    # Tight check against an apples-to-apples bf16-input/f32-accumulate reference,
    # loose sanity check against the full-f32 reference (bf16 MXU compute).
    assert jnp.allclose(out, ref_bf16, atol=5e-3, rtol=5e-3), \
        f"bf16-ref max abs diff = {err_bf16}"
    assert jnp.allclose(out, ref_f32, atol=5e-2, rtol=5e-2), \
        f"f32-ref max abs diff = {err_f32}"
    print("KERNEL_OK")
</pallas_src>

<mosaic_0001>
module attributes {stable_mosaic.version = 11 : i64} {
  func.func @_conv_act_kernel(%arg0: i32, %arg1: memref<256x128xbf16, #tpu.memory_space<vmem>>, %arg2: memref<128x64xbf16, #tpu.memory_space<vmem>>, %arg3: memref<1x64xf32, #tpu.memory_space<vmem>>, %arg4: memref<256x64xf32, #tpu.memory_space<vmem>>) attributes {dimension_semantics = [#tpu.dimension_semantics<parallel>], iteration_bounds = array<i64: 2>, scalar_prefetch = 0 : i64, scratch_operands = 0 : i64, tpu.core_type = #tpu.core_type<tc>, window_params = [{transform_indices = @transform_0, window_bounds = array<i64: 256, 128>}, {pipeline_mode = #tpu.pipeline_mode<synchronous>, transform_indices = @transform_1, window_bounds = array<i64: 128, 64>}, {pipeline_mode = #tpu.pipeline_mode<synchronous>, transform_indices = @transform_2, window_bounds = array<i64: 1, 64>}, {transform_indices = @transform_3, window_bounds = array<i64: 256, 64>}]} {
    %c0 = arith.constant 0 : index
    %c0_0 = arith.constant 0 : index
    %0 = vector.load %arg1[%c0, %c0_0] : memref<256x128xbf16, #tpu.memory_space<vmem>>, vector<256x128xbf16>
    %c0_1 = arith.constant 0 : index
    %c0_2 = arith.constant 0 : index
    %1 = vector.load %arg2[%c0_1, %c0_2] : memref<128x64xbf16, #tpu.memory_space<vmem>>, vector<128x64xbf16>
    %cst = arith.constant dense<0.000000e+00> : vector<256x64xf32>
    %2 = tpu.matmul %0, %1, %cst {dimension_numbers = #tpu.dot_dimension_numbers<[1], [0], [0], [1], [0, 0, 1, 1], [], []>} : vector<256x128xbf16>, vector<128x64xbf16>, vector<256x64xf32> -> vector<256x64xf32>
    %c0_3 = arith.constant 0 : index
    %c0_4 = arith.constant 0 : index
    %3 = vector.load %arg3[%c0_3, %c0_4] : memref<1x64xf32, #tpu.memory_space<vmem>>, vector<1x64xf32>
    %4 = vector.broadcast %3 : vector<1x64xf32> to vector<256x64xf32>
    %5 = arith.addf %2, %4 : vector<256x64xf32>
    %cst_5 = arith.constant 0.000000e+00 : f32
    %6 = vector.broadcast %cst_5 : f32 to vector<256x64xf32>
    %7 = arith.cmpf ogt, %5, %6 : vector<256x64xf32>
    %cst_6 = arith.constant 2.000000e-01 : f32
    %8 = vector.broadcast %cst_6 : f32 to vector<256x64xf32>
    %9 = arith.mulf %8, %5 : vector<256x64xf32>
    %10 = arith.select %7, %5, %9 : vector<256x64xi1>, vector<256x64xf32>
    %c0_7 = arith.constant 0 : index
    %c0_8 = arith.constant 0 : index
    %11 = vector.load %arg4[%c0_7, %c0_8] : memref<256x64xf32, #tpu.memory_space<vmem>>, vector<256x64xf32>
    tpu.vector_store %arg4[%c0_7, %c0_8], %10 {strides = array<i32>} : memref<256x64xf32, #tpu.memory_space<vmem>>, vector<256x64xf32>,
    return
  }
  func.func @transform_0(%arg0: i32) -> (i32, i32) {
    %c0_i32 = arith.constant 0 : i32
    %c0_i32_0 = arith.constant 0 : i32
    return %arg0, %c0_i32 : i32, i32
  }
  func.func @transform_1(%arg0: i32) -> (i32, i32) {
    %c0_i32 = arith.constant 0 : i32
    %c0_i32_0 = arith.constant 0 : i32
    %c0_i32_1 = arith.constant 0 : i32
    return %c0_i32, %c0_i32_0 : i32, i32
  }
  func.func @transform_2(%arg0: i32) -> (i32, i32) {
    %c0_i32 = arith.constant 0 : i32
    %c0_i32_0 = arith.constant 0 : i32
    %c0_i32_1 = arith.constant 0 : i32
    return %c0_i32, %c0_i32_0 : i32, i32
  }
  func.func @transform_3(%arg0: i32) -> (i32, i32) {
    %c0_i32 = arith.constant 0 : i32
    %c0_i32_0 = arith.constant 0 : i32
    return %arg0, %c0_i32 : i32, i32
  }
}

module attributes {stable_mosaic.version = 11 : i64} {
  func.func @_conv_stats_kernel(%arg0: i32, %arg1: memref<128x1024xbf16, #tpu.memory_space<vmem>>, %arg2: memref<1024x128xbf16, #tpu.memory_space<vmem>>, %arg3: memref<1x128xf32, #tpu.memory_space<vmem>>, %arg4: memref<128x128xf32, #tpu.memory_space<vmem>>, %arg5: memref<1x1x128xf32, #tpu.memory_space<vmem>>, %arg6: memref<1x1x128xf32, #tpu.memory_space<vmem>>) attributes {dimension_semantics = [#tpu.dimension_semantics<parallel>], iteration_bounds = array<i64: 1>, scalar_prefetch = 0 : i64, scratch_operands = 0 : i64, tpu.core_type = #tpu.core_type<tc>, window_params = [{transform_indices = @transform_0, window_bounds = array<i64: 128, 1024>}, {pipeline_mode = #tpu.pipeline_mode<synchronous>, transform_indices = @transform_1, window_bounds = array<i64: 1024, 128>}, {pipeline_mode = #tpu.pipeline_mode<synchronous>, transform_indices = @transform_2, window_bounds = array<i64: 1, 128>}, {transform_indices = @transform_3, window_bounds = array<i64: 128, 128>}, {transform_indices = @transform_4, window_bounds = array<i64: 1, 1, 128>}, {transform_indices = @transform_5, window_bounds = array<i64: 1, 1, 128>}]} {
    %c0 = arith.constant 0 : index
    %c0_0 = arith.constant 0 : index
    %0 = vector.load %arg1[%c0, %c0_0] : memref<128x1024xbf16, #tpu.memory_space<vmem>>, vector<128x1024xbf16>
    %c0_1 = arith.constant 0 : index
    %c0_2 = arith.constant 0 : index
    %1 = vector.load %arg2[%c0_1, %c0_2] : memref<1024x128xbf16, #tpu.memory_space<vmem>>, vector<1024x128xbf16>
    %cst = arith.constant dense<0.000000e+00> : vector<128x128xf32>
    %2 = tpu.matmul %0, %1, %cst {dimension_numbers = #tpu.dot_dimension_numbers<[1], [0], [0], [1], [0, 0, 1, 1], [], []>} : vector<128x1024xbf16>, vector<1024x128xbf16>, vector<128x128xf32> -> vector<128x128xf32>
    %c0_3 = arith.constant 0 : index
    %c0_4 = arith.constant 0 : index
    %3 = vector.load %arg3[%c0_3, %c0_4] : memref<1x128xf32, #tpu.memory_space<vmem>>, vector<1x128xf32>
    %4 = vector.broadcast %3 : vector<1x128xf32> to vector<128x128xf32>
    %5 = arith.addf %2, %4 : vector<128x128xf32>
    %c0_5 = arith.constant 0 : index
    %c0_6 = arith.constant 0 : index
    %6 = vector.load %arg4[%c0_5, %c0_6] : memref<128x128xf32, #tpu.memory_space<vmem>>, vector<128x128xf32>
    tpu.vector_store %arg4[%c0_5, %c0_6], %5 {strides = array<i32>} : memref<128x128xf32, #tpu.memory_space<vmem>>, vector<128x128xf32>,
    %c128_i32 = arith.constant 128 : i32
    %7 = arith.muli %arg0, %c128_i32 : i32
    %8 = tpu.iota {dimensions = array<i32: 0>} : vector<128x1xi32>
    %9 = vector.broadcast %7 : i32 to vector<128x1xi32>
    %10 = arith.addi %9, %8 : vector<128x1xi32>
    %c128_i32_7 = arith.constant 128 : i32
    %11 = vector.broadcast %c128_i32_7 : i32 to vector<128x1xi32>
    %12 = arith.cmpi slt, %10, %11 : vector<128x1xi32>
    %cst_8 = arith.constant 0.000000e+00 : f32
    %13 = vector.shape_cast %12 : vector<128x1xi1> to vector<128x1xi1>
    %14 = vector.broadcast %13 : vector<128x1xi1> to vector<128x128xi1>
    %15 = vector.broadcast %cst_8 : f32 to vector<128x128xf32>
    %16 = arith.select %14, %5, %15 : vector<128x128xi1>, vector<128x128xf32>
    %cst_9 = arith.constant dense<0.000000e+00> : vector<128xf32>
    %17 = vector.multi_reduction <add>, %16, %cst_9 [0] : vector<128x128xf32> to vector<128xf32>
    %18 = vector.shape_cast %17 : vector<128xf32> to vector<1x1x128xf32>
    %c0_10 = arith.constant 0 : index
    %c0_11 = arith.constant 0 : index
    %c0_12 = arith.constant 0 : index
    %19 = vector.load %arg5[%c0_10, %c0_11, %c0_12] : memref<1x1x128xf32, #tpu.memory_space<vmem>>, vector<1x1x128xf32>
    tpu.vector_store %arg5[%c0_10, %c0_11, %c0_12], %18 {strides = array<i32>} : memref<1x1x128xf32, #tpu.memory_space<vmem>>, vector<1x1x128xf32>,
    %20 = arith.mulf %16, %16 : vector<128x128xf32>
    %cst_13 = arith.constant dense<0.000000e+00> : vector<128xf32>
    %21 = vector.multi_reduction <add>, %20, %cst_13 [0] : vector<128x128xf32> to vector<128xf32>
    %22 = vector.shape_cast %21 : vector<128xf32> to vector<1x1x128xf32>
    %c0_14 = arith.constant 0 : index
    %c0_15 = arith.constant 0 : index
    %c0_16 = arith.constant 0 : index
    %23 = vector.load %arg6[%c0_14, %c0_15, %c0_16] : memref<1x1x128xf32, #tpu.memory_space<vmem>>, vector<1x1x128xf32>
    tpu.vector_store %arg6[%c0_14, %c0_15, %c0_16], %22 {strides = array<i32>} : memref<1x1x128xf32, #tpu.memory_space<vmem>>, vector<1x1x128xf32>,
    return
  }
  func.func @transform_0(%arg0: i32) -> (i32, i32) {
    %c0_i32 = arith.constant 0 : i32
    %c0_i32_0 = arith.constant 0 : i32
    return %arg0, %c0_i32 : i32, i32
  }
  func.func @transform_1(%arg0: i32) -> (i32, i32) {
    %c0_i32 = arith.constant 0 : i32
    %c0_i32_0 = arith.constant 0 : i32
    %c0_i32_1 = arith.constant 0 : i32
    return %c0_i32, %c0_i32_0 : i32, i32
  }
  func.func @transform_2(%arg0: i32) -> (i32, i32) {
    %c0_i32 = arith.constant 0 : i32
    %c0_i32_0 = arith.constant 0 : i32
    %c0_i32_1 = arith.constant 0 : i32
    return %c0_i32, %c0_i32_0 : i32, i32
  }
  func.func @transform_3(%arg0: i32) -> (i32, i32) {
    %c0_i32 = arith.constant 0 : i32
    %c0_i32_0 = arith.constant 0 : i32
    return %arg0, %c0_i32 : i32, i32
  }
  func.func @transform_4(%arg0: i32) -> (i32, i32, i32) {
    %c0_i32 = arith.constant 0 : i32
    %c0_i32_0 = arith.constant 0 : i32
    %c0_i32_1 = arith.constant 0 : i32
    return %arg0, %c0_i32, %c0_i32_0 : i32, i32, i32
  }
  func.func @transform_5(%arg0: i32) -> (i32, i32, i32) {
    %c0_i32 = arith.constant 0 : i32
    %c0_i32_0 = arith.constant 0 : i32
    %c0_i32_1 = arith.constant 0 : i32
    return %arg0, %c0_i32, %c0_i32_0 : i32, i32, i32
  }
}

module attributes {stable_mosaic.version = 11 : i64} {
  func.func @_bn_apply_kernel(%arg0: i32, %arg1: memref<128x128xf32, #tpu.memory_space<vmem>>, %arg2: memref<1x128xf32, #tpu.memory_space<vmem>>, %arg3: memref<1x128xf32, #tpu.memory_space<vmem>>, %arg4: memref<128x128xf32, #tpu.memory_space<vmem>>) attributes {dimension_semantics = [#tpu.dimension_semantics<parallel>], iteration_bounds = array<i64: 1>, scalar_prefetch = 0 : i64, scratch_operands = 0 : i64, tpu.core_type = #tpu.core_type<tc>, window_params = [{transform_indices = @transform_0, window_bounds = array<i64: 128, 128>}, {pipeline_mode = #tpu.pipeline_mode<synchronous>, transform_indices = @transform_1, window_bounds = array<i64: 1, 128>}, {pipeline_mode = #tpu.pipeline_mode<synchronous>, transform_indices = @transform_2, window_bounds = array<i64: 1, 128>}, {transform_indices = @transform_3, window_bounds = array<i64: 128, 128>}]} {
    %c0 = arith.constant 0 : index
    %c0_0 = arith.constant 0 : index
    %0 = vector.load %arg1[%c0, %c0_0] : memref<128x128xf32, #tpu.memory_space<vmem>>, vector<128x128xf32>
    %c0_1 = arith.constant 0 : index
    %c0_2 = arith.constant 0 : index
    %1 = vector.load %arg2[%c0_1, %c0_2] : memref<1x128xf32, #tpu.memory_space<vmem>>, vector<1x128xf32>
    %2 = vector.broadcast %1 : vector<1x128xf32> to vector<128x128xf32>
    %3 = arith.mulf %0, %2 : vector<128x128xf32>
    %c0_3 = arith.constant 0 : index
    %c0_4 = arith.constant 0 : index
    %4 = vector.load %arg3[%c0_3, %c0_4] : memref<1x128xf32, #tpu.memory_space<vmem>>, vector<1x128xf32>
    %5 = vector.broadcast %4 : vector<1x128xf32> to vector<128x128xf32>
    %6 = arith.addf %3, %5 : vector<128x128xf32>
    %cst = arith.constant 0.000000e+00 : f32
    %7 = vector.broadcast %cst : f32 to vector<128x128xf32>
    %8 = arith.cmpf ogt, %6, %7 : vector<128x128xf32>
    %cst_5 = arith.constant 2.000000e-01 : f32
    %9 = vector.broadcast %cst_5 : f32 to vector<128x128xf32>
    %10 = arith.mulf %9, %6 : vector<128x128xf32>
    %11 = arith.select %8, %6, %10 : vector<128x128xi1>, vector<128x128xf32>
    %c0_6 = arith.constant 0 : index
    %c0_7 = arith.constant 0 : index
    %12 = vector.load %arg4[%c0_6, %c0_7] : memref<128x128xf32, #tpu.memory_space<vmem>>, vector<128x128xf32>
    tpu.vector_store %arg4[%c0_6, %c0_7], %11 {strides = array<i32>} : memref<128x128xf32, #tpu.memory_space<vmem>>, vector<128x128xf32>,
    return
  }
  func.func @transform_0(%arg0: i32) -> (i32, i32) {
    %c0_i32 = arith.constant 0 : i32
    %c0_i32_0 = arith.constant 0 : i32
    return %arg0, %c0_i32 : i32, i32
  }
  func.func @transform_1(%arg0: i32) -> (i32, i32) {
    %c0_i32 = arith.constant 0 : i32
    %c0_i32_0 = arith.constant 0 : i32
    %c0_i32_1 = arith.constant 0 : i32
    return %c0_i32, %c0_i32_0 : i32, i32
  }
  func.func @transform_2(%arg0: i32) -> (i32, i32) {
    %c0_i32 = arith.constant 0 : i32
    %c0_i32_0 = arith.constant 0 : i32
    %c0_i32_1 = arith.constant 0 : i32
    return %c0_i32, %c0_i32_0 : i32, i32
  }
  func.func @transform_3(%arg0: i32) -> (i32, i32) {
    %c0_i32 = arith.constant 0 : i32
    %c0_i32_0 = arith.constant 0 : i32
    return %arg0, %c0_i32 : i32, i32
  }
}

module attributes {stable_mosaic.version = 11 : i64} {
  func.func @_conv_stats_kernel(%arg0: i32, %arg1: memref<32x2048xbf16, #tpu.memory_space<vmem>>, %arg2: memref<2048x256xbf16, #tpu.memory_space<vmem>>, %arg3: memref<1x256xf32, #tpu.memory_space<vmem>>, %arg4: memref<32x256xf32, #tpu.memory_space<vmem>>, %arg5: memref<1x1x256xf32, #tpu.memory_space<vmem>>, %arg6: memref<1x1x256xf32, #tpu.memory_space<vmem>>) attributes {dimension_semantics = [#tpu.dimension_semantics<parallel>], iteration_bounds = array<i64: 1>, scalar_prefetch = 0 : i64, scratch_operands = 0 : i64, tpu.core_type = #tpu.core_type<tc>, window_params = [{transform_indices = @transform_0, window_bounds = array<i64: 32, 2048>}, {pipeline_mode = #tpu.pipeline_mode<synchronous>, transform_indices = @transform_1, window_bounds = array<i64: 2048, 256>}, {pipeline_mode = #tpu.pipeline_mode<synchronous>, transform_indices = @transform_2, window_bounds = array<i64: 1, 256>}, {transform_indices = @transform_3, window_bounds = array<i64: 32, 256>}, {transform_indices = @transform_4, window_bounds = array<i64: 1, 1, 256>}, {transform_indices = @transform_5, window_bounds = array<i64: 1, 1, 256>}]} {
    %c0 = arith.constant 0 : index
    %c0_0 = arith.constant 0 : index
    %0 = vector.load %arg1[%c0, %c0_0] : memref<32x2048xbf16, #tpu.memory_space<vmem>>, vector<32x2048xbf16>
    %c0_1 = arith.constant 0 : index
    %c0_2 = arith.constant 0 : index
    %1 = vector.load %arg2[%c0_1, %c0_2] : memref<2048x256xbf16, #tpu.memory_space<vmem>>, vector<2048x256xbf16>
    %cst = arith.constant dense<0.000000e+00> : vector<32x256xf32>
    %2 = tpu.matmul %0, %1, %cst {dimension_numbers = #tpu.dot_dimension_numbers<[1], [0], [0], [1], [0, 0, 1, 1], [], []>} : vector<32x2048xbf16>, vector<2048x256xbf16>, vector<32x256xf32> -> vector<32x256xf32>
    %c0_3 = arith.constant 0 : index
    %c0_4 = arith.constant 0 : index
    %3 = vector.load %arg3[%c0_3, %c0_4] : memref<1x256xf32, #tpu.memory_space<vmem>>, vector<1x256xf32>
    %4 = vector.broadcast %3 : vector<1x256xf32> to vector<32x256xf32>
    %5 = arith.addf %2, %4 : vector<32x256xf32>
    %c0_5 = arith.constant 0 : index
    %c0_6 = arith.constant 0 : index
    %6 = vector.load %arg4[%c0_5, %c0_6] : memref<32x256xf32, #tpu.memory_space<vmem>>, vector<32x256xf32>
    tpu.vector_store %arg4[%c0_5, %c0_6], %5 {strides = array<i32>} : memref<32x256xf32, #tpu.memory_space<vmem>>, vector<32x256xf32>,
    %c32_i32 = arith.constant 32 : i32
    %7 = arith.muli %arg0, %c32_i32 : i32
    %8 = tpu.iota {dimensions = array<i32: 0>} : vector<32x1xi32>
    %9 = vector.broadcast %7 : i32 to vector<32x1xi32>
    %10 = arith.addi %9, %8 : vector<32x1xi32>
    %c32_i32_7 = arith.constant 32 : i32
    %11 = vector.broadcast %c32_i32_7 : i32 to vector<32x1xi32>
    %12 = arith.cmpi slt, %10, %11 : vector<32x1xi32>
    %cst_8 = arith.constant 0.000000e+00 : f32
    %13 = vector.shape_cast %12 : vector<32x1xi1> to vector<32x1xi1>
    %14 = vector.broadcast %13 : vector<32x1xi1> to vector<32x256xi1>
    %15 = vector.broadcast %cst_8 : f32 to vector<32x256xf32>
    %16 = arith.select %14, %5, %15 : vector<32x256xi1>, vector<32x256xf32>
    %cst_9 = arith.constant dense<0.000000e+00> : vector<256xf32>
    %17 = vector.multi_reduction <add>, %16, %cst_9 [0] : vector<32x256xf32> to vector<256xf32>
    %18 = vector.shape_cast %17 : vector<256xf32> to vector<1x1x256xf32>
    %c0_10 = arith.constant 0 : index
    %c0_11 = arith.constant 0 : index
    %c0_12 = arith.constant 0 : index
    %19 = vector.load %arg5[%c0_10, %c0_11, %c0_12] : memref<1x1x256xf32, #tpu.memory_space<vmem>>, vector<1x1x256xf32>
    tpu.vector_store %arg5[%c0_10, %c0_11, %c0_12], %18 {strides = array<i32>} : memref<1x1x256xf32, #tpu.memory_space<vmem>>, vector<1x1x256xf32>,
    %20 = arith.mulf %16, %16 : vector<32x256xf32>
    %cst_13 = arith.constant dense<0.000000e+00> : vector<256xf32>
    %21 = vector.multi_reduction <add>, %20, %cst_13 [0] : vector<32x256xf32> to vector<256xf32>
    %22 = vector.shape_cast %21 : vector<256xf32> to vector<1x1x256xf32>
    %c0_14 = arith.constant 0 : index
    %c0_15 = arith.constant 0 : index
    %c0_16 = arith.constant 0 : index
    %23 = vector.load %arg6[%c0_14, %c0_15, %c0_16] : memref<1x1x256xf32, #tpu.memory_space<vmem>>, vector<1x1x256xf32>
    tpu.vector_store %arg6[%c0_14, %c0_15, %c0_16], %22 {strides = array<i32>} : memref<1x1x256xf32, #tpu.memory_space<vmem>>, vector<1x1x256xf32>,
    return
  }
  func.func @transform_0(%arg0: i32) -> (i32, i32) {
    %c0_i32 = arith.constant 0 : i32
    %c0_i32_0 = arith.constant 0 : i32
    return %arg0, %c0_i32 : i32, i32
  }
  func.func @transform_1(%arg0: i32) -> (i32, i32) {
    %c0_i32 = arith.constant 0 : i32
    %c0_i32_0 = arith.constant 0 : i32
    %c0_i32_1 = arith.constant 0 : i32
    return %c0_i32, %c0_i32_0 : i32, i32
  }
  func.func @transform_2(%arg0: i32) -> (i32, i32) {
    %c0_i32 = arith.constant 0 : i32
    %c0_i32_0 = arith.constant 0 : i32
    %c0_i32_1 = arith.constant 0 : i32
    return %c0_i32, %c0_i32_0 : i32, i32
  }
  func.func @transform_3(%arg0: i32) -> (i32, i32) {
    %c0_i32 = arith.constant 0 : i32
    %c0_i32_0 = arith.constant 0 : i32
    return %arg0, %c0_i32 : i32, i32
  }
  func.func @transform_4(%arg0: i32) -> (i32, i32, i32) {
    %c0_i32 = arith.constant 0 : i32
    %c0_i32_0 = arith.constant 0 : i32
    %c0_i32_1 = arith.constant 0 : i32
    return %arg0, %c0_i32, %c0_i32_0 : i32, i32, i32
  }
  func.func @transform_5(%arg0: i32) -> (i32, i32, i32) {
    %c0_i32 = arith.constant 0 : i32
    %c0_i32_0 = arith.constant 0 : i32
    %c0_i32_1 = arith.constant 0 : i32
    return %arg0, %c0_i32, %c0_i32_0 : i32, i32, i32
  }
}

module attributes {stable_mosaic.version = 11 : i64} {
  func.func @_bn_apply_kernel(%arg0: i32, %arg1: memref<32x256xf32, #tpu.memory_space<vmem>>, %arg2: memref<1x256xf32, #tpu.memory_space<vmem>>, %arg3: memref<1x256xf32, #tpu.memory_space<vmem>>, %arg4: memref<32x256xf32, #tpu.memory_space<vmem>>) attributes {dimension_semantics = [#tpu.dimension_semantics<parallel>], iteration_bounds = array<i64: 1>, scalar_prefetch = 0 : i64, scratch_operands = 0 : i64, tpu.core_type = #tpu.core_type<tc>, window_params = [{transform_indices = @transform_0, window_bounds = array<i64: 32, 256>}, {pipeline_mode = #tpu.pipeline_mode<synchronous>, transform_indices = @transform_1, window_bounds = array<i64: 1, 256>}, {pipeline_mode = #tpu.pipeline_mode<synchronous>, transform_indices = @transform_2, window_bounds = array<i64: 1, 256>}, {transform_indices = @transform_3, window_bounds = array<i64: 32, 256>}]} {
    %c0 = arith.constant 0 : index
    %c0_0 = arith.constant 0 : index
    %0 = vector.load %arg1[%c0, %c0_0] : memref<32x256xf32, #tpu.memory_space<vmem>>, vector<32x256xf32>
    %c0_1 = arith.constant 0 : index
    %c0_2 = arith.constant 0 : index
    %1 = vector.load %arg2[%c0_1, %c0_2] : memref<1x256xf32, #tpu.memory_space<vmem>>, vector<1x256xf32>
    %2 = vector.broadcast %1 : vector<1x256xf32> to vector<32x256xf32>
    %3 = arith.mulf %0, %2 : vector<32x256xf32>
    %c0_3 = arith.constant 0 : index
    %c0_4 = arith.constant 0 : index
    %4 = vector.load %arg3[%c0_3, %c0_4] : memref<1x256xf32, #tpu.memory_space<vmem>>, vector<1x256xf32>
    %5 = vector.broadcast %4 : vector<1x256xf32> to vector<32x256xf32>
    %6 = arith.addf %3, %5 : vector<32x256xf32>
    %cst = arith.constant 0.000000e+00 : f32
    %7 = vector.broadcast %cst : f32 to vector<32x256xf32>
    %8 = arith.cmpf ogt, %6, %7 : vector<32x256xf32>
    %cst_5 = arith.constant 2.000000e-01 : f32
    %9 = vector.broadcast %cst_5 : f32 to vector<32x256xf32>
    %10 = arith.mulf %9, %6 : vector<32x256xf32>
    %11 = arith.select %8, %6, %10 : vector<32x256xi1>, vector<32x256xf32>
    %c0_6 = arith.constant 0 : index
    %c0_7 = arith.constant 0 : index
    %12 = vector.load %arg4[%c0_6, %c0_7] : memref<32x256xf32, #tpu.memory_space<vmem>>, vector<32x256xf32>
    tpu.vector_store %arg4[%c0_6, %c0_7], %11 {strides = array<i32>} : memref<32x256xf32, #tpu.memory_space<vmem>>, vector<32x256xf32>,
    return
  }
  func.func @transform_0(%arg0: i32) -> (i32, i32) {
    %c0_i32 = arith.constant 0 : i32
    %c0_i32_0 = arith.constant 0 : i32
    return %arg0, %c0_i32 : i32, i32
  }
  func.func @transform_1(%arg0: i32) -> (i32, i32) {
    %c0_i32 = arith.constant 0 : i32
    %c0_i32_0 = arith.constant 0 : i32
    %c0_i32_1 = arith.constant 0 : i32
    return %c0_i32, %c0_i32_0 : i32, i32
  }
  func.func @transform_2(%arg0: i32) -> (i32, i32) {
    %c0_i32 = arith.constant 0 : i32
    %c0_i32_0 = arith.constant 0 : i32
    %c0_i32_1 = arith.constant 0 : i32
    return %c0_i32, %c0_i32_0 : i32, i32
  }
  func.func @transform_3(%arg0: i32) -> (i32, i32) {
    %c0_i32 = arith.constant 0 : i32
    %c0_i32_0 = arith.constant 0 : i32
    return %arg0, %c0_i32 : i32, i32
  }
}

module attributes {stable_mosaic.version = 11 : i64} {
  func.func @_conv_stats_kernel(%arg0: i32, %arg1: memref<8x4096xbf16, #tpu.memory_space<vmem>>, %arg2: memref<4096x512xbf16, #tpu.memory_space<vmem>>, %arg3: memref<1x512xf32, #tpu.memory_space<vmem>>, %arg4: memref<8x512xf32, #tpu.memory_space<vmem>>, %arg5: memref<1x1x512xf32, #tpu.memory_space<vmem>>, %arg6: memref<1x1x512xf32, #tpu.memory_space<vmem>>) attributes {dimension_semantics = [#tpu.dimension_semantics<parallel>], iteration_bounds = array<i64: 1>, scalar_prefetch = 0 : i64, scratch_operands = 0 : i64, tpu.core_type = #tpu.core_type<tc>, window_params = [{transform_indices = @transform_0, window_bounds = array<i64: 8, 4096>}, {pipeline_mode = #tpu.pipeline_mode<synchronous>, transform_indices = @transform_1, window_bounds = array<i64: 4096, 512>}, {pipeline_mode = #tpu.pipeline_mode<synchronous>, transform_indices = @transform_2, window_bounds = array<i64: 1, 512>}, {transform_indices = @transform_3, window_bounds = array<i64: 8, 512>}, {transform_indices = @transform_4, window_bounds = array<i64: 1, 1, 512>}, {transform_indices = @transform_5, window_bounds = array<i64: 1, 1, 512>}]} {
    %c0 = arith.constant 0 : index
    %c0_0 = arith.constant 0 : index
    %0 = vector.load %arg1[%c0, %c0_0] : memref<8x4096xbf16, #tpu.memory_space<vmem>>, vector<8x4096xbf16>
    %c0_1 = arith.constant 0 : index
    %c0_2 = arith.constant 0 : index
    %1 = vector.load %arg2[%c0_1, %c0_2] : memref<4096x512xbf16, #tpu.memory_space<vmem>>, vector<4096x512xbf16>
    %cst = arith.constant dense<0.000000e+00> : vector<8x512xf32>
    %2 = tpu.matmul %0, %1, %cst {dimension_numbers = #tpu.dot_dimension_numbers<[1], [0], [0], [1], [0, 0, 1, 1], [], []>} : vector<8x4096xbf16>, vector<4096x512xbf16>, vector<8x512xf32> -> vector<8x512xf32>
    %c0_3 = arith.constant 0 : index
    %c0_4 = arith.constant 0 : index
    %3 = vector.load %arg3[%c0_3, %c0_4] : memref<1x512xf32, #tpu.memory_space<vmem>>, vector<1x512xf32>
    %4 = vector.broadcast %3 : vector<1x512xf32> to vector<8x512xf32>
    %5 = arith.addf %2, %4 : vector<8x512xf32>
    %c0_5 = arith.constant 0 : index
    %c0_6 = arith.constant 0 : index
    %6 = vector.load %arg4[%c0_5, %c0_6] : memref<8x512xf32, #tpu.memory_space<vmem>>, vector<8x512xf32>
    tpu.vector_store %arg4[%c0_5, %c0_6], %5 {strides = array<i32>} : memref<8x512xf32, #tpu.memory_space<vmem>>, vector<8x512xf32>,
    %c8_i32 = arith.constant 8 : i32
    %7 = arith.muli %arg0, %c8_i32 : i32
    %8 = tpu.iota {dimensions = array<i32: 0>} : vector<8x1xi32>
    %9 = vector.broadcast %7 : i32 to vector<8x1xi32>
    %10 = arith.addi %9, %8 : vector<8x1xi32>
    %c8_i32_7 = arith.constant 8 : i32
    %11 = vector.broadcast %c8_i32_7 : i32 to vector<8x1xi32>
    %12 = arith.cmpi slt, %10, %11 : vector<8x1xi32>
    %cst_8 = arith.constant 0.000000e+00 : f32
    %13 = vector.shape_cast %12 : vector<8x1xi1> to vector<8x1xi1>
    %14 = vector.broadcast %13 : vector<8x1xi1> to vector<8x512xi1>
    %15 = vector.broadcast %cst_8 : f32 to vector<8x512xf32>
    %16 = arith.select %14, %5, %15 : vector<8x512xi1>, vector<8x512xf32>
    %cst_9 = arith.constant dense<0.000000e+00> : vector<512xf32>
    %17 = vector.multi_reduction <add>, %16, %cst_9 [0] : vector<8x512xf32> to vector<512xf32>
    %18 = vector.shape_cast %17 : vector<512xf32> to vector<1x1x512xf32>
    %c0_10 = arith.constant 0 : index
    %c0_11 = arith.constant 0 : index
    %c0_12 = arith.constant 0 : index
    %19 = vector.load %arg5[%c0_10, %c0_11, %c0_12] : memref<1x1x512xf32, #tpu.memory_space<vmem>>, vector<1x1x512xf32>
    tpu.vector_store %arg5[%c0_10, %c0_11, %c0_12], %18 {strides = array<i32>} : memref<1x1x512xf32, #tpu.memory_space<vmem>>, vector<1x1x512xf32>,
    %20 = arith.mulf %16, %16 : vector<8x512xf32>
    %cst_13 = arith.constant dense<0.000000e+00> : vector<512xf32>
    %21 = vector.multi_reduction <add>, %20, %cst_13 [0] : vector<8x512xf32> to vector<512xf32>
    %22 = vector.shape_cast %21 : vector<512xf32> to vector<1x1x512xf32>
    %c0_14 = arith.constant 0 : index
    %c0_15 = arith.constant 0 : index
    %c0_16 = arith.constant 0 : index
    %23 = vector.load %arg6[%c0_14, %c0_15, %c0_16] : memref<1x1x512xf32, #tpu.memory_space<vmem>>, vector<1x1x512xf32>
    tpu.vector_store %arg6[%c0_14, %c0_15, %c0_16], %22 {strides = array<i32>} : memref<1x1x512xf32, #tpu.memory_space<vmem>>, vector<1x1x512xf32>,
    return
  }
  func.func @transform_0(%arg0: i32) -> (i32, i32) {
    %c0_i32 = arith.constant 0 : i32
    %c0_i32_0 = arith.constant 0 : i32
    return %arg0, %c0_i32 : i32, i32
  }
  func.func @transform_1(%arg0: i32) -> (i32, i32) {
    %c0_i32 = arith.constant 0 : i32
    %c0_i32_0 = arith.constant 0 : i32
    %c0_i32_1 = arith.constant 0 : i32
    return %c0_i32, %c0_i32_0 : i32, i32
  }
  func.func @transform_2(%arg0: i32) -> (i32, i32) {
    %c0_i32 = arith.constant 0 : i32
    %c0_i32_0 = arith.constant 0 : i32
    %c0_i32_1 = arith.constant 0 : i32
    return %c0_i32, %c0_i32_0 : i32, i32
  }
  func.func @transform_3(%arg0: i32) -> (i32, i32) {
    %c0_i32 = arith.constant 0 : i32
    %c0_i32_0 = arith.constant 0 : i32
    return %arg0, %c0_i32 : i32, i32
  }
  func.func @transform_4(%arg0: i32) -> (i32, i32, i32) {
    %c0_i32 = arith.constant 0 : i32
    %c0_i32_0 = arith.constant 0 : i32
    %c0_i32_1 = arith.constant 0 : i32
    return %arg0, %c0_i32, %c0_i32_0 : i32, i32, i32
  }
  func.func @transform_5(%arg0: i32) -> (i32, i32, i32) {
    %c0_i32 = arith.constant 0 : i32
    %c0_i32_0 = arith.constant 0 : i32
    %c0_i32_1 = arith.constant 0 : i32
    return %arg0, %c0_i32, %c0_i32_0 : i32, i32, i32
  }
}

module attributes {stable_mosaic.version = 11 : i64} {
  func.func @_bn_apply_kernel(%arg0: i32, %arg1: memref<8x512xf32, #tpu.memory_space<vmem>>, %arg2: memref<1x512xf32, #tpu.memory_space<vmem>>, %arg3: memref<1x512xf32, #tpu.memory_space<vmem>>, %arg4: memref<8x512xf32, #tpu.memory_space<vmem>>) attributes {dimension_semantics = [#tpu.dimension_semantics<parallel>], iteration_bounds = array<i64: 1>, scalar_prefetch = 0 : i64, scratch_operands = 0 : i64, tpu.core_type = #tpu.core_type<tc>, window_params = [{transform_indices = @transform_0, window_bounds = array<i64: 8, 512>}, {pipeline_mode = #tpu.pipeline_mode<synchronous>, transform_indices = @transform_1, window_bounds = array<i64: 1, 512>}, {pipeline_mode = #tpu.pipeline_mode<synchronous>, transform_indices = @transform_2, window_bounds = array<i64: 1, 512>}, {transform_indices = @transform_3, window_bounds = array<i64: 8, 512>}]} {
    %c0 = arith.constant 0 : index
    %c0_0 = arith.constant 0 : index
    %0 = vector.load %arg1[%c0, %c0_0] : memref<8x512xf32, #tpu.memory_space<vmem>>, vector<8x512xf32>
    %c0_1 = arith.constant 0 : index
    %c0_2 = arith.constant 0 : index
    %1 = vector.load %arg2[%c0_1, %c0_2] : memref<1x512xf32, #tpu.memory_space<vmem>>, vector<1x512xf32>
    %2 = vector.broadcast %1 : vector<1x512xf32> to vector<8x512xf32>
    %3 = arith.mulf %0, %2 : vector<8x512xf32>
    %c0_3 = arith.constant 0 : index
    %c0_4 = arith.constant 0 : index
    %4 = vector.load %arg3[%c0_3, %c0_4] : memref<1x512xf32, #tpu.memory_space<vmem>>, vector<1x512xf32>
    %5 = vector.broadcast %4 : vector<1x512xf32> to vector<8x512xf32>
    %6 = arith.addf %3, %5 : vector<8x512xf32>
    %cst = arith.constant 0.000000e+00 : f32
    %7 = vector.broadcast %cst : f32 to vector<8x512xf32>
    %8 = arith.cmpf ogt, %6, %7 : vector<8x512xf32>
    %cst_5 = arith.constant 2.000000e-01 : f32
    %9 = vector.broadcast %cst_5 : f32 to vector<8x512xf32>
    %10 = arith.mulf %9, %6 : vector<8x512xf32>
    %11 = arith.select %8, %6, %10 : vector<8x512xi1>, vector<8x512xf32>
    %c0_6 = arith.constant 0 : index
    %c0_7 = arith.constant 0 : index
    %12 = vector.load %arg4[%c0_6, %c0_7] : memref<8x512xf32, #tpu.memory_space<vmem>>, vector<8x512xf32>
    tpu.vector_store %arg4[%c0_6, %c0_7], %11 {strides = array<i32>} : memref<8x512xf32, #tpu.memory_space<vmem>>, vector<8x512xf32>,
    return
  }
  func.func @transform_0(%arg0: i32) -> (i32, i32) {
    %c0_i32 = arith.constant 0 : i32
    %c0_i32_0 = arith.constant 0 : i32
    return %arg0, %c0_i32 : i32, i32
  }
  func.func @transform_1(%arg0: i32) -> (i32, i32) {
    %c0_i32 = arith.constant 0 : i32
    %c0_i32_0 = arith.constant 0 : i32
    %c0_i32_1 = arith.constant 0 : i32
    return %c0_i32, %c0_i32_0 : i32, i32
  }
  func.func @transform_2(%arg0: i32) -> (i32, i32) {
    %c0_i32 = arith.constant 0 : i32
    %c0_i32_0 = arith.constant 0 : i32
    %c0_i32_1 = arith.constant 0 : i32
    return %c0_i32, %c0_i32_0 : i32, i32
  }
  func.func @transform_3(%arg0: i32) -> (i32, i32) {
    %c0_i32 = arith.constant 0 : i32
    %c0_i32_0 = arith.constant 0 : i32
    return %arg0, %c0_i32 : i32, i32
  }
}

module attributes {stable_mosaic.version = 11 : i64} {
  func.func @_conv_act_kernel(%arg0: i32, %arg1: memref<8x8192xbf16, #tpu.memory_space<vmem>>, %arg2: memref<8192x128xbf16, #tpu.memory_space<vmem>>, %arg3: memref<1x128xf32, #tpu.memory_space<vmem>>, %arg4: memref<8x128xf32, #tpu.memory_space<vmem>>) attributes {dimension_semantics = [#tpu.dimension_semantics<parallel>], iteration_bounds = array<i64: 1>, scalar_prefetch = 0 : i64, scratch_operands = 0 : i64, tpu.core_type = #tpu.core_type<tc>, window_params = [{transform_indices = @transform_0, window_bounds = array<i64: 8, 8192>}, {pipeline_mode = #tpu.pipeline_mode<synchronous>, transform_indices = @transform_1, window_bounds = array<i64: 8192, 128>}, {pipeline_mode = #tpu.pipeline_mode<synchronous>, transform_indices = @transform_2, window_bounds = array<i64: 1, 128>}, {transform_indices = @transform_3, window_bounds = array<i64: 8, 128>}]} {
    %c0 = arith.constant 0 : index
    %c0_0 = arith.constant 0 : index
    %0 = vector.load %arg1[%c0, %c0_0] : memref<8x8192xbf16, #tpu.memory_space<vmem>>, vector<8x8192xbf16>
    %c0_1 = arith.constant 0 : index
    %c0_2 = arith.constant 0 : index
    %1 = vector.load %arg2[%c0_1, %c0_2] : memref<8192x128xbf16, #tpu.memory_space<vmem>>, vector<8192x128xbf16>
    %cst = arith.constant dense<0.000000e+00> : vector<8x128xf32>
    %2 = tpu.matmul %0, %1, %cst {dimension_numbers = #tpu.dot_dimension_numbers<[1], [0], [0], [1], [0, 0, 1, 1], [], []>} : vector<8x8192xbf16>, vector<8192x128xbf16>, vector<8x128xf32> -> vector<8x128xf32>
    %c0_3 = arith.constant 0 : index
    %c0_4 = arith.constant 0 : index
    %3 = vector.load %arg3[%c0_3, %c0_4] : memref<1x128xf32, #tpu.memory_space<vmem>>, vector<1x128xf32>
    %4 = vector.broadcast %3 : vector<1x128xf32> to vector<8x128xf32>
    %5 = arith.addf %2, %4 : vector<8x128xf32>
    %cst_5 = arith.constant 0.000000e+00 : f32
    %6 = vector.broadcast %cst_5 : f32 to vector<8x128xf32>
    %7 = arith.subf %6, %5 : vector<8x128xf32>
    %8 = math.exp %7 : vector<8x128xf32>
    %cst_6 = arith.constant 1.000000e+00 : f32
    %9 = vector.broadcast %cst_6 : f32 to vector<8x128xf32>
    %10 = arith.addf %9, %8 : vector<8x128xf32>
    %11 = tpu.reciprocal %10 {approx = true} : vector<8x128xf32> -> vector<8x128xf32>
    %c0_7 = arith.constant 0 : index
    %c0_8 = arith.constant 0 : index
    %12 = vector.load %arg4[%c0_7, %c0_8] : memref<8x128xf32, #tpu.memory_space<vmem>>, vector<8x128xf32>
    tpu.vector_store %arg4[%c0_7, %c0_8], %11 {strides = array<i32>} : memref<8x128xf32, #tpu.memory_space<vmem>>, vector<8x128xf32>,
    return
  }
  func.func @transform_0(%arg0: i32) -> (i32, i32) {
    %c0_i32 = arith.constant 0 : i32
    %c0_i32_0 = arith.constant 0 : i32
    return %arg0, %c0_i32 : i32, i32
  }
  func.func @transform_1(%arg0: i32) -> (i32, i32) {
    %c0_i32 = arith.constant 0 : i32
    %c0_i32_0 = arith.constant 0 : i32
    %c0_i32_1 = arith.constant 0 : i32
    return %c0_i32, %c0_i32_0 : i32, i32
  }
  func.func @transform_2(%arg0: i32) -> (i32, i32) {
    %c0_i32 = arith.constant 0 : i32
    %c0_i32_0 = arith.constant 0 : i32
    %c0_i32_1 = arith.constant 0 : i32
    return %c0_i32, %c0_i32_0 : i32, i32
  }
  func.func @transform_3(%arg0: i32) -> (i32, i32) {
    %c0_i32 = arith.constant 0 : i32
    %c0_i32_0 = arith.constant 0 : i32
    return %arg0, %c0_i32 : i32, i32
  }
}

</mosaic_0001>

<bundles_post_ra>
// kernel: discriminator_forward.8
= control target key start
LH: loop header
LB: loop body
LE: loop exit
PB: predicated region body
PF: predicated region fallthrough
CT: control target
= control target key end

     0   :  { %s904_s12 = smov 0   ;;  %s1070_s0 = inlined_call_operand.vmem [shape: bf16[512,128], index: 0, kind: input, shape index: {}]   ;;  %s1071_s1 = inlined_call_operand.vmem [shape: bf16[128,64], index: 1, kind: input, shape index: {}]   ;;  %s1072_s2 = inlined_call_operand.vmem [shape: f32[1,64], index: 2, kind: input, shape index: {}]   ;;  %s1073_s3 = inlined_call_operand.vmem [shape: f32[512,64], index: 3, kind: output, shape index: {}]  }
   0x1 LB: > { %s720_s13 = sadd.s32 4294967295, %s882_s12   ;;  %p724_p0 = scmp.ge.s32.totalorder %s882_s12, 1  ;;  %s882_s12 = sphi %s904_s12, %s13_s12  }
   0x2   : > { %p138_p1 = scmp.lt.s32.totalorder %s882_s12, 3 }
   0x4   : > { %p139_p2 = pnand %p724_p0, %p138_p1 }
   0x5   : > { %v852_v0 = vld [vmem:[%s1071_s1] sm:$0xff] (!%p139_p2)   ;;  %s725_s16 = sshll.u32 (!%p139_p2), %s720_s13, 5  ;;  %v853_v1 = vld [vmem:[%s1071_s1 + $0x8] sm:$0xff] (!%p139_p2)   ;;  %v854_v2 = vld [vmem:[%s1071_s1 + $0x10] sm:$0xff] (!%p139_p2)   ;;  %vm631_vm0 = vcmask (!%p139_p2), 523264  }
   0x6   : > { %142 = sbr.rel (%p139_p2) target bundleno = 287 (0x11f), region = 32  ;;  %p163_p3 = scmp.lt.s32.totalorder (!%p139_p2), %s725_s16, 63  ;;  %780 = vmatprep.subr.bf16.mxu0 (!%p139_p2), %v852_v0  ;;  %828 = vmatprep.subr.bf16.mxu1 (!%p139_p2), %v852_v0  ;;  %v855_v3 = vld [vmem:[%s1071_s1 + $0x18] sm:$0xff] (!%p139_p2)   ;;  %v856_v6 = vld [vmem:[%s1071_s1 + $0x20] sm:$0xff] (!%p139_p2)   ;;  %v857_v7 = vld [vmem:[%s1071_s1 + $0x28] sm:$0xff] (!%p139_p2)  }
   0x7   : > { %781 = vmatpush3.bf16.msra.mxu0 (!%p139_p2), %v852_v0  ;;  %836 = vmatpush3.bf16.msra.mxu1 (!%p139_p2), %v852_v0  ;;  %v858_v8 = vld [vmem:[%s1071_s1 + $0x30] sm:$0xff] (!%p139_p2)   ;;  %v859_v9 = vld [vmem:[%s1071_s1 + $0x38] sm:$0xff] (!%p139_p2)   ;;  %v963_v24 = vld [vmem:[%s1072_s2] ss:$0 sm:$0xff] (!%p139_p2) }
   0x8   : > { %782 = vmatprep.subr.bf16.mxu0 (!%p139_p2), %v853_v1  ;;  %829 = vmatprep.subr.bf16.mxu1 (!%p139_p2), %v853_v1 }
   0xb   : > { %783 = vmatpush3.bf16.msra.mxu0 (!%p139_p2), %v853_v1  ;;  %837 = vmatpush3.bf16.msra.mxu1 (!%p139_p2), %v853_v1 }
   0xc   : > { %784 = vmatprep.subr.bf16.mxu0 (!%p139_p2), %v854_v2  ;;  %830 = vmatprep.subr.bf16.mxu1 (!%p139_p2), %v854_v2 }
   0xd   : > { %s1075_s16 = smov (!%p163_p3, %s725_s16), 63 }
   0xe   : > { %s726_s21 = sshll.u32 %s1075_s16, 2  ;;  %s728_s10 = sshll.u32 %s1075_s16, 3 }
   0xf   : > { %s927_s24 = scalar_lea.vmem %s1070_s0, %s726_s21  ;;  %785 = vmatpush3.bf16.msra.mxu0 %v854_v2  ;;  %838 = vmatpush3.bf16.msra.mxu1 %v854_v2  ;;  %s973_s14 = scalar_lea.vmem %s1073_s3, %s728_s10 }
  0x10   : > { %v860_v4 = vld [vmem:[%s927_s24] sm:$0xff]   ;;  %786 = vmatprep.subr.bf16.mxu0 %v855_v3  ;;  %831 = vmatprep.subr.bf16.mxu1 %v855_v3  ;;  %v862_v10 = vld [vmem:[%s927_s24 + $0x8] sm:$0xff]   ;;  %v864_v12 = vld [vmem:[%s927_s24 + $0x10] sm:$0xff]  }
  0x11   : > { %v861_v5 = vld [vmem:[%s927_s24 + $0x40] sm:$0xff]   ;;  %796 = vmatprep.mubr.bf16.mxu0 %v860_v4  ;;  %v863_v11 = vld [vmem:[%s927_s24 + $0x48] sm:$0xff]   ;;  %v865_v13 = vld [vmem:[%s927_s24 + $0x50] sm:$0xff]  }
  0x12   : > { %812 = vmatprep.mubr.bf16.mxu1 %v861_v5  ;;  %v866_v14 = vld [vmem:[%s927_s24 + $0x18] sm:$0xff]   ;;  %v868_v16 = vld [vmem:[%s927_s24 + $0x20] sm:$0xff]   ;;  %v870_v18 = vld [vmem:[%s927_s24 + $0x28] sm:$0xff]  }
  0x13   : > { %787 = vmatpush3.bf16.msra.mxu0 %v855_v3  ;;  %839 = vmatpush3.bf16.msra.mxu1 %v855_v3  ;;  %v867_v15 = vld [vmem:[%s927_s24 + $0x58] sm:$0xff]   ;;  %v869_v17 = vld [vmem:[%s927_s24 + $0x60] sm:$0xff]   ;;  %v871_v19 = vld [vmem:[%s927_s24 + $0x68] sm:$0xff]  }
  0x14   : > { %788 = vmatprep.subr.bf16.mxu0 %v856_v6  ;;  %832 = vmatprep.subr.bf16.mxu1 %v856_v6  ;;  %v872_v20 = vld [vmem:[%s927_s24 + $0x30] sm:$0xff]   ;;  %v874_v22 = vld [vmem:[%s927_s24 + $0x38] sm:$0xff]  }
  0x15   : > { %v873_v21 = vld [vmem:[%s927_s24 + $0x70] sm:$0xff]   ;;  %v875_v23 = vld [vmem:[%s927_s24 + $0x78] sm:$0xff]  }
  0x17   : > { %789 = vmatpush3.bf16.msra.mxu0 %v856_v6  ;;  %840 = vmatpush3.bf16.msra.mxu1 %v856_v6 }
  0x18   : > { %790 = vmatprep.subr.bf16.mxu0 %v857_v7  ;;  %833 = vmatprep.subr.bf16.mxu1 %v857_v7 }
  0x1b   : > { %791 = vmatpush3.bf16.msra.mxu0 %v857_v7  ;;  %841 = vmatpush3.bf16.msra.mxu1 %v857_v7 }
  0x1c   : > { %792 = vmatprep.subr.bf16.mxu0 %v858_v8  ;;  %834 = vmatprep.subr.bf16.mxu1 %v858_v8 }
  0x1f   : > { %793 = vmatpush3.bf16.msra.mxu0 %v858_v8  ;;  %842 = vmatpush3.bf16.msra.mxu1 %v858_v8 }
  0x20   : > { %794 = vmatprep.subr.bf16.mxu0 %v859_v9  ;;  %835 = vmatprep.subr.bf16.mxu1 %v859_v9 }
  0x23   : > { %795 = vmatpush3.bf16.msra.mxu0 %v859_v9  ;;  %843 = vmatpush3.bf16.msra.mxu1 %v859_v9 }
  0x26   : > { %797 = vmatmul.mubr.bf16.vlgmr.msra.gmra.mrb[0].mxu0 %v862_v10  ;;  %813 = vmatmul.mubr.bf16.vlgmr.msra.gmra.mrb[0].mxu1 %v863_v11 }
  0x27   : > { %800 = vmatprep.mubr.bf16.mxu0 %v864_v12  ;;  %816 = vmatprep.mubr.bf16.mxu1 %v865_v13 }
  0x2e   : > { %801 = vmatmul.mubr.bf16.gmra.mrb[4].mxu0 %v866_v14  ;;  %817 = vmatmul.mubr.bf16.gmra.mrb[4].mxu1 %v867_v15 }
  0x2f   : > { %804 = vmatprep.mubr.bf16.mxu0 %v868_v16  ;;  %820 = vmatprep.mubr.bf16.mxu1 %v869_v17 }
  0x36   : > { %805 = vmatmul.mubr.bf16.gmra.mrb[8].mxu0 %v870_v18  ;;  %821 = vmatmul.mubr.bf16.gmra.mrb[8].mxu1 %v871_v19 }
  0x37   : > { %808 = vmatprep.mubr.bf16.mxu0 %v872_v20  ;;  %824 = vmatprep.mubr.bf16.mxu1 %v873_v21 }
  0x3e   : > { %809 = vmatmul.mubr.bf16.gmra.mrb[12].mxu0 %v874_v22  ;;  %825 = vmatmul.mubr.bf16.gmra.mrb[12].mxu1 %v875_v23 }
  0xf9   : > { %v798_v25 = vpop.f32.mrb[0].mxu0  ;;  %v814_v26 = vpop.f32.mrb[0].mxu1 }
  0xfa   : > { %v417_v27 = vadd.f32 %v798_v25, %v963_v24  ;;  %v481_v28 = vadd.f32 %v814_v26, %v963_v24  ;;  %v408_v29 = vpop.f32.mrb[1].mxu0  ;;  %v472_v30 = vpop.f32.mrb[1].mxu1 }
  0xfb   : > { %v409_v31 = vadd.f32 %v963_v24, %v408_v29  ;;  %v473_v32 = vadd.f32 %v963_v24, %v472_v30  ;;  %v799_v33 = vpop.f32.mrb[2].mxu0  ;;  %v815_v34 = vpop.f32.mrb[2].mxu1 }
  0xfc   : > { %vm537_vm1 = vcmp.gt.f32.partialorder %v417_v27, 0.0  ;;  %v569_v35 = vmul.f32 0.2, %v417_v27  ;;  %vm553_vm2 = vcmp.gt.f32.partialorder %v481_v28, 0.0  ;;  %v585_v36 = vmul.f32 0.2, %v481_v28 }
  0xfd   : > { %vm535_vm3 = vcmp.gt.f32.partialorder %v409_v31, 0.0  ;;  %v567_v37 = vmul.f32 0.2, %v409_v31  ;;  %vm551_vm4 = vcmp.gt.f32.partialorder %v473_v32, 0.0  ;;  %v583_v38 = vmul.f32 0.2, %v473_v32 }
  0xfe   : > { %v601_v39 = vsel %vm537_vm1, %v417_v27, %v569_v35  ;;  %v617_v40 = vsel %vm553_vm2, %v481_v28, %v585_v36  ;;  %v420_v41 = vadd.f32 %v799_v33, %v963_v24  ;;  %v484_v42 = vadd.f32 %v815_v34, %v963_v24  ;;  %v411_v43 = vpop.f32.mrb[3].mxu0  ;;  %v475_v44 = vpop.f32.mrb[3].mxu1 }
  0xff   : > { %634 = vst.msk [vmem:[%s973_s14 + $0x10] sm:$0xff] %vm631_vm0, %v601_v39  ;;  %650 = vst.msk [vmem:[%s973_s14 + $0x90] sm:$0xff] %vm631_vm0, %v617_v40  ;;  %v599_v45 = vsel %vm535_vm3, %v409_v31, %v567_v37  ;;  %v615_v46 = vsel %vm551_vm4, %v473_v32, %v583_v38  ;;  %v412_v47 = vadd.f32 %v963_v24, %v411_v43 }
 0x100   : > { %v476_v48 = vadd.f32 %v963_v24, %v475_v44  ;;  %632 = vst.msk [vmem:[%s973_s14] sm:$0xff] %vm631_vm0, %v599_v45  ;;  %648 = vst.msk [vmem:[%s973_s14 + $0x80] sm:$0xff] %vm631_vm0, %v615_v46  ;;  %vm538_vm5 = vcmp.gt.f32.partialorder %v420_v41, 0.0  ;;  %v570_v49 = vmul.f32 0.2, %v420_v41  ;;  %vm554_vm6 = vcmp.gt.f32.partialorder %v484_v42, 0.0 }
 0x101   : > { %v586_v50 = vmul.f32 0.2, %v484_v42  ;;  %vm536_vm7 = vcmp.gt.f32.partialorder %v412_v47, 0.0  ;;  %v568_v51 = vmul.f32 0.2, %v412_v47  ;;  %v802_v55 = vpop.f32.mrb[4].mxu0 }
 0x102   : > { %vm552_vm8 = vcmp.gt.f32.partialorder %v476_v48, 0.0  ;;  %v584_v52 = vmul.f32 0.2, %v476_v48  ;;  %v602_v53 = vsel %vm538_vm5, %v420_v41, %v570_v49  ;;  %v818_v56 = vpop.f32.mrb[4].mxu1  ;;  %v433_v59 = vadd.f32 %v802_v55, %v963_v24  ;;  %v424_v61 = vpop.f32.mrb[5].mxu0 }
 0x103   : > { %v618_v54 = vsel %vm554_vm6, %v484_v42, %v586_v50  ;;  %635 = vst.msk [vmem:[%s973_s14 + $0x18] sm:$0xff] %vm631_vm0, %v602_v53  ;;  %v600_v57 = vsel %vm536_vm7, %v412_v47, %v568_v51  ;;  %v497_v60 = vadd.f32 %v818_v56, %v963_v24  ;;  %v488_v62 = vpop.f32.mrb[5].mxu1  ;;  %v425_v63 = vadd.f32 %v963_v24, %v424_v61  ;;  %v803_v1 = vpop.f32.mrb[6].mxu0 }
 0x104   : > { %651 = vst.msk [vmem:[%s973_s14 + $0x98] sm:$0xff] %vm631_vm0, %v618_v54  ;;  %v616_v58 = vsel %vm552_vm8, %v476_v48, %v584_v52  ;;  %633 = vst.msk [vmem:[%s973_s14 + $0x8] sm:$0xff] %vm631_vm0, %v600_v57  ;;  %v489_v0 = vadd.f32 %v963_v24, %v488_v62  ;;  %v819_v2 = vpop.f32.mrb[6].mxu1  ;;  %vm541_vm9 = vcmp.gt.f32.partialorder %v433_v59, 0.0  ;;  %v573_v3 = vmul.f32 0.2, %v433_v59 }
 0x105   : > { %649 = vst.msk [vmem:[%s973_s14 + $0x88] sm:$0xff] %vm631_vm0, %v616_v58  ;;  %vm557_vm10 = vcmp.gt.f32.partialorder %v497_v60, 0.0  ;;  %v589_v4 = vmul.f32 0.2, %v497_v60  ;;  %vm539_vm11 = vcmp.gt.f32.partialorder %v425_v63, 0.0  ;;  %v436_v9 = vadd.f32 %v803_v1, %v963_v24  ;;  %v427_v11 = vpop.f32.mrb[7].mxu0 }
 0x106   : > { %v571_v5 = vmul.f32 0.2, %v425_v63  ;;  %vm555_vm12 = vcmp.gt.f32.partialorder %v489_v0, 0.0  ;;  %v587_v6 = vmul.f32 0.2, %v489_v0  ;;  %v605_v7 = vsel %vm541_vm9, %v433_v59, %v573_v3  ;;  %v491_v12 = vpop.f32.mrb[7].mxu1 }
 0x107   : > { %v621_v8 = vsel %vm557_vm10, %v497_v60, %v589_v4  ;;  %v500_v10 = vadd.f32 %v819_v2, %v963_v24  ;;  %638 = vst.msk [vmem:[%s973_s14 + $0x30] sm:$0xff] %vm631_vm0, %v605_v7  ;;  %v428_v15 = vadd.f32 %v963_v24, %v427_v11  ;;  %v492_v16 = vadd.f32 %v963_v24, %v491_v12 }
 0x108   : > { %654 = vst.msk [vmem:[%s973_s14 + $0xb0] sm:$0xff] %vm631_vm0, %v621_v8  ;;  %v603_v13 = vsel %vm539_vm11, %v425_v63, %v571_v5  ;;  %v619_v14 = vsel %vm555_vm12, %v489_v0, %v587_v6  ;;  %vm542_vm13 = vcmp.gt.f32.partialorder %v436_v9, 0.0  ;;  %v574_v17 = vmul.f32 0.2, %v436_v9 }
 0x109   : > { %636 = vst.msk [vmem:[%s973_s14 + $0x20] sm:$0xff] %vm631_vm0, %v603_v13  ;;  %652 = vst.msk [vmem:[%s973_s14 + $0xa0] sm:$0xff] %vm631_vm0, %v619_v14  ;;  %vm558_vm14 = vcmp.gt.f32.partialorder %v500_v10, 0.0  ;;  %v590_v18 = vmul.f32 0.2, %v500_v10  ;;  %vm540_vm15 = vcmp.gt.f32.partialorder %v428_v15, 0.0 }
 0x10a   : > { %v572_v19 = vmul.f32 0.2, %v428_v15  ;;  %vm556_vm1 = vcmp.gt.f32.partialorder %v492_v16, 0.0  ;;  %v588_v20 = vmul.f32 0.2, %v492_v16  ;;  %v606_v21 = vsel %vm542_vm13, %v436_v9, %v574_v17  ;;  %v806_v23 = vpop.f32.mrb[8].mxu0 }
 0x10b   : > { %v622_v22 = vsel %vm558_vm14, %v500_v10, %v590_v18  ;;  %v822_v25 = vpop.f32.mrb[8].mxu1  ;;  %639 = vst.msk [vmem:[%s973_s14 + $0x38] sm:$0xff] %vm631_vm0, %v606_v21  ;;  %v449_v28 = vadd.f32 %v806_v23, %v963_v24  ;;  %v440_v30 = vpop.f32.mrb[9].mxu0 }
 0x10c   : > { %655 = vst.msk [vmem:[%s973_s14 + $0xb8] sm:$0xff] %vm631_vm0, %v622_v22  ;;  %v604_v26 = vsel %vm540_vm15, %v428_v15, %v572_v19  ;;  %v620_v27 = vsel %vm556_vm1, %v492_v16, %v588_v20  ;;  %v513_v29 = vadd.f32 %v822_v25, %v963_v24  ;;  %v504_v31 = vpop.f32.mrb[9].mxu1  ;;  %v441_v32 = vadd.f32 %v963_v24, %v440_v30  ;;  %v807_v34 = vpop.f32.mrb[10].mxu0 }
 0x10d   : > { %637 = vst.msk [vmem:[%s973_s14 + $0x28] sm:$0xff] %vm631_vm0, %v604_v26  ;;  %653 = vst.msk [vmem:[%s973_s14 + $0xa8] sm:$0xff] %vm631_vm0, %v620_v27  ;;  %v505_v33 = vadd.f32 %v963_v24, %v504_v31  ;;  %v823_v35 = vpop.f32.mrb[10].mxu1  ;;  %vm545_vm2 = vcmp.gt.f32.partialorder %v449_v28, 0.0  ;;  %v577_v36 = vmul.f32 0.2, %v449_v28  ;;  %v452_v42 = vadd.f32 %v807_v34, %v963_v24 }
 0x10e   : > { %vm561_vm3 = vcmp.gt.f32.partialorder %v513_v29, 0.0  ;;  %v593_v37 = vmul.f32 0.2, %v513_v29  ;;  %vm543_vm4 = vcmp.gt.f32.partialorder %v441_v32, 0.0  ;;  %v575_v38 = vmul.f32 0.2, %v441_v32 }
 0x10f   : > { %vm559_vm5 = vcmp.gt.f32.partialorder %v505_v33, 0.0  ;;  %v591_v39 = vmul.f32 0.2, %v505_v33  ;;  %v609_v40 = vsel %vm545_vm2, %v449_v28, %v577_v36  ;;  %v516_v43 = vadd.f32 %v823_v35, %v963_v24  ;;  %v443_v44 = vpop.f32.mrb[11].mxu0  ;;  %v507_v45 = vpop.f32.mrb[11].mxu1 }
 0x110   : > { %v625_v41 = vsel %vm561_vm3, %v513_v29, %v593_v37  ;;  %642 = vst.msk [vmem:[%s973_s14 + $0x50] sm:$0xff] %vm631_vm0, %v609_v40  ;;  %v607_v46 = vsel %vm543_vm4, %v441_v32, %v575_v38  ;;  %v444_v48 = vadd.f32 %v963_v24, %v443_v44  ;;  %v508_v49 = vadd.f32 %v963_v24, %v507_v45 }
 0x111   : > { %658 = vst.msk [vmem:[%s973_s14 + $0xd0] sm:$0xff] %vm631_vm0, %v625_v41  ;;  %v623_v47 = vsel %vm559_vm5, %v505_v33, %v591_v39  ;;  %v810_v50 = vpop.f32.mrb[12].mxu0  ;;  %v826_v51 = vpop.f32.mrb[12].mxu1  ;;  %640 = vst.msk [vmem:[%s973_s14 + $0x40] sm:$0xff] %vm631_vm0, %v607_v46  ;;  %vm546_vm6 = vcmp.gt.f32.partialorder %v452_v42, 0.0  ;;  %vm562_vm7 = vcmp.gt.f32.partialorder %v516_v43, 0.0 }
 0x112   : > { %656 = vst.msk [vmem:[%s973_s14 + $0xc0] sm:$0xff] %vm631_vm0, %v623_v47  ;;  %v578_v52 = vmul.f32 0.2, %v452_v42  ;;  %v594_v53 = vmul.f32 0.2, %v516_v43  ;;  %vm544_vm8 = vcmp.gt.f32.partialorder %v444_v48, 0.0  ;;  %v465_v58 = vadd.f32 %v810_v50, %v963_v24 }
 0x113   : > { %v576_v54 = vmul.f32 0.2, %v444_v48  ;;  %vm560_vm9 = vcmp.gt.f32.partialorder %v508_v49, 0.0  ;;  %v592_v55 = vmul.f32 0.2, %v508_v49  ;;  %v529_v59 = vadd.f32 %v826_v51, %v963_v24  ;;  %v456_v60 = vpop.f32.mrb[13].mxu0 }
 0x114   : > { %v610_v56 = vsel %vm546_vm6, %v452_v42, %v578_v52  ;;  %v626_v57 = vsel %vm562_vm7, %v516_v43, %v594_v53  ;;  %v520_v61 = vpop.f32.mrb[13].mxu1  ;;  %v457_v0 = vadd.f32 %v963_v24, %v456_v60  ;;  %v811_v2 = vpop.f32.mrb[14].mxu0  ;;  %vm549_vm10 = vcmp.gt.f32.partialorder %v465_v58, 0.0 }
 0x115   : > { %643 = vst.msk [vmem:[%s973_s14 + $0x58] sm:$0xff] %vm631_vm0, %v610_v56  ;;  %659 = vst.msk [vmem:[%s973_s14 + $0xd8] sm:$0xff] %vm631_vm0, %v626_v57  ;;  %v608_v62 = vsel %vm544_vm8, %v444_v48, %v576_v54  ;;  %v624_v63 = vsel %vm560_vm9, %v508_v49, %v592_v55  ;;  %v521_v1 = vadd.f32 %v963_v24, %v520_v61  ;;  %v827_v3 = vpop.f32.mrb[14].mxu1  ;;  %v581_v4 = vmul.f32 0.2, %v465_v58  ;;  %v459_v12 = vpop.f32.mrb[15].mxu0 }
 0x116   : > { %641 = vst.msk [vmem:[%s973_s14 + $0x48] sm:$0xff] %vm631_vm0, %v608_v62  ;;  %657 = vst.msk [vmem:[%s973_s14 + $0xc8] sm:$0xff] %vm631_vm0, %v624_v63  ;;  %vm565_vm11 = vcmp.gt.f32.partialorder %v529_v59, 0.0  ;;  %v597_v5 = vmul.f32 0.2, %v529_v59  ;;  %vm547_vm12 = vcmp.gt.f32.partialorder %v457_v0, 0.0  ;;  %v468_v10 = vadd.f32 %v811_v2, %v963_v24 }
 0x117   : > { %v579_v6 = vmul.f32 0.2, %v457_v0  ;;  %vm563_vm13 = vcmp.gt.f32.partialorder %v521_v1, 0.0  ;;  %v595_v7 = vmul.f32 0.2, %v521_v1  ;;  %v613_v8 = vsel %vm549_vm10, %v465_v58, %v581_v4  ;;  %v523_v13 = vpop.f32.mrb[15].mxu1 }
 0x118   : > { %v629_v9 = vsel %vm565_vm11, %v529_v59, %v597_v5  ;;  %v532_v11 = vadd.f32 %v827_v3, %v963_v24  ;;  %646 = vst.msk [vmem:[%s973_s14 + $0x70] sm:$0xff] %vm631_vm0, %v613_v8  ;;  %v460_v16 = vadd.f32 %v963_v24, %v459_v12  ;;  %v524_v17 = vadd.f32 %v963_v24, %v523_v13 }
 0x119   : > { %662 = vst.msk [vmem:[%s973_s14 + $0xf0] sm:$0xff] %vm631_vm0, %v629_v9  ;;  %v611_v14 = vsel %vm547_vm12, %v457_v0, %v579_v6  ;;  %v627_v15 = vsel %vm563_vm13, %v521_v1, %v595_v7  ;;  %vm550_vm14 = vcmp.gt.f32.partialorder %v468_v10, 0.0  ;;  %v582_v18 = vmul.f32 0.2, %v468_v10 }
 0x11a   : > { %644 = vst.msk [vmem:[%s973_s14 + $0x60] sm:$0xff] %vm631_vm0, %v611_v14  ;;  %660 = vst.msk [vmem:[%s973_s14 + $0xe0] sm:$0xff] %vm631_vm0, %v627_v15  ;;  %vm566_vm15 = vcmp.gt.f32.partialorder %v532_v11, 0.0  ;;  %v598_v19 = vmul.f32 0.2, %v532_v11  ;;  %vm548_vm1 = vcmp.gt.f32.partialorder %v460_v16, 0.0 }
 0x11b   : > { %v580_v20 = vmul.f32 0.2, %v460_v16  ;;  %vm564_vm2 = vcmp.gt.f32.partialorder %v524_v17, 0.0  ;;  %v596_v21 = vmul.f32 0.2, %v524_v17  ;;  %v614_v22 = vsel %vm550_vm14, %v468_v10, %v582_v18 }
 0x11c   : > { %v630_v23 = vsel %vm566_vm15, %v532_v11, %v598_v19  ;;  %647 = vst.msk [vmem:[%s973_s14 + $0x78] sm:$0xff] %vm631_vm0, %v614_v22 }
 0x11d   : > { %663 = vst.msk [vmem:[%s973_s14 + $0xf8] sm:$0xff] %vm631_vm0, %v630_v23  ;;  %v612_v24 = vsel %vm548_vm1, %v460_v16, %v580_v20  ;;  %v628_v25 = vsel %vm564_vm2, %v524_v17, %v596_v21 }
 0x11e   : > { %645 = vst.msk [vmem:[%s973_s14 + $0x68] sm:$0xff] %vm631_vm0, %v612_v24  ;;  %661 = vst.msk [vmem:[%s973_s14 + $0xe8] sm:$0xff] %vm631_vm0, %v628_v25 }
 0x11f PF: > { %s13_s12 = sadd.s32 1, %s882_s12  }
 0x120   : > { %p10_p4 = scmp.ge.s32.totalorder %s13_s12, 4  }
 0x122   :  { %12 = sbr.rel (!%p10_p4) target bundleno = 1 (0x1), region = 62 }

// kernel: discriminator_forward.9
= control target key start
LH: loop header
LB: loop body
LE: loop exit
PB: predicated region body
PF: predicated region fallthrough
CT: control target
= control target key end

     0   :  { %s2482_s1 = inlined_call_operand.vmem [shape: bf16[1024,128], index: 1, kind: input, shape index: {}]   ;;  %s2483_s0 = inlined_call_operand.vmem [shape: bf16[128,1024], index: 0, kind: input, shape index: {}]   ;;  %s2484_s2 = inlined_call_operand.vmem [shape: f32[1,128], index: 2, kind: input, shape index: {}]   ;;  %s2485_s3 = inlined_call_operand.vmem [shape: f32[128,128], index: 3, kind: output, shape index: {0}]   ;;  %s2486_s4 = inlined_call_operand.vmem [shape: f32[1,1,128], index: 4, kind: output, shape index: {1}]   ;;  %s2487_s5 = inlined_call_operand.vmem [shape: f32[1,1,128], index: 5, kind: output, shape index: {2}]  }
   0x1   :  { %v1881_v0 = vld [vmem:[%s2482_s1 + $0x40] sm:$0xff]   ;;  %v1885_v4 = vld [vmem:[%s2482_s1 + $0x48] sm:$0xff]   ;;  %v1889_v8 = vld [vmem:[%s2482_s1 + $0x50] sm:$0xff]  }
   0x2   :  { %v1882_v1 = vld [vmem:[%s2482_s1 + $0xc0] sm:$0xff]   ;;  %1625 = vmatprep.subr.bf16.mxu0 %v1881_v0  ;;  %v1886_v5 = vld [vmem:[%s2482_s1 + $0xc8] sm:$0xff]   ;;  %v1890_v9 = vld [vmem:[%s2482_s1 + $0xd0] sm:$0xff]  }
   0x3   :  { %v1883_v2 = vld [vmem:[%s2482_s1] sm:$0xff]   ;;  %1689 = vmatprep.subr.bf16.mxu1 %v1882_v1  ;;  %v1887_v6 = vld [vmem:[%s2482_s1 + $0x8] sm:$0xff]   ;;  %v1891_v10 = vld [vmem:[%s2482_s1 + $0x10] sm:$0xff]  }
   0x4   :  { %v1884_v3 = vld [vmem:[%s2482_s1 + $0x80] sm:$0xff]   ;;  %1626 = vmatpush3.bf16.msra.mxu0 %v1883_v2  ;;  %v1888_v7 = vld [vmem:[%s2482_s1 + $0x88] sm:$0xff]   ;;  %v1892_v11 = vld [vmem:[%s2482_s1 + $0x90] sm:$0xff]  }
   0x5   :  { %1690 = vmatpush3.bf16.msra.mxu1 %v1884_v3  ;;  %1627 = vmatprep.subr.bf16.mxu0 %v1885_v4  ;;  %v1893_v12 = vld [vmem:[%s2482_s1 + $0x58] sm:$0xff]   ;;  %v1897_v16 = vld [vmem:[%s2482_s1 + $0x60] sm:$0xff]   ;;  %v1901_v20 = vld [vmem:[%s2482_s1 + $0x68] sm:$0xff]  }
   0x6   :  { %1691 = vmatprep.subr.bf16.mxu1 %v1886_v5  ;;  %v1894_v13 = vld [vmem:[%s2482_s1 + $0xd8] sm:$0xff]   ;;  %v1898_v17 = vld [vmem:[%s2482_s1 + $0xe0] sm:$0xff]   ;;  %v1902_v21 = vld [vmem:[%s2482_s1 + $0xe8] sm:$0xff]  }
   0x7   :  { %v1895_v14 = vld [vmem:[%s2482_s1 + $0x18] sm:$0xff]   ;;  %v1899_v18 = vld [vmem:[%s2482_s1 + $0x20] sm:$0xff]   ;;  %v1903_v22 = vld [vmem:[%s2482_s1 + $0x28] sm:$0xff]  }
   0x8   :  { %1628 = vmatpush3.bf16.msra.mxu0 %v1887_v6  ;;  %v1896_v15 = vld [vmem:[%s2482_s1 + $0x98] sm:$0xff]   ;;  %v1900_v19 = vld [vmem:[%s2482_s1 + $0xa0] sm:$0xff]   ;;  %v1904_v23 = vld [vmem:[%s2482_s1 + $0xa8] sm:$0xff]  }
   0x9   :  { %1692 = vmatpush3.bf16.msra.mxu1 %v1888_v7  ;;  %1629 = vmatprep.subr.bf16.mxu0 %v1889_v8  ;;  %v1905_v24 = vld [vmem:[%s2482_s1 + $0x70] sm:$0xff]   ;;  %v1909_v28 = vld [vmem:[%s2482_s1 + $0x78] sm:$0xff]   ;;  %v18_v32 = vld [vmem:[%s2483_s0] sm:$0xff] }
   0xa   :  { %1693 = vmatprep.subr.bf16.mxu1 %v1890_v9  ;;  %v1906_v25 = vld [vmem:[%s2482_s1 + $0xf0] sm:$0xff]   ;;  %v1910_v29 = vld [vmem:[%s2482_s1 + $0xf8] sm:$0xff]   ;;  %v22_v33 = vld [vmem:[%s2483_s0 + $0x20] sm:$0xff] }
   0xb   :  { %v1907_v26 = vld [vmem:[%s2482_s1 + $0x30] sm:$0xff]   ;;  %v1911_v30 = vld [vmem:[%s2482_s1 + $0x38] sm:$0xff]   ;;  %v19_v34 = vld [vmem:[%s2483_s0 + $0x8] sm:$0xff]  ;;  %v1497_v35 = vcombine.low %v18_v32, %v22_v33  ;;  %v1498_v36 = vcombine.high %v18_v32, %v22_v33 }
   0xc   :  { %1630 = vmatpush3.bf16.msra.mxu0 %v1891_v10  ;;  %v1908_v27 = vld [vmem:[%s2482_s1 + $0xb0] sm:$0xff]   ;;  %v1912_v31 = vld [vmem:[%s2482_s1 + $0xb8] sm:$0xff]   ;;  %v23_v37 = vld [vmem:[%s2483_s0 + $0x28] sm:$0xff] }
   0xd   :  { %1694 = vmatpush3.bf16.msra.mxu1 %v1892_v11  ;;  %1631 = vmatprep.subr.bf16.mxu0 %v1893_v12  ;;  %v1499_v38 = vcombine.low %v19_v34, %v23_v37  ;;  %v1500_v39 = vcombine.high %v19_v34, %v23_v37  ;;  %v1913_v40 = vld [vmem:[%s2482_s1 + $0x140] sm:$0xff]   ;;  %v27_v47 = vld [vmem:[%s2483_s0 + $0x48] sm:$0xff]  ;;  %v1921_v62 = vld [vmem:[%s2482_s1 + $0x150] sm:$0xff]  }
   0xe   :  { %1695 = vmatprep.subr.bf16.mxu1 %v1894_v13  ;;  %953 = vmatprep.mubr.bf16.mxu0 %v1498_v36  ;;  %v1914_v41 = vld [vmem:[%s2482_s1 + $0x100] sm:$0xff]   ;;  %v31_v48 = vld [vmem:[%s2483_s0 + $0x68] sm:$0xff]  ;;  %v1922_v63 = vld [vmem:[%s2482_s1 + $0x110] sm:$0xff]  }
   0xf   :  { %1050 = vmatprep.mubr.bf16.mxu1 %v1500_v39  ;;  %v1915_v42 = vld [vmem:[%s2482_s1 + $0x1c0] sm:$0xff]   ;;  %v1508_v49 = vcombine.high %v27_v47, %v31_v48  ;;  %v1917_v50 = vld [vmem:[%s2482_s1 + $0x148] sm:$0xff]   ;;  %v1507_v53 = vcombine.low %v27_v47, %v31_v48  ;;  %v1923_v0 = vld [vmem:[%s2482_s1 + $0x1d0] sm:$0xff]  }
  0x10   :  { %1632 = vmatpush3.bf16.msra.mxu0 %v1895_v14  ;;  %v1916_v43 = vld [vmem:[%s2482_s1 + $0x180] sm:$0xff]   ;;  %v1918_v52 = vld [vmem:[%s2482_s1 + $0x108] sm:$0xff]   ;;  %v1924_v1 = vld [vmem:[%s2482_s1 + $0x190] sm:$0xff]  }
  0x11   :  { %1696 = vmatpush3.bf16.msra.mxu1 %v1896_v15  ;;  %1633 = vmatprep.subr.bf16.mxu0 %v1897_v16  ;;  %v26_v44 = vld [vmem:[%s2483_s0 + $0x40] sm:$0xff]  ;;  %v1919_v54 = vld [vmem:[%s2482_s1 + $0x1c8] sm:$0xff]   ;;  %v1925_v10 = vld [vmem:[%s2482_s1 + $0x158] sm:$0xff]  }
  0x12   :  { %1697 = vmatprep.subr.bf16.mxu1 %v1898_v17  ;;  %v30_v45 = vld [vmem:[%s2483_s0 + $0x60] sm:$0xff]  ;;  %v1920_v55 = vld [vmem:[%s2482_s1 + $0x188] sm:$0xff]   ;;  %v1926_v11 = vld [vmem:[%s2482_s1 + $0x118] sm:$0xff]  }
  0x13   :  { %v1506_v46 = vcombine.high %v26_v44, %v30_v45  ;;  %v1505_v51 = vcombine.low %v26_v44, %v30_v45  ;;  %v34_v56 = vld [vmem:[%s2483_s0 + $0x80] sm:$0xff]  ;;  %v35_v58 = vld [vmem:[%s2483_s0 + $0x88] sm:$0xff]  ;;  %v1927_v12 = vld [vmem:[%s2482_s1 + $0x1d8] sm:$0xff]  }
  0x14   :  { %1634 = vmatpush3.bf16.msra.mxu0 %v1899_v18  ;;  %v38_v57 = vld [vmem:[%s2483_s0 + $0xa0] sm:$0xff]  ;;  %v39_v59 = vld [vmem:[%s2483_s0 + $0xa8] sm:$0xff]  ;;  %v1928_v13 = vld [vmem:[%s2482_s1 + $0x198] sm:$0xff]  }
  0x15   :  { %1698 = vmatpush3.bf16.msra.mxu1 %v1900_v19  ;;  %1635 = vmatprep.subr.bf16.mxu0 %v1901_v20  ;;  %v1514_v60 = vcombine.high %v34_v56, %v38_v57  ;;  %v1516_v61 = vcombine.high %v35_v58, %v39_v59  ;;  %v1513_v2 = vcombine.low %v34_v56, %v38_v57  ;;  %v42_v3 = vld [vmem:[%s2483_s0 + $0xc0] sm:$0xff]  ;;  %v43_v5 = vld [vmem:[%s2483_s0 + $0xc8] sm:$0xff]  ;;  %v1938_v39 = vld [vmem:[%s2482_s1 + $0x130] sm:$0xff]  }
  0x16   :  { %1699 = vmatprep.subr.bf16.mxu1 %v1902_v21  ;;  %v46_v4 = vld [vmem:[%s2483_s0 + $0xe0] sm:$0xff]  ;;  %v1515_v6 = vcombine.low %v35_v58, %v39_v59  ;;  %v47_v8 = vld [vmem:[%s2483_s0 + $0xe8] sm:$0xff]  ;;  %v1942_v48 = vld [vmem:[%s2482_s1 + $0x138] sm:$0xff]  }
  0x17   :  { %v1522_v7 = vcombine.high %v42_v3, %v46_v4  ;;  %v1524_v9 = vcombine.high %v43_v5, %v47_v8  ;;  %v50_v14 = vld [vmem:[%s2483_s0 + $0x100] sm:$0xff]  ;;  %v51_v16 = vld [vmem:[%s2483_s0 + $0x108] sm:$0xff]  ;;  %v1521_v19 = vcombine.low %v42_v3, %v46_v4  ;;  %v1523_v21 = vcombine.low %v43_v5, %v47_v8  ;;  %v29_v8 = vld [vmem:[%s2483_s0 + $0x58] sm:$0xff] }
  0x18   :  { %1636 = vmatpush3.bf16.msra.mxu0 %v1903_v22  ;;  %v54_v15 = vld [vmem:[%s2483_s0 + $0x120] sm:$0xff]  ;;  %v55_v17 = vld [vmem:[%s2483_s0 + $0x128] sm:$0xff] }
  0x19   :  { %1700 = vmatpush3.bf16.msra.mxu1 %v1904_v23  ;;  %1637 = vmatprep.subr.bf16.mxu0 %v1905_v24  ;;  %v1929_v18 = vld [vmem:[%s2482_s1 + $0x160] sm:$0xff]   ;;  %v1530_v22 = vcombine.high %v50_v14, %v54_v15  ;;  %v1532_v24 = vcombine.high %v51_v16, %v55_v17  ;;  %v1935_v32 = vld [vmem:[%s2482_s1 + $0x1e8] sm:$0xff]   ;;  %v1529_v34 = vcombine.low %v50_v14, %v54_v15  ;;  %v36_v14 = vld [vmem:[%s2483_s0 + $0x90] sm:$0xff] }
  0x1a   :  { %1701 = vmatprep.subr.bf16.mxu1 %v1906_v25  ;;  %v1930_v20 = vld [vmem:[%s2482_s1 + $0x120] sm:$0xff]   ;;  %v1936_v33 = vld [vmem:[%s2482_s1 + $0x1a8] sm:$0xff]   ;;  %v40_v15 = vld [vmem:[%s2483_s0 + $0xb0] sm:$0xff] }
  0x1b   :  { %v1931_v23 = vld [vmem:[%s2482_s1 + $0x1e0] sm:$0xff]   ;;  %v67_v44 = vld [vmem:[%s2483_s0 + $0x188] sm:$0xff] }
  0x1c   :  { %1638 = vmatpush3.bf16.msra.mxu0 %v1907_v26  ;;  %v1932_v25 = vld [vmem:[%s2482_s1 + $0x1a0] sm:$0xff]   ;;  %v71_v45 = vld [vmem:[%s2483_s0 + $0x1a8] sm:$0xff] }
  0x1d   :  { %1702 = vmatpush3.bf16.msra.mxu1 %v1908_v27  ;;  %1639 = vmatprep.subr.bf16.mxu0 %v1909_v28  ;;  %v58_v26 = vld [vmem:[%s2483_s0 + $0x140] sm:$0xff]  ;;  %v1933_v28 = vld [vmem:[%s2482_s1 + $0x168] sm:$0xff]   ;;  %v1547_v59 = vcombine.low %v67_v44, %v71_v45 }
  0x1e   :  { %1703 = vmatprep.subr.bf16.mxu1 %v1910_v29  ;;  %v62_v27 = vld [vmem:[%s2483_s0 + $0x160] sm:$0xff]  ;;  %v59_v29 = vld [vmem:[%s2483_s0 + $0x148] sm:$0xff] }
  0x1f   :  { %v1538_v36 = vcombine.high %v58_v26, %v62_v27  ;;  %v1537_v47 = vcombine.low %v58_v26, %v62_v27  ;;  %v75_v56 = vld [vmem:[%s2483_s0 + $0x1c8] sm:$0xff]  ;;  %v1517_v26 = vcombine.low %v36_v14, %v40_v15 }
  0x20   :  { %1640 = vmatpush3.bf16.msra.mxu0 %v1911_v30  ;;  %v63_v30 = vld [vmem:[%s2483_s0 + $0x168] sm:$0xff] }
  0x21   :  { %1704 = vmatpush3.bf16.msra.mxu1 %v1912_v31  ;;  %1753 = vmatprep.subr.bf16.mxu0 %v1913_v40  ;;  %v1934_v31 = vld [vmem:[%s2482_s1 + $0x128] sm:$0xff]   ;;  %v1540_v37 = vcombine.high %v59_v29, %v63_v30  ;;  %v1939_v40 = vld [vmem:[%s2482_s1 + $0x1f0] sm:$0xff]  }
  0x22   :  { %1817 = vmatprep.subr.bf16.mxu1 %v1915_v42  ;;  %v70_v42 = vld [vmem:[%s2483_s0 + $0x1a0] sm:$0xff]  ;;  %v79_v57 = vld [vmem:[%s2483_s0 + $0x1e8] sm:$0xff] }
  0x23   :  { %954 = vmatmul.mubr.bf16.vlgmr.msra.gmra.mrb[0].mxu0 %v1497_v35  ;;  %v1531_v35 = vcombine.low %v51_v16, %v55_v17  ;;  %v1555_v3 = vcombine.low %v75_v56, %v79_v57  ;;  %v37_v16 = vld [vmem:[%s2483_s0 + $0x98] sm:$0xff] }
  0x24   :  { %1051 = vmatmul.mubr.bf16.vlgmr.msra.gmra.mrb[0].mxu1 %v1499_v38  ;;  %1754 = vmatpush3.bf16.msra.mxu0 %v1914_v41  ;;  %v1937_v38 = vld [vmem:[%s2482_s1 + $0x170] sm:$0xff]   ;;  %v66_v41 = vld [vmem:[%s2483_s0 + $0x180] sm:$0xff]  ;;  %v41_v17 = vld [vmem:[%s2483_s0 + $0xb8] sm:$0xff] }
  0x25   :  { %1818 = vmatpush3.bf16.msra.mxu1 %v1916_v43  ;;  %961 = vmatprep.mubr.bf16.mxu0 %v1506_v46  ;;  %v1940_v43 = vld [vmem:[%s2482_s1 + $0x1b0] sm:$0xff]   ;;  %v1941_v46 = vld [vmem:[%s2482_s1 + $0x178] sm:$0xff]   ;;  %v1545_v58 = vcombine.low %v66_v41, %v70_v42  ;;  %v1519_v27 = vcombine.low %v37_v16, %v41_v17 }
  0x26   :  { %1058 = vmatprep.mubr.bf16.mxu1 %v1508_v49  ;;  %1755 = vmatprep.subr.bf16.mxu0 %v1917_v50  ;;  %v1539_v49 = vcombine.low %v59_v29, %v63_v30  ;;  %v1546_v50 = vcombine.high %v66_v41, %v70_v42  ;;  %v52_v30 = vld [vmem:[%s2483_s0 + $0x110] sm:$0xff]  ;;  %v65_v41 = vld [vmem:[%s2483_s0 + $0x178] sm:$0xff] }
  0x27   :  { %1819 = vmatprep.subr.bf16.mxu1 %v1919_v54  ;;  %v74_v54 = vld [vmem:[%s2483_s0 + $0x1c0] sm:$0xff] }
  0x28   :  { %1756 = vmatpush3.bf16.msra.mxu0 %v1918_v52  ;;  %v1548_v52 = vcombine.high %v67_v44, %v71_v45 }
  0x29   :  { %1820 = vmatpush3.bf16.msra.mxu1 %v1920_v55  ;;  %1757 = vmatprep.subr.bf16.mxu0 %v1921_v62  ;;  %v78_v55 = vld [vmem:[%s2483_s0 + $0x1e0] sm:$0xff]  ;;  %v20_v62 = vld [vmem:[%s2483_s0 + $0x10] sm:$0xff] }
  0x2a   :  { %1821 = vmatprep.subr.bf16.mxu1 %v1923_v0  ;;  %v21_v0 = vld [vmem:[%s2483_s0 + $0x18] sm:$0xff] }
  0x2b   :  { %962 = vmatmul.mubr.bf16.gmra.mrb[4].mxu0 %v1505_v51  ;;  %v1943_v51 = vld [vmem:[%s2482_s1 + $0x1f8] sm:$0xff]  }
  0x2c   :  { %1059 = vmatmul.mubr.bf16.gmra.mrb[4].mxu1 %v1507_v53  ;;  %969 = vmatprep.mubr.bf16.mxu0 %v1514_v60  ;;  %v1944_v53 = vld [vmem:[%s2482_s1 + $0x1b8] sm:$0xff]   ;;  %v1554_v60 = vcombine.high %v74_v54, %v78_v55 }
  0x2d   :  { %1066 = vmatprep.mubr.bf16.mxu1 %v1516_v61  ;;  %1758 = vmatpush3.bf16.msra.mxu0 %v1922_v63  ;;  %v1556_v61 = vcombine.high %v75_v56, %v79_v57  ;;  %v24_v63 = vld [vmem:[%s2483_s0 + $0x30] sm:$0xff]  ;;  %v77_v56 = vld [vmem:[%s2483_s0 + $0x1d8] sm:$0xff] }
  0x2e   :  { %1822 = vmatpush3.bf16.msra.mxu1 %v1924_v1  ;;  %1759 = vmatprep.subr.bf16.mxu0 %v1925_v10  ;;  %v25_v1 = vld [vmem:[%s2483_s0 + $0x38] sm:$0xff]  ;;  %v1502_v4 = vcombine.high %v20_v62, %v24_v63  ;;  %v1501_v10 = vcombine.low %v20_v62, %v24_v63 }
  0x2f   :  { %1823 = vmatprep.subr.bf16.mxu1 %v1927_v12  ;;  %v1504_v5 = vcombine.high %v21_v0, %v25_v1  ;;  %v81_v57 = vld [vmem:[%s2483_s0 + $0x1f8] sm:$0xff] }
  0x30   :  { %v1559_v63 = vcombine.low %v77_v56, %v81_v57 }
  0x31   :  { %1760 = vmatpush3.bf16.msra.mxu0 %v1926_v11  ;;  %v1503_v11 = vcombine.low %v21_v0, %v25_v1 }
  0x32   :  { %1824 = vmatpush3.bf16.msra.mxu1 %v1928_v13  ;;  %1761 = vmatprep.subr.bf16.mxu0 %v1929_v18 }
  0x33   :  { %970 = vmatmul.mubr.bf16.gmra.mrb[8].mxu0 %v1513_v2  ;;  %1825 = vmatprep.subr.bf16.mxu1 %v1931_v23  ;;  %v1553_v2 = vcombine.low %v74_v54, %v78_v55  ;;  %v48_v23 = vld [vmem:[%s2483_s0 + $0xf0] sm:$0xff] }
  0x34   :  { %1067 = vmatmul.mubr.bf16.gmra.mrb[8].mxu1 %v1515_v6  ;;  %977 = vmatprep.mubr.bf16.mxu0 %v1522_v7  ;;  %v28_v6 = vld [vmem:[%s2483_s0 + $0x50] sm:$0xff] }
  0x35   :  { %1074 = vmatprep.mubr.bf16.mxu1 %v1524_v9  ;;  %1762 = vmatpush3.bf16.msra.mxu0 %v1930_v20  ;;  %v32_v7 = vld [vmem:[%s2483_s0 + $0x70] sm:$0xff]  ;;  %v33_v9 = vld [vmem:[%s2483_s0 + $0x78] sm:$0xff]  ;;  %v1518_v20 = vcombine.high %v36_v14, %v40_v15 }
  0x36   :  { %1826 = vmatpush3.bf16.msra.mxu1 %v1932_v25  ;;  %1763 = vmatprep.subr.bf16.mxu0 %v1933_v28  ;;  %v1510_v12 = vcombine.high %v28_v6, %v32_v7  ;;  %v1512_v13 = vcombine.high %v29_v8, %v33_v9  ;;  %v1509_v18 = vcombine.low %v28_v6, %v32_v7  ;;  %v49_v25 = vld [vmem:[%s2483_s0 + $0xf8] sm:$0xff]  ;;  %v76_v54 = vld [vmem:[%s2483_s0 + $0x1d0] sm:$0xff] }
  0x37   :  { %1827 = vmatprep.subr.bf16.mxu1 %v1935_v32  ;;  %v53_v32 = vld [vmem:[%s2483_s0 + $0x118] sm:$0xff]  ;;  %v80_v55 = vld [vmem:[%s2483_s0 + $0x1f0] sm:$0xff] }
  0x38   :  { %v1557_v62 = vcombine.low %v76_v54, %v80_v55 }
  0x39   :  { %1764 = vmatpush3.bf16.msra.mxu0 %v1934_v31  ;;  %v56_v31 = vld [vmem:[%s2483_s0 + $0x130] sm:$0xff] }
  0x3a   :  { %1828 = vmatpush3.bf16.msra.mxu1 %v1936_v33  ;;  %1765 = vmatprep.subr.bf16.mxu0 %v1937_v38  ;;  %v57_v33 = vld [vmem:[%s2483_s0 + $0x138] sm:$0xff]  ;;  %v60_v38 = vld [vmem:[%s2483_s0 + $0x150] sm:$0xff]  ;;  %v1533_v42 = vcombine.low %v52_v30, %v56_v31 }
  0x3b   :  { %978 = vmatmul.mubr.bf16.gmra.mrb[12].mxu0 %v1521_v19  ;;  %1829 = vmatprep.subr.bf16.mxu1 %v1939_v40  ;;  %v1511_v19 = vcombine.low %v29_v8, %v33_v9  ;;  %v61_v40 = vld [vmem:[%s2483_s0 + $0x158] sm:$0xff] }
  0x3c   :  { %1075 = vmatmul.mubr.bf16.gmra.mrb[12].mxu1 %v1523_v21  ;;  %985 = vmatprep.mubr.bf16.mxu0 %v1530_v22  ;;  %v1520_v21 = vcombine.high %v37_v16, %v41_v17  ;;  %v44_v22 = vld [vmem:[%s2483_s0 + $0xd0] sm:$0xff]  ;;  %v1544_v45 = vcombine.high %v61_v40, %v65_v41 }
  0x3d   :  { %1082 = vmatprep.mubr.bf16.mxu1 %v1532_v24  ;;  %1766 = vmatpush3.bf16.msra.mxu0 %v1938_v39  ;;  %v45_v24 = vld [vmem:[%s2483_s0 + $0xd8] sm:$0xff]  ;;  %v1526_v28 = vcombine.high %v44_v22, %v48_v23  ;;  %v64_v39 = vld [vmem:[%s2483_s0 + $0x170] sm:$0xff] }
  0x3e   :  { %1830 = vmatpush3.bf16.msra.mxu1 %v1940_v43  ;;  %1767 = vmatprep.subr.bf16.mxu0 %v1941_v46  ;;  %v1528_v29 = vcombine.high %v45_v24, %v49_v25  ;;  %v1535_v43 = vcombine.low %v53_v32, %v57_v33  ;;  %v1542_v44 = vcombine.high %v60_v38, %v64_v39  ;;  %v68_v46 = vld [vmem:[%s2483_s0 + $0x190] sm:$0xff] }
  0x3f   :  { %1831 = vmatprep.subr.bf16.mxu1 %v1943_v51  ;;  %v1543_v51 = vcombine.low %v61_v40, %v65_v41 }
  0x41   :  { %1768 = vmatpush3.bf16.msra.mxu0 %v1942_v48  ;;  %v69_v48 = vld [vmem:[%s2483_s0 + $0x198] sm:$0xff] }
  0x42   :  { %1832 = vmatpush3.bf16.msra.mxu1 %v1944_v53 }
  0x43   :  { %986 = vmatmul.mubr.bf16.gmra.mrb[16].mxu0 %v1529_v34  ;;  %v1525_v34 = vcombine.low %v44_v22, %v48_v23 }
  0x44   :  { %1083 = vmatmul.mubr.bf16.gmra.mrb[16].mxu1 %v1531_v35  ;;  %993 = vmatprep.mubr.bf16.mxu0 %v1538_v36  ;;  %v1527_v35 = vcombine.low %v45_v24, %v49_v25  ;;  %v1534_v36 = vcombine.high %v52_v30, %v56_v31 }
  0x45   :  { %1090 = vmatprep.mubr.bf16.mxu1 %v1540_v37  ;;  %v1536_v37 = vcombine.high %v53_v32, %v57_v33 }
  0x4b   :  { %994 = vmatmul.mubr.bf16.gmra.mrb[20].mxu0 %v1537_v47  ;;  %v72_v47 = vld [vmem:[%s2483_s0 + $0x1b0] sm:$0xff] }
  0x4c   :  { %1091 = vmatmul.mubr.bf16.gmra.mrb[20].mxu1 %v1539_v49  ;;  %1001 = vmatprep.mubr.bf16.mxu0 %v1546_v50  ;;  %v73_v49 = vld [vmem:[%s2483_s0 + $0x1b8] sm:$0xff]  ;;  %v1541_v50 = vcombine.low %v60_v38, %v64_v39 }
  0x4d   :  { %1098 = vmatprep.mubr.bf16.mxu1 %v1548_v52  ;;  %v1550_v52 = vcombine.high %v68_v46, %v72_v47  ;;  %v1552_v53 = vcombine.high %v69_v48, %v73_v49 }
  0x53   :  { %1002 = vmatmul.mubr.bf16.gmra.mrb[24].mxu0 %v1545_v58  ;;  %v1549_v58 = vcombine.low %v68_v46, %v72_v47 }
  0x54   :  { %1099 = vmatmul.mubr.bf16.gmra.mrb[24].mxu1 %v1547_v59  ;;  %1009 = vmatprep.mubr.bf16.mxu0 %v1554_v60  ;;  %v1551_v59 = vcombine.low %v69_v48, %v73_v49  ;;  %v1558_v60 = vcombine.high %v76_v54, %v80_v55 }
  0x55   :  { %1106 = vmatprep.mubr.bf16.mxu1 %v1556_v61  ;;  %v1560_v61 = vcombine.high %v77_v56, %v81_v57 }
  0x5b   :  { %1010 = vmatmul.mubr.bf16.gmra.mrb[28].mxu0 %v1553_v2  ;;  %v2362_v2 = vld [vmem:[%s2484_s2] ss:$0 sm:$0xff] }
  0x5c   :  { %1107 = vmatmul.mubr.bf16.gmra.mrb[28].mxu1 %v1555_v3  ;;  %1147 = vmatprep.mubr.bf16.mxu0 %v1502_v4 }
  0x5d   :  { %1244 = vmatprep.mubr.bf16.mxu1 %v1504_v5 }
  0x63   :  { %1148 = vmatmul.mubr.bf16.vlgmr.msra.gmra.mrb[32].mxu0 %v1501_v10 }
  0x64   :  { %1245 = vmatmul.mubr.bf16.vlgmr.msra.gmra.mrb[32].mxu1 %v1503_v11  ;;  %1155 = vmatprep.mubr.bf16.mxu0 %v1510_v12 }
  0x65   :  { %1252 = vmatprep.mubr.bf16.mxu1 %v1512_v13 }
  0x6b   :  { %1156 = vmatmul.mubr.bf16.gmra.mrb[36].mxu0 %v1509_v18 }
  0x6c   :  { %1253 = vmatmul.mubr.bf16.gmra.mrb[36].mxu1 %v1511_v19  ;;  %1163 = vmatprep.mubr.bf16.mxu0 %v1518_v20 }
  0x6d   :  { %1260 = vmatprep.mubr.bf16.mxu1 %v1520_v21 }
  0x73   :  { %1164 = vmatmul.mubr.bf16.gmra.mrb[40].mxu0 %v1517_v26 }
  0x74   :  { %1261 = vmatmul.mubr.bf16.gmra.mrb[40].mxu1 %v1519_v27  ;;  %1171 = vmatprep.mubr.bf16.mxu0 %v1526_v28 }
  0x75   :  { %1268 = vmatprep.mubr.bf16.mxu1 %v1528_v29 }
  0x7b   :  { %1172 = vmatmul.mubr.bf16.gmra.mrb[44].mxu0 %v1525_v34 }
  0x7c   :  { %1269 = vmatmul.mubr.bf16.gmra.mrb[44].mxu1 %v1527_v35  ;;  %1179 = vmatprep.mubr.bf16.mxu0 %v1534_v36 }
  0x7d   :  { %1276 = vmatprep.mubr.bf16.mxu1 %v1536_v37 }
  0x83   :  { %1180 = vmatmul.mubr.bf16.gmra.mrb[48].mxu0 %v1533_v42 }
  0x84   :  { %1277 = vmatmul.mubr.bf16.gmra.mrb[48].mxu1 %v1535_v43  ;;  %1187 = vmatprep.mubr.bf16.mxu0 %v1542_v44 }
  0x85   :  { %1284 = vmatprep.mubr.bf16.mxu1 %v1544_v45 }
  0x8b   :  { %1188 = vmatmul.mubr.bf16.gmra.mrb[52].mxu0 %v1541_v50 }
  0x8c   :  { %1285 = vmatmul.mubr.bf16.gmra.mrb[52].mxu1 %v1543_v51  ;;  %1195 = vmatprep.mubr.bf16.mxu0 %v1550_v52 }
  0x8d   :  { %1292 = vmatprep.mubr.bf16.mxu1 %v1552_v53 }
  0x93   :  { %1196 = vmatmul.mubr.bf16.gmra.mrb[56].mxu0 %v1549_v58 }
  0x94   :  { %1293 = vmatmul.mubr.bf16.gmra.mrb[56].mxu1 %v1551_v59  ;;  %1203 = vmatprep.mubr.bf16.mxu0 %v1558_v60 }
  0x95   :  { %1300 = vmatprep.mubr.bf16.mxu1 %v1560_v61 }
  0x9b   :  { %1204 = vmatmul.mubr.bf16.gmra.mrb[60].mxu0 %v1557_v62 }
  0x9c   :  { %1301 = vmatmul.mubr.bf16.gmra.mrb[60].mxu1 %v1559_v63 }
  0xf6   :  { %v1641_v0 = vpop.f32.mrb[0].mxu0 }
  0xf7   :  { %v1705_v1 = vpop.f32.mrb[0].mxu1  ;;  %v1642_v3 = vpop.f32.mrb[1].mxu0 }
  0xf8   :  { %v1643_v4 = vadd.f32 %v1642_v3, %v1641_v0  ;;  %v1706_v5 = vpop.f32.mrb[1].mxu1  ;;  %v1644_v6 = vpop.f32.mrb[2].mxu0 }
  0xf9   :  { %v1707_v7 = vadd.f32 %v1706_v5, %v1705_v1  ;;  %v1708_v8 = vpop.f32.mrb[2].mxu1  ;;  %v1645_v9 = vpop.f32.mrb[3].mxu0 }
  0xfa   :  { %v956_v10 = vadd.f32 %v1643_v4, %v2362_v2  ;;  %v1646_v11 = vadd.f32 %v1645_v9, %v1644_v6  ;;  %v1709_v12 = vpop.f32.mrb[3].mxu1 }
  0xfb   :  { %v1710_v13 = vadd.f32 %v1709_v12, %v1708_v8 }
  0xfc   :  { %v2365_v14 = vadd.f32 %v1707_v7, %v956_v10  ;;  %v959_v15 = vadd.f32 %v1646_v11, %v2362_v2 }
  0xfe   :  { %v2368_v16 = vadd.f32 %v1710_v13, %v959_v15  ;;  %v1647_v17 = vpop.f32.mrb[4].mxu0 }
  0xff   :  { %v1711_v18 = vpop.f32.mrb[4].mxu1  ;;  %v1648_v19 = vpop.f32.mrb[5].mxu0 }
 0x100   :  { %v1649_v20 = vadd.f32 %v1648_v19, %v1647_v17  ;;  %v1712_v21 = vpop.f32.mrb[5].mxu1  ;;  %v1650_v22 = vpop.f32.mrb[6].mxu0 }
 0x101   :  { %v1713_v23 = vadd.f32 %v1712_v21, %v1711_v18  ;;  %v1714_v24 = vpop.f32.mrb[6].mxu1  ;;  %v1651_v25 = vpop.f32.mrb[7].mxu0 }
 0x102   :  { %v964_v26 = vadd.f32 %v1649_v20, %v2362_v2  ;;  %v1652_v27 = vadd.f32 %v1651_v25, %v1650_v22  ;;  %v1715_v28 = vpop.f32.mrb[7].mxu1 }
 0x103   :  { %v1716_v29 = vadd.f32 %v1715_v28, %v1714_v24 }
 0x104   :  { %v2371_v30 = vadd.f32 %v1713_v23, %v964_v26  ;;  %v967_v31 = vadd.f32 %v1652_v27, %v2362_v2 }
 0x106   :  { %v2374_v32 = vadd.f32 %v1716_v29, %v967_v31  ;;  %v1653_v33 = vpop.f32.mrb[8].mxu0 }
 0x107   :  { %v1717_v34 = vpop.f32.mrb[8].mxu1  ;;  %v1654_v35 = vpop.f32.mrb[9].mxu0 }
 0x108   :  { %v1655_v36 = vadd.f32 %v1654_v35, %v1653_v33  ;;  %v1718_v37 = vpop.f32.mrb[9].mxu1  ;;  %v1656_v38 = vpop.f32.mrb[10].mxu0 }
 0x109   :  { %v1719_v39 = vadd.f32 %v1718_v37, %v1717_v34  ;;  %v1720_v40 = vpop.f32.mrb[10].mxu1  ;;  %v1657_v41 = vpop.f32.mrb[11].mxu0 }
 0x10a   :  { %v972_v42 = vadd.f32 %v1655_v36, %v2362_v2  ;;  %v1658_v43 = vadd.f32 %v1657_v41, %v1656_v38  ;;  %v1721_v44 = vpop.f32.mrb[11].mxu1 }
 0x10b   :  { %v1722_v45 = vadd.f32 %v1721_v44, %v1720_v40 }
 0x10c   :  { %v2377_v46 = vadd.f32 %v1719_v39, %v972_v42  ;;  %v975_v47 = vadd.f32 %v1658_v43, %v2362_v2 }
 0x10e   :  { %v2380_v48 = vadd.f32 %v1722_v45, %v975_v47  ;;  %v1659_v49 = vpop.f32.mrb[12].mxu0 }
 0x10f   :  { %v1723_v50 = vpop.f32.mrb[12].mxu1  ;;  %v1660_v51 = vpop.f32.mrb[13].mxu0 }
 0x110   :  { %v1661_v52 = vadd.f32 %v1660_v51, %v1659_v49  ;;  %v1724_v53 = vpop.f32.mrb[13].mxu1  ;;  %v1662_v54 = vpop.f32.mrb[14].mxu0 }
 0x111   :  { %v1725_v55 = vadd.f32 %v1724_v53, %v1723_v50  ;;  %v1726_v56 = vpop.f32.mrb[14].mxu1  ;;  %v1663_v57 = vpop.f32.mrb[15].mxu0 }
 0x112   :  { %v980_v58 = vadd.f32 %v1661_v52, %v2362_v2  ;;  %v1664_v59 = vadd.f32 %v1663_v57, %v1662_v54  ;;  %v1727_v60 = vpop.f32.mrb[15].mxu1 }
 0x113   :  { %v1728_v61 = vadd.f32 %v1727_v60, %v1726_v56 }
 0x114   :  { %v2383_v62 = vadd.f32 %v1725_v55, %v980_v58  ;;  %v983_v63 = vadd.f32 %v1664_v59, %v2362_v2 }
 0x116   :  { %v2386_v0 = vadd.f32 %v1728_v61, %v983_v63  ;;  %v1665_v1 = vpop.f32.mrb[16].mxu0 }
 0x117   :  { %v1729_v3 = vpop.f32.mrb[16].mxu1  ;;  %v1666_v4 = vpop.f32.mrb[17].mxu0 }
 0x118   :  { %v1667_v5 = vadd.f32 %v1666_v4, %v1665_v1  ;;  %v1730_v6 = vpop.f32.mrb[17].mxu1  ;;  %v1668_v7 = vpop.f32.mrb[18].mxu0 }
 0x119   :  { %v1731_v8 = vadd.f32 %v1730_v6, %v1729_v3  ;;  %v1732_v9 = vpop.f32.mrb[18].mxu1  ;;  %v1669_v10 = vpop.f32.mrb[19].mxu0 }
 0x11a   :  { %v988_v11 = vadd.f32 %v1667_v5, %v2362_v2  ;;  %v1670_v12 = vadd.f32 %v1669_v10, %v1668_v7  ;;  %v1733_v13 = vpop.f32.mrb[19].mxu1 }
 0x11b   :  { %v1734_v15 = vadd.f32 %v1733_v13, %v1732_v9 }
 0x11c   :  { %v2389_v17 = vadd.f32 %v1731_v8, %v988_v11  ;;  %v991_v18 = vadd.f32 %v1670_v12, %v2362_v2 }
 0x11e   :  { %v2392_v19 = vadd.f32 %v1734_v15, %v991_v18  ;;  %v1671_v20 = vpop.f32.mrb[20].mxu0 }
 0x11f   :  { %v1735_v21 = vpop.f32.mrb[20].mxu1  ;;  %v1672_v22 = vpop.f32.mrb[21].mxu0 }
 0x120   :  { %v1673_v23 = vadd.f32 %v1672_v22, %v1671_v20  ;;  %v1736_v24 = vpop.f32.mrb[21].mxu1  ;;  %v1674_v25 = vpop.f32.mrb[22].mxu0 }
 0x121   :  { %v1737_v26 = vadd.f32 %v1736_v24, %v1735_v21  ;;  %v1738_v27 = vpop.f32.mrb[22].mxu1  ;;  %v1675_v28 = vpop.f32.mrb[23].mxu0 }
 0x122   :  { %v996_v29 = vadd.f32 %v1673_v23, %v2362_v2  ;;  %v1676_v31 = vadd.f32 %v1675_v28, %v1674_v25  ;;  %v1739_v33 = vpop.f32.mrb[23].mxu1 }
 0x123   :  { %v1740_v34 = vadd.f32 %v1739_v33, %v1738_v27 }
 0x124   :  { %v2395_v35 = vadd.f32 %v1737_v26, %v996_v29  ;;  %v999_v36 = vadd.f32 %v1676_v31, %v2362_v2 }
 0x126   :  { %v2398_v37 = vadd.f32 %v1740_v34, %v999_v36  ;;  %v1677_v38 = vpop.f32.mrb[24].mxu0 }
 0x127   :  { %v1741_v39 = vpop.f32.mrb[24].mxu1  ;;  %v1678_v40 = vpop.f32.mrb[25].mxu0 }
 0x128   :  { %v1679_v41 = vadd.f32 %v1678_v40, %v1677_v38  ;;  %v1742_v42 = vpop.f32.mrb[25].mxu1  ;;  %v1680_v43 = vpop.f32.mrb[26].mxu0 }
 0x129   :  { %v1743_v44 = vadd.f32 %v1742_v42, %v1741_v39  ;;  %v1744_v45 = vpop.f32.mrb[26].mxu1  ;;  %v1681_v47 = vpop.f32.mrb[27].mxu0 }
 0x12a   :  { %v1004_v49 = vadd.f32 %v1679_v41, %v2362_v2  ;;  %v1682_v50 = vadd.f32 %v1681_v47, %v1680_v43  ;;  %v1745_v51 = vpop.f32.mrb[27].mxu1 }
 0x12b   :  { %v1746_v52 = vadd.f32 %v1745_v51, %v1744_v45 }
 0x12c   :  { %v2401_v53 = vadd.f32 %v1743_v44, %v1004_v49  ;;  %v1007_v54 = vadd.f32 %v1682_v50, %v2362_v2 }
 0x12e   :  { %v2404_v55 = vadd.f32 %v1746_v52, %v1007_v54  ;;  %v1683_v56 = vpop.f32.mrb[28].mxu0 }
 0x12f   :  { %v1747_v57 = vpop.f32.mrb[28].mxu1  ;;  %v1684_v58 = vpop.f32.mrb[29].mxu0 }
 0x130   :  { %v1685_v59 = vadd.f32 %v1684_v58, %v1683_v56  ;;  %v1748_v60 = vpop.f32.mrb[29].mxu1  ;;  %v1686_v61 = vpop.f32.mrb[30].mxu0 }
 0x131   :  { %v1749_v63 = vadd.f32 %v1748_v60, %v1747_v57  ;;  %v1750_v1 = vpop.f32.mrb[30].mxu1  ;;  %v1687_v3 = vpop.f32.mrb[31].mxu0 }
 0x132   :  { %v1012_v4 = vadd.f32 %v1685_v59, %v2362_v2  ;;  %v1688_v5 = vadd.f32 %v1687_v3, %v1686_v61  ;;  %v1751_v6 = vpop.f32.mrb[31].mxu1 }
 0x133   :  { %v1752_v7 = vadd.f32 %v1751_v6, %v1750_v1 }
 0x134   :  { %v2407_v8 = vadd.f32 %v1749_v63, %v1012_v4  ;;  %v1015_v9 = vadd.f32 %v1688_v5, %v2362_v2 }
 0x136   :  { %v2410_v10 = vadd.f32 %v1752_v7, %v1015_v9  ;;  %v1769_v11 = vpop.f32.mrb[32].mxu0 }
 0x137   :  { %v1833_v12 = vpop.f32.mrb[32].mxu1  ;;  %v1770_v13 = vpop.f32.mrb[33].mxu0 }
 0x138   :  { %v1771_v15 = vadd.f32 %v1770_v13, %v1769_v11  ;;  %v1834_v18 = vpop.f32.mrb[33].mxu1  ;;  %v1772_v20 = vpop.f32.mrb[34].mxu0 }
 0x139   :  { %v1835_v21 = vadd.f32 %v1834_v18, %v1833_v12  ;;  %v1836_v22 = vpop.f32.mrb[34].mxu1  ;;  %v1773_v23 = vpop.f32.mrb[35].mxu0 }
 0x13a   :  { %v1150_v24 = vadd.f32 %v1771_v15, %v2365_v14  ;;  %v1774_v25 = vadd.f32 %v1773_v23, %v1772_v20  ;;  %v1837_v26 = vpop.f32.mrb[35].mxu1 }
 0x13b   :  { %v1838_v27 = vadd.f32 %v1837_v26, %v1836_v22 }
 0x13c   :  { %v1247_v28 = vadd.f32 %v1835_v21, %v1150_v24  ;;  %v1153_v29 = vadd.f32 %v1774_v25, %v2368_v16 }
 0x13e   :  { %1309 = vst [vmem:[%s2485_s3] sm:$0xff] %v1247_v28  ;;  %v1250_v2 = vadd.f32 %v1838_v27, %v1153_v29  ;;  %v1775_v31 = vpop.f32.mrb[36].mxu0  ;;  %v1446_v36 = vmul.f32 %v1247_v28, %v1247_v28 }
 0x13f   :  { %v1839_v33 = vpop.f32.mrb[36].mxu1  ;;  %v1776_v34 = vpop.f32.mrb[37].mxu0 }
 0x140   :  { %1310 = vst [vmem:[%s2485_s3 + $0x8] sm:$0xff] %v1250_v2  ;;  %v1424_v14 = vadd.f32 %v1250_v2, %v1247_v28  ;;  %v1447_v38 = vmul.f32 %v1250_v2, %v1250_v2  ;;  %v1777_v39 = vadd.f32 %v1776_v34, %v1775_v31  ;;  %v1840_v40 = vpop.f32.mrb[37].mxu1  ;;  %v1778_v41 = vpop.f32.mrb[38].mxu0 }
 0x141   :  { %v1841_v42 = vadd.f32 %v1840_v40, %v1839_v33  ;;  %v1842_v16 = vpop.f32.mrb[38].mxu1  ;;  %v1779_v43 = vpop.f32.mrb[39].mxu0 }
 0x142   :  { %v1462_v44 = vadd.f32 %v1447_v38, %v1446_v36  ;;  %v1158_v45 = vadd.f32 %v1777_v39, %v2371_v30  ;;  %v1780_v47 = vadd.f32 %v1779_v43, %v1778_v41  ;;  %v1843_v49 = vpop.f32.mrb[39].mxu1 }
 0x143   :  { %v1844_v50 = vadd.f32 %v1843_v49, %v1842_v16 }
 0x144   :  { %v1255_v51 = vadd.f32 %v1841_v42, %v1158_v45  ;;  %v1161_v52 = vadd.f32 %v1780_v47, %v2374_v32 }
 0x146   :  { %1311 = vst [vmem:[%s2485_s3 + $0x10] sm:$0xff] %v1255_v51  ;;  %v1425_v54 = vadd.f32 %v1424_v14, %v1255_v51  ;;  %v1448_v56 = vmul.f32 %v1255_v51, %v1255_v51  ;;  %v1258_v57 = vadd.f32 %v1844_v50, %v1161_v52  ;;  %v1781_v58 = vpop.f32.mrb[40].mxu0 }
 0x147   :  { %v1845_v59 = vpop.f32.mrb[40].mxu1  ;;  %v1782_v60 = vpop.f32.mrb[41].mxu0 }
 0x148   :  { %v1463_v61 = vadd.f32 %v1462_v44, %v1448_v56  ;;  %1312 = vst [vmem:[%s2485_s3 + $0x18] sm:$0xff] %v1258_v57  ;;  %v1426_v30 = vadd.f32 %v1425_v54, %v1258_v57  ;;  %v1449_v63 = vmul.f32 %v1258_v57, %v1258_v57  ;;  %v1783_v1 = vadd.f32 %v1782_v60, %v1781_v58  ;;  %v1846_v3 = vpop.f32.mrb[41].mxu1  ;;  %v1784_v32 = vpop.f32.mrb[42].mxu0 }
 0x149   :  { %v1847_v4 = vadd.f32 %v1846_v3, %v1845_v59  ;;  %v1848_v5 = vpop.f32.mrb[42].mxu1  ;;  %v1785_v6 = vpop.f32.mrb[43].mxu0 }
 0x14a   :  { %v1464_v7 = vadd.f32 %v1463_v61, %v1449_v63  ;;  %v1166_v9 = vadd.f32 %v1783_v1, %v2377_v46  ;;  %v1786_v11 = vadd.f32 %v1785_v6, %v1784_v32  ;;  %v1849_v12 = vpop.f32.mrb[43].mxu1 }
 0x14b   :  { %v1850_v13 = vadd.f32 %v1849_v12, %v1848_v5 }
 0x14c   :  { %v1263_v15 = vadd.f32 %v1847_v4, %v1166_v9  ;;  %v1169_v18 = vadd.f32 %v1786_v11, %v2380_v48 }
 0x14e   :  { %1313 = vst [vmem:[%s2485_s3 + $0x20] sm:$0xff] %v1263_v15  ;;  %v1427_v20 = vadd.f32 %v1426_v30, %v1263_v15  ;;  %v1450_v21 = vmul.f32 %v1263_v15, %v1263_v15  ;;  %v1266_v22 = vadd.f32 %v1850_v13, %v1169_v18  ;;  %v1787_v23 = vpop.f32.mrb[44].mxu0 }
 0x14f   :  { %v1851_v24 = vpop.f32.mrb[44].mxu1  ;;  %v1788_v25 = vpop.f32.mrb[45].mxu0 }
 0x150   :  { %v1465_v26 = vadd.f32 %v1464_v7, %v1450_v21  ;;  %1314 = vst [vmem:[%s2485_s3 + $0x28] sm:$0xff] %v1266_v22  ;;  %v1428_v46 = vadd.f32 %v1427_v20, %v1266_v22  ;;  %v1451_v27 = vmul.f32 %v1266_v22, %v1266_v22  ;;  %v1789_v28 = vadd.f32 %v1788_v25, %v1787_v23  ;;  %v1852_v29 = vpop.f32.mrb[45].mxu1  ;;  %v1790_v48 = vpop.f32.mrb[46].mxu0 }
 0x151   :  { %v1853_v2 = vadd.f32 %v1852_v29, %v1851_v24  ;;  %v1854_v31 = vpop.f32.mrb[46].mxu1  ;;  %v1791_v33 = vpop.f32.mrb[47].mxu0 }
 0x152   :  { %v1466_v34 = vadd.f32 %v1465_v26, %v1451_v27  ;;  %v1174_v36 = vadd.f32 %v1789_v28, %v2383_v62  ;;  %v1792_v14 = vadd.f32 %v1791_v33, %v1790_v48  ;;  %v1855_v38 = vpop.f32.mrb[47].mxu1 }
 0x153   :  { %v1856_v39 = vadd.f32 %v1855_v38, %v1854_v31 }
 0x154   :  { %v1271_v40 = vadd.f32 %v1853_v2, %v1174_v36  ;;  %v1177_v41 = vadd.f32 %v1792_v14, %v2386_v0 }
 0x156   :  { %1315 = vst [vmem:[%s2485_s3 + $0x30] sm:$0xff] %v1271_v40  ;;  %v1429_v42 = vadd.f32 %v1428_v46, %v1271_v40  ;;  %v1452_v16 = vmul.f32 %v1271_v40, %v1271_v40  ;;  %v1274_v43 = vadd.f32 %v1856_v39, %v1177_v41  ;;  %v1793_v44 = vpop.f32.mrb[48].mxu0 }
 0x157   :  { %v1857_v45 = vpop.f32.mrb[48].mxu1  ;;  %v1794_v47 = vpop.f32.mrb[49].mxu0 }
 0x158   :  { %v1467_v49 = vadd.f32 %v1466_v34, %v1452_v16  ;;  %1316 = vst [vmem:[%s2485_s3 + $0x38] sm:$0xff] %v1274_v43  ;;  %v1430_v62 = vadd.f32 %v1429_v42, %v1274_v43  ;;  %v1453_v50 = vmul.f32 %v1274_v43, %v1274_v43  ;;  %v1795_v51 = vadd.f32 %v1794_v47, %v1793_v44  ;;  %v1858_v52 = vpop.f32.mrb[49].mxu1  ;;  %v1796_v0 = vpop.f32.mrb[50].mxu0 }
 0x159   :  { %v1859_v54 = vadd.f32 %v1858_v52, %v1857_v45  ;;  %v1860_v56 = vpop.f32.mrb[50].mxu1  ;;  %v1797_v57 = vpop.f32.mrb[51].mxu0 }
 0x15a   :  { %v1468_v58 = vadd.f32 %v1467_v49, %v1453_v50  ;;  %v1182_v59 = vadd.f32 %v1795_v51, %v2389_v17  ;;  %v1798_v60 = vadd.f32 %v1797_v57, %v1796_v0  ;;  %v1861_v61 = vpop.f32.mrb[51].mxu1 }
 0x15b   :  { %v1862_v30 = vadd.f32 %v1861_v61, %v1860_v56 }
 0x15c   :  { %v1279_v63 = vadd.f32 %v1859_v54, %v1182_v59  ;;  %v1185_v1 = vadd.f32 %v1798_v60, %v2392_v19 }
 0x15e   :  { %1317 = vst [vmem:[%s2485_s3 + $0x40] sm:$0xff] %v1279_v63  ;;  %v1431_v3 = vadd.f32 %v1430_v62, %v1279_v63  ;;  %v1454_v32 = vmul.f32 %v1279_v63, %v1279_v63  ;;  %v1282_v4 = vadd.f32 %v1862_v30, %v1185_v1  ;;  %v1799_v5 = vpop.f32.mrb[52].mxu0 }
 0x15f   :  { %v1863_v6 = vpop.f32.mrb[52].mxu1  ;;  %v1800_v7 = vpop.f32.mrb[53].mxu0 }
 0x160   :  { %v1469_v9 = vadd.f32 %v1468_v58, %v1454_v32  ;;  %1318 = vst [vmem:[%s2485_s3 + $0x48] sm:$0xff] %v1282_v4  ;;  %v1432_v17 = vadd.f32 %v1431_v3, %v1282_v4  ;;  %v1455_v11 = vmul.f32 %v1282_v4, %v1282_v4  ;;  %v1801_v12 = vadd.f32 %v1800_v7, %v1799_v5  ;;  %v1864_v13 = vpop.f32.mrb[53].mxu1  ;;  %v1802_v19 = vpop.f32.mrb[54].mxu0 }
 0x161   :  { %v1865_v15 = vadd.f32 %v1864_v13, %v1863_v6  ;;  %v1866_v18 = vpop.f32.mrb[54].mxu1  ;;  %v1803_v20 = vpop.f32.mrb[55].mxu0 }
 0x162   :  { %v1470_v21 = vadd.f32 %v1469_v9, %v1455_v11  ;;  %v1190_v22 = vadd.f32 %v1801_v12, %v2395_v35  ;;  %v1804_v23 = vadd.f32 %v1803_v20, %v1802_v19  ;;  %v1867_v24 = vpop.f32.mrb[55].mxu1 }
 0x163   :  { %v1868_v25 = vadd.f32 %v1867_v24, %v1866_v18 }
 0x164   :  { %v1287_v26 = vadd.f32 %v1865_v15, %v1190_v22  ;;  %v1193_v46 = vadd.f32 %v1804_v23, %v2398_v37 }
 0x166   :  { %1319 = vst [vmem:[%s2485_s3 + $0x50] sm:$0xff] %v1287_v26  ;;  %v1433_v27 = vadd.f32 %v1432_v17, %v1287_v26  ;;  %v1456_v28 = vmul.f32 %v1287_v26, %v1287_v26  ;;  %v1290_v29 = vadd.f32 %v1868_v25, %v1193_v46  ;;  %v1805_v48 = vpop.f32.mrb[56].mxu0 }
 0x167   :  { %v1869_v2 = vpop.f32.mrb[56].mxu1  ;;  %v1806_v31 = vpop.f32.mrb[57].mxu0 }
 0x168   :  { %v1471_v33 = vadd.f32 %v1470_v21, %v1456_v28  ;;  %1320 = vst [vmem:[%s2485_s3 + $0x58] sm:$0xff] %v1290_v29  ;;  %v1434_v35 = vadd.f32 %v1433_v27, %v1290_v29  ;;  %v1457_v34 = vmul.f32 %v1290_v29, %v1290_v29  ;;  %v1807_v36 = vadd.f32 %v1806_v31, %v1805_v48  ;;  %v1870_v14 = vpop.f32.mrb[57].mxu1  ;;  %v1808_v37 = vpop.f32.mrb[58].mxu0 }
 0x169   :  { %v1871_v38 = vadd.f32 %v1870_v14, %v1869_v2  ;;  %v1872_v39 = vpop.f32.mrb[58].mxu1  ;;  %v1809_v40 = vpop.f32.mrb[59].mxu0 }
 0x16a   :  { %v1472_v41 = vadd.f32 %v1471_v33, %v1457_v34  ;;  %v1198_v42 = vadd.f32 %v1807_v36, %v2401_v53  ;;  %v1810_v16 = vadd.f32 %v1809_v40, %v1808_v37  ;;  %v1873_v43 = vpop.f32.mrb[59].mxu1 }
 0x16b   :  { %v1874_v44 = vadd.f32 %v1873_v43, %v1872_v39 }
 0x16c   :  { %v1295_v45 = vadd.f32 %v1871_v38, %v1198_v42  ;;  %v1201_v47 = vadd.f32 %v1810_v16, %v2404_v55 }
 0x16e   :  { %1321 = vst [vmem:[%s2485_s3 + $0x60] sm:$0xff] %v1295_v45  ;;  %v1435_v49 = vadd.f32 %v1434_v35, %v1295_v45  ;;  %v1458_v62 = vmul.f32 %v1295_v45, %v1295_v45  ;;  %v1298_v50 = vadd.f32 %v1874_v44, %v1201_v47  ;;  %v1811_v51 = vpop.f32.mrb[60].mxu0 }
 0x16f   :  { %v1875_v52 = vpop.f32.mrb[60].mxu1  ;;  %v1812_v0 = vpop.f32.mrb[61].mxu0 }
 0x170   :  { %v1473_v54 = vadd.f32 %v1472_v41, %v1458_v62  ;;  %1322 = vst [vmem:[%s2485_s3 + $0x68] sm:$0xff] %v1298_v50  ;;  %v1436_v53 = vadd.f32 %v1435_v49, %v1298_v50  ;;  %v1459_v56 = vmul.f32 %v1298_v50, %v1298_v50  ;;  %v1813_v57 = vadd.f32 %v1812_v0, %v1811_v51  ;;  %v1876_v58 = vpop.f32.mrb[61].mxu1  ;;  %v1814_v55 = vpop.f32.mrb[62].mxu0 }
 0x171   :  { %v1877_v59 = vadd.f32 %v1876_v58, %v1875_v52  ;;  %v1878_v60 = vpop.f32.mrb[62].mxu1  ;;  %v1815_v61 = vpop.f32.mrb[63].mxu0 }
 0x172   :  { %v1474_v30 = vadd.f32 %v1473_v54, %v1459_v56  ;;  %v1206_v63 = vadd.f32 %v1813_v57, %v2407_v8  ;;  %v1816_v1 = vadd.f32 %v1815_v61, %v1814_v55  ;;  %v1879_v3 = vpop.f32.mrb[63].mxu1 }
 0x173   :  { %v1880_v32 = vadd.f32 %v1879_v3, %v1878_v60 }
 0x174   :  { %v1303_v4 = vadd.f32 %v1877_v59, %v1206_v63  ;;  %v1209_v5 = vadd.f32 %v1816_v1, %v2410_v10 }
 0x176   :  { %1323 = vst [vmem:[%s2485_s3 + $0x70] sm:$0xff] %v1303_v4  ;;  %v1437_v6 = vadd.f32 %v1436_v53, %v1303_v4  ;;  %v1460_v7 = vmul.f32 %v1303_v4, %v1303_v4  ;;  %v1306_v9 = vadd.f32 %v1880_v32, %v1209_v5 }
 0x178   :  { %v1475_v17 = vadd.f32 %v1474_v30, %v1460_v7  ;;  %1324 = vst [vmem:[%s2485_s3 + $0x78] sm:$0xff] %v1306_v9  ;;  %v1438_v11 = vadd.f32 %v1437_v6, %v1306_v9  ;;  %v1461_v8 = vmul.f32 %v1306_v9, %v1306_v9 }
 0x17a   :  { %v1439_v12 = vrot.slane %v1438_v11, 4  ;;  %v1476_v13 = vadd.f32 %v1475_v17, %v1461_v8 }
 0x17c   :  { %v1440_v19 = vadd.f32 %v1439_v12, %v1438_v11  ;;  %v1477_v15 = vrot.slane %v1476_v13, 4 }
 0x17e   :  { %v1441_v18 = vrot.slane %v1440_v19, 2  ;;  %v1478_v10 = vadd.f32 %v1477_v15, %v1476_v13 }
 0x180   :  { %v1442_v20 = vadd.f32 %v1441_v18, %v1440_v19  ;;  %v1479_v21 = vrot.slane %v1478_v10, 2 }
 0x182   :  { %v1443_v22 = vrot.slane %v1442_v20, 1  ;;  %v1480_v23 = vadd.f32 %v1479_v21, %v1478_v10 }
 0x184   :  { %v1444_v24 = vadd.f32 %v1443_v22, %v1442_v20  ;;  %v1481_v25 = vrot.slane %v1480_v23, 1 }
 0x186   :  { %1445 = vst [vmem:[%s2486_s4] sm:$0x1] %v1444_v24  ;;  %v1482_v26 = vadd.f32 %v1481_v25, %v1480_v23 }
 0x188   :  { %1483 = vst [vmem:[%s2487_s5] sm:$0x1] %v1482_v26 }

// kernel: discriminator_forward.10
= control target key start
LH: loop header
LB: loop body
LE: loop exit
PB: predicated region body
PF: predicated region fallthrough
CT: control target
= control target key end

     0   :  { %s305_s0 = inlined_call_operand.vmem [shape: f32[128,128], index: 0, kind: input, shape index: {}]   ;;  %s306_s1 = inlined_call_operand.vmem [shape: f32[1,128], index: 1, kind: input, shape index: {}]   ;;  %s307_s2 = inlined_call_operand.vmem [shape: f32[1,128], index: 2, kind: input, shape index: {}]   ;;  %s308_s3 = inlined_call_operand.vmem [shape: f32[128,128], index: 3, kind: output, shape index: {}]  }
   0x1   :  { %v14_v0 = vld [vmem:[%s305_s0] sm:$0xff]  ;;  %v15_v4 = vld [vmem:[%s305_s0 + $0x8] sm:$0xff]  ;;  %v16_v5 = vld [vmem:[%s305_s0 + $0x10] sm:$0xff] }
   0x2   :  { %v172_v1 = vld [vmem:[%s306_s1] ss:$0 sm:$0xff]  ;;  %v17_v6 = vld [vmem:[%s305_s0 + $0x18] sm:$0xff]  ;;  %v19_v11 = vld [vmem:[%s305_s0 + $0x28] sm:$0xff] }
   0x3   :  { %v177_v2 = vld [vmem:[%s307_s2] ss:$0 sm:$0xff]  ;;  %v37_v3 = vmul.f32 %v172_v1, %v14_v0  ;;  %v38_v7 = vmul.f32 %v172_v1, %v15_v4  ;;  %v39_v8 = vmul.f32 %v172_v1, %v16_v5  ;;  %v40_v9 = vmul.f32 %v172_v1, %v17_v6  ;;  %v20_v12 = vld [vmem:[%s305_s0 + $0x30] sm:$0xff]  ;;  %v21_v17 = vld [vmem:[%s305_s0 + $0x38] sm:$0xff] }
   0x4   :  { %v18_v10 = vld [vmem:[%s305_s0 + $0x20] sm:$0xff]  ;;  %v42_v15 = vmul.f32 %v172_v1, %v19_v11  ;;  %v43_v16 = vmul.f32 %v172_v1, %v20_v12  ;;  %v44_v21 = vmul.f32 %v172_v1, %v21_v17  ;;  %v23_v30 = vld [vmem:[%s305_s0 + $0x48] sm:$0xff]  ;;  %v24_v31 = vld [vmem:[%s305_s0 + $0x50] sm:$0xff] }
   0x5   :  { %v60_v13 = vadd.f32 %v177_v2, %v37_v3  ;;  %v41_v14 = vmul.f32 %v172_v1, %v18_v10  ;;  %v61_v18 = vadd.f32 %v177_v2, %v38_v7  ;;  %v62_v19 = vadd.f32 %v177_v2, %v39_v8  ;;  %v22_v25 = vld [vmem:[%s305_s0 + $0x40] sm:$0xff]  ;;  %v25_v43 = vld [vmem:[%s305_s0 + $0x58] sm:$0xff]  ;;  %v27_v45 = vld [vmem:[%s305_s0 + $0x68] sm:$0xff] }
   0x6   :  { %v63_v20 = vadd.f32 %v177_v2, %v40_v9  ;;  %v65_v24 = vadd.f32 %v177_v2, %v42_v15  ;;  %v66_v37 = vadd.f32 %v177_v2, %v43_v16  ;;  %v67_v38 = vadd.f32 %v177_v2, %v44_v21  ;;  %v26_v44 = vld [vmem:[%s305_s0 + $0x60] sm:$0xff]  ;;  %v28_v56 = vld [vmem:[%s305_s0 + $0x70] sm:$0xff]  ;;  %v29_v4 = vld [vmem:[%s305_s0 + $0x78] sm:$0xff] }
   0x7   :  { %vm76_vm0 = vcmp.gt.f32.partialorder %v60_v13, 0.0  ;;  %v92_v22 = vmul.f32 0.2, %v60_v13  ;;  %v64_v23 = vadd.f32 %v177_v2, %v41_v14  ;;  %vm77_vm1 = vcmp.gt.f32.partialorder %v61_v18, 0.0 }
   0x8   :  { %v93_v26 = vmul.f32 0.2, %v61_v18  ;;  %vm78_vm2 = vcmp.gt.f32.partialorder %v62_v19, 0.0  ;;  %v94_v27 = vmul.f32 0.2, %v62_v19  ;;  %vm79_vm3 = vcmp.gt.f32.partialorder %v63_v20, 0.0 }
   0x9   :  { %v108_v28 = vsel %vm76_vm0, %v60_v13, %v92_v22  ;;  %v95_v29 = vmul.f32 0.2, %v63_v20  ;;  %vm80_vm4 = vcmp.gt.f32.partialorder %v64_v23, 0.0  ;;  %v96_v34 = vmul.f32 0.2, %v64_v23 }
   0xa   :  { %124 = vst [vmem:[%s308_s3] sm:$0xff] %v108_v28  ;;  %v109_v32 = vsel %vm77_vm1, %v61_v18, %v93_v26  ;;  %v110_v33 = vsel %vm78_vm2, %v62_v19, %v94_v27  ;;  %vm81_vm5 = vcmp.gt.f32.partialorder %v65_v24, 0.0  ;;  %v97_v36 = vmul.f32 0.2, %v65_v24 }
   0xb   :  { %125 = vst [vmem:[%s308_s3 + $0x8] sm:$0xff] %v109_v32  ;;  %126 = vst [vmem:[%s308_s3 + $0x10] sm:$0xff] %v110_v33  ;;  %v111_v35 = vsel %vm79_vm3, %v63_v20, %v95_v29  ;;  %v112_v39 = vsel %vm80_vm4, %v64_v23, %v96_v34  ;;  %v45_v40 = vmul.f32 %v172_v1, %v22_v25  ;;  %vm82_vm6 = vcmp.gt.f32.partialorder %v66_v37, 0.0 }
   0xc   :  { %127 = vst [vmem:[%s308_s3 + $0x18] sm:$0xff] %v111_v35  ;;  %v46_v41 = vmul.f32 %v172_v1, %v23_v30  ;;  %v47_v42 = vmul.f32 %v172_v1, %v24_v31  ;;  %128 = vst [vmem:[%s308_s3 + $0x20] sm:$0xff] %v112_v39  ;;  %v113_v46 = vsel %vm81_vm5, %v65_v24, %v97_v36  ;;  %v98_v47 = vmul.f32 0.2, %v66_v37 }
   0xd   :  { %vm83_vm7 = vcmp.gt.f32.partialorder %v67_v38, 0.0  ;;  %129 = vst [vmem:[%s308_s3 + $0x28] sm:$0xff] %v113_v46  ;;  %v99_v48 = vmul.f32 0.2, %v67_v38  ;;  %v68_v49 = vadd.f32 %v177_v2, %v45_v40  ;;  %v48_v53 = vmul.f32 %v172_v1, %v25_v43 }
   0xe   :  { %v69_v50 = vadd.f32 %v177_v2, %v46_v41  ;;  %v70_v51 = vadd.f32 %v177_v2, %v47_v42  ;;  %v114_v52 = vsel %vm82_vm6, %v66_v37, %v98_v47  ;;  %v49_v54 = vmul.f32 %v172_v1, %v26_v44 }
   0xf   :  { %v50_v55 = vmul.f32 %v172_v1, %v27_v45  ;;  %130 = vst [vmem:[%s308_s3 + $0x30] sm:$0xff] %v114_v52  ;;  %v115_v57 = vsel %vm83_vm7, %v67_v38, %v99_v48  ;;  %vm84_vm8 = vcmp.gt.f32.partialorder %v68_v49, 0.0  ;;  %v100_v58 = vmul.f32 0.2, %v68_v49 }
  0x10   :  { %vm85_vm9 = vcmp.gt.f32.partialorder %v69_v50, 0.0  ;;  %131 = vst [vmem:[%s308_s3 + $0x38] sm:$0xff] %v115_v57  ;;  %v101_v59 = vmul.f32 0.2, %v69_v50  ;;  %vm86_vm10 = vcmp.gt.f32.partialorder %v70_v51, 0.0  ;;  %v71_v61 = vadd.f32 %v177_v2, %v48_v53 }
  0x11   :  { %v102_v60 = vmul.f32 0.2, %v70_v51  ;;  %v116_v62 = vsel %vm84_vm8, %v68_v49, %v100_v58  ;;  %v72_v63 = vadd.f32 %v177_v2, %v49_v54  ;;  %v73_v0 = vadd.f32 %v177_v2, %v50_v55 }
  0x12   :  { %v51_v3 = vmul.f32 %v172_v1, %v28_v56  ;;  %132 = vst [vmem:[%s308_s3 + $0x40] sm:$0xff] %v116_v62  ;;  %v117_v5 = vsel %vm85_vm9, %v69_v50, %v101_v59  ;;  %vm87_vm11 = vcmp.gt.f32.partialorder %v71_v61, 0.0  ;;  %v103_v7 = vmul.f32 0.2, %v71_v61 }
  0x13   :  { %v118_v6 = vsel %vm86_vm10, %v70_v51, %v102_v60  ;;  %133 = vst [vmem:[%s308_s3 + $0x48] sm:$0xff] %v117_v5  ;;  %vm88_vm12 = vcmp.gt.f32.partialorder %v72_v63, 0.0  ;;  %v104_v8 = vmul.f32 0.2, %v72_v63  ;;  %vm89_vm13 = vcmp.gt.f32.partialorder %v73_v0, 0.0 }
  0x14   :  { %134 = vst [vmem:[%s308_s3 + $0x50] sm:$0xff] %v118_v6  ;;  %v105_v9 = vmul.f32 0.2, %v73_v0  ;;  %v119_v10 = vsel %vm87_vm11, %v71_v61, %v103_v7  ;;  %v74_v11 = vadd.f32 %v177_v2, %v51_v3  ;;  %v52_v12 = vmul.f32 %v172_v1, %v29_v4 }
  0x15   :  { %135 = vst [vmem:[%s308_s3 + $0x58] sm:$0xff] %v119_v10  ;;  %v120_v13 = vsel %vm88_vm12, %v72_v63, %v104_v8 }
  0x16   :  { %v121_v14 = vsel %vm89_vm13, %v73_v0, %v105_v9  ;;  %136 = vst [vmem:[%s308_s3 + $0x60] sm:$0xff] %v120_v13  ;;  %vm90_vm14 = vcmp.gt.f32.partialorder %v74_v11, 0.0  ;;  %v106_v15 = vmul.f32 0.2, %v74_v11  ;;  %v75_v16 = vadd.f32 %v177_v2, %v52_v12 }
  0x17   :  { %137 = vst [vmem:[%s308_s3 + $0x68] sm:$0xff] %v121_v14 }
  0x18   :  { %v122_v17 = vsel %vm90_vm14, %v74_v11, %v106_v15  ;;  %vm91_vm15 = vcmp.gt.f32.partialorder %v75_v16, 0.0  ;;  %v107_v1 = vmul.f32 0.2, %v75_v16 }
  0x19   :  { %138 = vst [vmem:[%s308_s3 + $0x70] sm:$0xff] %v122_v17 }
  0x1a   :  { %v123_v18 = vsel %vm91_vm15, %v75_v16, %v107_v1 }
  0x1b   :  { %139 = vst [vmem:[%s308_s3 + $0x78] sm:$0xff] %v123_v18 }

// kernel: discriminator_forward.11
= control target key start
LH: loop header
LB: loop body
LE: loop exit
PB: predicated region body
PF: predicated region fallthrough
CT: control target
= control target key end

     0   :  { %s4038_s1 = inlined_call_operand.vmem [shape: bf16[2048,256], index: 1, kind: input, shape index: {}]   ;;  %s4039_s0 = inlined_call_operand.vmem [shape: bf16[32,2048], index: 0, kind: input, shape index: {}]   ;;  %s4040_s2 = inlined_call_operand.vmem [shape: f32[1,256], index: 2, kind: input, shape index: {}]   ;;  %s4041_s3 = inlined_call_operand.vmem [shape: f32[32,256], index: 3, kind: output, shape index: {0}]   ;;  %s4042_s4 = inlined_call_operand.vmem [shape: f32[1,1,256], index: 4, kind: output, shape index: {1}]   ;;  %s4043_s5 = inlined_call_operand.vmem [shape: f32[1,1,256], index: 5, kind: output, shape index: {2}]  }
   0x1   :  { %v2671_v0 = vld [vmem:[%s4038_s1 + $0x4] ss:$8 sps:$4 sm:$0xff]   ;;  %v2675_v2 = vld [vmem:[%s4038_s1] ss:$8 sps:$4 sm:$0xff]   ;;  %v2677_v4 = vld [vmem:[%s4038_s1 + $0x14] ss:$8 sps:$4 sm:$0xff]  }
   0x2   :  { %v2673_v1 = vld [vmem:[%s4038_s1 + $0x404] ss:$8 sps:$4 sm:$0xff]   ;;  %1757 = vmatprep.subr.bf16.mxu1 %v2671_v0  ;;  %v2676_v3 = vld [vmem:[%s4038_s1 + $0x400] ss:$8 sps:$4 sm:$0xff]   ;;  %v2679_v5 = vld [vmem:[%s4038_s1 + $0x414] ss:$8 sps:$4 sm:$0xff]  }
   0x3   :  { %1969 = vmatprep.subr.bf16.mxu0 %v2673_v1  ;;  %1758 = vmatpush1.bf16.msra.mxu1 %v2675_v2  ;;  %v2681_v6 = vld [vmem:[%s4038_s1 + $0x10] ss:$8 sps:$4 sm:$0xff]   ;;  %v2683_v8 = vld [vmem:[%s4038_s1 + $0x24] ss:$8 sps:$4 sm:$0xff]   ;;  %v2687_v10 = vld [vmem:[%s4038_s1 + $0x20] ss:$8 sps:$4 sm:$0xff]  }
   0x4   :  { %1970 = vmatpush1.bf16.msra.mxu0 %v2676_v3  ;;  %1759 = vmatprep.subr.bf16.mxu1 %v2677_v4  ;;  %v2682_v7 = vld [vmem:[%s4038_s1 + $0x410] ss:$8 sps:$4 sm:$0xff]   ;;  %v2685_v9 = vld [vmem:[%s4038_s1 + $0x424] ss:$8 sps:$4 sm:$0xff]   ;;  %v2688_v11 = vld [vmem:[%s4038_s1 + $0x420] ss:$8 sps:$4 sm:$0xff]  }
   0x5   :  { %1971 = vmatprep.subr.bf16.mxu0 %v2679_v5  ;;  %v2689_v12 = vld [vmem:[%s4038_s1 + $0x34] ss:$8 sps:$4 sm:$0xff]   ;;  %v2693_v14 = vld [vmem:[%s4038_s1 + $0x30] ss:$8 sps:$4 sm:$0xff]   ;;  %v2695_v16 = vld [vmem:[%s4038_s1 + $0x44] ss:$8 sps:$4 sm:$0xff]  }
   0x6   :  { %v2691_v13 = vld [vmem:[%s4038_s1 + $0x434] ss:$8 sps:$4 sm:$0xff]   ;;  %v2694_v15 = vld [vmem:[%s4038_s1 + $0x430] ss:$8 sps:$4 sm:$0xff]   ;;  %v2697_v17 = vld [vmem:[%s4038_s1 + $0x444] ss:$8 sps:$4 sm:$0xff]  }
   0x7   :  { %1760 = vmatpush1.bf16.msra.mxu1 %v2681_v6  ;;  %v2699_v18 = vld [vmem:[%s4038_s1 + $0x40] ss:$8 sps:$4 sm:$0xff]   ;;  %v2701_v20 = vld [vmem:[%s4038_s1 + $0x54] ss:$8 sps:$4 sm:$0xff]   ;;  %v2705_v22 = vld [vmem:[%s4038_s1 + $0x50] ss:$8 sps:$4 sm:$0xff]  }
   0x8   :  { %1972 = vmatpush1.bf16.msra.mxu0 %v2682_v7  ;;  %1761 = vmatprep.subr.bf16.mxu1 %v2683_v8  ;;  %v2700_v19 = vld [vmem:[%s4038_s1 + $0x440] ss:$8 sps:$4 sm:$0xff]   ;;  %v2703_v21 = vld [vmem:[%s4038_s1 + $0x454] ss:$8 sps:$4 sm:$0xff]   ;;  %v2706_v23 = vld [vmem:[%s4038_s1 + $0x450] ss:$8 sps:$4 sm:$0xff]  }
   0x9   :  { %1973 = vmatprep.subr.bf16.mxu0 %v2685_v9  ;;  %v2707_v24 = vld [vmem:[%s4038_s1 + $0x64] ss:$8 sps:$4 sm:$0xff]   ;;  %v2711_v26 = vld [vmem:[%s4038_s1 + $0x60] ss:$8 sps:$4 sm:$0xff]   ;;  %v2713_v28 = vld [vmem:[%s4038_s1 + $0x74] ss:$8 sps:$4 sm:$0xff]  }
   0xa   :  { %v2709_v25 = vld [vmem:[%s4038_s1 + $0x464] ss:$8 sps:$4 sm:$0xff]   ;;  %v2712_v27 = vld [vmem:[%s4038_s1 + $0x460] ss:$8 sps:$4 sm:$0xff]   ;;  %v2715_v29 = vld [vmem:[%s4038_s1 + $0x474] ss:$8 sps:$4 sm:$0xff]  }
   0xb   :  { %1762 = vmatpush1.bf16.msra.mxu1 %v2687_v10  ;;  %v2717_v30 = vld [vmem:[%s4038_s1 + $0x70] ss:$8 sps:$4 sm:$0xff]   ;;  %v2719_v32 = vld [vmem:[%s4038_s1 + $0x84] ss:$8 sps:$4 sm:$0xff]   ;;  %v2723_v34 = vld [vmem:[%s4038_s1 + $0x80] ss:$8 sps:$4 sm:$0xff]  }
   0xc   :  { %1974 = vmatpush1.bf16.msra.mxu0 %v2688_v11  ;;  %1763 = vmatprep.subr.bf16.mxu1 %v2689_v12  ;;  %v2718_v31 = vld [vmem:[%s4038_s1 + $0x470] ss:$8 sps:$4 sm:$0xff]   ;;  %v2721_v33 = vld [vmem:[%s4038_s1 + $0x484] ss:$8 sps:$4 sm:$0xff]   ;;  %v2724_v35 = vld [vmem:[%s4038_s1 + $0x480] ss:$8 sps:$4 sm:$0xff]  }
   0xd   :  { %1975 = vmatprep.subr.bf16.mxu0 %v2691_v13  ;;  %v2725_v36 = vld [vmem:[%s4038_s1 + $0x94] ss:$8 sps:$4 sm:$0xff]   ;;  %v2729_v38 = vld [vmem:[%s4038_s1 + $0x90] ss:$8 sps:$4 sm:$0xff]   ;;  %v2731_v40 = vld [vmem:[%s4038_s1 + $0xa4] ss:$8 sps:$4 sm:$0xff]  }
   0xe   :  { %v2727_v37 = vld [vmem:[%s4038_s1 + $0x494] ss:$8 sps:$4 sm:$0xff]   ;;  %v2730_v39 = vld [vmem:[%s4038_s1 + $0x490] ss:$8 sps:$4 sm:$0xff]   ;;  %v2733_v41 = vld [vmem:[%s4038_s1 + $0x4a4] ss:$8 sps:$4 sm:$0xff]  }
   0xf   :  { %1764 = vmatpush1.bf16.msra.mxu1 %v2693_v14  ;;  %v2735_v42 = vld [vmem:[%s4038_s1 + $0xa0] ss:$8 sps:$4 sm:$0xff]   ;;  %v2737_v44 = vld [vmem:[%s4038_s1 + $0xb4] ss:$8 sps:$4 sm:$0xff]   ;;  %v2741_v46 = vld [vmem:[%s4038_s1 + $0xb0] ss:$8 sps:$4 sm:$0xff]  }
  0x10   :  { %1976 = vmatpush1.bf16.msra.mxu0 %v2694_v15  ;;  %1765 = vmatprep.subr.bf16.mxu1 %v2695_v16  ;;  %v2736_v43 = vld [vmem:[%s4038_s1 + $0x4a0] ss:$8 sps:$4 sm:$0xff]   ;;  %v2739_v45 = vld [vmem:[%s4038_s1 + $0x4b4] ss:$8 sps:$4 sm:$0xff]   ;;  %v2742_v47 = vld [vmem:[%s4038_s1 + $0x4b0] ss:$8 sps:$4 sm:$0xff]  }
  0x11   :  { %1977 = vmatprep.subr.bf16.mxu0 %v2697_v17  ;;  %v17_v48 = vld [vmem:[%s4039_s0] sm:$0xff]  ;;  %v2749_v58 = vld [vmem:[%s4038_s1 + $0xd4] ss:$8 sps:$4 sm:$0xff]   ;;  %v2753_v60 = vld [vmem:[%s4038_s1 + $0xd0] ss:$8 sps:$4 sm:$0xff]  }
  0x12   :  { %v25_v49 = vld [vmem:[%s4039_s0 + $0x40] sm:$0xff]  ;;  %v2751_v59 = vld [vmem:[%s4038_s1 + $0x4d4] ss:$8 sps:$4 sm:$0xff]   ;;  %v2754_v61 = vld [vmem:[%s4038_s1 + $0x4d0] ss:$8 sps:$4 sm:$0xff]  }
  0x13   :  { %1766 = vmatpush1.bf16.msra.mxu1 %v2699_v18  ;;  %v2743_v50 = vld [vmem:[%s4038_s1 + $0xc4] ss:$8 sps:$4 sm:$0xff]   ;;  %v2319_v52 = vcombine.high %v17_v48, %v25_v49  ;;  %v2747_v56 = vld [vmem:[%s4038_s1 + $0xc0] ss:$8 sps:$4 sm:$0xff]   ;;  %v2761_v2 = vld [vmem:[%s4038_s1 + $0xf4] ss:$8 sps:$4 sm:$0xff]   ;;  %v2318_v8 = vcombine.low %v17_v48, %v25_v49 }
  0x14   :  { %1978 = vmatpush1.bf16.msra.mxu0 %v2700_v19  ;;  %1767 = vmatprep.subr.bf16.mxu1 %v2701_v20  ;;  %v2745_v51 = vld [vmem:[%s4038_s1 + $0x4c4] ss:$8 sps:$4 sm:$0xff]   ;;  %v2748_v57 = vld [vmem:[%s4038_s1 + $0x4c0] ss:$8 sps:$4 sm:$0xff]   ;;  %v2763_v3 = vld [vmem:[%s4038_s1 + $0x4f4] ss:$8 sps:$4 sm:$0xff]  }
  0x15   :  { %1979 = vmatprep.subr.bf16.mxu0 %v2703_v21  ;;  %v21_v53 = vld [vmem:[%s4039_s0 + $0x20] sm:$0xff]  ;;  %1789 = vmatprep.mubr.bf16.mxu1 %v2319_v52  ;;  %v2765_v4 = vld [vmem:[%s4038_s1 + $0xf0] ss:$8 sps:$4 sm:$0xff]   ;;  %v2775_v12 = vld [vmem:[%s4038_s1 + $0x114] ss:$8 sps:$4 sm:$0xff]  }
  0x16   :  { %v29_v54 = vld [vmem:[%s4039_s0 + $0x60] sm:$0xff]  ;;  %v2766_v5 = vld [vmem:[%s4038_s1 + $0x4f0] ss:$8 sps:$4 sm:$0xff]   ;;  %v2778_v13 = vld [vmem:[%s4038_s1 + $0x514] ss:$8 sps:$4 sm:$0xff]  }
  0x17   :  { %1768 = vmatpush1.bf16.msra.mxu1 %v2705_v22  ;;  %v2327_v55 = vcombine.high %v21_v53, %v29_v54  ;;  %v2755_v62 = vld [vmem:[%s4038_s1 + $0xe4] ss:$8 sps:$4 sm:$0xff]   ;;  %v2759_v0 = vld [vmem:[%s4038_s1 + $0xe0] ss:$8 sps:$4 sm:$0xff]   ;;  %v2326_v10 = vcombine.low %v21_v53, %v29_v54  ;;  %v2773_v14 = vld [vmem:[%s4038_s1 + $0x110] ss:$8 sps:$4 sm:$0xff]  }
  0x18   :  { %1980 = vmatpush1.bf16.msra.mxu0 %v2706_v23  ;;  %1769 = vmatprep.subr.bf16.mxu1 %v2707_v24  ;;  %v2757_v63 = vld [vmem:[%s4038_s1 + $0x4e4] ss:$8 sps:$4 sm:$0xff]   ;;  %v2760_v1 = vld [vmem:[%s4038_s1 + $0x4e0] ss:$8 sps:$4 sm:$0xff]   ;;  %v2776_v15 = vld [vmem:[%s4038_s1 + $0x510] ss:$8 sps:$4 sm:$0xff]  }
  0x19   :  { %1981 = vmatprep.subr.bf16.mxu0 %v2709_v25  ;;  %2001 = vmatprep.mubr.bf16.mxu0 %v2327_v55  ;;  %v2769_v6 = vld [vmem:[%s4038_s1 + $0x104] ss:$8 sps:$4 sm:$0xff]   ;;  %v2767_v9 = vld [vmem:[%s4038_s1 + $0x100] ss:$8 sps:$4 sm:$0xff]   ;;  %v2787_v20 = vld [vmem:[%s4038_s1 + $0x134] ss:$8 sps:$4 sm:$0xff]  }
  0x1a   :  { %v2772_v7 = vld [vmem:[%s4038_s1 + $0x504] ss:$8 sps:$4 sm:$0xff]   ;;  %v2770_v11 = vld [vmem:[%s4038_s1 + $0x500] ss:$8 sps:$4 sm:$0xff]   ;;  %v2790_v21 = vld [vmem:[%s4038_s1 + $0x534] ss:$8 sps:$4 sm:$0xff]  }
  0x1b   :  { %1770 = vmatpush1.bf16.msra.mxu1 %v2711_v26  ;;  %v2781_v16 = vld [vmem:[%s4038_s1 + $0x124] ss:$8 sps:$4 sm:$0xff]   ;;  %v2779_v18 = vld [vmem:[%s4038_s1 + $0x120] ss:$8 sps:$4 sm:$0xff]   ;;  %v2785_v22 = vld [vmem:[%s4038_s1 + $0x130] ss:$8 sps:$4 sm:$0xff]  }
  0x1c   :  { %1982 = vmatpush1.bf16.msra.mxu0 %v2712_v27  ;;  %1771 = vmatprep.subr.bf16.mxu1 %v2713_v28  ;;  %v2784_v17 = vld [vmem:[%s4038_s1 + $0x524] ss:$8 sps:$4 sm:$0xff]   ;;  %v2782_v19 = vld [vmem:[%s4038_s1 + $0x520] ss:$8 sps:$4 sm:$0xff]   ;;  %v2788_v23 = vld [vmem:[%s4038_s1 + $0x530] ss:$8 sps:$4 sm:$0xff]  }
  0x1d   :  { %1983 = vmatprep.subr.bf16.mxu0 %v2715_v29  ;;  %v2793_v24 = vld [vmem:[%s4038_s1 + $0x144] ss:$8 sps:$4 sm:$0xff]   ;;  %v2791_v26 = vld [vmem:[%s4038_s1 + $0x140] ss:$8 sps:$4 sm:$0xff]   ;;  %v2799_v28 = vld [vmem:[%s4038_s1 + $0x154] ss:$8 sps:$4 sm:$0xff]  }
  0x1e   :  { %v2796_v25 = vld [vmem:[%s4038_s1 + $0x544] ss:$8 sps:$4 sm:$0xff]   ;;  %v2794_v27 = vld [vmem:[%s4038_s1 + $0x540] ss:$8 sps:$4 sm:$0xff]   ;;  %v2802_v29 = vld [vmem:[%s4038_s1 + $0x554] ss:$8 sps:$4 sm:$0xff]  }
  0x1f   :  { %1772 = vmatpush1.bf16.msra.mxu1 %v2717_v30  ;;  %v33_v30 = vld [vmem:[%s4039_s0 + $0x80] sm:$0xff]  ;;  %v3407_v49 = vld [vmem:[%s4039_s0 + $0x28] sm:$0xff]  ;;  %v2812_v52 = vld [vmem:[%s4038_s1 + $0x570] ss:$8 sps:$4 sm:$0xff]  }
  0x20   :  { %1984 = vmatpush1.bf16.msra.mxu0 %v2718_v31  ;;  %1773 = vmatprep.subr.bf16.mxu1 %v2719_v32  ;;  %v41_v31 = vld [vmem:[%s4039_s0 + $0xc0] sm:$0xff]  ;;  %v2797_v32 = vld [vmem:[%s4038_s1 + $0x150] ss:$8 sps:$4 sm:$0xff]  }
  0x21   :  { %1985 = vmatprep.subr.bf16.mxu0 %v2721_v33  ;;  %v2335_v33 = vcombine.high %v33_v30, %v41_v31  ;;  %v2817_v54 = vld [vmem:[%s4038_s1 + $0x184] ss:$8 sps:$4 sm:$0xff]  }
  0x22   :  { %v2820_v55 = vld [vmem:[%s4038_s1 + $0x584] ss:$8 sps:$4 sm:$0xff]  }
  0x23   :  { %1774 = vmatpush1.bf16.msra.mxu1 %v2723_v34  ;;  %v2800_v34 = vld [vmem:[%s4038_s1 + $0x550] ss:$8 sps:$4 sm:$0xff]  }
  0x24   :  { %1986 = vmatpush1.bf16.msra.mxu0 %v2724_v35  ;;  %1775 = vmatprep.subr.bf16.mxu1 %v2725_v36  ;;  %v37_v35 = vld [vmem:[%s4039_s0 + $0xa0] sm:$0xff] }
  0x25   :  { %1987 = vmatprep.subr.bf16.mxu0 %v2727_v37  ;;  %v45_v36 = vld [vmem:[%s4039_s0 + $0xe0] sm:$0xff]  ;;  %v2334_v37 = vcombine.low %v33_v30, %v41_v31  ;;  %v2871_v30 = vld [vmem:[%s4038_s1 + $0x214] ss:$8 sps:$4 sm:$0xff]  }
  0x26   :  { %v2874_v31 = vld [vmem:[%s4038_s1 + $0x614] ss:$8 sps:$4 sm:$0xff]  }
  0x27   :  { %1776 = vmatpush1.bf16.msra.mxu1 %v2729_v38  ;;  %v2805_v38 = vld [vmem:[%s4038_s1 + $0x164] ss:$8 sps:$4 sm:$0xff]  }
  0x28   :  { %1988 = vmatpush1.bf16.msra.mxu0 %v2730_v39  ;;  %1777 = vmatprep.subr.bf16.mxu1 %v2731_v40  ;;  %v2343_v39 = vcombine.high %v37_v35, %v45_v36  ;;  %v2342_v40 = vcombine.low %v37_v35, %v45_v36  ;;  %v2869_v36 = vld [vmem:[%s4038_s1 + $0x210] ss:$8 sps:$4 sm:$0xff]  }
  0x29   :  { %1989 = vmatprep.subr.bf16.mxu0 %v2733_v41  ;;  %v2808_v41 = vld [vmem:[%s4038_s1 + $0x564] ss:$8 sps:$4 sm:$0xff]  }
  0x2b   :  { %1778 = vmatpush1.bf16.msra.mxu1 %v2735_v42  ;;  %v2803_v42 = vld [vmem:[%s4038_s1 + $0x160] ss:$8 sps:$4 sm:$0xff]  }
  0x2c   :  { %1990 = vmatpush1.bf16.msra.mxu0 %v2736_v43  ;;  %1779 = vmatprep.subr.bf16.mxu1 %v2737_v44  ;;  %v2806_v43 = vld [vmem:[%s4038_s1 + $0x560] ss:$8 sps:$4 sm:$0xff]  }
  0x2d   :  { %1991 = vmatprep.subr.bf16.mxu0 %v2739_v45  ;;  %v3389_v44 = vld [vmem:[%s4039_s0 + $0x8] sm:$0xff] }
  0x2e   :  { %v3394_v45 = vld [vmem:[%s4039_s0 + $0x48] sm:$0xff] }
  0x2f   :  { %1780 = vmatpush1.bf16.msra.mxu1 %v2741_v46  ;;  %v2811_v46 = vld [vmem:[%s4038_s1 + $0x174] ss:$8 sps:$4 sm:$0xff]   ;;  %v2321_v48 = vcombine.high %v3389_v44, %v3394_v45 }
  0x30   :  { %1992 = vmatpush1.bf16.msra.mxu0 %v2742_v47  ;;  %1781 = vmatprep.subr.bf16.mxu1 %v2743_v50  ;;  %v2814_v47 = vld [vmem:[%s4038_s1 + $0x574] ss:$8 sps:$4 sm:$0xff]   ;;  %v3412_v50 = vld [vmem:[%s4039_s0 + $0x68] sm:$0xff] }
  0x31   :  { %1993 = vmatprep.subr.bf16.mxu0 %v2745_v51  ;;  %v2809_v51 = vld [vmem:[%s4038_s1 + $0x170] ss:$8 sps:$4 sm:$0xff]   ;;  %v2329_v53 = vcombine.high %v3407_v49, %v3412_v50 }
  0x33   :  { %1782 = vmatpush1.bf16.msra.mxu1 %v2747_v56  ;;  %v2815_v56 = vld [vmem:[%s4038_s1 + $0x180] ss:$8 sps:$4 sm:$0xff]  }
  0x34   :  { %1994 = vmatpush1.bf16.msra.mxu0 %v2748_v57  ;;  %1783 = vmatprep.subr.bf16.mxu1 %v2749_v58  ;;  %v2818_v57 = vld [vmem:[%s4038_s1 + $0x580] ss:$8 sps:$4 sm:$0xff]   ;;  %v2823_v58 = vld [vmem:[%s4038_s1 + $0x194] ss:$8 sps:$4 sm:$0xff]  }
  0x35   :  { %1995 = vmatprep.subr.bf16.mxu0 %v2751_v59  ;;  %v2826_v59 = vld [vmem:[%s4038_s1 + $0x594] ss:$8 sps:$4 sm:$0xff]  }
  0x37   :  { %1784 = vmatpush1.bf16.msra.mxu1 %v2753_v60  ;;  %v2821_v60 = vld [vmem:[%s4038_s1 + $0x190] ss:$8 sps:$4 sm:$0xff]  }
  0x38   :  { %1996 = vmatpush1.bf16.msra.mxu0 %v2754_v61  ;;  %1785 = vmatprep.subr.bf16.mxu1 %v2755_v62  ;;  %v2824_v61 = vld [vmem:[%s4038_s1 + $0x590] ss:$8 sps:$4 sm:$0xff]   ;;  %v2829_v62 = vld [vmem:[%s4038_s1 + $0x1a4] ss:$8 sps:$4 sm:$0xff]  }
  0x39   :  { %1997 = vmatprep.subr.bf16.mxu0 %v2757_v63  ;;  %v2832_v63 = vld [vmem:[%s4038_s1 + $0x5a4] ss:$8 sps:$4 sm:$0xff]  }
  0x3b   :  { %1786 = vmatpush1.bf16.msra.mxu1 %v2759_v0  ;;  %v2827_v0 = vld [vmem:[%s4038_s1 + $0x1a0] ss:$8 sps:$4 sm:$0xff]  }
  0x3c   :  { %1998 = vmatpush1.bf16.msra.mxu0 %v2760_v1  ;;  %1787 = vmatprep.subr.bf16.mxu1 %v2761_v2  ;;  %v2830_v1 = vld [vmem:[%s4038_s1 + $0x5a0] ss:$8 sps:$4 sm:$0xff]   ;;  %v2835_v2 = vld [vmem:[%s4038_s1 + $0x1b4] ss:$8 sps:$4 sm:$0xff]  }
  0x3d   :  { %1999 = vmatprep.subr.bf16.mxu0 %v2763_v3  ;;  %v2838_v3 = vld [vmem:[%s4038_s1 + $0x5b4] ss:$8 sps:$4 sm:$0xff]  }
  0x3f   :  { %1788 = vmatpush1.bf16.msra.mxu1 %v2765_v4  ;;  %v2833_v4 = vld [vmem:[%s4038_s1 + $0x1b0] ss:$8 sps:$4 sm:$0xff]  }
  0x40   :  { %2000 = vmatpush1.bf16.msra.mxu0 %v2766_v5  ;;  %1810 = vmatprep.subr.bf16.mxu1 %v2769_v6  ;;  %v2836_v5 = vld [vmem:[%s4038_s1 + $0x5b0] ss:$8 sps:$4 sm:$0xff]   ;;  %v2841_v6 = vld [vmem:[%s4038_s1 + $0x1c4] ss:$8 sps:$4 sm:$0xff]  }
  0x41   :  { %2022 = vmatprep.subr.bf16.mxu0 %v2772_v7  ;;  %v2844_v7 = vld [vmem:[%s4038_s1 + $0x5c4] ss:$8 sps:$4 sm:$0xff]  }
  0x42   :  { %1790 = vmatmul.mubr.bf16.vlgmr.msra.gmra.mrb[0].mxu1 %v2318_v8  ;;  %v2839_v8 = vld [vmem:[%s4038_s1 + $0x1c0] ss:$8 sps:$4 sm:$0xff]  }
  0x43   :  { %2002 = vmatmul.mubr.bf16.vlgmr.msra.gmra.mrb[0].mxu0 %v2326_v10  ;;  %1811 = vmatpush1.bf16.msra.mxu1 %v2767_v9  ;;  %v2842_v9 = vld [vmem:[%s4038_s1 + $0x5c0] ss:$8 sps:$4 sm:$0xff]   ;;  %v2847_v10 = vld [vmem:[%s4038_s1 + $0x1d4] ss:$8 sps:$4 sm:$0xff]  }
  0x44   :  { %2023 = vmatpush1.bf16.msra.mxu0 %v2770_v11  ;;  %1812 = vmatprep.subr.bf16.mxu1 %v2775_v12  ;;  %v2850_v11 = vld [vmem:[%s4038_s1 + $0x5d4] ss:$8 sps:$4 sm:$0xff]   ;;  %v2845_v12 = vld [vmem:[%s4038_s1 + $0x1d0] ss:$8 sps:$4 sm:$0xff]  }
  0x45   :  { %2024 = vmatprep.subr.bf16.mxu0 %v2778_v13  ;;  %1799 = vmatprep.mubr.bf16.mxu1 %v2335_v33  ;;  %v2848_v13 = vld [vmem:[%s4038_s1 + $0x5d0] ss:$8 sps:$4 sm:$0xff]   ;;  %v46_v33 = vld [vmem:[%s4039_s0 + $0xe8] sm:$0xff] }
  0x46   :  { %2011 = vmatprep.mubr.bf16.mxu0 %v2343_v39  ;;  %v2880_v39 = vld [vmem:[%s4038_s1 + $0x624] ss:$8 sps:$4 sm:$0xff]  }
  0x47   :  { %1813 = vmatpush1.bf16.msra.mxu1 %v2773_v14  ;;  %v2853_v14 = vld [vmem:[%s4038_s1 + $0x1e4] ss:$8 sps:$4 sm:$0xff]  }
  0x48   :  { %2025 = vmatpush1.bf16.msra.mxu0 %v2776_v15  ;;  %1814 = vmatprep.subr.bf16.mxu1 %v2781_v16  ;;  %v2856_v15 = vld [vmem:[%s4038_s1 + $0x5e4] ss:$8 sps:$4 sm:$0xff]   ;;  %v2851_v16 = vld [vmem:[%s4038_s1 + $0x1e0] ss:$8 sps:$4 sm:$0xff]  }
  0x49   :  { %2026 = vmatprep.subr.bf16.mxu0 %v2784_v17  ;;  %v2854_v17 = vld [vmem:[%s4038_s1 + $0x5e0] ss:$8 sps:$4 sm:$0xff]  }
  0x4a   :  { %1800 = vmatmul.mubr.bf16.gmra.mrb[4].mxu1 %v2334_v37  ;;  %v2872_v37 = vld [vmem:[%s4038_s1 + $0x610] ss:$8 sps:$4 sm:$0xff]  }
  0x4b   :  { %1815 = vmatpush1.bf16.msra.mxu1 %v2779_v18  ;;  %2012 = vmatmul.mubr.bf16.gmra.mrb[4].mxu0 %v2342_v40  ;;  %v2859_v18 = vld [vmem:[%s4038_s1 + $0x1f4] ss:$8 sps:$4 sm:$0xff]   ;;  %v2875_v40 = vld [vmem:[%s4038_s1 + $0x220] ss:$8 sps:$4 sm:$0xff]  }
  0x4c   :  { %2027 = vmatpush1.bf16.msra.mxu0 %v2782_v19  ;;  %1816 = vmatprep.subr.bf16.mxu1 %v2787_v20  ;;  %v2862_v19 = vld [vmem:[%s4038_s1 + $0x5f4] ss:$8 sps:$4 sm:$0xff]   ;;  %v2857_v20 = vld [vmem:[%s4038_s1 + $0x1f0] ss:$8 sps:$4 sm:$0xff]  }
  0x4d   :  { %2028 = vmatprep.subr.bf16.mxu0 %v2790_v21  ;;  %1842 = vmatprep.mubr.bf16.mxu1 %v2321_v48  ;;  %v2860_v21 = vld [vmem:[%s4038_s1 + $0x5f0] ss:$8 sps:$4 sm:$0xff]   ;;  %v2883_v48 = vld [vmem:[%s4038_s1 + $0x234] ss:$8 sps:$4 sm:$0xff]  }
  0x4e   :  { %2054 = vmatprep.mubr.bf16.mxu0 %v2329_v53  ;;  %v2884_v53 = vld [vmem:[%s4038_s1 + $0x630] ss:$8 sps:$4 sm:$0xff]  }
  0x4f   :  { %1817 = vmatpush1.bf16.msra.mxu1 %v2785_v22  ;;  %v2865_v22 = vld [vmem:[%s4038_s1 + $0x204] ss:$8 sps:$4 sm:$0xff]  }
  0x50   :  { %2029 = vmatpush1.bf16.msra.mxu0 %v2788_v23  ;;  %1818 = vmatprep.subr.bf16.mxu1 %v2793_v24  ;;  %v2868_v23 = vld [vmem:[%s4038_s1 + $0x604] ss:$8 sps:$4 sm:$0xff]   ;;  %v2863_v24 = vld [vmem:[%s4038_s1 + $0x200] ss:$8 sps:$4 sm:$0xff]  }
  0x51   :  { %2030 = vmatprep.subr.bf16.mxu0 %v2796_v25  ;;  %v2866_v25 = vld [vmem:[%s4038_s1 + $0x600] ss:$8 sps:$4 sm:$0xff]  }
  0x53   :  { %1819 = vmatpush1.bf16.msra.mxu1 %v2791_v26  ;;  %v34_v26 = vld [vmem:[%s4039_s0 + $0x88] sm:$0xff] }
  0x54   :  { %2031 = vmatpush1.bf16.msra.mxu0 %v2794_v27  ;;  %1820 = vmatprep.subr.bf16.mxu1 %v2799_v28  ;;  %v2320_v27 = vcombine.low %v3389_v44, %v3394_v45  ;;  %v2328_v28 = vcombine.low %v3407_v49, %v3412_v50  ;;  %v3578_v45 = vld [vmem:[%s4039_s0 + $0x50] sm:$0xff] }
  0x55   :  { %2032 = vmatprep.subr.bf16.mxu0 %v2802_v29  ;;  %v42_v29 = vld [vmem:[%s4039_s0 + $0xc8] sm:$0xff]  ;;  %v2886_v49 = vld [vmem:[%s4038_s1 + $0x634] ss:$8 sps:$4 sm:$0xff]  }
  0x57   :  { %1821 = vmatpush1.bf16.msra.mxu1 %v2797_v32  ;;  %v38_v32 = vld [vmem:[%s4039_s0 + $0xa8] sm:$0xff] }
  0x58   :  { %2033 = vmatpush1.bf16.msra.mxu0 %v2800_v34  ;;  %1822 = vmatprep.subr.bf16.mxu1 %v2805_v38  ;;  %v2337_v34 = vcombine.high %v34_v26, %v42_v29  ;;  %v2345_v35 = vcombine.high %v38_v32, %v46_v33  ;;  %v2877_v38 = vld [vmem:[%s4038_s1 + $0x224] ss:$8 sps:$4 sm:$0xff]   ;;  %v2344_v44 = vcombine.low %v38_v32, %v46_v33  ;;  %v2947_v32 = vld [vmem:[%s4038_s1 + $0x2e0] ss:$8 sps:$4 sm:$0xff]  }
  0x59   :  { %2034 = vmatprep.subr.bf16.mxu0 %v2808_v41  ;;  %v2878_v41 = vld [vmem:[%s4038_s1 + $0x620] ss:$8 sps:$4 sm:$0xff]  }
  0x5a   :  { %v2950_v33 = vld [vmem:[%s4038_s1 + $0x6e0] ss:$8 sps:$4 sm:$0xff]  }
  0x5b   :  { %1823 = vmatpush1.bf16.msra.mxu1 %v2803_v42  ;;  %v3573_v42 = vld [vmem:[%s4039_s0 + $0x10] sm:$0xff] }
  0x5c   :  { %2035 = vmatpush1.bf16.msra.mxu0 %v2806_v43  ;;  %1824 = vmatprep.subr.bf16.mxu1 %v2811_v46  ;;  %v2336_v43 = vcombine.low %v34_v26, %v42_v29  ;;  %v3583_v46 = vld [vmem:[%s4039_s0 + $0x30] sm:$0xff]  ;;  %v2323_v50 = vcombine.high %v3573_v42, %v3578_v45 }
  0x5d   :  { %2036 = vmatprep.subr.bf16.mxu0 %v2814_v47  ;;  %v3588_v47 = vld [vmem:[%s4039_s0 + $0x70] sm:$0xff] }
  0x5e   :  { %v2943_v26 = vld [vmem:[%s4038_s1 + $0x2d4] ss:$8 sps:$4 sm:$0xff]   ;;  %v2944_v29 = vld [vmem:[%s4038_s1 + $0x6d0] ss:$8 sps:$4 sm:$0xff]  }
  0x5f   :  { %1825 = vmatpush1.bf16.msra.mxu1 %v2809_v51  ;;  %v2331_v51 = vcombine.high %v3583_v46, %v3588_v47 }
  0x60   :  { %2037 = vmatpush1.bf16.msra.mxu0 %v2812_v52  ;;  %1826 = vmatprep.subr.bf16.mxu1 %v2817_v54  ;;  %v2881_v52 = vld [vmem:[%s4038_s1 + $0x230] ss:$8 sps:$4 sm:$0xff]   ;;  %v2889_v54 = vld [vmem:[%s4038_s1 + $0x244] ss:$8 sps:$4 sm:$0xff]  }
  0x61   :  { %2038 = vmatprep.subr.bf16.mxu0 %v2820_v55  ;;  %v2892_v55 = vld [vmem:[%s4038_s1 + $0x644] ss:$8 sps:$4 sm:$0xff]  }
  0x63   :  { %1827 = vmatpush1.bf16.msra.mxu1 %v2815_v56  ;;  %v2887_v56 = vld [vmem:[%s4038_s1 + $0x240] ss:$8 sps:$4 sm:$0xff]  }
  0x64   :  { %2039 = vmatpush1.bf16.msra.mxu0 %v2818_v57  ;;  %1828 = vmatprep.subr.bf16.mxu1 %v2823_v58  ;;  %v2890_v57 = vld [vmem:[%s4038_s1 + $0x640] ss:$8 sps:$4 sm:$0xff]   ;;  %v2895_v58 = vld [vmem:[%s4038_s1 + $0x254] ss:$8 sps:$4 sm:$0xff]  }
  0x65   :  { %2040 = vmatprep.subr.bf16.mxu0 %v2826_v59  ;;  %v2898_v59 = vld [vmem:[%s4038_s1 + $0x654] ss:$8 sps:$4 sm:$0xff]  }
  0x67   :  { %1829 = vmatpush1.bf16.msra.mxu1 %v2821_v60  ;;  %v2893_v60 = vld [vmem:[%s4038_s1 + $0x250] ss:$8 sps:$4 sm:$0xff]  }
  0x68   :  { %2041 = vmatpush1.bf16.msra.mxu0 %v2824_v61  ;;  %1830 = vmatprep.subr.bf16.mxu1 %v2829_v62  ;;  %v2896_v61 = vld [vmem:[%s4038_s1 + $0x650] ss:$8 sps:$4 sm:$0xff]   ;;  %v2901_v62 = vld [vmem:[%s4038_s1 + $0x264] ss:$8 sps:$4 sm:$0xff]  }
  0x69   :  { %2042 = vmatprep.subr.bf16.mxu0 %v2832_v63  ;;  %v2904_v63 = vld [vmem:[%s4038_s1 + $0x664] ss:$8 sps:$4 sm:$0xff]  }
  0x6b   :  { %1831 = vmatpush1.bf16.msra.mxu1 %v2827_v0  ;;  %v2899_v0 = vld [vmem:[%s4038_s1 + $0x260] ss:$8 sps:$4 sm:$0xff]  }
  0x6c   :  { %2043 = vmatpush1.bf16.msra.mxu0 %v2830_v1  ;;  %1832 = vmatprep.subr.bf16.mxu1 %v2835_v2  ;;  %v2902_v1 = vld [vmem:[%s4038_s1 + $0x660] ss:$8 sps:$4 sm:$0xff]   ;;  %v2907_v2 = vld [vmem:[%s4038_s1 + $0x274] ss:$8 sps:$4 sm:$0xff]  }
  0x6d   :  { %2044 = vmatprep.subr.bf16.mxu0 %v2838_v3  ;;  %v2910_v3 = vld [vmem:[%s4038_s1 + $0x674] ss:$8 sps:$4 sm:$0xff]  }
  0x6f   :  { %1833 = vmatpush1.bf16.msra.mxu1 %v2833_v4  ;;  %v2905_v4 = vld [vmem:[%s4038_s1 + $0x270] ss:$8 sps:$4 sm:$0xff]  }
  0x70   :  { %2045 = vmatpush1.bf16.msra.mxu0 %v2836_v5  ;;  %1834 = vmatprep.subr.bf16.mxu1 %v2841_v6  ;;  %v2908_v5 = vld [vmem:[%s4038_s1 + $0x670] ss:$8 sps:$4 sm:$0xff]   ;;  %v2913_v6 = vld [vmem:[%s4038_s1 + $0x284] ss:$8 sps:$4 sm:$0xff]  }
  0x71   :  { %2046 = vmatprep.subr.bf16.mxu0 %v2844_v7  ;;  %v2916_v7 = vld [vmem:[%s4038_s1 + $0x684] ss:$8 sps:$4 sm:$0xff]  }
  0x73   :  { %1835 = vmatpush1.bf16.msra.mxu1 %v2839_v8  ;;  %v2911_v8 = vld [vmem:[%s4038_s1 + $0x280] ss:$8 sps:$4 sm:$0xff]  }
  0x74   :  { %2047 = vmatpush1.bf16.msra.mxu0 %v2842_v9  ;;  %1836 = vmatprep.subr.bf16.mxu1 %v2847_v10  ;;  %v2914_v9 = vld [vmem:[%s4038_s1 + $0x680] ss:$8 sps:$4 sm:$0xff]   ;;  %v2919_v10 = vld [vmem:[%s4038_s1 + $0x294] ss:$8 sps:$4 sm:$0xff]  }
  0x75   :  { %2048 = vmatprep.subr.bf16.mxu0 %v2850_v11  ;;  %v2922_v11 = vld [vmem:[%s4038_s1 + $0x694] ss:$8 sps:$4 sm:$0xff]  }
  0x77   :  { %1837 = vmatpush1.bf16.msra.mxu1 %v2845_v12  ;;  %v2917_v12 = vld [vmem:[%s4038_s1 + $0x290] ss:$8 sps:$4 sm:$0xff]  }
  0x78   :  { %2049 = vmatpush1.bf16.msra.mxu0 %v2848_v13  ;;  %1838 = vmatprep.subr.bf16.mxu1 %v2853_v14  ;;  %v2920_v13 = vld [vmem:[%s4038_s1 + $0x690] ss:$8 sps:$4 sm:$0xff]   ;;  %v2925_v14 = vld [vmem:[%s4038_s1 + $0x2a4] ss:$8 sps:$4 sm:$0xff]  }
  0x79   :  { %2050 = vmatprep.subr.bf16.mxu0 %v2856_v15  ;;  %v2928_v15 = vld [vmem:[%s4038_s1 + $0x6a4] ss:$8 sps:$4 sm:$0xff]  }
  0x7b   :  { %1839 = vmatpush1.bf16.msra.mxu1 %v2851_v16  ;;  %v2923_v16 = vld [vmem:[%s4038_s1 + $0x2a0] ss:$8 sps:$4 sm:$0xff]  }
  0x7c   :  { %2051 = vmatpush1.bf16.msra.mxu0 %v2854_v17  ;;  %1840 = vmatprep.subr.bf16.mxu1 %v2859_v18  ;;  %v2926_v17 = vld [vmem:[%s4038_s1 + $0x6a0] ss:$8 sps:$4 sm:$0xff]   ;;  %v2931_v18 = vld [vmem:[%s4038_s1 + $0x2b4] ss:$8 sps:$4 sm:$0xff]  }
  0x7d   :  { %2052 = vmatprep.subr.bf16.mxu0 %v2862_v19  ;;  %v2934_v19 = vld [vmem:[%s4038_s1 + $0x6b4] ss:$8 sps:$4 sm:$0xff]  }
  0x7f   :  { %1841 = vmatpush1.bf16.msra.mxu1 %v2857_v20  ;;  %v2929_v20 = vld [vmem:[%s4038_s1 + $0x2b0] ss:$8 sps:$4 sm:$0xff]  }
  0x80   :  { %2053 = vmatpush1.bf16.msra.mxu0 %v2860_v21  ;;  %1863 = vmatprep.subr.bf16.mxu1 %v2865_v22  ;;  %v2932_v21 = vld [vmem:[%s4038_s1 + $0x6b0] ss:$8 sps:$4 sm:$0xff]   ;;  %v2937_v22 = vld [vmem:[%s4038_s1 + $0x2c4] ss:$8 sps:$4 sm:$0xff]  }
  0x81   :  { %2075 = vmatprep.subr.bf16.mxu0 %v2868_v23  ;;  %v2940_v23 = vld [vmem:[%s4038_s1 + $0x6c4] ss:$8 sps:$4 sm:$0xff]  }
  0x82   :  { %1843 = vmatmul.mubr.bf16.vlgmr.msra.gmra.mrb[0].mxu1 %v2320_v27  ;;  %v2946_v27 = vld [vmem:[%s4038_s1 + $0x6d4] ss:$8 sps:$4 sm:$0xff]  }
  0x83   :  { %2055 = vmatmul.mubr.bf16.vlgmr.msra.gmra.mrb[0].mxu0 %v2328_v28  ;;  %1864 = vmatpush1.bf16.msra.mxu1 %v2863_v24  ;;  %v2935_v24 = vld [vmem:[%s4038_s1 + $0x2c0] ss:$8 sps:$4 sm:$0xff]   ;;  %v2941_v28 = vld [vmem:[%s4038_s1 + $0x2d0] ss:$8 sps:$4 sm:$0xff]  }
  0x84   :  { %2076 = vmatpush1.bf16.msra.mxu0 %v2866_v25  ;;  %1865 = vmatprep.subr.bf16.mxu1 %v2871_v30  ;;  %v2938_v25 = vld [vmem:[%s4038_s1 + $0x6c0] ss:$8 sps:$4 sm:$0xff]   ;;  %v2949_v30 = vld [vmem:[%s4038_s1 + $0x2e4] ss:$8 sps:$4 sm:$0xff]  }
  0x85   :  { %2077 = vmatprep.subr.bf16.mxu0 %v2874_v31  ;;  %1852 = vmatprep.mubr.bf16.mxu1 %v2337_v34  ;;  %v2952_v31 = vld [vmem:[%s4038_s1 + $0x6e4] ss:$8 sps:$4 sm:$0xff]   ;;  %v2955_v34 = vld [vmem:[%s4038_s1 + $0x2f4] ss:$8 sps:$4 sm:$0xff]  }
  0x86   :  { %2064 = vmatprep.mubr.bf16.mxu0 %v2345_v35  ;;  %v2958_v35 = vld [vmem:[%s4038_s1 + $0x6f4] ss:$8 sps:$4 sm:$0xff]  }
  0x87   :  { %1866 = vmatpush1.bf16.msra.mxu1 %v2869_v36  ;;  %v2953_v36 = vld [vmem:[%s4038_s1 + $0x2f0] ss:$8 sps:$4 sm:$0xff]  }
  0x88   :  { %2078 = vmatpush1.bf16.msra.mxu0 %v2872_v37  ;;  %1867 = vmatprep.subr.bf16.mxu1 %v2877_v38  ;;  %v2956_v37 = vld [vmem:[%s4038_s1 + $0x6f0] ss:$8 sps:$4 sm:$0xff]   ;;  %v2961_v38 = vld [vmem:[%s4038_s1 + $0x304] ss:$8 sps:$4 sm:$0xff]  }
  0x89   :  { %2079 = vmatprep.subr.bf16.mxu0 %v2880_v39  ;;  %v2964_v39 = vld [vmem:[%s4038_s1 + $0x704] ss:$8 sps:$4 sm:$0xff]  }
  0x8a   :  { %1853 = vmatmul.mubr.bf16.gmra.mrb[4].mxu1 %v2336_v43  ;;  %v2330_v43 = vcombine.low %v3583_v46, %v3588_v47  ;;  %v2967_v46 = vld [vmem:[%s4038_s1 + $0x314] ss:$8 sps:$4 sm:$0xff]  }
  0x8b   :  { %2065 = vmatmul.mubr.bf16.gmra.mrb[4].mxu0 %v2344_v44  ;;  %1868 = vmatpush1.bf16.msra.mxu1 %v2875_v40  ;;  %v35_v40 = vld [vmem:[%s4039_s0 + $0x90] sm:$0xff] }
  0x8c   :  { %2080 = vmatpush1.bf16.msra.mxu0 %v2878_v41  ;;  %1869 = vmatprep.subr.bf16.mxu1 %v2883_v48  ;;  %v2322_v41 = vcombine.low %v3573_v42, %v3578_v45  ;;  %v43_v44 = vld [vmem:[%s4039_s0 + $0xd0] sm:$0xff]  ;;  %v2959_v42 = vld [vmem:[%s4038_s1 + $0x300] ss:$8 sps:$4 sm:$0xff]  }
  0x8d   :  { %2081 = vmatprep.subr.bf16.mxu0 %v2886_v49  ;;  %1895 = vmatprep.mubr.bf16.mxu1 %v2323_v50  ;;  %v39_v48 = vld [vmem:[%s4039_s0 + $0xb0] sm:$0xff]  ;;  %v2962_v45 = vld [vmem:[%s4038_s1 + $0x700] ss:$8 sps:$4 sm:$0xff]   ;;  %v2339_v50 = vcombine.high %v35_v40, %v43_v44 }
  0x8e   :  { %2107 = vmatprep.mubr.bf16.mxu0 %v2331_v51  ;;  %v47_v49 = vld [vmem:[%s4039_s0 + $0xf0] sm:$0xff] }
  0x8f   :  { %1870 = vmatpush1.bf16.msra.mxu1 %v2881_v52  ;;  %v2970_v47 = vld [vmem:[%s4038_s1 + $0x714] ss:$8 sps:$4 sm:$0xff]   ;;  %v2347_v51 = vcombine.high %v39_v48, %v47_v49  ;;  %v2965_v52 = vld [vmem:[%s4038_s1 + $0x310] ss:$8 sps:$4 sm:$0xff]  }
  0x90   :  { %2082 = vmatpush1.bf16.msra.mxu0 %v2884_v53  ;;  %1871 = vmatprep.subr.bf16.mxu1 %v2889_v54  ;;  %v2968_v53 = vld [vmem:[%s4038_s1 + $0x710] ss:$8 sps:$4 sm:$0xff]   ;;  %v2973_v54 = vld [vmem:[%s4038_s1 + $0x324] ss:$8 sps:$4 sm:$0xff]  }
  0x91   :  { %2083 = vmatprep.subr.bf16.mxu0 %v2892_v55  ;;  %v2976_v55 = vld [vmem:[%s4038_s1 + $0x724] ss:$8 sps:$4 sm:$0xff]  }
  0x93   :  { %1872 = vmatpush1.bf16.msra.mxu1 %v2887_v56  ;;  %v3799_v56 = vld [vmem:[%s4039_s0 + $0x18] sm:$0xff] }
  0x94   :  { %2084 = vmatpush1.bf16.msra.mxu0 %v2890_v57  ;;  %1873 = vmatprep.subr.bf16.mxu1 %v2895_v58  ;;  %v2338_v57 = vcombine.low %v35_v40, %v43_v44  ;;  %v2346_v58 = vcombine.low %v39_v48, %v47_v49  ;;  %v3031_v40 = vld [vmem:[%s4038_s1 + $0x3c0] ss:$8 sps:$4 sm:$0xff]   ;;  %v3042_v44 = vld [vmem:[%s4038_s1 + $0x7d4] ss:$8 sps:$4 sm:$0xff]   ;;  %v3037_v48 = vld [vmem:[%s4038_s1 + $0x3d0] ss:$8 sps:$4 sm:$0xff]  }
  0x95   :  { %2085 = vmatprep.subr.bf16.mxu0 %v2898_v59  ;;  %v3804_v59 = vld [vmem:[%s4039_s0 + $0x58] sm:$0xff] }
  0x96   :  { %v3040_v49 = vld [vmem:[%s4038_s1 + $0x7d0] ss:$8 sps:$4 sm:$0xff]  }
  0x97   :  { %1874 = vmatpush1.bf16.msra.mxu1 %v2893_v60  ;;  %v3809_v60 = vld [vmem:[%s4039_s0 + $0x38] sm:$0xff] }
  0x98   :  { %2086 = vmatpush1.bf16.msra.mxu0 %v2896_v61  ;;  %1875 = vmatprep.subr.bf16.mxu1 %v2901_v62  ;;  %v3814_v61 = vld [vmem:[%s4039_s0 + $0x78] sm:$0xff]  ;;  %v2971_v62 = vld [vmem:[%s4038_s1 + $0x320] ss:$8 sps:$4 sm:$0xff]  }
  0x99   :  { %2087 = vmatprep.subr.bf16.mxu0 %v2904_v63  ;;  %v2974_v63 = vld [vmem:[%s4038_s1 + $0x720] ss:$8 sps:$4 sm:$0xff]  }
  0x9b   :  { %1876 = vmatpush1.bf16.msra.mxu1 %v2899_v0  ;;  %v2979_v0 = vld [vmem:[%s4038_s1 + $0x334] ss:$8 sps:$4 sm:$0xff]  }
  0x9c   :  { %2088 = vmatpush1.bf16.msra.mxu0 %v2902_v1  ;;  %1877 = vmatprep.subr.bf16.mxu1 %v2907_v2  ;;  %v2982_v1 = vld [vmem:[%s4038_s1 + $0x734] ss:$8 sps:$4 sm:$0xff]   ;;  %v2325_v2 = vcombine.high %v3799_v56, %v3804_v59 }
  0x9d   :  { %2089 = vmatprep.subr.bf16.mxu0 %v2910_v3  ;;  %v2333_v3 = vcombine.high %v3809_v60, %v3814_v61 }
  0x9f   :  { %1878 = vmatpush1.bf16.msra.mxu1 %v2905_v4  ;;  %v2977_v4 = vld [vmem:[%s4038_s1 + $0x330] ss:$8 sps:$4 sm:$0xff]  }
  0xa0   :  { %2090 = vmatpush1.bf16.msra.mxu0 %v2908_v5  ;;  %1879 = vmatprep.subr.bf16.mxu1 %v2913_v6  ;;  %v2980_v5 = vld [vmem:[%s4038_s1 + $0x730] ss:$8 sps:$4 sm:$0xff]   ;;  %v2985_v6 = vld [vmem:[%s4038_s1 + $0x344] ss:$8 sps:$4 sm:$0xff]  }
  0xa1   :  { %2091 = vmatprep.subr.bf16.mxu0 %v2916_v7  ;;  %v2988_v7 = vld [vmem:[%s4038_s1 + $0x744] ss:$8 sps:$4 sm:$0xff]  }
  0xa3   :  { %1880 = vmatpush1.bf16.msra.mxu1 %v2911_v8  ;;  %v2983_v8 = vld [vmem:[%s4038_s1 + $0x340] ss:$8 sps:$4 sm:$0xff]  }
  0xa4   :  { %2092 = vmatpush1.bf16.msra.mxu0 %v2914_v9  ;;  %1881 = vmatprep.subr.bf16.mxu1 %v2919_v10  ;;  %v2986_v9 = vld [vmem:[%s4038_s1 + $0x740] ss:$8 sps:$4 sm:$0xff]   ;;  %v2991_v10 = vld [vmem:[%s4038_s1 + $0x354] ss:$8 sps:$4 sm:$0xff]  }
  0xa5   :  { %2093 = vmatprep.subr.bf16.mxu0 %v2922_v11  ;;  %v2994_v11 = vld [vmem:[%s4038_s1 + $0x754] ss:$8 sps:$4 sm:$0xff]  }
  0xa7   :  { %1882 = vmatpush1.bf16.msra.mxu1 %v2917_v12  ;;  %v2989_v12 = vld [vmem:[%s4038_s1 + $0x350] ss:$8 sps:$4 sm:$0xff]  }
  0xa8   :  { %2094 = vmatpush1.bf16.msra.mxu0 %v2920_v13  ;;  %1883 = vmatprep.subr.bf16.mxu1 %v2925_v14  ;;  %v2992_v13 = vld [vmem:[%s4038_s1 + $0x750] ss:$8 sps:$4 sm:$0xff]   ;;  %v2997_v14 = vld [vmem:[%s4038_s1 + $0x364] ss:$8 sps:$4 sm:$0xff]  }
  0xa9   :  { %2095 = vmatprep.subr.bf16.mxu0 %v2928_v15  ;;  %v3000_v15 = vld [vmem:[%s4038_s1 + $0x764] ss:$8 sps:$4 sm:$0xff]  }
  0xab   :  { %1884 = vmatpush1.bf16.msra.mxu1 %v2923_v16  ;;  %v2995_v16 = vld [vmem:[%s4038_s1 + $0x360] ss:$8 sps:$4 sm:$0xff]  }
  0xac   :  { %2096 = vmatpush1.bf16.msra.mxu0 %v2926_v17  ;;  %1885 = vmatprep.subr.bf16.mxu1 %v2931_v18  ;;  %v2998_v17 = vld [vmem:[%s4038_s1 + $0x760] ss:$8 sps:$4 sm:$0xff]   ;;  %v3003_v18 = vld [vmem:[%s4038_s1 + $0x374] ss:$8 sps:$4 sm:$0xff]  }
  0xad   :  { %2097 = vmatprep.subr.bf16.mxu0 %v2934_v19  ;;  %v3006_v19 = vld [vmem:[%s4038_s1 + $0x774] ss:$8 sps:$4 sm:$0xff]  }
  0xaf   :  { %1886 = vmatpush1.bf16.msra.mxu1 %v2929_v20  ;;  %v3001_v20 = vld [vmem:[%s4038_s1 + $0x370] ss:$8 sps:$4 sm:$0xff]  }
  0xb0   :  { %2098 = vmatpush1.bf16.msra.mxu0 %v2932_v21  ;;  %1887 = vmatprep.subr.bf16.mxu1 %v2937_v22  ;;  %v3004_v21 = vld [vmem:[%s4038_s1 + $0x770] ss:$8 sps:$4 sm:$0xff]   ;;  %v3009_v22 = vld [vmem:[%s4038_s1 + $0x384] ss:$8 sps:$4 sm:$0xff]  }
  0xb1   :  { %2099 = vmatprep.subr.bf16.mxu0 %v2940_v23  ;;  %v3012_v23 = vld [vmem:[%s4038_s1 + $0x784] ss:$8 sps:$4 sm:$0xff]  }
  0xb3   :  { %1888 = vmatpush1.bf16.msra.mxu1 %v2935_v24  ;;  %v3007_v24 = vld [vmem:[%s4038_s1 + $0x380] ss:$8 sps:$4 sm:$0xff]  }
  0xb4   :  { %2100 = vmatpush1.bf16.msra.mxu0 %v2938_v25  ;;  %1889 = vmatprep.subr.bf16.mxu1 %v2943_v26  ;;  %v3010_v25 = vld [vmem:[%s4038_s1 + $0x780] ss:$8 sps:$4 sm:$0xff]   ;;  %v3015_v26 = vld [vmem:[%s4038_s1 + $0x394] ss:$8 sps:$4 sm:$0xff]  }
  0xb5   :  { %2101 = vmatprep.subr.bf16.mxu0 %v2946_v27  ;;  %v3018_v27 = vld [vmem:[%s4038_s1 + $0x794] ss:$8 sps:$4 sm:$0xff]  }
  0xb7   :  { %1890 = vmatpush1.bf16.msra.mxu1 %v2941_v28  ;;  %v3013_v28 = vld [vmem:[%s4038_s1 + $0x390] ss:$8 sps:$4 sm:$0xff]  }
  0xb8   :  { %2102 = vmatpush1.bf16.msra.mxu0 %v2944_v29  ;;  %1891 = vmatprep.subr.bf16.mxu1 %v2949_v30  ;;  %v3016_v29 = vld [vmem:[%s4038_s1 + $0x790] ss:$8 sps:$4 sm:$0xff]   ;;  %v3021_v30 = vld [vmem:[%s4038_s1 + $0x3a4] ss:$8 sps:$4 sm:$0xff]  }
  0xb9   :  { %2103 = vmatprep.subr.bf16.mxu0 %v2952_v31  ;;  %v3024_v31 = vld [vmem:[%s4038_s1 + $0x7a4] ss:$8 sps:$4 sm:$0xff]  }
  0xbb   :  { %1892 = vmatpush1.bf16.msra.mxu1 %v2947_v32  ;;  %v3019_v32 = vld [vmem:[%s4038_s1 + $0x3a0] ss:$8 sps:$4 sm:$0xff]  }
  0xbc   :  { %2104 = vmatpush1.bf16.msra.mxu0 %v2950_v33  ;;  %1893 = vmatprep.subr.bf16.mxu1 %v2955_v34  ;;  %v3022_v33 = vld [vmem:[%s4038_s1 + $0x7a0] ss:$8 sps:$4 sm:$0xff]   ;;  %v3027_v34 = vld [vmem:[%s4038_s1 + $0x3b4] ss:$8 sps:$4 sm:$0xff]  }
  0xbd   :  { %2105 = vmatprep.subr.bf16.mxu0 %v2958_v35  ;;  %v3030_v35 = vld [vmem:[%s4038_s1 + $0x7b4] ss:$8 sps:$4 sm:$0xff]  }
  0xbf   :  { %1894 = vmatpush1.bf16.msra.mxu1 %v2953_v36  ;;  %v3025_v36 = vld [vmem:[%s4038_s1 + $0x3b0] ss:$8 sps:$4 sm:$0xff]  }
  0xc0   :  { %2106 = vmatpush1.bf16.msra.mxu0 %v2956_v37  ;;  %1916 = vmatprep.subr.bf16.mxu1 %v2961_v38  ;;  %v3028_v37 = vld [vmem:[%s4038_s1 + $0x7b0] ss:$8 sps:$4 sm:$0xff]   ;;  %v3033_v38 = vld [vmem:[%s4038_s1 + $0x3c4] ss:$8 sps:$4 sm:$0xff]  }
  0xc1   :  { %2128 = vmatprep.subr.bf16.mxu0 %v2964_v39  ;;  %v3036_v39 = vld [vmem:[%s4038_s1 + $0x7c4] ss:$8 sps:$4 sm:$0xff]  }
  0xc2   :  { %1896 = vmatmul.mubr.bf16.vlgmr.msra.gmra.mrb[0].mxu1 %v2322_v41  ;;  %v3034_v41 = vld [vmem:[%s4038_s1 + $0x7c0] ss:$8 sps:$4 sm:$0xff]  }
  0xc3   :  { %2108 = vmatmul.mubr.bf16.vlgmr.msra.gmra.mrb[0].mxu0 %v2330_v43  ;;  %1917 = vmatpush1.bf16.msra.mxu1 %v2959_v42  ;;  %v3039_v43 = vld [vmem:[%s4038_s1 + $0x3d4] ss:$8 sps:$4 sm:$0xff]   ;;  %v3045_v42 = vld [vmem:[%s4038_s1 + $0x3e4] ss:$8 sps:$4 sm:$0xff]  }
  0xc4   :  { %2129 = vmatpush1.bf16.msra.mxu0 %v2962_v45  ;;  %1918 = vmatprep.subr.bf16.mxu1 %v2967_v46  ;;  %v3048_v45 = vld [vmem:[%s4038_s1 + $0x7e4] ss:$8 sps:$4 sm:$0xff]   ;;  %v3043_v46 = vld [vmem:[%s4038_s1 + $0x3e0] ss:$8 sps:$4 sm:$0xff]  }
  0xc5   :  { %2130 = vmatprep.subr.bf16.mxu0 %v2970_v47  ;;  %1905 = vmatprep.mubr.bf16.mxu1 %v2339_v50  ;;  %v3046_v47 = vld [vmem:[%s4038_s1 + $0x7e0] ss:$8 sps:$4 sm:$0xff]   ;;  %v3051_v50 = vld [vmem:[%s4038_s1 + $0x3f4] ss:$8 sps:$4 sm:$0xff]  }
  0xc6   :  { %2117 = vmatprep.mubr.bf16.mxu0 %v2347_v51  ;;  %v3054_v51 = vld [vmem:[%s4038_s1 + $0x7f4] ss:$8 sps:$4 sm:$0xff]  }
  0xc7   :  { %1919 = vmatpush1.bf16.msra.mxu1 %v2965_v52  ;;  %v3049_v52 = vld [vmem:[%s4038_s1 + $0x3f0] ss:$8 sps:$4 sm:$0xff]  }
  0xc8   :  { %2131 = vmatpush1.bf16.msra.mxu0 %v2968_v53  ;;  %1920 = vmatprep.subr.bf16.mxu1 %v2973_v54  ;;  %v3052_v53 = vld [vmem:[%s4038_s1 + $0x7f0] ss:$8 sps:$4 sm:$0xff]  }
  0xc9   :  { %2132 = vmatprep.subr.bf16.mxu0 %v2976_v55  ;;  %v36_v54 = vld [vmem:[%s4039_s0 + $0x98] sm:$0xff] }
  0xca   :  { %1906 = vmatmul.mubr.bf16.gmra.mrb[4].mxu1 %v2338_v57  ;;  %v44_v55 = vld [vmem:[%s4039_s0 + $0xd8] sm:$0xff] }
  0xcb   :  { %2118 = vmatmul.mubr.bf16.gmra.mrb[4].mxu0 %v2346_v58  ;;  %1921 = vmatpush1.bf16.msra.mxu1 %v2971_v62  ;;  %v40_v57 = vld [vmem:[%s4039_s0 + $0xb8] sm:$0xff]  ;;  %v2324_v62 = vcombine.low %v3799_v56, %v3804_v59  ;;  %v305_v59 = vld [vmem:[%s4040_s2] sm:$0x3] }
  0xcc   :  { %2133 = vmatpush1.bf16.msra.mxu0 %v2974_v63  ;;  %1922 = vmatprep.subr.bf16.mxu1 %v2979_v0  ;;  %v48_v58 = vld [vmem:[%s4039_s0 + $0xf8] sm:$0xff]  ;;  %v2332_v63 = vcombine.low %v3809_v60, %v3814_v61  ;;  %v2341_v0 = vcombine.high %v36_v54, %v44_v55 }
  0xcd   :  { %2134 = vmatprep.subr.bf16.mxu0 %v2982_v1  ;;  %1948 = vmatprep.mubr.bf16.mxu1 %v2325_v2  ;;  %v2349_v1 = vcombine.high %v40_v57, %v48_v58  ;;  %v2340_v2 = vcombine.low %v36_v54, %v44_v55 }
  0xce   :  { %2160 = vmatprep.mubr.bf16.mxu0 %v2333_v3  ;;  %v2348_v3 = vcombine.low %v40_v57, %v48_v58 }
  0xcf   :  { %1923 = vmatpush1.bf16.msra.mxu1 %v2977_v4  ;;  %v307_v4 = vlaneseq }
  0xd0   :  { %2135 = vmatpush1.bf16.msra.mxu0 %v2980_v5  ;;  %1924 = vmatprep.subr.bf16.mxu1 %v2985_v6 }
  0xd1   :  { %2136 = vmatprep.subr.bf16.mxu0 %v2988_v7  ;;  %v3999_v5 = vshrl.u32 %v307_v4, 7  ;;  %vm2258_vm0 = vcmp.lt.s32.totalorder %v307_v4, 256 }
  0xd3   :  { %1925 = vmatpush1.bf16.msra.mxu1 %v2983_v8  ;;  %v309_v56 = vsub.s32 0, %v3999_v5  ;;  %v313_v60 = vsub.s32 1, %v3999_v5 }
  0xd4   :  { %2137 = vmatpush1.bf16.msra.mxu0 %v2986_v9  ;;  %1926 = vmatprep.subr.bf16.mxu1 %v2991_v10 }
  0xd5   :  { %2138 = vmatprep.subr.bf16.mxu0 %v2994_v11  ;;  %v310_v61 = vrot.slane %v305_v59, %v309_v56  ;;  %v314_v6 = vrot.slane %v305_v59, %v313_v60 }
  0xd7   :  { %1927 = vmatpush1.bf16.msra.mxu1 %v2989_v12 }
  0xd8   :  { %2139 = vmatpush1.bf16.msra.mxu0 %v2992_v13  ;;  %1928 = vmatprep.subr.bf16.mxu1 %v2997_v14 }
  0xd9   :  { %2140 = vmatprep.subr.bf16.mxu0 %v3000_v15 }
  0xdb   :  { %1929 = vmatpush1.bf16.msra.mxu1 %v2995_v16 }
  0xdc   :  { %2141 = vmatpush1.bf16.msra.mxu0 %v2998_v17  ;;  %1930 = vmatprep.subr.bf16.mxu1 %v3003_v18 }
  0xdd   :  { %2142 = vmatprep.subr.bf16.mxu0 %v3006_v19 }
  0xdf   :  { %1931 = vmatpush1.bf16.msra.mxu1 %v3001_v20 }
  0xe0   :  { %2143 = vmatpush1.bf16.msra.mxu0 %v3004_v21  ;;  %1932 = vmatprep.subr.bf16.mxu1 %v3009_v22 }
  0xe1   :  { %2144 = vmatprep.subr.bf16.mxu0 %v3012_v23 }
  0xe3   :  { %1933 = vmatpush1.bf16.msra.mxu1 %v3007_v24 }
  0xe4   :  { %2145 = vmatpush1.bf16.msra.mxu0 %v3010_v25  ;;  %1934 = vmatprep.subr.bf16.mxu1 %v3015_v26 }
  0xe5   :  { %2146 = vmatprep.subr.bf16.mxu0 %v3018_v27 }
  0xe7   :  { %1935 = vmatpush1.bf16.msra.mxu1 %v3013_v28 }
  0xe8   :  { %2147 = vmatpush1.bf16.msra.mxu0 %v3016_v29  ;;  %1936 = vmatprep.subr.bf16.mxu1 %v3021_v30 }
  0xe9   :  { %2148 = vmatprep.subr.bf16.mxu0 %v3024_v31 }
  0xeb   :  { %1937 = vmatpush1.bf16.msra.mxu1 %v3019_v32 }
  0xec   :  { %2149 = vmatpush1.bf16.msra.mxu0 %v3022_v33  ;;  %1938 = vmatprep.subr.bf16.mxu1 %v3027_v34 }
  0xed   :  { %2150 = vmatprep.subr.bf16.mxu0 %v3030_v35 }
  0xef   :  { %1939 = vmatpush1.bf16.msra.mxu1 %v3025_v36 }
  0xf0   :  { %2151 = vmatpush1.bf16.msra.mxu0 %v3028_v37  ;;  %1940 = vmatprep.subr.bf16.mxu1 %v3033_v38 }
  0xf1   :  { %2152 = vmatprep.subr.bf16.mxu0 %v3036_v39 }
  0xf3   :  { %1941 = vmatpush1.bf16.msra.mxu1 %v3031_v40 }
  0xf4   :  { %2153 = vmatpush1.bf16.msra.mxu0 %v3034_v41  ;;  %1942 = vmatprep.subr.bf16.mxu1 %v3039_v43 }
  0xf5   :  { %2154 = vmatprep.subr.bf16.mxu0 %v3042_v44 }
  0xf7   :  { %1943 = vmatpush1.bf16.msra.mxu1 %v3037_v48 }
  0xf8   :  { %2155 = vmatpush1.bf16.msra.mxu0 %v3040_v49  ;;  %1944 = vmatprep.subr.bf16.mxu1 %v3045_v42 }
  0xf9   :  { %2156 = vmatprep.subr.bf16.mxu0 %v3048_v45 }
  0xfb   :  { %1945 = vmatpush1.bf16.msra.mxu1 %v3043_v46 }
  0xfc   :  { %2157 = vmatpush1.bf16.msra.mxu0 %v3046_v47  ;;  %1946 = vmatprep.subr.bf16.mxu1 %v3051_v50 }
  0xfd   :  { %2158 = vmatprep.subr.bf16.mxu0 %v3054_v51 }
  0xff   :  { %1947 = vmatpush1.bf16.msra.mxu1 %v3049_v52 }
 0x100   :  { %2159 = vmatpush1.bf16.msra.mxu0 %v3052_v53 }
 0x102   :  { %1949 = vmatmul.mubr.bf16.vlgmr.msra.gmra.mrb[0].mxu1 %v2324_v62 }
 0x103   :  { %2161 = vmatmul.mubr.bf16.vlgmr.msra.gmra.mrb[0].mxu0 %v2332_v63  ;;  %1958 = vmatprep.mubr.bf16.mxu1 %v2341_v0 }
 0x104   :  { %2170 = vmatprep.mubr.bf16.mxu0 %v2349_v1 }
 0x10a   :  { %1959 = vmatmul.mubr.bf16.gmra.mrb[4].mxu1 %v2340_v2 }
 0x10b   :  { %2171 = vmatmul.mubr.bf16.gmra.mrb[4].mxu0 %v2348_v3  ;;  %v3055_v3 = vmov 1966171168  }
 0x10c   :  { %v2242_v56 = vunpack.c.l.s4 %v3055_v3 }
 0x1d5   :  { %v1950_v7 = vpop.f32.mrb[0].mxu1 }
 0x1d6   :  { %v2162_v8 = vpop.f32.mrb[0].mxu0  ;;  %v2606_v9 = vadd.f32 %v1950_v7, %v310_v61  ;;  %v1952_v10 = vpop.f32.mrb[1].mxu1 }
 0x1d7   :  { %v2164_v11 = vpop.f32.mrb[1].mxu0  ;;  %v2608_v12 = vadd.f32 %v1952_v10, %v314_v6  ;;  %v1954_v13 = vpop.f32.mrb[2].mxu1 }
 0x1d8   :  { %v2166_v14 = vpop.f32.mrb[2].mxu0  ;;  %v2607_v15 = vadd.f32 %v2606_v9, %v2162_v8  ;;  %v2610_v16 = vadd.f32 %v1954_v13, %v310_v61  ;;  %v1956_v17 = vpop.f32.mrb[3].mxu1 }
 0x1d9   :  { %v2168_v18 = vpop.f32.mrb[3].mxu0  ;;  %v2609_v19 = vadd.f32 %v2608_v12, %v2164_v11  ;;  %v2612_v20 = vadd.f32 %v1956_v17, %v314_v6  ;;  %v2243_v11 = vunpack.c.0.s8 %v2242_v56 }
 0x1da   :  { %2181 = vst [vmem:[%s4041_s3] sm:$0xff] %v2607_v15  ;;  %v2611_v21 = vadd.f32 %v2610_v16, %v2166_v14  ;;  %v2261_v23 = vmul.f32 %v2607_v15, %v2607_v15 }
 0x1db   :  { %2182 = vst [vmem:[%s4041_s3 + $0x8] sm:$0xff] %v2609_v19  ;;  %v2613_v22 = vadd.f32 %v2612_v20, %v2168_v18  ;;  %v2262_v26 = vmul.f32 %v2609_v19, %v2609_v19  ;;  %v2246_v20 = vsub.s32 %v2243_v11, %v3999_v5 }
 0x1dc   :  { %2183 = vst [vmem:[%s4041_s3 + $0x10] sm:$0xff] %v2611_v21  ;;  %v2220_v24 = vadd.f32 %v2611_v21, %v2607_v15  ;;  %v2263_v25 = vmul.f32 %v2611_v21, %v2611_v21 }
 0x1dd   :  { %2184 = vst [vmem:[%s4041_s3 + $0x18] sm:$0xff] %v2613_v22  ;;  %v2229_v27 = vadd.f32 %v2613_v22, %v2609_v19  ;;  %v2264_v28 = vmul.f32 %v2613_v22, %v2613_v22  ;;  %v1960_v29 = vpop.f32.mrb[4].mxu1 }
 0x1de   :  { %v2172_v30 = vpop.f32.mrb[4].mxu0  ;;  %v2269_v31 = vadd.f32 %v2263_v25, %v2261_v23  ;;  %v2614_v32 = vadd.f32 %v1960_v29, %v310_v61  ;;  %v1962_v33 = vpop.f32.mrb[5].mxu1 }
 0x1df   :  { %v2174_v34 = vpop.f32.mrb[5].mxu0  ;;  %v2278_v35 = vadd.f32 %v2264_v28, %v2262_v26  ;;  %v2616_v36 = vadd.f32 %v1962_v33, %v314_v6  ;;  %v1964_v37 = vpop.f32.mrb[6].mxu1 }
 0x1e0   :  { %v2176_v38 = vpop.f32.mrb[6].mxu0  ;;  %v2615_v39 = vadd.f32 %v2614_v32, %v2172_v30  ;;  %v2618_v40 = vadd.f32 %v1964_v37, %v310_v61  ;;  %v1966_v41 = vpop.f32.mrb[7].mxu1 }
 0x1e1   :  { %v2178_v43 = vpop.f32.mrb[7].mxu0  ;;  %v2617_v44 = vadd.f32 %v2616_v36, %v2174_v34  ;;  %v2620_v48 = vadd.f32 %v1966_v41, %v314_v6 }
 0x1e2   :  { %2185 = vst [vmem:[%s4041_s3 + $0x20] sm:$0xff] %v2615_v39  ;;  %v2221_v49 = vadd.f32 %v2615_v39, %v2220_v24  ;;  %v2265_v42 = vmul.f32 %v2615_v39, %v2615_v39  ;;  %v2619_v45 = vadd.f32 %v2618_v40, %v2176_v38 }
 0x1e3   :  { %2186 = vst [vmem:[%s4041_s3 + $0x28] sm:$0xff] %v2617_v44  ;;  %v2230_v46 = vadd.f32 %v2617_v44, %v2229_v27  ;;  %v2266_v47 = vmul.f32 %v2617_v44, %v2617_v44  ;;  %v2621_v50 = vadd.f32 %v2620_v48, %v2178_v43 }
 0x1e4   :  { %v2270_v51 = vadd.f32 %v2269_v31, %v2265_v42  ;;  %2187 = vst [vmem:[%s4041_s3 + $0x30] sm:$0xff] %v2619_v45  ;;  %v2222_v52 = vadd.f32 %v2619_v45, %v2221_v49  ;;  %v2267_v53 = vmul.f32 %v2619_v45, %v2619_v45 }
 0x1e5   :  { %v2279_v54 = vadd.f32 %v2278_v35, %v2266_v47  ;;  %2188 = vst [vmem:[%s4041_s3 + $0x38] sm:$0xff] %v2621_v50  ;;  %v2231_v55 = vadd.f32 %v2621_v50, %v2230_v46  ;;  %v2268_v57 = vmul.f32 %v2621_v50, %v2621_v50 }
 0x1e6   :  { %v2223_v58 = vrot.slane %v2222_v52, 4  ;;  %v2271_v62 = vadd.f32 %v2270_v51, %v2267_v53 }
 0x1e7   :  { %v2232_v63 = vrot.slane %v2231_v55, 4  ;;  %v2280_v0 = vadd.f32 %v2279_v54, %v2268_v57 }
 0x1e8   :  { %v2224_v1 = vadd.f32 %v2223_v58, %v2222_v52  ;;  %v2272_v2 = vrot.slane %v2271_v62, 4 }
 0x1e9   :  { %v2233_v59 = vadd.f32 %v2232_v63, %v2231_v55  ;;  %v2281_v60 = vrot.slane %v2280_v0, 4 }
 0x1ea   :  { %v2225_v61 = vrot.slane %v2224_v1, 2  ;;  %v2273_v6 = vadd.f32 %v2272_v2, %v2271_v62 }
 0x1eb   :  { %v2234_v7 = vrot.slane %v2233_v59, 2  ;;  %v2282_v8 = vadd.f32 %v2281_v60, %v2280_v0 }
 0x1ec   :  { %v2226_v9 = vadd.f32 %v2225_v61, %v2224_v1  ;;  %v2274_v10 = vrot.slane %v2273_v6, 2 }
 0x1ed   :  { %v2235_v12 = vadd.f32 %v2234_v7, %v2233_v59  ;;  %v2283_v13 = vrot.slane %v2282_v8, 2 }
 0x1ee   :  { %v2227_v14 = vrot.slane %v2226_v9, 1  ;;  %v2275_v15 = vadd.f32 %v2274_v10, %v2273_v6 }
 0x1ef   :  { %v2236_v16 = vrot.slane %v2235_v12, 1  ;;  %v2284_v17 = vadd.f32 %v2283_v13, %v2282_v8 }
 0x1f0   :  { %v2228_v18 = vadd.f32 %v2227_v14, %v2226_v9  ;;  %v2276_v19 = vrot.slane %v2275_v15, 1 }
 0x1f1   :  { %v2237_v21 = vadd.f32 %v2236_v16, %v2235_v12  ;;  %v2285_v22 = vrot.slane %v2284_v17, 1 }
 0x1f2   :  { %v2277_v23 = vadd.f32 %v2276_v19, %v2275_v15 }
 0x1f3   :  { %v2240_v24 = vcombine.low %v2228_v18, %v2237_v21  ;;  %v2286_v25 = vadd.f32 %v2285_v22, %v2284_v17 }
 0x1f5   :  { %v2247_v26 = vrot.slane %v2240_v24, %v2246_v20  ;;  %v2289_v27 = vcombine.low %v2277_v23, %v2286_v25 }
 0x1f7   :  { %v2254_v28 = vrot.slane %v2247_v26, %v2246_v20  ;;  %v2296_v29 = vrot.slane %v2289_v27, %v2246_v20 }
 0x1f9   :  { %2260 = vst.msk [vmem:[%s4042_s4] sm:$0x3] %vm2258_vm0, %v2254_v28  ;;  %v2303_v30 = vrot.slane %v2296_v29, %v2246_v20 }
 0x1fb   :  { %2305 = vst.msk [vmem:[%s4043_s5] sm:$0x3] %vm2258_vm0, %v2303_v30 }

// kernel: discriminator_forward.12
= control target key start
LH: loop header
LB: loop body
LE: loop exit
PB: predicated region body
PF: predicated region fallthrough
CT: control target
= control target key end

     0   :  { %v24_v0 = vlaneseq  ;;  %s172_s1 = inlined_call_operand.vmem [shape: f32[1,256], index: 1, kind: input, shape index: {}]   ;;  %s173_s2 = inlined_call_operand.vmem [shape: f32[1,256], index: 2, kind: input, shape index: {}]   ;;  %s174_s0 = inlined_call_operand.vmem [shape: f32[32,256], index: 0, kind: input, shape index: {}]   ;;  %s175_s3 = inlined_call_operand.vmem [shape: f32[32,256], index: 3, kind: output, shape index: {}]  }
   0x1   :  { %v22_v2 = vld [vmem:[%s172_s1] sm:$0x3]  ;;  %v15_v6 = vld [vmem:[%s174_s0 + $0x8] sm:$0xff]  ;;  %v16_v8 = vld [vmem:[%s174_s0 + $0x10] sm:$0xff] }
   0x2   :  { %v25_v1 = vshrl.u32 %v24_v0, 7  ;;  %v42_v3 = vld [vmem:[%s173_s2] sm:$0x3]  ;;  %v17_v9 = vld [vmem:[%s174_s0 + $0x18] sm:$0xff]  ;;  %v19_v15 = vld [vmem:[%s174_s0 + $0x28] sm:$0xff] }
   0x3   :  { %v14_v4 = vld [vmem:[%s174_s0] sm:$0xff]  ;;  %v20_v16 = vld [vmem:[%s174_s0 + $0x30] sm:$0xff]  ;;  %v21_v17 = vld [vmem:[%s174_s0 + $0x38] sm:$0xff] }
   0x4   :  { %v26_v5 = vsub.s32 0, %v25_v1  ;;  %v30_v7 = vsub.s32 1, %v25_v1  ;;  %v18_v10 = vld [vmem:[%s174_s0 + $0x20] sm:$0xff] }
   0x6   :  { %v27_v11 = vrot.slane %v22_v2, %v26_v5  ;;  %v47_v12 = vrot.slane %v42_v3, %v26_v5  ;;  %v31_v13 = vrot.slane %v22_v2, %v30_v7  ;;  %v51_v14 = vrot.slane %v42_v3, %v30_v7 }
   0x8   :  { %v34_v18 = vmul.f32 %v27_v11, %v14_v4  ;;  %v35_v19 = vmul.f32 %v31_v13, %v15_v6  ;;  %v36_v20 = vmul.f32 %v27_v11, %v16_v8  ;;  %v37_v21 = vmul.f32 %v31_v13, %v17_v9 }
   0x9   :  { %v38_v22 = vmul.f32 %v27_v11, %v18_v10  ;;  %v39_v23 = vmul.f32 %v31_v13, %v19_v15  ;;  %v40_v24 = vmul.f32 %v27_v11, %v20_v16  ;;  %v41_v25 = vmul.f32 %v31_v13, %v21_v17 }
   0xa   :  { %v54_v26 = vadd.f32 %v47_v12, %v34_v18  ;;  %v55_v27 = vadd.f32 %v51_v14, %v35_v19  ;;  %v56_v28 = vadd.f32 %v47_v12, %v36_v20  ;;  %v57_v29 = vadd.f32 %v51_v14, %v37_v21 }
   0xb   :  { %v58_v30 = vadd.f32 %v47_v12, %v38_v22  ;;  %v59_v31 = vadd.f32 %v51_v14, %v39_v23  ;;  %v60_v32 = vadd.f32 %v47_v12, %v40_v24  ;;  %v61_v33 = vadd.f32 %v51_v14, %v41_v25 }
   0xc   :  { %vm62_vm0 = vcmp.gt.f32.partialorder %v54_v26, 0.0  ;;  %v70_v34 = vmul.f32 0.2, %v54_v26  ;;  %vm63_vm1 = vcmp.gt.f32.partialorder %v55_v27, 0.0  ;;  %v71_v35 = vmul.f32 0.2, %v55_v27 }
   0xd   :  { %vm64_vm2 = vcmp.gt.f32.partialorder %v56_v28, 0.0  ;;  %v72_v36 = vmul.f32 0.2, %v56_v28  ;;  %vm65_vm3 = vcmp.gt.f32.partialorder %v57_v29, 0.0  ;;  %v73_v37 = vmul.f32 0.2, %v57_v29 }
   0xe   :  { %v78_v38 = vsel %vm62_vm0, %v54_v26, %v70_v34  ;;  %v79_v39 = vsel %vm63_vm1, %v55_v27, %v71_v35  ;;  %vm66_vm4 = vcmp.gt.f32.partialorder %v58_v30, 0.0  ;;  %v74_v40 = vmul.f32 0.2, %v58_v30 }
   0xf   :  { %86 = vst [vmem:[%s175_s3] sm:$0xff] %v78_v38  ;;  %87 = vst [vmem:[%s175_s3 + $0x8] sm:$0xff] %v79_v39  ;;  %v80_v41 = vsel %vm64_vm2, %v56_v28, %v72_v36  ;;  %v81_v42 = vsel %vm65_vm3, %v57_v29, %v73_v37  ;;  %vm67_vm5 = vcmp.gt.f32.partialorder %v59_v31, 0.0  ;;  %v75_v43 = vmul.f32 0.2, %v59_v31 }
  0x10   :  { %88 = vst [vmem:[%s175_s3 + $0x10] sm:$0xff] %v80_v41  ;;  %89 = vst [vmem:[%s175_s3 + $0x18] sm:$0xff] %v81_v42  ;;  %v82_v44 = vsel %vm66_vm4, %v58_v30, %v74_v40  ;;  %vm68_vm6 = vcmp.gt.f32.partialorder %v60_v32, 0.0  ;;  %v76_v45 = vmul.f32 0.2, %v60_v32  ;;  %vm69_vm7 = vcmp.gt.f32.partialorder %v61_v33, 0.0 }
  0x11   :  { %90 = vst [vmem:[%s175_s3 + $0x20] sm:$0xff] %v82_v44  ;;  %v83_v46 = vsel %vm67_vm5, %v59_v31, %v75_v43  ;;  %v77_v47 = vmul.f32 0.2, %v61_v33 }
  0x12   :  { %91 = vst [vmem:[%s175_s3 + $0x28] sm:$0xff] %v83_v46  ;;  %v84_v48 = vsel %vm68_vm6, %v60_v32, %v76_v45 }
  0x13   :  { %92 = vst [vmem:[%s175_s3 + $0x30] sm:$0xff] %v84_v48  ;;  %v85_v49 = vsel %vm69_vm7, %v61_v33, %v77_v47 }
  0x14   :  { %93 = vst [vmem:[%s175_s3 + $0x38] sm:$0xff] %v85_v49 }

// kernel: discriminator_forward.14
= control target key start
LH: loop header
LB: loop body
LE: loop exit
PB: predicated region body
PF: predicated region fallthrough
CT: control target
= control target key end

     0   :  { %v20_v0 = vlaneseq  ;;  %s140_s1 = inlined_call_operand.vmem [shape: f32[1,512], index: 1, kind: input, shape index: {}]   ;;  %s141_s2 = inlined_call_operand.vmem [shape: f32[1,512], index: 2, kind: input, shape index: {}]   ;;  %s142_s0 = inlined_call_operand.vmem [shape: f32[8,512], index: 0, kind: input, shape index: {}]   ;;  %s143_s3 = inlined_call_operand.vmem [shape: f32[8,512], index: 3, kind: output, shape index: {}]  }
   0x1   :  { %v18_v2 = vld [vmem:[%s140_s1] sm:$0xf]  ;;  %v15_v9 = vld [vmem:[%s142_s0 + $0x8] sm:$0xff]  ;;  %v16_v14 = vld [vmem:[%s142_s0 + $0x10] sm:$0xff] }
   0x2   :  { %v21_v1 = vshrl.u32 %v20_v0, 7  ;;  %v44_v3 = vld [vmem:[%s141_s2] sm:$0xf]  ;;  %v17_v15 = vld [vmem:[%s142_s0 + $0x18] sm:$0xff] }
   0x3   :  { %v14_v8 = vld [vmem:[%s142_s0] sm:$0xff] }
   0x4   :  { %v22_v4 = vsub.s32 0, %v21_v1  ;;  %v26_v5 = vsub.s32 1, %v21_v1  ;;  %v30_v6 = vsub.s32 2, %v21_v1  ;;  %v34_v7 = vsub.s32 3, %v21_v1 }
   0x6   :  { %v23_v10 = vrot.slane %v18_v2, %v22_v4  ;;  %v49_v11 = vrot.slane %v44_v3, %v22_v4  ;;  %v27_v12 = vrot.slane %v18_v2, %v26_v5  ;;  %v53_v13 = vrot.slane %v44_v3, %v26_v5 }
   0x7   :  { %v31_v16 = vrot.slane %v18_v2, %v30_v6  ;;  %v57_v17 = vrot.slane %v44_v3, %v30_v6  ;;  %v35_v18 = vrot.slane %v18_v2, %v34_v7  ;;  %v61_v19 = vrot.slane %v44_v3, %v34_v7 }
   0x8   :  { %v40_v20 = vmul.f32 %v23_v10, %v14_v8  ;;  %v41_v21 = vmul.f32 %v27_v12, %v15_v9 }
   0x9   :  { %v42_v22 = vmul.f32 %v31_v16, %v16_v14  ;;  %v43_v23 = vmul.f32 %v35_v18, %v17_v15 }
   0xa   :  { %v66_v24 = vadd.f32 %v49_v11, %v40_v20  ;;  %v67_v25 = vadd.f32 %v53_v13, %v41_v21 }
   0xb   :  { %v68_v26 = vadd.f32 %v57_v17, %v42_v22  ;;  %v69_v27 = vadd.f32 %v61_v19, %v43_v23 }
   0xc   :  { %vm70_vm0 = vcmp.gt.f32.partialorder %v66_v24, 0.0  ;;  %v74_v28 = vmul.f32 0.2, %v66_v24  ;;  %vm71_vm1 = vcmp.gt.f32.partialorder %v67_v25, 0.0  ;;  %v75_v29 = vmul.f32 0.2, %v67_v25 }
   0xd   :  { %vm72_vm2 = vcmp.gt.f32.partialorder %v68_v26, 0.0  ;;  %v76_v30 = vmul.f32 0.2, %v68_v26  ;;  %vm73_vm3 = vcmp.gt.f32.partialorder %v69_v27, 0.0  ;;  %v77_v31 = vmul.f32 0.2, %v69_v27 }
   0xe   :  { %v78_v32 = vsel %vm70_vm0, %v66_v24, %v74_v28  ;;  %v79_v33 = vsel %vm71_vm1, %v67_v25, %v75_v29 }
   0xf   :  { %82 = vst [vmem:[%s143_s3] sm:$0xff] %v78_v32  ;;  %83 = vst [vmem:[%s143_s3 + $0x8] sm:$0xff] %v79_v33  ;;  %v80_v34 = vsel %vm72_vm2, %v68_v26, %v76_v30  ;;  %v81_v35 = vsel %vm73_vm3, %v69_v27, %v77_v31 }
  0x10   :  { %84 = vst [vmem:[%s143_s3 + $0x10] sm:$0xff] %v80_v34  ;;  %85 = vst [vmem:[%s143_s3 + $0x18] sm:$0xff] %v81_v35 }

// kernel: discriminator_forward.13
= control target key start
LH: loop header
LB: loop body
LE: loop exit
PB: predicated region body
PF: predicated region fallthrough
CT: control target
= control target key end

     0   :  { %s13788_s1 = inlined_call_operand.vmem [shape: bf16[4096,512], index: 1, kind: input, shape index: {}]   ;;  %s13789_s0 = inlined_call_operand.vmem [shape: bf16[8,4096], index: 0, kind: input, shape index: {}]   ;;  %s13790_s2 = inlined_call_operand.vmem [shape: f32[1,512], index: 2, kind: input, shape index: {}]   ;;  %s13791_s3 = inlined_call_operand.vmem [shape: f32[8,512], index: 3, kind: output, shape index: {0}]   ;;  %s13792_s4 = inlined_call_operand.vmem [shape: f32[1,1,512], index: 4, kind: output, shape index: {1}]   ;;  %s13793_s5 = inlined_call_operand.vmem [shape: f32[1,1,512], index: 5, kind: output, shape index: {2}]  }
   0x1   :  { %v8948_v0 = vld [vmem:[%s13788_s1 + $0x4] ss:$16 sps:$4 sm:$0xff]   ;;  %v8950_v1 = vld [vmem:[%s13788_s1 + $0xc] ss:$16 sps:$4 sm:$0xff]   ;;  %v8952_v2 = vld [vmem:[%s13788_s1] ss:$16 sps:$4 sm:$0xff]  }
   0x2   :  { %6311 = vmatprep.subr.bf16.mxu0 %v8948_v0  ;;  %v8953_v3 = vld [vmem:[%s13788_s1 + $0x8] ss:$16 sps:$4 sm:$0xff]   ;;  %6967 = vmatprep.subr.bf16.mxu1 %v8950_v1  ;;  %v8954_v4 = vld [vmem:[%s13788_s1 + $0x24] ss:$16 sps:$4 sm:$0xff]   ;;  %v8956_v5 = vld [vmem:[%s13788_s1 + $0x2c] ss:$16 sps:$4 sm:$0xff]  }
   0x3   :  { %6312 = vmatpush1.bf16.msra.mxu0 %v8952_v2  ;;  %6968 = vmatpush1.bf16.msra.mxu1 %v8953_v3  ;;  %v8958_v6 = vld [vmem:[%s13788_s1 + $0x20] ss:$16 sps:$4 sm:$0xff]   ;;  %v8959_v7 = vld [vmem:[%s13788_s1 + $0x28] ss:$16 sps:$4 sm:$0xff]   ;;  %v8960_v8 = vld [vmem:[%s13788_s1 + $0x44] ss:$16 sps:$4 sm:$0xff]  }
   0x4   :  { %6313 = vmatprep.subr.bf16.mxu0 %v8954_v4  ;;  %6969 = vmatprep.subr.bf16.mxu1 %v8956_v5  ;;  %v8962_v9 = vld [vmem:[%s13788_s1 + $0x4c] ss:$16 sps:$4 sm:$0xff]   ;;  %v8964_v10 = vld [vmem:[%s13788_s1 + $0x40] ss:$16 sps:$4 sm:$0xff]   ;;  %v8965_v11 = vld [vmem:[%s13788_s1 + $0x48] ss:$16 sps:$4 sm:$0xff]  }
   0x5   :  { %v8966_v12 = vld [vmem:[%s13788_s1 + $0x64] ss:$16 sps:$4 sm:$0xff]   ;;  %v8968_v13 = vld [vmem:[%s13788_s1 + $0x6c] ss:$16 sps:$4 sm:$0xff]   ;;  %v8970_v14 = vld [vmem:[%s13788_s1 + $0x60] ss:$16 sps:$4 sm:$0xff]  }
   0x6   :  { %v8971_v15 = vld [vmem:[%s13788_s1 + $0x68] ss:$16 sps:$4 sm:$0xff]   ;;  %v8972_v16 = vld [vmem:[%s13788_s1 + $0x84] ss:$16 sps:$4 sm:$0xff]   ;;  %v8974_v17 = vld [vmem:[%s13788_s1 + $0x8c] ss:$16 sps:$4 sm:$0xff]  }
   0x7   :  { %6314 = vmatpush1.bf16.msra.mxu0 %v8958_v6  ;;  %6970 = vmatpush1.bf16.msra.mxu1 %v8959_v7  ;;  %v8976_v18 = vld [vmem:[%s13788_s1 + $0x80] ss:$16 sps:$4 sm:$0xff]   ;;  %v8977_v19 = vld [vmem:[%s13788_s1 + $0x88] ss:$16 sps:$4 sm:$0xff]   ;;  %v8978_v20 = vld [vmem:[%s13788_s1 + $0xa4] ss:$16 sps:$4 sm:$0xff]  }
   0x8   :  { %6315 = vmatprep.subr.bf16.mxu0 %v8960_v8  ;;  %6971 = vmatprep.subr.bf16.mxu1 %v8962_v9  ;;  %v8980_v21 = vld [vmem:[%s13788_s1 + $0xac] ss:$16 sps:$4 sm:$0xff]   ;;  %v8982_v22 = vld [vmem:[%s13788_s1 + $0xa0] ss:$16 sps:$4 sm:$0xff]   ;;  %v8983_v23 = vld [vmem:[%s13788_s1 + $0xa8] ss:$16 sps:$4 sm:$0xff]  }
   0x9   :  { %v8984_v24 = vld [vmem:[%s13788_s1 + $0xc4] ss:$16 sps:$4 sm:$0xff]   ;;  %v8986_v25 = vld [vmem:[%s13788_s1 + $0xcc] ss:$16 sps:$4 sm:$0xff]   ;;  %v8988_v26 = vld [vmem:[%s13788_s1 + $0xc0] ss:$16 sps:$4 sm:$0xff]  }
   0xa   :  { %v8989_v27 = vld [vmem:[%s13788_s1 + $0xc8] ss:$16 sps:$4 sm:$0xff]   ;;  %v8990_v28 = vld [vmem:[%s13788_s1 + $0xe4] ss:$16 sps:$4 sm:$0xff]   ;;  %v8992_v29 = vld [vmem:[%s13788_s1 + $0xec] ss:$16 sps:$4 sm:$0xff]  }
   0xb   :  { %6316 = vmatpush1.bf16.msra.mxu0 %v8964_v10  ;;  %6972 = vmatpush1.bf16.msra.mxu1 %v8965_v11  ;;  %v8994_v30 = vld [vmem:[%s13788_s1 + $0xe0] ss:$16 sps:$4 sm:$0xff]   ;;  %v8995_v31 = vld [vmem:[%s13788_s1 + $0xe8] ss:$16 sps:$4 sm:$0xff]   ;;  %v8996_v32 = vld [vmem:[%s13788_s1 + $0x104] ss:$16 sps:$4 sm:$0xff]  }
   0xc   :  { %6317 = vmatprep.subr.bf16.mxu0 %v8966_v12  ;;  %6973 = vmatprep.subr.bf16.mxu1 %v8968_v13  ;;  %v8998_v33 = vld [vmem:[%s13788_s1 + $0x10c] ss:$16 sps:$4 sm:$0xff]   ;;  %v9000_v34 = vld [vmem:[%s13788_s1 + $0x100] ss:$16 sps:$4 sm:$0xff]   ;;  %v9001_v35 = vld [vmem:[%s13788_s1 + $0x108] ss:$16 sps:$4 sm:$0xff]  }
   0xd   :  { %v9002_v36 = vld [vmem:[%s13788_s1 + $0x124] ss:$16 sps:$4 sm:$0xff]   ;;  %v9004_v37 = vld [vmem:[%s13788_s1 + $0x12c] ss:$16 sps:$4 sm:$0xff]   ;;  %v9006_v38 = vld [vmem:[%s13788_s1 + $0x120] ss:$16 sps:$4 sm:$0xff]  }
   0xe   :  { %v9007_v39 = vld [vmem:[%s13788_s1 + $0x128] ss:$16 sps:$4 sm:$0xff]   ;;  %v9008_v40 = vld [vmem:[%s13788_s1 + $0x144] ss:$16 sps:$4 sm:$0xff]   ;;  %v9010_v41 = vld [vmem:[%s13788_s1 + $0x14c] ss:$16 sps:$4 sm:$0xff]  }
   0xf   :  { %6318 = vmatpush1.bf16.msra.mxu0 %v8970_v14  ;;  %6974 = vmatpush1.bf16.msra.mxu1 %v8971_v15  ;;  %v9012_v42 = vld [vmem:[%s13788_s1 + $0x140] ss:$16 sps:$4 sm:$0xff]   ;;  %v9013_v43 = vld [vmem:[%s13788_s1 + $0x148] ss:$16 sps:$4 sm:$0xff]   ;;  %v9014_v44 = vld [vmem:[%s13788_s1 + $0x164] ss:$16 sps:$4 sm:$0xff]  }
  0x10   :  { %6319 = vmatprep.subr.bf16.mxu0 %v8972_v16  ;;  %6975 = vmatprep.subr.bf16.mxu1 %v8974_v17  ;;  %v9016_v45 = vld [vmem:[%s13788_s1 + $0x16c] ss:$16 sps:$4 sm:$0xff]   ;;  %v17_v46 = vld [vmem:[%s13789_s0] sm:$0xff]  ;;  %v9019_v49 = vld [vmem:[%s13788_s1 + $0x168] ss:$16 sps:$4 sm:$0xff]  }
  0x11   :  { %v9018_v47 = vld [vmem:[%s13788_s1 + $0x160] ss:$16 sps:$4 sm:$0xff]   ;;  %v7768_v48 = vcombine.high %v17_v46, %v17_v46  ;;  %v9020_v50 = vld [vmem:[%s13788_s1 + $0x184] ss:$16 sps:$4 sm:$0xff]   ;;  %v9022_v51 = vld [vmem:[%s13788_s1 + $0x18c] ss:$16 sps:$4 sm:$0xff]   ;;  %v7767_v4 = vcombine.low %v17_v46, %v17_v46 }
  0x12   :  { %v9024_v52 = vld [vmem:[%s13788_s1 + $0x180] ss:$16 sps:$4 sm:$0xff]   ;;  %v9025_v53 = vld [vmem:[%s13788_s1 + $0x188] ss:$16 sps:$4 sm:$0xff]   ;;  %v9026_v54 = vld [vmem:[%s13788_s1 + $0x1a4] ss:$16 sps:$4 sm:$0xff]  }
  0x13   :  { %6320 = vmatpush1.bf16.msra.mxu0 %v8976_v18  ;;  %6976 = vmatpush1.bf16.msra.mxu1 %v8977_v19  ;;  %v9028_v55 = vld [vmem:[%s13788_s1 + $0x1ac] ss:$16 sps:$4 sm:$0xff]   ;;  %v9030_v56 = vld [vmem:[%s13788_s1 + $0x1a0] ss:$16 sps:$4 sm:$0xff]   ;;  %v9031_v57 = vld [vmem:[%s13788_s1 + $0x1a8] ss:$16 sps:$4 sm:$0xff]  }
  0x14   :  { %6321 = vmatprep.subr.bf16.mxu0 %v8978_v20  ;;  %6977 = vmatprep.subr.bf16.mxu1 %v8980_v21  ;;  %v9032_v58 = vld [vmem:[%s13788_s1 + $0x1c4] ss:$16 sps:$4 sm:$0xff]   ;;  %v9034_v59 = vld [vmem:[%s13788_s1 + $0x1cc] ss:$16 sps:$4 sm:$0xff]   ;;  %v9036_v60 = vld [vmem:[%s13788_s1 + $0x1c0] ss:$16 sps:$4 sm:$0xff]  }
  0x15   :  { %6343 = vmatprep.mubr.bf16.mxu0 %v7768_v48  ;;  %6999 = vmatprep.mubr.bf16.mxu1 %v7768_v48  ;;  %v9037_v61 = vld [vmem:[%s13788_s1 + $0x1c8] ss:$16 sps:$4 sm:$0xff]   ;;  %v9038_v62 = vld [vmem:[%s13788_s1 + $0x1e4] ss:$16 sps:$4 sm:$0xff]   ;;  %v9040_v63 = vld [vmem:[%s13788_s1 + $0x1ec] ss:$16 sps:$4 sm:$0xff]  }
  0x16   :  { %v9042_v0 = vld [vmem:[%s13788_s1 + $0x1e0] ss:$16 sps:$4 sm:$0xff]   ;;  %v9043_v1 = vld [vmem:[%s13788_s1 + $0x1e8] ss:$16 sps:$4 sm:$0xff]   ;;  %v9048_v2 = vld [vmem:[%s13788_s1 + $0x204] ss:$16 sps:$4 sm:$0xff]  }
  0x17   :  { %6322 = vmatpush1.bf16.msra.mxu0 %v8982_v22  ;;  %6978 = vmatpush1.bf16.msra.mxu1 %v8983_v23  ;;  %v9051_v3 = vld [vmem:[%s13788_s1 + $0x20c] ss:$16 sps:$4 sm:$0xff]   ;;  %v9046_v5 = vld [vmem:[%s13788_s1 + $0x200] ss:$16 sps:$4 sm:$0xff]   ;;  %v9049_v6 = vld [vmem:[%s13788_s1 + $0x208] ss:$16 sps:$4 sm:$0xff]  }
  0x18   :  { %6323 = vmatprep.subr.bf16.mxu0 %v8984_v24  ;;  %6979 = vmatprep.subr.bf16.mxu1 %v8986_v25  ;;  %v9054_v7 = vld [vmem:[%s13788_s1 + $0x224] ss:$16 sps:$4 sm:$0xff]   ;;  %v9057_v8 = vld [vmem:[%s13788_s1 + $0x22c] ss:$16 sps:$4 sm:$0xff]   ;;  %v9052_v9 = vld [vmem:[%s13788_s1 + $0x220] ss:$16 sps:$4 sm:$0xff]  }
  0x19   :  { %v9055_v10 = vld [vmem:[%s13788_s1 + $0x228] ss:$16 sps:$4 sm:$0xff]   ;;  %v9060_v11 = vld [vmem:[%s13788_s1 + $0x244] ss:$16 sps:$4 sm:$0xff]   ;;  %v9063_v12 = vld [vmem:[%s13788_s1 + $0x24c] ss:$16 sps:$4 sm:$0xff]  }
  0x1a   :  { %v9058_v13 = vld [vmem:[%s13788_s1 + $0x240] ss:$16 sps:$4 sm:$0xff]   ;;  %v9061_v14 = vld [vmem:[%s13788_s1 + $0x248] ss:$16 sps:$4 sm:$0xff]   ;;  %v9066_v15 = vld [vmem:[%s13788_s1 + $0x264] ss:$16 sps:$4 sm:$0xff]  }
  0x1b   :  { %6324 = vmatpush1.bf16.msra.mxu0 %v8988_v26  ;;  %6980 = vmatpush1.bf16.msra.mxu1 %v8989_v27  ;;  %v9069_v16 = vld [vmem:[%s13788_s1 + $0x26c] ss:$16 sps:$4 sm:$0xff]   ;;  %v9064_v17 = vld [vmem:[%s13788_s1 + $0x260] ss:$16 sps:$4 sm:$0xff]   ;;  %v9067_v18 = vld [vmem:[%s13788_s1 + $0x268] ss:$16 sps:$4 sm:$0xff]  }
  0x1c   :  { %6325 = vmatprep.subr.bf16.mxu0 %v8990_v28  ;;  %6981 = vmatprep.subr.bf16.mxu1 %v8992_v29  ;;  %v9072_v19 = vld [vmem:[%s13788_s1 + $0x284] ss:$16 sps:$4 sm:$0xff]   ;;  %v9075_v20 = vld [vmem:[%s13788_s1 + $0x28c] ss:$16 sps:$4 sm:$0xff]   ;;  %v9070_v21 = vld [vmem:[%s13788_s1 + $0x280] ss:$16 sps:$4 sm:$0xff]  }
  0x1d   :  { %v9073_v22 = vld [vmem:[%s13788_s1 + $0x288] ss:$16 sps:$4 sm:$0xff]   ;;  %v9078_v23 = vld [vmem:[%s13788_s1 + $0x2a4] ss:$16 sps:$4 sm:$0xff]   ;;  %v9081_v24 = vld [vmem:[%s13788_s1 + $0x2ac] ss:$16 sps:$4 sm:$0xff]  }
  0x1e   :  { %v9076_v25 = vld [vmem:[%s13788_s1 + $0x2a0] ss:$16 sps:$4 sm:$0xff]   ;;  %v9079_v26 = vld [vmem:[%s13788_s1 + $0x2a8] ss:$16 sps:$4 sm:$0xff]   ;;  %v9084_v27 = vld [vmem:[%s13788_s1 + $0x2c4] ss:$16 sps:$4 sm:$0xff]  }
  0x1f   :  { %6326 = vmatpush1.bf16.msra.mxu0 %v8994_v30  ;;  %6982 = vmatpush1.bf16.msra.mxu1 %v8995_v31  ;;  %v9087_v28 = vld [vmem:[%s13788_s1 + $0x2cc] ss:$16 sps:$4 sm:$0xff]   ;;  %v9082_v31 = vld [vmem:[%s13788_s1 + $0x2c0] ss:$16 sps:$4 sm:$0xff]   ;;  %v9109_v48 = vld [vmem:[%s13788_s1 + $0x348] ss:$16 sps:$4 sm:$0xff]  }
  0x20   :  { %6327 = vmatprep.subr.bf16.mxu0 %v8996_v32  ;;  %6983 = vmatprep.subr.bf16.mxu1 %v8998_v33  ;;  %v10823_v29 = vld [vmem:[%s13789_s0 + $0x8] sm:$0xff]  ;;  %v9090_v33 = vld [vmem:[%s13788_s1 + $0x2e4] ss:$16 sps:$4 sm:$0xff]  }
  0x21   :  { %v7770_v30 = vcombine.high %v10823_v29, %v10823_v29  ;;  %v9085_v32 = vld [vmem:[%s13788_s1 + $0x2c8] ss:$16 sps:$4 sm:$0xff]   ;;  %v9111_v46 = vld [vmem:[%s13788_s1 + $0x34c] ss:$16 sps:$4 sm:$0xff]  }
  0x23   :  { %6328 = vmatpush1.bf16.msra.mxu0 %v9000_v34  ;;  %6984 = vmatpush1.bf16.msra.mxu1 %v9001_v35  ;;  %v9093_v34 = vld [vmem:[%s13788_s1 + $0x2ec] ss:$16 sps:$4 sm:$0xff]   ;;  %v9088_v35 = vld [vmem:[%s13788_s1 + $0x2e0] ss:$16 sps:$4 sm:$0xff]  }
  0x24   :  { %6329 = vmatprep.subr.bf16.mxu0 %v9002_v36  ;;  %6985 = vmatprep.subr.bf16.mxu1 %v9004_v37  ;;  %v9091_v36 = vld [vmem:[%s13788_s1 + $0x2e8] ss:$16 sps:$4 sm:$0xff]   ;;  %v9096_v37 = vld [vmem:[%s13788_s1 + $0x304] ss:$16 sps:$4 sm:$0xff]  }
  0x27   :  { %6330 = vmatpush1.bf16.msra.mxu0 %v9006_v38  ;;  %6986 = vmatpush1.bf16.msra.mxu1 %v9007_v39  ;;  %v9099_v38 = vld [vmem:[%s13788_s1 + $0x30c] ss:$16 sps:$4 sm:$0xff]   ;;  %v9094_v39 = vld [vmem:[%s13788_s1 + $0x300] ss:$16 sps:$4 sm:$0xff]  }
  0x28   :  { %6331 = vmatprep.subr.bf16.mxu0 %v9008_v40  ;;  %6987 = vmatprep.subr.bf16.mxu1 %v9010_v41  ;;  %v9097_v40 = vld [vmem:[%s13788_s1 + $0x308] ss:$16 sps:$4 sm:$0xff]   ;;  %v9102_v41 = vld [vmem:[%s13788_s1 + $0x324] ss:$16 sps:$4 sm:$0xff]  }
  0x2b   :  { %6332 = vmatpush1.bf16.msra.mxu0 %v9012_v42  ;;  %6988 = vmatpush1.bf16.msra.mxu1 %v9013_v43  ;;  %v9105_v42 = vld [vmem:[%s13788_s1 + $0x32c] ss:$16 sps:$4 sm:$0xff]   ;;  %v9100_v43 = vld [vmem:[%s13788_s1 + $0x320] ss:$16 sps:$4 sm:$0xff]  }
  0x2c   :  { %6333 = vmatprep.subr.bf16.mxu0 %v9014_v44  ;;  %6989 = vmatprep.subr.bf16.mxu1 %v9016_v45  ;;  %v9103_v44 = vld [vmem:[%s13788_s1 + $0x328] ss:$16 sps:$4 sm:$0xff]   ;;  %v9108_v45 = vld [vmem:[%s13788_s1 + $0x344] ss:$16 sps:$4 sm:$0xff]  }
  0x2f   :  { %6334 = vmatpush1.bf16.msra.mxu0 %v9018_v47  ;;  %6990 = vmatpush1.bf16.msra.mxu1 %v9019_v49  ;;  %v9106_v47 = vld [vmem:[%s13788_s1 + $0x340] ss:$16 sps:$4 sm:$0xff]   ;;  %v9114_v49 = vld [vmem:[%s13788_s1 + $0x364] ss:$16 sps:$4 sm:$0xff]  }
  0x30   :  { %6335 = vmatprep.subr.bf16.mxu0 %v9020_v50  ;;  %6991 = vmatprep.subr.bf16.mxu1 %v9022_v51  ;;  %v9117_v50 = vld [vmem:[%s13788_s1 + $0x36c] ss:$16 sps:$4 sm:$0xff]   ;;  %v9112_v51 = vld [vmem:[%s13788_s1 + $0x360] ss:$16 sps:$4 sm:$0xff]  }
  0x33   :  { %6336 = vmatpush1.bf16.msra.mxu0 %v9024_v52  ;;  %6992 = vmatpush1.bf16.msra.mxu1 %v9025_v53  ;;  %v9115_v52 = vld [vmem:[%s13788_s1 + $0x368] ss:$16 sps:$4 sm:$0xff]   ;;  %v9120_v53 = vld [vmem:[%s13788_s1 + $0x384] ss:$16 sps:$4 sm:$0xff]  }
  0x34   :  { %6337 = vmatprep.subr.bf16.mxu0 %v9026_v54  ;;  %6993 = vmatprep.subr.bf16.mxu1 %v9028_v55  ;;  %v9123_v54 = vld [vmem:[%s13788_s1 + $0x38c] ss:$16 sps:$4 sm:$0xff]   ;;  %v9118_v55 = vld [vmem:[%s13788_s1 + $0x380] ss:$16 sps:$4 sm:$0xff]  }
  0x37   :  { %6338 = vmatpush1.bf16.msra.mxu0 %v9030_v56  ;;  %6994 = vmatpush1.bf16.msra.mxu1 %v9031_v57  ;;  %v9121_v56 = vld [vmem:[%s13788_s1 + $0x388] ss:$16 sps:$4 sm:$0xff]   ;;  %v9126_v57 = vld [vmem:[%s13788_s1 + $0x3a4] ss:$16 sps:$4 sm:$0xff]  }
  0x38   :  { %6339 = vmatprep.subr.bf16.mxu0 %v9032_v58  ;;  %6995 = vmatprep.subr.bf16.mxu1 %v9034_v59  ;;  %v9129_v58 = vld [vmem:[%s13788_s1 + $0x3ac] ss:$16 sps:$4 sm:$0xff]   ;;  %v9124_v59 = vld [vmem:[%s13788_s1 + $0x3a0] ss:$16 sps:$4 sm:$0xff]  }
  0x3b   :  { %6340 = vmatpush1.bf16.msra.mxu0 %v9036_v60  ;;  %6996 = vmatpush1.bf16.msra.mxu1 %v9037_v61  ;;  %v9127_v60 = vld [vmem:[%s13788_s1 + $0x3a8] ss:$16 sps:$4 sm:$0xff]   ;;  %v9132_v61 = vld [vmem:[%s13788_s1 + $0x3c4] ss:$16 sps:$4 sm:$0xff]  }
  0x3c   :  { %6341 = vmatprep.subr.bf16.mxu0 %v9038_v62  ;;  %6997 = vmatprep.subr.bf16.mxu1 %v9040_v63  ;;  %v9135_v62 = vld [vmem:[%s13788_s1 + $0x3cc] ss:$16 sps:$4 sm:$0xff]   ;;  %v9130_v63 = vld [vmem:[%s13788_s1 + $0x3c0] ss:$16 sps:$4 sm:$0xff]  }
  0x3f   :  { %6342 = vmatpush1.bf16.msra.mxu0 %v9042_v0  ;;  %6998 = vmatpush1.bf16.msra.mxu1 %v9043_v1  ;;  %v9133_v0 = vld [vmem:[%s13788_s1 + $0x3c8] ss:$16 sps:$4 sm:$0xff]   ;;  %v9138_v1 = vld [vmem:[%s13788_s1 + $0x3e4] ss:$16 sps:$4 sm:$0xff]  }
  0x40   :  { %6352 = vmatprep.subr.bf16.mxu0 %v9048_v2  ;;  %7008 = vmatprep.subr.bf16.mxu1 %v9051_v3  ;;  %v9141_v2 = vld [vmem:[%s13788_s1 + $0x3ec] ss:$16 sps:$4 sm:$0xff]   ;;  %v9136_v3 = vld [vmem:[%s13788_s1 + $0x3e0] ss:$16 sps:$4 sm:$0xff]  }
  0x42   :  { %6344 = vmatmul.mubr.bf16.vlgmr.msra.gmra.mrb[0].mxu0 %v7767_v4  ;;  %7000 = vmatmul.mubr.bf16.vlgmr.msra.gmra.mrb[0].mxu1 %v7767_v4  ;;  %v9139_v4 = vld [vmem:[%s13788_s1 + $0x3e8] ss:$16 sps:$4 sm:$0xff]  }
  0x43   :  { %6353 = vmatpush1.bf16.msra.mxu0 %v9046_v5  ;;  %7009 = vmatpush1.bf16.msra.mxu1 %v9049_v6  ;;  %v9146_v5 = vld [vmem:[%s13788_s1 + $0x404] ss:$16 sps:$4 sm:$0xff]   ;;  %v9149_v6 = vld [vmem:[%s13788_s1 + $0x40c] ss:$16 sps:$4 sm:$0xff]  }
  0x44   :  { %6354 = vmatprep.subr.bf16.mxu0 %v9054_v7  ;;  %7010 = vmatprep.subr.bf16.mxu1 %v9057_v8  ;;  %v7769_v7 = vcombine.low %v10823_v29, %v10823_v29  ;;  %v9144_v8 = vld [vmem:[%s13788_s1 + $0x400] ss:$16 sps:$4 sm:$0xff]   ;;  %v9179_v29 = vld [vmem:[%s13788_s1 + $0x4ac] ss:$16 sps:$4 sm:$0xff]  }
  0x45   :  { %6384 = vmatprep.mubr.bf16.mxu0 %v7770_v30  ;;  %7040 = vmatprep.mubr.bf16.mxu1 %v7770_v30  ;;  %v9174_v30 = vld [vmem:[%s13788_s1 + $0x4a0] ss:$16 sps:$4 sm:$0xff]  }
  0x47   :  { %6355 = vmatpush1.bf16.msra.mxu0 %v9052_v9  ;;  %7011 = vmatpush1.bf16.msra.mxu1 %v9055_v10  ;;  %v9147_v9 = vld [vmem:[%s13788_s1 + $0x408] ss:$16 sps:$4 sm:$0xff]   ;;  %v9152_v10 = vld [vmem:[%s13788_s1 + $0x424] ss:$16 sps:$4 sm:$0xff]  }
  0x48   :  { %6356 = vmatprep.subr.bf16.mxu0 %v9060_v11  ;;  %7012 = vmatprep.subr.bf16.mxu1 %v9063_v12  ;;  %v10961_v11 = vld [vmem:[%s13789_s0 + $0x10] sm:$0xff]  ;;  %v9155_v12 = vld [vmem:[%s13788_s1 + $0x42c] ss:$16 sps:$4 sm:$0xff]  }
  0x4b   :  { %6357 = vmatpush1.bf16.msra.mxu0 %v9058_v13  ;;  %7013 = vmatpush1.bf16.msra.mxu1 %v9061_v14  ;;  %v7772_v13 = vcombine.high %v10961_v11, %v10961_v11  ;;  %v9150_v14 = vld [vmem:[%s13788_s1 + $0x420] ss:$16 sps:$4 sm:$0xff]  }
  0x4c   :  { %6358 = vmatprep.subr.bf16.mxu0 %v9066_v15  ;;  %7014 = vmatprep.subr.bf16.mxu1 %v9069_v16  ;;  %v9153_v15 = vld [vmem:[%s13788_s1 + $0x428] ss:$16 sps:$4 sm:$0xff]   ;;  %v9158_v16 = vld [vmem:[%s13788_s1 + $0x444] ss:$16 sps:$4 sm:$0xff]  }
  0x4f   :  { %6359 = vmatpush1.bf16.msra.mxu0 %v9064_v17  ;;  %7015 = vmatpush1.bf16.msra.mxu1 %v9067_v18  ;;  %v9161_v17 = vld [vmem:[%s13788_s1 + $0x44c] ss:$16 sps:$4 sm:$0xff]   ;;  %v9156_v18 = vld [vmem:[%s13788_s1 + $0x440] ss:$16 sps:$4 sm:$0xff]  }
  0x50   :  { %6360 = vmatprep.subr.bf16.mxu0 %v9072_v19  ;;  %7016 = vmatprep.subr.bf16.mxu1 %v9075_v20  ;;  %v9159_v19 = vld [vmem:[%s13788_s1 + $0x448] ss:$16 sps:$4 sm:$0xff]   ;;  %v9164_v20 = vld [vmem:[%s13788_s1 + $0x464] ss:$16 sps:$4 sm:$0xff]  }
  0x53   :  { %6361 = vmatpush1.bf16.msra.mxu0 %v9070_v21  ;;  %7017 = vmatpush1.bf16.msra.mxu1 %v9073_v22  ;;  %v9167_v21 = vld [vmem:[%s13788_s1 + $0x46c] ss:$16 sps:$4 sm:$0xff]   ;;  %v9162_v22 = vld [vmem:[%s13788_s1 + $0x460] ss:$16 sps:$4 sm:$0xff]  }
  0x54   :  { %6362 = vmatprep.subr.bf16.mxu0 %v9078_v23  ;;  %7018 = vmatprep.subr.bf16.mxu1 %v9081_v24  ;;  %v9165_v23 = vld [vmem:[%s13788_s1 + $0x468] ss:$16 sps:$4 sm:$0xff]   ;;  %v9170_v24 = vld [vmem:[%s13788_s1 + $0x484] ss:$16 sps:$4 sm:$0xff]  }
  0x57   :  { %6363 = vmatpush1.bf16.msra.mxu0 %v9076_v25  ;;  %7019 = vmatpush1.bf16.msra.mxu1 %v9079_v26  ;;  %v9173_v25 = vld [vmem:[%s13788_s1 + $0x48c] ss:$16 sps:$4 sm:$0xff]   ;;  %v9168_v26 = vld [vmem:[%s13788_s1 + $0x480] ss:$16 sps:$4 sm:$0xff]  }
  0x58   :  { %6364 = vmatprep.subr.bf16.mxu0 %v9084_v27  ;;  %7020 = vmatprep.subr.bf16.mxu1 %v9087_v28  ;;  %v9171_v27 = vld [vmem:[%s13788_s1 + $0x488] ss:$16 sps:$4 sm:$0xff]   ;;  %v9176_v28 = vld [vmem:[%s13788_s1 + $0x4a4] ss:$16 sps:$4 sm:$0xff]  }
  0x5b   :  { %6365 = vmatpush1.bf16.msra.mxu0 %v9082_v31  ;;  %7021 = vmatpush1.bf16.msra.mxu1 %v9085_v32  ;;  %v9177_v31 = vld [vmem:[%s13788_s1 + $0x4a8] ss:$16 sps:$4 sm:$0xff]   ;;  %v9182_v32 = vld [vmem:[%s13788_s1 + $0x4c4] ss:$16 sps:$4 sm:$0xff]  }
  0x5c   :  { %6366 = vmatprep.subr.bf16.mxu0 %v9090_v33  ;;  %7022 = vmatprep.subr.bf16.mxu1 %v9093_v34  ;;  %v9185_v33 = vld [vmem:[%s13788_s1 + $0x4cc] ss:$16 sps:$4 sm:$0xff]   ;;  %v9180_v34 = vld [vmem:[%s13788_s1 + $0x4c0] ss:$16 sps:$4 sm:$0xff]  }
  0x5f   :  { %6367 = vmatpush1.bf16.msra.mxu0 %v9088_v35  ;;  %7023 = vmatpush1.bf16.msra.mxu1 %v9091_v36  ;;  %v9183_v35 = vld [vmem:[%s13788_s1 + $0x4c8] ss:$16 sps:$4 sm:$0xff]   ;;  %v9188_v36 = vld [vmem:[%s13788_s1 + $0x4e4] ss:$16 sps:$4 sm:$0xff]  }
  0x60   :  { %6368 = vmatprep.subr.bf16.mxu0 %v9096_v37  ;;  %7024 = vmatprep.subr.bf16.mxu1 %v9099_v38  ;;  %v9191_v37 = vld [vmem:[%s13788_s1 + $0x4ec] ss:$16 sps:$4 sm:$0xff]   ;;  %v9186_v38 = vld [vmem:[%s13788_s1 + $0x4e0] ss:$16 sps:$4 sm:$0xff]  }
  0x63   :  { %6369 = vmatpush1.bf16.msra.mxu0 %v9094_v39  ;;  %7025 = vmatpush1.bf16.msra.mxu1 %v9097_v40  ;;  %v9189_v39 = vld [vmem:[%s13788_s1 + $0x4e8] ss:$16 sps:$4 sm:$0xff]   ;;  %v9194_v40 = vld [vmem:[%s13788_s1 + $0x504] ss:$16 sps:$4 sm:$0xff]  }
  0x64   :  { %6370 = vmatprep.subr.bf16.mxu0 %v9102_v41  ;;  %7026 = vmatprep.subr.bf16.mxu1 %v9105_v42  ;;  %v9197_v41 = vld [vmem:[%s13788_s1 + $0x50c] ss:$16 sps:$4 sm:$0xff]   ;;  %v9192_v42 = vld [vmem:[%s13788_s1 + $0x500] ss:$16 sps:$4 sm:$0xff]  }
  0x67   :  { %6371 = vmatpush1.bf16.msra.mxu0 %v9100_v43  ;;  %7027 = vmatpush1.bf16.msra.mxu1 %v9103_v44  ;;  %v9195_v43 = vld [vmem:[%s13788_s1 + $0x508] ss:$16 sps:$4 sm:$0xff]   ;;  %v9200_v44 = vld [vmem:[%s13788_s1 + $0x524] ss:$16 sps:$4 sm:$0xff]  }
  0x68   :  { %6372 = vmatprep.subr.bf16.mxu0 %v9108_v45  ;;  %7028 = vmatprep.subr.bf16.mxu1 %v9111_v46  ;;  %v9203_v45 = vld [vmem:[%s13788_s1 + $0x52c] ss:$16 sps:$4 sm:$0xff]   ;;  %v9198_v46 = vld [vmem:[%s13788_s1 + $0x520] ss:$16 sps:$4 sm:$0xff]  }
  0x6b   :  { %6373 = vmatpush1.bf16.msra.mxu0 %v9106_v47  ;;  %7029 = vmatpush1.bf16.msra.mxu1 %v9109_v48  ;;  %v9201_v47 = vld [vmem:[%s13788_s1 + $0x528] ss:$16 sps:$4 sm:$0xff]   ;;  %v9206_v48 = vld [vmem:[%s13788_s1 + $0x544] ss:$16 sps:$4 sm:$0xff]  }
  0x6c   :  { %6374 = vmatprep.subr.bf16.mxu0 %v9114_v49  ;;  %7030 = vmatprep.subr.bf16.mxu1 %v9117_v50  ;;  %v9209_v49 = vld [vmem:[%s13788_s1 + $0x54c] ss:$16 sps:$4 sm:$0xff]   ;;  %v9204_v50 = vld [vmem:[%s13788_s1 + $0x540] ss:$16 sps:$4 sm:$0xff]  }
  0x6f   :  { %6375 = vmatpush1.bf16.msra.mxu0 %v9112_v51  ;;  %7031 = vmatpush1.bf16.msra.mxu1 %v9115_v52  ;;  %v9207_v51 = vld [vmem:[%s13788_s1 + $0x548] ss:$16 sps:$4 sm:$0xff]   ;;  %v9212_v52 = vld [vmem:[%s13788_s1 + $0x564] ss:$16 sps:$4 sm:$0xff]  }
  0x70   :  { %6376 = vmatprep.subr.bf16.mxu0 %v9120_v53  ;;  %7032 = vmatprep.subr.bf16.mxu1 %v9123_v54  ;;  %v9215_v53 = vld [vmem:[%s13788_s1 + $0x56c] ss:$16 sps:$4 sm:$0xff]   ;;  %v9210_v54 = vld [vmem:[%s13788_s1 + $0x560] ss:$16 sps:$4 sm:$0xff]  }
  0x73   :  { %6377 = vmatpush1.bf16.msra.mxu0 %v9118_v55  ;;  %7033 = vmatpush1.bf16.msra.mxu1 %v9121_v56  ;;  %v9213_v55 = vld [vmem:[%s13788_s1 + $0x568] ss:$16 sps:$4 sm:$0xff]   ;;  %v9218_v56 = vld [vmem:[%s13788_s1 + $0x584] ss:$16 sps:$4 sm:$0xff]  }
  0x74   :  { %6378 = vmatprep.subr.bf16.mxu0 %v9126_v57  ;;  %7034 = vmatprep.subr.bf16.mxu1 %v9129_v58  ;;  %v9221_v57 = vld [vmem:[%s13788_s1 + $0x58c] ss:$16 sps:$4 sm:$0xff]   ;;  %v9216_v58 = vld [vmem:[%s13788_s1 + $0x580] ss:$16 sps:$4 sm:$0xff]  }
  0x77   :  { %6379 = vmatpush1.bf16.msra.mxu0 %v9124_v59  ;;  %7035 = vmatpush1.bf16.msra.mxu1 %v9127_v60  ;;  %v9219_v59 = vld [vmem:[%s13788_s1 + $0x588] ss:$16 sps:$4 sm:$0xff]   ;;  %v9224_v60 = vld [vmem:[%s13788_s1 + $0x5a4] ss:$16 sps:$4 sm:$0xff]  }
  0x78   :  { %6380 = vmatprep.subr.bf16.mxu0 %v9132_v61  ;;  %7036 = vmatprep.subr.bf16.mxu1 %v9135_v62  ;;  %v9227_v61 = vld [vmem:[%s13788_s1 + $0x5ac] ss:$16 sps:$4 sm:$0xff]   ;;  %v9222_v62 = vld [vmem:[%s13788_s1 + $0x5a0] ss:$16 sps:$4 sm:$0xff]  }
  0x7b   :  { %6381 = vmatpush1.bf16.msra.mxu0 %v9130_v63  ;;  %7037 = vmatpush1.bf16.msra.mxu1 %v9133_v0  ;;  %v9225_v63 = vld [vmem:[%s13788_s1 + $0x5a8] ss:$16 sps:$4 sm:$0xff]   ;;  %v9230_v0 = vld [vmem:[%s13788_s1 + $0x5c4] ss:$16 sps:$4 sm:$0xff]  }
  0x7c   :  { %6382 = vmatprep.subr.bf16.mxu0 %v9138_v1  ;;  %7038 = vmatprep.subr.bf16.mxu1 %v9141_v2  ;;  %v9233_v1 = vld [vmem:[%s13788_s1 + $0x5cc] ss:$16 sps:$4 sm:$0xff]   ;;  %v9228_v2 = vld [vmem:[%s13788_s1 + $0x5c0] ss:$16 sps:$4 sm:$0xff]  }
  0x7f   :  { %6383 = vmatpush1.bf16.msra.mxu0 %v9136_v3  ;;  %7039 = vmatpush1.bf16.msra.mxu1 %v9139_v4  ;;  %v9231_v3 = vld [vmem:[%s13788_s1 + $0x5c8] ss:$16 sps:$4 sm:$0xff]   ;;  %v9236_v4 = vld [vmem:[%s13788_s1 + $0x5e4] ss:$16 sps:$4 sm:$0xff]  }
  0x80   :  { %6393 = vmatprep.subr.bf16.mxu0 %v9146_v5  ;;  %7049 = vmatprep.subr.bf16.mxu1 %v9149_v6  ;;  %v9239_v5 = vld [vmem:[%s13788_s1 + $0x5ec] ss:$16 sps:$4 sm:$0xff]   ;;  %v9234_v6 = vld [vmem:[%s13788_s1 + $0x5e0] ss:$16 sps:$4 sm:$0xff]  }
  0x82   :  { %6385 = vmatmul.mubr.bf16.vlgmr.msra.gmra.mrb[0].mxu0 %v7769_v7  ;;  %7041 = vmatmul.mubr.bf16.vlgmr.msra.gmra.mrb[0].mxu1 %v7769_v7  ;;  %v9237_v7 = vld [vmem:[%s13788_s1 + $0x5e8] ss:$16 sps:$4 sm:$0xff]  }
  0x83   :  { %6394 = vmatpush1.bf16.msra.mxu0 %v9144_v8  ;;  %7050 = vmatpush1.bf16.msra.mxu1 %v9147_v9  ;;  %v9244_v8 = vld [vmem:[%s13788_s1 + $0x604] ss:$16 sps:$4 sm:$0xff]   ;;  %v9247_v9 = vld [vmem:[%s13788_s1 + $0x60c] ss:$16 sps:$4 sm:$0xff]  }
  0x84   :  { %6395 = vmatprep.subr.bf16.mxu0 %v9152_v10  ;;  %7051 = vmatprep.subr.bf16.mxu1 %v9155_v12  ;;  %v9242_v10 = vld [vmem:[%s13788_s1 + $0x600] ss:$16 sps:$4 sm:$0xff]   ;;  %v7771_v12 = vcombine.low %v10961_v11, %v10961_v11  ;;  %v9253_v11 = vld [vmem:[%s13788_s1 + $0x62c] ss:$16 sps:$4 sm:$0xff]  }
  0x85   :  { %6425 = vmatprep.mubr.bf16.mxu0 %v7772_v13  ;;  %7081 = vmatprep.mubr.bf16.mxu1 %v7772_v13  ;;  %v9245_v13 = vld [vmem:[%s13788_s1 + $0x608] ss:$16 sps:$4 sm:$0xff]  }
  0x87   :  { %6396 = vmatpush1.bf16.msra.mxu0 %v9150_v14  ;;  %7052 = vmatpush1.bf16.msra.mxu1 %v9153_v15  ;;  %v11159_v14 = vld [vmem:[%s13789_s0 + $0x18] sm:$0xff]  ;;  %v9250_v15 = vld [vmem:[%s13788_s1 + $0x624] ss:$16 sps:$4 sm:$0xff]  }
  0x88   :  { %6397 = vmatprep.subr.bf16.mxu0 %v9158_v16  ;;  %7053 = vmatprep.subr.bf16.mxu1 %v9161_v17  ;;  %v7774_v16 = vcombine.high %v11159_v14, %v11159_v14  ;;  %v9248_v17 = vld [vmem:[%s13788_s1 + $0x620] ss:$16 sps:$4 sm:$0xff]  }
  0x8b   :  { %6398 = vmatpush1.bf16.msra.mxu0 %v9156_v18  ;;  %7054 = vmatpush1.bf16.msra.mxu1 %v9159_v19  ;;  %v9251_v18 = vld [vmem:[%s13788_s1 + $0x628] ss:$16 sps:$4 sm:$0xff]   ;;  %v9256_v19 = vld [vmem:[%s13788_s1 + $0x644] ss:$16 sps:$4 sm:$0xff]  }
  0x8c   :  { %6399 = vmatprep.subr.bf16.mxu0 %v9164_v20  ;;  %7055 = vmatprep.subr.bf16.mxu1 %v9167_v21  ;;  %v9259_v20 = vld [vmem:[%s13788_s1 + $0x64c] ss:$16 sps:$4 sm:$0xff]   ;;  %v9254_v21 = vld [vmem:[%s13788_s1 + $0x640] ss:$16 sps:$4 sm:$0xff]  }
  0x8f   :  { %6400 = vmatpush1.bf16.msra.mxu0 %v9162_v22  ;;  %7056 = vmatpush1.bf16.msra.mxu1 %v9165_v23  ;;  %v9257_v22 = vld [vmem:[%s13788_s1 + $0x648] ss:$16 sps:$4 sm:$0xff]   ;;  %v9262_v23 = vld [vmem:[%s13788_s1 + $0x664] ss:$16 sps:$4 sm:$0xff]  }
  0x90   :  { %6401 = vmatprep.subr.bf16.mxu0 %v9170_v24  ;;  %7057 = vmatprep.subr.bf16.mxu1 %v9173_v25  ;;  %v9265_v24 = vld [vmem:[%s13788_s1 + $0x66c] ss:$16 sps:$4 sm:$0xff]   ;;  %v9260_v25 = vld [vmem:[%s13788_s1 + $0x660] ss:$16 sps:$4 sm:$0xff]  }
  0x93   :  { %6402 = vmatpush1.bf16.msra.mxu0 %v9168_v26  ;;  %7058 = vmatpush1.bf16.msra.mxu1 %v9171_v27  ;;  %v9263_v26 = vld [vmem:[%s13788_s1 + $0x668] ss:$16 sps:$4 sm:$0xff]   ;;  %v9268_v27 = vld [vmem:[%s13788_s1 + $0x684] ss:$16 sps:$4 sm:$0xff]  }
  0x94   :  { %6403 = vmatprep.subr.bf16.mxu0 %v9176_v28  ;;  %7059 = vmatprep.subr.bf16.mxu1 %v9179_v29  ;;  %v9271_v28 = vld [vmem:[%s13788_s1 + $0x68c] ss:$16 sps:$4 sm:$0xff]   ;;  %v9266_v29 = vld [vmem:[%s13788_s1 + $0x680] ss:$16 sps:$4 sm:$0xff]  }
  0x97   :  { %6404 = vmatpush1.bf16.msra.mxu0 %v9174_v30  ;;  %7060 = vmatpush1.bf16.msra.mxu1 %v9177_v31  ;;  %v9269_v30 = vld [vmem:[%s13788_s1 + $0x688] ss:$16 sps:$4 sm:$0xff]   ;;  %v9274_v31 = vld [vmem:[%s13788_s1 + $0x6a4] ss:$16 sps:$4 sm:$0xff]  }
  0x98   :  { %6405 = vmatprep.subr.bf16.mxu0 %v9182_v32  ;;  %7061 = vmatprep.subr.bf16.mxu1 %v9185_v33  ;;  %v9277_v32 = vld [vmem:[%s13788_s1 + $0x6ac] ss:$16 sps:$4 sm:$0xff]   ;;  %v9272_v33 = vld [vmem:[%s13788_s1 + $0x6a0] ss:$16 sps:$4 sm:$0xff]  }
  0x9b   :  { %6406 = vmatpush1.bf16.msra.mxu0 %v9180_v34  ;;  %7062 = vmatpush1.bf16.msra.mxu1 %v9183_v35  ;;  %v9275_v34 = vld [vmem:[%s13788_s1 + $0x6a8] ss:$16 sps:$4 sm:$0xff]   ;;  %v9280_v35 = vld [vmem:[%s13788_s1 + $0x6c4] ss:$16 sps:$4 sm:$0xff]  }
  0x9c   :  { %6407 = vmatprep.subr.bf16.mxu0 %v9188_v36  ;;  %7063 = vmatprep.subr.bf16.mxu1 %v9191_v37  ;;  %v9283_v36 = vld [vmem:[%s13788_s1 + $0x6cc] ss:$16 sps:$4 sm:$0xff]   ;;  %v9278_v37 = vld [vmem:[%s13788_s1 + $0x6c0] ss:$16 sps:$4 sm:$0xff]  }
  0x9f   :  { %6408 = vmatpush1.bf16.msra.mxu0 %v9186_v38  ;;  %7064 = vmatpush1.bf16.msra.mxu1 %v9189_v39  ;;  %v9281_v38 = vld [vmem:[%s13788_s1 + $0x6c8] ss:$16 sps:$4 sm:$0xff]   ;;  %v9286_v39 = vld [vmem:[%s13788_s1 + $0x6e4] ss:$16 sps:$4 sm:$0xff]  }
  0xa0   :  { %6409 = vmatprep.subr.bf16.mxu0 %v9194_v40  ;;  %7065 = vmatprep.subr.bf16.mxu1 %v9197_v41  ;;  %v9289_v40 = vld [vmem:[%s13788_s1 + $0x6ec] ss:$16 sps:$4 sm:$0xff]   ;;  %v9284_v41 = vld [vmem:[%s13788_s1 + $0x6e0] ss:$16 sps:$4 sm:$0xff]  }
  0xa3   :  { %6410 = vmatpush1.bf16.msra.mxu0 %v9192_v42  ;;  %7066 = vmatpush1.bf16.msra.mxu1 %v9195_v43  ;;  %v9287_v42 = vld [vmem:[%s13788_s1 + $0x6e8] ss:$16 sps:$4 sm:$0xff]   ;;  %v9292_v43 = vld [vmem:[%s13788_s1 + $0x704] ss:$16 sps:$4 sm:$0xff]  }
  0xa4   :  { %6411 = vmatprep.subr.bf16.mxu0 %v9200_v44  ;;  %7067 = vmatprep.subr.bf16.mxu1 %v9203_v45  ;;  %v9295_v44 = vld [vmem:[%s13788_s1 + $0x70c] ss:$16 sps:$4 sm:$0xff]   ;;  %v9290_v45 = vld [vmem:[%s13788_s1 + $0x700] ss:$16 sps:$4 sm:$0xff]  }
  0xa7   :  { %6412 = vmatpush1.bf16.msra.mxu0 %v9198_v46  ;;  %7068 = vmatpush1.bf16.msra.mxu1 %v9201_v47  ;;  %v9293_v46 = vld [vmem:[%s13788_s1 + $0x708] ss:$16 sps:$4 sm:$0xff]   ;;  %v9298_v47 = vld [vmem:[%s13788_s1 + $0x724] ss:$16 sps:$4 sm:$0xff]  }
  0xa8   :  { %6413 = vmatprep.subr.bf16.mxu0 %v9206_v48  ;;  %7069 = vmatprep.subr.bf16.mxu1 %v9209_v49  ;;  %v9301_v48 = vld [vmem:[%s13788_s1 + $0x72c] ss:$16 sps:$4 sm:$0xff]   ;;  %v9296_v49 = vld [vmem:[%s13788_s1 + $0x720] ss:$16 sps:$4 sm:$0xff]  }
  0xab   :  { %6414 = vmatpush1.bf16.msra.mxu0 %v9204_v50  ;;  %7070 = vmatpush1.bf16.msra.mxu1 %v9207_v51  ;;  %v9299_v50 = vld [vmem:[%s13788_s1 + $0x728] ss:$16 sps:$4 sm:$0xff]   ;;  %v9304_v51 = vld [vmem:[%s13788_s1 + $0x744] ss:$16 sps:$4 sm:$0xff]  }
  0xac   :  { %6415 = vmatprep.subr.bf16.mxu0 %v9212_v52  ;;  %7071 = vmatprep.subr.bf16.mxu1 %v9215_v53  ;;  %v9307_v52 = vld [vmem:[%s13788_s1 + $0x74c] ss:$16 sps:$4 sm:$0xff]   ;;  %v9302_v53 = vld [vmem:[%s13788_s1 + $0x740] ss:$16 sps:$4 sm:$0xff]  }
  0xaf   :  { %6416 = vmatpush1.bf16.msra.mxu0 %v9210_v54  ;;  %7072 = vmatpush1.bf16.msra.mxu1 %v9213_v55  ;;  %v9305_v54 = vld [vmem:[%s13788_s1 + $0x748] ss:$16 sps:$4 sm:$0xff]   ;;  %v9310_v55 = vld [vmem:[%s13788_s1 + $0x764] ss:$16 sps:$4 sm:$0xff]  }
  0xb0   :  { %6417 = vmatprep.subr.bf16.mxu0 %v9218_v56  ;;  %7073 = vmatprep.subr.bf16.mxu1 %v9221_v57  ;;  %v9313_v56 = vld [vmem:[%s13788_s1 + $0x76c] ss:$16 sps:$4 sm:$0xff]   ;;  %v9308_v57 = vld [vmem:[%s13788_s1 + $0x760] ss:$16 sps:$4 sm:$0xff]  }
  0xb3   :  { %6418 = vmatpush1.bf16.msra.mxu0 %v9216_v58  ;;  %7074 = vmatpush1.bf16.msra.mxu1 %v9219_v59  ;;  %v9311_v58 = vld [vmem:[%s13788_s1 + $0x768] ss:$16 sps:$4 sm:$0xff]   ;;  %v9316_v59 = vld [vmem:[%s13788_s1 + $0x784] ss:$16 sps:$4 sm:$0xff]  }
  0xb4   :  { %6419 = vmatprep.subr.bf16.mxu0 %v9224_v60  ;;  %7075 = vmatprep.subr.bf16.mxu1 %v9227_v61  ;;  %v9319_v60 = vld [vmem:[%s13788_s1 + $0x78c] ss:$16 sps:$4 sm:$0xff]   ;;  %v9314_v61 = vld [vmem:[%s13788_s1 + $0x780] ss:$16 sps:$4 sm:$0xff]  }
  0xb7   :  { %6420 = vmatpush1.bf16.msra.mxu0 %v9222_v62  ;;  %7076 = vmatpush1.bf16.msra.mxu1 %v9225_v63  ;;  %v9317_v62 = vld [vmem:[%s13788_s1 + $0x788] ss:$16 sps:$4 sm:$0xff]   ;;  %v9322_v63 = vld [vmem:[%s13788_s1 + $0x7a4] ss:$16 sps:$4 sm:$0xff]  }
  0xb8   :  { %6421 = vmatprep.subr.bf16.mxu0 %v9230_v0  ;;  %7077 = vmatprep.subr.bf16.mxu1 %v9233_v1  ;;  %v9325_v0 = vld [vmem:[%s13788_s1 + $0x7ac] ss:$16 sps:$4 sm:$0xff]   ;;  %v9320_v1 = vld [vmem:[%s13788_s1 + $0x7a0] ss:$16 sps:$4 sm:$0xff]  }
  0xbb   :  { %6422 = vmatpush1.bf16.msra.mxu0 %v9228_v2  ;;  %7078 = vmatpush1.bf16.msra.mxu1 %v9231_v3  ;;  %v9323_v2 = vld [vmem:[%s13788_s1 + $0x7a8] ss:$16 sps:$4 sm:$0xff]   ;;  %v9328_v3 = vld [vmem:[%s13788_s1 + $0x7c4] ss:$16 sps:$4 sm:$0xff]  }
  0xbc   :  { %6423 = vmatprep.subr.bf16.mxu0 %v9236_v4  ;;  %7079 = vmatprep.subr.bf16.mxu1 %v9239_v5  ;;  %v9331_v4 = vld [vmem:[%s13788_s1 + $0x7cc] ss:$16 sps:$4 sm:$0xff]   ;;  %v9326_v5 = vld [vmem:[%s13788_s1 + $0x7c0] ss:$16 sps:$4 sm:$0xff]  }
  0xbf   :  { %6424 = vmatpush1.bf16.msra.mxu0 %v9234_v6  ;;  %7080 = vmatpush1.bf16.msra.mxu1 %v9237_v7  ;;  %v9329_v6 = vld [vmem:[%s13788_s1 + $0x7c8] ss:$16 sps:$4 sm:$0xff]   ;;  %v9334_v7 = vld [vmem:[%s13788_s1 + $0x7e4] ss:$16 sps:$4 sm:$0xff]  }
  0xc0   :  { %6434 = vmatprep.subr.bf16.mxu0 %v9244_v8  ;;  %7090 = vmatprep.subr.bf16.mxu1 %v9247_v9  ;;  %v9337_v8 = vld [vmem:[%s13788_s1 + $0x7ec] ss:$16 sps:$4 sm:$0xff]   ;;  %v9332_v9 = vld [vmem:[%s13788_s1 + $0x7e0] ss:$16 sps:$4 sm:$0xff]  }
  0xc2   :  { %6426 = vmatmul.mubr.bf16.vlgmr.msra.gmra.mrb[0].mxu0 %v7771_v12  ;;  %7082 = vmatmul.mubr.bf16.vlgmr.msra.gmra.mrb[0].mxu1 %v7771_v12  ;;  %v9342_v12 = vld [vmem:[%s13788_s1 + $0x804] ss:$16 sps:$4 sm:$0xff]  }
  0xc3   :  { %6435 = vmatpush1.bf16.msra.mxu0 %v9242_v10  ;;  %7091 = vmatpush1.bf16.msra.mxu1 %v9245_v13  ;;  %v9335_v10 = vld [vmem:[%s13788_s1 + $0x7e8] ss:$16 sps:$4 sm:$0xff]   ;;  %v9345_v13 = vld [vmem:[%s13788_s1 + $0x80c] ss:$16 sps:$4 sm:$0xff]  }
  0xc4   :  { %6436 = vmatprep.subr.bf16.mxu0 %v9250_v15  ;;  %7092 = vmatprep.subr.bf16.mxu1 %v9253_v11  ;;  %v9340_v15 = vld [vmem:[%s13788_s1 + $0x800] ss:$16 sps:$4 sm:$0xff]   ;;  %v7773_v11 = vcombine.low %v11159_v14, %v11159_v14  ;;  %v9351_v14 = vld [vmem:[%s13788_s1 + $0x82c] ss:$16 sps:$4 sm:$0xff]  }
  0xc5   :  { %6466 = vmatprep.mubr.bf16.mxu0 %v7774_v16  ;;  %7122 = vmatprep.mubr.bf16.mxu1 %v7774_v16  ;;  %v11357_v16 = vld [vmem:[%s13789_s0 + $0x20] sm:$0xff] }
  0xc7   :  { %6437 = vmatpush1.bf16.msra.mxu0 %v9248_v17  ;;  %7093 = vmatpush1.bf16.msra.mxu1 %v9251_v18  ;;  %v9343_v17 = vld [vmem:[%s13788_s1 + $0x808] ss:$16 sps:$4 sm:$0xff]   ;;  %v9348_v18 = vld [vmem:[%s13788_s1 + $0x824] ss:$16 sps:$4 sm:$0xff]  }
  0xc8   :  { %6438 = vmatprep.subr.bf16.mxu0 %v9256_v19  ;;  %7094 = vmatprep.subr.bf16.mxu1 %v9259_v20  ;;  %v7776_v19 = vcombine.high %v11357_v16, %v11357_v16  ;;  %v9346_v20 = vld [vmem:[%s13788_s1 + $0x820] ss:$16 sps:$4 sm:$0xff]  }
  0xcb   :  { %6439 = vmatpush1.bf16.msra.mxu0 %v9254_v21  ;;  %7095 = vmatpush1.bf16.msra.mxu1 %v9257_v22  ;;  %v9349_v21 = vld [vmem:[%s13788_s1 + $0x828] ss:$16 sps:$4 sm:$0xff]   ;;  %v9354_v22 = vld [vmem:[%s13788_s1 + $0x844] ss:$16 sps:$4 sm:$0xff]  }
  0xcc   :  { %6440 = vmatprep.subr.bf16.mxu0 %v9262_v23  ;;  %7096 = vmatprep.subr.bf16.mxu1 %v9265_v24  ;;  %v9357_v23 = vld [vmem:[%s13788_s1 + $0x84c] ss:$16 sps:$4 sm:$0xff]   ;;  %v9352_v24 = vld [vmem:[%s13788_s1 + $0x840] ss:$16 sps:$4 sm:$0xff]  }
  0xcf   :  { %6441 = vmatpush1.bf16.msra.mxu0 %v9260_v25  ;;  %7097 = vmatpush1.bf16.msra.mxu1 %v9263_v26  ;;  %v9355_v25 = vld [vmem:[%s13788_s1 + $0x848] ss:$16 sps:$4 sm:$0xff]   ;;  %v9360_v26 = vld [vmem:[%s13788_s1 + $0x864] ss:$16 sps:$4 sm:$0xff]  }
  0xd0   :  { %6442 = vmatprep.subr.bf16.mxu0 %v9268_v27  ;;  %7098 = vmatprep.subr.bf16.mxu1 %v9271_v28  ;;  %v9363_v27 = vld [vmem:[%s13788_s1 + $0x86c] ss:$16 sps:$4 sm:$0xff]   ;;  %v9358_v28 = vld [vmem:[%s13788_s1 + $0x860] ss:$16 sps:$4 sm:$0xff]  }
  0xd3   :  { %6443 = vmatpush1.bf16.msra.mxu0 %v9266_v29  ;;  %7099 = vmatpush1.bf16.msra.mxu1 %v9269_v30  ;;  %v9361_v29 = vld [vmem:[%s13788_s1 + $0x868] ss:$16 sps:$4 sm:$0xff]   ;;  %v9366_v30 = vld [vmem:[%s13788_s1 + $0x884] ss:$16 sps:$4 sm:$0xff]  }
  0xd4   :  { %6444 = vmatprep.subr.bf16.mxu0 %v9274_v31  ;;  %7100 = vmatprep.subr.bf16.mxu1 %v9277_v32  ;;  %v9369_v31 = vld [vmem:[%s13788_s1 + $0x88c] ss:$16 sps:$4 sm:$0xff]   ;;  %v9364_v32 = vld [vmem:[%s13788_s1 + $0x880] ss:$16 sps:$4 sm:$0xff]  }
  0xd7   :  { %6445 = vmatpush1.bf16.msra.mxu0 %v9272_v33  ;;  %7101 = vmatpush1.bf16.msra.mxu1 %v9275_v34  ;;  %v9367_v33 = vld [vmem:[%s13788_s1 + $0x888] ss:$16 sps:$4 sm:$0xff]   ;;  %v9372_v34 = vld [vmem:[%s13788_s1 + $0x8a4] ss:$16 sps:$4 sm:$0xff]  }
  0xd8   :  { %6446 = vmatprep.subr.bf16.mxu0 %v9280_v35  ;;  %7102 = vmatprep.subr.bf16.mxu1 %v9283_v36  ;;  %v9375_v35 = vld [vmem:[%s13788_s1 + $0x8ac] ss:$16 sps:$4 sm:$0xff]   ;;  %v9370_v36 = vld [vmem:[%s13788_s1 + $0x8a0] ss:$16 sps:$4 sm:$0xff]  }
  0xdb   :  { %6447 = vmatpush1.bf16.msra.mxu0 %v9278_v37  ;;  %7103 = vmatpush1.bf16.msra.mxu1 %v9281_v38  ;;  %v9373_v37 = vld [vmem:[%s13788_s1 + $0x8a8] ss:$16 sps:$4 sm:$0xff]   ;;  %v9378_v38 = vld [vmem:[%s13788_s1 + $0x8c4] ss:$16 sps:$4 sm:$0xff]  }
  0xdc   :  { %6448 = vmatprep.subr.bf16.mxu0 %v9286_v39  ;;  %7104 = vmatprep.subr.bf16.mxu1 %v9289_v40  ;;  %v9381_v39 = vld [vmem:[%s13788_s1 + $0x8cc] ss:$16 sps:$4 sm:$0xff]   ;;  %v9376_v40 = vld [vmem:[%s13788_s1 + $0x8c0] ss:$16 sps:$4 sm:$0xff]  }
  0xdf   :  { %6449 = vmatpush1.bf16.msra.mxu0 %v9284_v41  ;;  %7105 = vmatpush1.bf16.msra.mxu1 %v9287_v42  ;;  %v9379_v41 = vld [vmem:[%s13788_s1 + $0x8c8] ss:$16 sps:$4 sm:$0xff]   ;;  %v9384_v42 = vld [vmem:[%s13788_s1 + $0x8e4] ss:$16 sps:$4 sm:$0xff]  }
  0xe0   :  { %6450 = vmatprep.subr.bf16.mxu0 %v9292_v43  ;;  %7106 = vmatprep.subr.bf16.mxu1 %v9295_v44  ;;  %v9387_v43 = vld [vmem:[%s13788_s1 + $0x8ec] ss:$16 sps:$4 sm:$0xff]   ;;  %v9382_v44 = vld [vmem:[%s13788_s1 + $0x8e0] ss:$16 sps:$4 sm:$0xff]  }
  0xe3   :  { %6451 = vmatpush1.bf16.msra.mxu0 %v9290_v45  ;;  %7107 = vmatpush1.bf16.msra.mxu1 %v9293_v46  ;;  %v9385_v45 = vld [vmem:[%s13788_s1 + $0x8e8] ss:$16 sps:$4 sm:$0xff]   ;;  %v9390_v46 = vld [vmem:[%s13788_s1 + $0x904] ss:$16 sps:$4 sm:$0xff]  }
  0xe4   :  { %6452 = vmatprep.subr.bf16.mxu0 %v9298_v47  ;;  %7108 = vmatprep.subr.bf16.mxu1 %v9301_v48  ;;  %v9393_v47 = vld [vmem:[%s13788_s1 + $0x90c] ss:$16 sps:$4 sm:$0xff]   ;;  %v9388_v48 = vld [vmem:[%s13788_s1 + $0x900] ss:$16 sps:$4 sm:$0xff]  }
  0xe7   :  { %6453 = vmatpush1.bf16.msra.mxu0 %v9296_v49  ;;  %7109 = vmatpush1.bf16.msra.mxu1 %v9299_v50  ;;  %v9391_v49 = vld [vmem:[%s13788_s1 + $0x908] ss:$16 sps:$4 sm:$0xff]   ;;  %v9396_v50 = vld [vmem:[%s13788_s1 + $0x924] ss:$16 sps:$4 sm:$0xff]  }
  0xe8   :  { %6454 = vmatprep.subr.bf16.mxu0 %v9304_v51  ;;  %7110 = vmatprep.subr.bf16.mxu1 %v9307_v52  ;;  %v9399_v51 = vld [vmem:[%s13788_s1 + $0x92c] ss:$16 sps:$4 sm:$0xff]   ;;  %v9394_v52 = vld [vmem:[%s13788_s1 + $0x920] ss:$16 sps:$4 sm:$0xff]  }
  0xeb   :  { %6455 = vmatpush1.bf16.msra.mxu0 %v9302_v53  ;;  %7111 = vmatpush1.bf16.msra.mxu1 %v9305_v54  ;;  %v9397_v53 = vld [vmem:[%s13788_s1 + $0x928] ss:$16 sps:$4 sm:$0xff]   ;;  %v9402_v54 = vld [vmem:[%s13788_s1 + $0x944] ss:$16 sps:$4 sm:$0xff]  }
  0xec   :  { %6456 = vmatprep.subr.bf16.mxu0 %v9310_v55  ;;  %7112 = vmatprep.subr.bf16.mxu1 %v9313_v56  ;;  %v9405_v55 = vld [vmem:[%s13788_s1 + $0x94c] ss:$16 sps:$4 sm:$0xff]   ;;  %v9400_v56 = vld [vmem:[%s13788_s1 + $0x940] ss:$16 sps:$4 sm:$0xff]  }
  0xef   :  { %6457 = vmatpush1.bf16.msra.mxu0 %v9308_v57  ;;  %7113 = vmatpush1.bf16.msra.mxu1 %v9311_v58  ;;  %v9403_v57 = vld [vmem:[%s13788_s1 + $0x948] ss:$16 sps:$4 sm:$0xff]   ;;  %v9408_v58 = vld [vmem:[%s13788_s1 + $0x964] ss:$16 sps:$4 sm:$0xff]  }
  0xf0   :  { %6458 = vmatprep.subr.bf16.mxu0 %v9316_v59  ;;  %7114 = vmatprep.subr.bf16.mxu1 %v9319_v60  ;;  %v9411_v59 = vld [vmem:[%s13788_s1 + $0x96c] ss:$16 sps:$4 sm:$0xff]   ;;  %v9406_v60 = vld [vmem:[%s13788_s1 + $0x960] ss:$16 sps:$4 sm:$0xff]  }
  0xf3   :  { %6459 = vmatpush1.bf16.msra.mxu0 %v9314_v61  ;;  %7115 = vmatpush1.bf16.msra.mxu1 %v9317_v62  ;;  %v9409_v61 = vld [vmem:[%s13788_s1 + $0x968] ss:$16 sps:$4 sm:$0xff]   ;;  %v9414_v62 = vld [vmem:[%s13788_s1 + $0x984] ss:$16 sps:$4 sm:$0xff]  }
  0xf4   :  { %6460 = vmatprep.subr.bf16.mxu0 %v9322_v63  ;;  %7116 = vmatprep.subr.bf16.mxu1 %v9325_v0  ;;  %v9417_v63 = vld [vmem:[%s13788_s1 + $0x98c] ss:$16 sps:$4 sm:$0xff]   ;;  %v9412_v0 = vld [vmem:[%s13788_s1 + $0x980] ss:$16 sps:$4 sm:$0xff]  }
  0xf7   :  { %6461 = vmatpush1.bf16.msra.mxu0 %v9320_v1  ;;  %7117 = vmatpush1.bf16.msra.mxu1 %v9323_v2  ;;  %v9415_v1 = vld [vmem:[%s13788_s1 + $0x988] ss:$16 sps:$4 sm:$0xff]   ;;  %v9420_v2 = vld [vmem:[%s13788_s1 + $0x9a4] ss:$16 sps:$4 sm:$0xff]  }
  0xf8   :  { %6462 = vmatprep.subr.bf16.mxu0 %v9328_v3  ;;  %7118 = vmatprep.subr.bf16.mxu1 %v9331_v4  ;;  %v9423_v3 = vld [vmem:[%s13788_s1 + $0x9ac] ss:$16 sps:$4 sm:$0xff]   ;;  %v9418_v4 = vld [vmem:[%s13788_s1 + $0x9a0] ss:$16 sps:$4 sm:$0xff]  }
  0xfb   :  { %6463 = vmatpush1.bf16.msra.mxu0 %v9326_v5  ;;  %7119 = vmatpush1.bf16.msra.mxu1 %v9329_v6  ;;  %v9421_v5 = vld [vmem:[%s13788_s1 + $0x9a8] ss:$16 sps:$4 sm:$0xff]   ;;  %v9426_v6 = vld [vmem:[%s13788_s1 + $0x9c4] ss:$16 sps:$4 sm:$0xff]  }
  0xfc   :  { %6464 = vmatprep.subr.bf16.mxu0 %v9334_v7  ;;  %7120 = vmatprep.subr.bf16.mxu1 %v9337_v8  ;;  %v9429_v7 = vld [vmem:[%s13788_s1 + $0x9cc] ss:$16 sps:$4 sm:$0xff]   ;;  %v9424_v8 = vld [vmem:[%s13788_s1 + $0x9c0] ss:$16 sps:$4 sm:$0xff]  }
  0xff   :  { %6465 = vmatpush1.bf16.msra.mxu0 %v9332_v9  ;;  %7121 = vmatpush1.bf16.msra.mxu1 %v9335_v10  ;;  %v9427_v9 = vld [vmem:[%s13788_s1 + $0x9c8] ss:$16 sps:$4 sm:$0xff]   ;;  %v9432_v10 = vld [vmem:[%s13788_s1 + $0x9e4] ss:$16 sps:$4 sm:$0xff]  }
 0x100   :  { %6475 = vmatprep.subr.bf16.mxu0 %v9342_v12  ;;  %7131 = vmatprep.subr.bf16.mxu1 %v9345_v13  ;;  %v9435_v12 = vld [vmem:[%s13788_s1 + $0x9ec] ss:$16 sps:$4 sm:$0xff]   ;;  %v9430_v13 = vld [vmem:[%s13788_s1 + $0x9e0] ss:$16 sps:$4 sm:$0xff]  }
 0x102   :  { %6467 = vmatmul.mubr.bf16.vlgmr.msra.gmra.mrb[0].mxu0 %v7773_v11  ;;  %7123 = vmatmul.mubr.bf16.vlgmr.msra.gmra.mrb[0].mxu1 %v7773_v11  ;;  %v9440_v11 = vld [vmem:[%s13788_s1 + $0xa04] ss:$16 sps:$4 sm:$0xff]  }
 0x103   :  { %6476 = vmatpush1.bf16.msra.mxu0 %v9340_v15  ;;  %7132 = vmatpush1.bf16.msra.mxu1 %v9343_v17  ;;  %v9433_v15 = vld [vmem:[%s13788_s1 + $0x9e8] ss:$16 sps:$4 sm:$0xff]   ;;  %v9443_v17 = vld [vmem:[%s13788_s1 + $0xa0c] ss:$16 sps:$4 sm:$0xff]  }
 0x104   :  { %6477 = vmatprep.subr.bf16.mxu0 %v9348_v18  ;;  %7133 = vmatprep.subr.bf16.mxu1 %v9351_v14  ;;  %v11553_v18 = vld [vmem:[%s13789_s0 + $0x28] sm:$0xff]  ;;  %v7775_v14 = vcombine.low %v11357_v16, %v11357_v16 }
 0x105   :  { %6507 = vmatprep.mubr.bf16.mxu0 %v7776_v19  ;;  %7163 = vmatprep.mubr.bf16.mxu1 %v7776_v19  ;;  %v9438_v19 = vld [vmem:[%s13788_s1 + $0xa00] ss:$16 sps:$4 sm:$0xff]   ;;  %v9449_v16 = vld [vmem:[%s13788_s1 + $0xa2c] ss:$16 sps:$4 sm:$0xff]  }
 0x107   :  { %6478 = vmatpush1.bf16.msra.mxu0 %v9346_v20  ;;  %7134 = vmatpush1.bf16.msra.mxu1 %v9349_v21  ;;  %v9441_v20 = vld [vmem:[%s13788_s1 + $0xa08] ss:$16 sps:$4 sm:$0xff]   ;;  %v9446_v21 = vld [vmem:[%s13788_s1 + $0xa24] ss:$16 sps:$4 sm:$0xff]  }
 0x108   :  { %6479 = vmatprep.subr.bf16.mxu0 %v9354_v22  ;;  %7135 = vmatprep.subr.bf16.mxu1 %v9357_v23  ;;  %v7778_v22 = vcombine.high %v11553_v18, %v11553_v18  ;;  %v9444_v23 = vld [vmem:[%s13788_s1 + $0xa20] ss:$16 sps:$4 sm:$0xff]  }
 0x10b   :  { %6480 = vmatpush1.bf16.msra.mxu0 %v9352_v24  ;;  %7136 = vmatpush1.bf16.msra.mxu1 %v9355_v25  ;;  %v9447_v24 = vld [vmem:[%s13788_s1 + $0xa28] ss:$16 sps:$4 sm:$0xff]   ;;  %v9452_v25 = vld [vmem:[%s13788_s1 + $0xa44] ss:$16 sps:$4 sm:$0xff]  }
 0x10c   :  { %6481 = vmatprep.subr.bf16.mxu0 %v9360_v26  ;;  %7137 = vmatprep.subr.bf16.mxu1 %v9363_v27  ;;  %v9455_v26 = vld [vmem:[%s13788_s1 + $0xa4c] ss:$16 sps:$4 sm:$0xff]   ;;  %v9450_v27 = vld [vmem:[%s13788_s1 + $0xa40] ss:$16 sps:$4 sm:$0xff]  }
 0x10f   :  { %6482 = vmatpush1.bf16.msra.mxu0 %v9358_v28  ;;  %7138 = vmatpush1.bf16.msra.mxu1 %v9361_v29  ;;  %v9453_v28 = vld [vmem:[%s13788_s1 + $0xa48] ss:$16 sps:$4 sm:$0xff]   ;;  %v9458_v29 = vld [vmem:[%s13788_s1 + $0xa64] ss:$16 sps:$4 sm:$0xff]  }
 0x110   :  { %6483 = vmatprep.subr.bf16.mxu0 %v9366_v30  ;;  %7139 = vmatprep.subr.bf16.mxu1 %v9369_v31  ;;  %v9461_v30 = vld [vmem:[%s13788_s1 + $0xa6c] ss:$16 sps:$4 sm:$0xff]   ;;  %v9456_v31 = vld [vmem:[%s13788_s1 + $0xa60] ss:$16 sps:$4 sm:$0xff]  }
 0x113   :  { %6484 = vmatpush1.bf16.msra.mxu0 %v9364_v32  ;;  %7140 = vmatpush1.bf16.msra.mxu1 %v9367_v33  ;;  %v9459_v32 = vld [vmem:[%s13788_s1 + $0xa68] ss:$16 sps:$4 sm:$0xff]   ;;  %v9464_v33 = vld [vmem:[%s13788_s1 + $0xa84] ss:$16 sps:$4 sm:$0xff]  }
 0x114   :  { %6485 = vmatprep.subr.bf16.mxu0 %v9372_v34  ;;  %7141 = vmatprep.subr.bf16.mxu1 %v9375_v35  ;;  %v9467_v34 = vld [vmem:[%s13788_s1 + $0xa8c] ss:$16 sps:$4 sm:$0xff]   ;;  %v9462_v35 = vld [vmem:[%s13788_s1 + $0xa80] ss:$16 sps:$4 sm:$0xff]  }
 0x117   :  { %6486 = vmatpush1.bf16.msra.mxu0 %v9370_v36  ;;  %7142 = vmatpush1.bf16.msra.mxu1 %v9373_v37  ;;  %v9465_v36 = vld [vmem:[%s13788_s1 + $0xa88] ss:$16 sps:$4 sm:$0xff]   ;;  %v9470_v37 = vld [vmem:[%s13788_s1 + $0xaa4] ss:$16 sps:$4 sm:$0xff]  }
 0x118   :  { %6487 = vmatprep.subr.bf16.mxu0 %v9378_v38  ;;  %7143 = vmatprep.subr.bf16.mxu1 %v9381_v39  ;;  %v9473_v38 = vld [vmem:[%s13788_s1 + $0xaac] ss:$16 sps:$4 sm:$0xff]   ;;  %v9468_v39 = vld [vmem:[%s13788_s1 + $0xaa0] ss:$16 sps:$4 sm:$0xff]  }
 0x11b   :  { %6488 = vmatpush1.bf16.msra.mxu0 %v9376_v40  ;;  %7144 = vmatpush1.bf16.msra.mxu1 %v9379_v41  ;;  %v9471_v40 = vld [vmem:[%s13788_s1 + $0xaa8] ss:$16 sps:$4 sm:$0xff]   ;;  %v9476_v41 = vld [vmem:[%s13788_s1 + $0xac4] ss:$16 sps:$4 sm:$0xff]  }
 0x11c   :  { %6489 = vmatprep.subr.bf16.mxu0 %v9384_v42  ;;  %7145 = vmatprep.subr.bf16.mxu1 %v9387_v43  ;;  %v9479_v42 = vld [vmem:[%s13788_s1 + $0xacc] ss:$16 sps:$4 sm:$0xff]   ;;  %v9474_v43 = vld [vmem:[%s13788_s1 + $0xac0] ss:$16 sps:$4 sm:$0xff]  }
 0x11f   :  { %6490 = vmatpush1.bf16.msra.mxu0 %v9382_v44  ;;  %7146 = vmatpush1.bf16.msra.mxu1 %v9385_v45  ;;  %v9477_v44 = vld [vmem:[%s13788_s1 + $0xac8] ss:$16 sps:$4 sm:$0xff]   ;;  %v9482_v45 = vld [vmem:[%s13788_s1 + $0xae4] ss:$16 sps:$4 sm:$0xff]  }
 0x120   :  { %6491 = vmatprep.subr.bf16.mxu0 %v9390_v46  ;;  %7147 = vmatprep.subr.bf16.mxu1 %v9393_v47  ;;  %v9485_v46 = vld [vmem:[%s13788_s1 + $0xaec] ss:$16 sps:$4 sm:$0xff]   ;;  %v9480_v47 = vld [vmem:[%s13788_s1 + $0xae0] ss:$16 sps:$4 sm:$0xff]  }
 0x123   :  { %6492 = vmatpush1.bf16.msra.mxu0 %v9388_v48  ;;  %7148 = vmatpush1.bf16.msra.mxu1 %v9391_v49  ;;  %v9483_v48 = vld [vmem:[%s13788_s1 + $0xae8] ss:$16 sps:$4 sm:$0xff]   ;;  %v9488_v49 = vld [vmem:[%s13788_s1 + $0xb04] ss:$16 sps:$4 sm:$0xff]  }
 0x124   :  { %6493 = vmatprep.subr.bf16.mxu0 %v9396_v50  ;;  %7149 = vmatprep.subr.bf16.mxu1 %v9399_v51  ;;  %v9491_v50 = vld [vmem:[%s13788_s1 + $0xb0c] ss:$16 sps:$4 sm:$0xff]   ;;  %v9486_v51 = vld [vmem:[%s13788_s1 + $0xb00] ss:$16 sps:$4 sm:$0xff]  }
 0x127   :  { %6494 = vmatpush1.bf16.msra.mxu0 %v9394_v52  ;;  %7150 = vmatpush1.bf16.msra.mxu1 %v9397_v53  ;;  %v9489_v52 = vld [vmem:[%s13788_s1 + $0xb08] ss:$16 sps:$4 sm:$0xff]   ;;  %v9494_v53 = vld [vmem:[%s13788_s1 + $0xb24] ss:$16 sps:$4 sm:$0xff]  }
 0x128   :  { %6495 = vmatprep.subr.bf16.mxu0 %v9402_v54  ;;  %7151 = vmatprep.subr.bf16.mxu1 %v9405_v55  ;;  %v9497_v54 = vld [vmem:[%s13788_s1 + $0xb2c] ss:$16 sps:$4 sm:$0xff]   ;;  %v9492_v55 = vld [vmem:[%s13788_s1 + $0xb20] ss:$16 sps:$4 sm:$0xff]  }
 0x12b   :  { %6496 = vmatpush1.bf16.msra.mxu0 %v9400_v56  ;;  %7152 = vmatpush1.bf16.msra.mxu1 %v9403_v57  ;;  %v9495_v56 = vld [vmem:[%s13788_s1 + $0xb28] ss:$16 sps:$4 sm:$0xff]   ;;  %v9500_v57 = vld [vmem:[%s13788_s1 + $0xb44] ss:$16 sps:$4 sm:$0xff]  }
 0x12c   :  { %6497 = vmatprep.subr.bf16.mxu0 %v9408_v58  ;;  %7153 = vmatprep.subr.bf16.mxu1 %v9411_v59  ;;  %v9503_v58 = vld [vmem:[%s13788_s1 + $0xb4c] ss:$16 sps:$4 sm:$0xff]   ;;  %v9498_v59 = vld [vmem:[%s13788_s1 + $0xb40] ss:$16 sps:$4 sm:$0xff]  }
 0x12f   :  { %6498 = vmatpush1.bf16.msra.mxu0 %v9406_v60  ;;  %7154 = vmatpush1.bf16.msra.mxu1 %v9409_v61  ;;  %v9501_v60 = vld [vmem:[%s13788_s1 + $0xb48] ss:$16 sps:$4 sm:$0xff]   ;;  %v9506_v61 = vld [vmem:[%s13788_s1 + $0xb64] ss:$16 sps:$4 sm:$0xff]  }
 0x130   :  { %6499 = vmatprep.subr.bf16.mxu0 %v9414_v62  ;;  %7155 = vmatprep.subr.bf16.mxu1 %v9417_v63  ;;  %v9509_v62 = vld [vmem:[%s13788_s1 + $0xb6c] ss:$16 sps:$4 sm:$0xff]   ;;  %v9504_v63 = vld [vmem:[%s13788_s1 + $0xb60] ss:$16 sps:$4 sm:$0xff]  }
 0x133   :  { %6500 = vmatpush1.bf16.msra.mxu0 %v9412_v0  ;;  %7156 = vmatpush1.bf16.msra.mxu1 %v9415_v1  ;;  %v9507_v0 = vld [vmem:[%s13788_s1 + $0xb68] ss:$16 sps:$4 sm:$0xff]   ;;  %v9512_v1 = vld [vmem:[%s13788_s1 + $0xb84] ss:$16 sps:$4 sm:$0xff]  }
 0x134   :  { %6501 = vmatprep.subr.bf16.mxu0 %v9420_v2  ;;  %7157 = vmatprep.subr.bf16.mxu1 %v9423_v3  ;;  %v9515_v2 = vld [vmem:[%s13788_s1 + $0xb8c] ss:$16 sps:$4 sm:$0xff]   ;;  %v9510_v3 = vld [vmem:[%s13788_s1 + $0xb80] ss:$16 sps:$4 sm:$0xff]  }
 0x137   :  { %6502 = vmatpush1.bf16.msra.mxu0 %v9418_v4  ;;  %7158 = vmatpush1.bf16.msra.mxu1 %v9421_v5  ;;  %v9513_v4 = vld [vmem:[%s13788_s1 + $0xb88] ss:$16 sps:$4 sm:$0xff]   ;;  %v9518_v5 = vld [vmem:[%s13788_s1 + $0xba4] ss:$16 sps:$4 sm:$0xff]  }
 0x138   :  { %6503 = vmatprep.subr.bf16.mxu0 %v9426_v6  ;;  %7159 = vmatprep.subr.bf16.mxu1 %v9429_v7  ;;  %v9521_v6 = vld [vmem:[%s13788_s1 + $0xbac] ss:$16 sps:$4 sm:$0xff]   ;;  %v9516_v7 = vld [vmem:[%s13788_s1 + $0xba0] ss:$16 sps:$4 sm:$0xff]  }
 0x13b   :  { %6504 = vmatpush1.bf16.msra.mxu0 %v9424_v8  ;;  %7160 = vmatpush1.bf16.msra.mxu1 %v9427_v9  ;;  %v9519_v8 = vld [vmem:[%s13788_s1 + $0xba8] ss:$16 sps:$4 sm:$0xff]   ;;  %v9524_v9 = vld [vmem:[%s13788_s1 + $0xbc4] ss:$16 sps:$4 sm:$0xff]  }
 0x13c   :  { %6505 = vmatprep.subr.bf16.mxu0 %v9432_v10  ;;  %7161 = vmatprep.subr.bf16.mxu1 %v9435_v12  ;;  %v9527_v10 = vld [vmem:[%s13788_s1 + $0xbcc] ss:$16 sps:$4 sm:$0xff]   ;;  %v9522_v12 = vld [vmem:[%s13788_s1 + $0xbc0] ss:$16 sps:$4 sm:$0xff]  }
 0x13f   :  { %6506 = vmatpush1.bf16.msra.mxu0 %v9430_v13  ;;  %7162 = vmatpush1.bf16.msra.mxu1 %v9433_v15  ;;  %v9525_v13 = vld [vmem:[%s13788_s1 + $0xbc8] ss:$16 sps:$4 sm:$0xff]   ;;  %v9530_v15 = vld [vmem:[%s13788_s1 + $0xbe4] ss:$16 sps:$4 sm:$0xff]  }
 0x140   :  { %6516 = vmatprep.subr.bf16.mxu0 %v9440_v11  ;;  %7172 = vmatprep.subr.bf16.mxu1 %v9443_v17  ;;  %v9533_v11 = vld [vmem:[%s13788_s1 + $0xbec] ss:$16 sps:$4 sm:$0xff]   ;;  %v9528_v17 = vld [vmem:[%s13788_s1 + $0xbe0] ss:$16 sps:$4 sm:$0xff]  }
 0x142   :  { %6508 = vmatmul.mubr.bf16.vlgmr.msra.gmra.mrb[0].mxu0 %v7775_v14  ;;  %7164 = vmatmul.mubr.bf16.vlgmr.msra.gmra.mrb[0].mxu1 %v7775_v14  ;;  %v9531_v14 = vld [vmem:[%s13788_s1 + $0xbe8] ss:$16 sps:$4 sm:$0xff]  }
 0x143   :  { %6517 = vmatpush1.bf16.msra.mxu0 %v9438_v19  ;;  %7173 = vmatpush1.bf16.msra.mxu1 %v9441_v20  ;;  %v9538_v19 = vld [vmem:[%s13788_s1 + $0xc04] ss:$16 sps:$4 sm:$0xff]   ;;  %v9541_v20 = vld [vmem:[%s13788_s1 + $0xc0c] ss:$16 sps:$4 sm:$0xff]  }
 0x144   :  { %6518 = vmatprep.subr.bf16.mxu0 %v9446_v21  ;;  %7174 = vmatprep.subr.bf16.mxu1 %v9449_v16  ;;  %v11754_v21 = vld [vmem:[%s13789_s0 + $0x30] sm:$0xff]  ;;  %v7777_v16 = vcombine.low %v11553_v18, %v11553_v18  ;;  %v9547_v18 = vld [vmem:[%s13788_s1 + $0xc2c] ss:$16 sps:$4 sm:$0xff]  }
 0x145   :  { %6548 = vmatprep.mubr.bf16.mxu0 %v7778_v22  ;;  %7204 = vmatprep.mubr.bf16.mxu1 %v7778_v22  ;;  %v9536_v22 = vld [vmem:[%s13788_s1 + $0xc00] ss:$16 sps:$4 sm:$0xff]  }
 0x147   :  { %6519 = vmatpush1.bf16.msra.mxu0 %v9444_v23  ;;  %7175 = vmatpush1.bf16.msra.mxu1 %v9447_v24  ;;  %v9539_v23 = vld [vmem:[%s13788_s1 + $0xc08] ss:$16 sps:$4 sm:$0xff]   ;;  %v9544_v24 = vld [vmem:[%s13788_s1 + $0xc24] ss:$16 sps:$4 sm:$0xff]  }
 0x148   :  { %6520 = vmatprep.subr.bf16.mxu0 %v9452_v25  ;;  %7176 = vmatprep.subr.bf16.mxu1 %v9455_v26  ;;  %v7780_v25 = vcombine.high %v11754_v21, %v11754_v21  ;;  %v9542_v26 = vld [vmem:[%s13788_s1 + $0xc20] ss:$16 sps:$4 sm:$0xff]  }
 0x14b   :  { %6521 = vmatpush1.bf16.msra.mxu0 %v9450_v27  ;;  %7177 = vmatpush1.bf16.msra.mxu1 %v9453_v28  ;;  %v9545_v27 = vld [vmem:[%s13788_s1 + $0xc28] ss:$16 sps:$4 sm:$0xff]   ;;  %v9550_v28 = vld [vmem:[%s13788_s1 + $0xc44] ss:$16 sps:$4 sm:$0xff]  }
 0x14c   :  { %6522 = vmatprep.subr.bf16.mxu0 %v9458_v29  ;;  %7178 = vmatprep.subr.bf16.mxu1 %v9461_v30  ;;  %v9553_v29 = vld [vmem:[%s13788_s1 + $0xc4c] ss:$16 sps:$4 sm:$0xff]   ;;  %v9548_v30 = vld [vmem:[%s13788_s1 + $0xc40] ss:$16 sps:$4 sm:$0xff]  }
 0x14f   :  { %6523 = vmatpush1.bf16.msra.mxu0 %v9456_v31  ;;  %7179 = vmatpush1.bf16.msra.mxu1 %v9459_v32  ;;  %v9551_v31 = vld [vmem:[%s13788_s1 + $0xc48] ss:$16 sps:$4 sm:$0xff]   ;;  %v9556_v32 = vld [vmem:[%s13788_s1 + $0xc64] ss:$16 sps:$4 sm:$0xff]  }
 0x150   :  { %6524 = vmatprep.subr.bf16.mxu0 %v9464_v33  ;;  %7180 = vmatprep.subr.bf16.mxu1 %v9467_v34  ;;  %v9559_v33 = vld [vmem:[%s13788_s1 + $0xc6c] ss:$16 sps:$4 sm:$0xff]   ;;  %v9554_v34 = vld [vmem:[%s13788_s1 + $0xc60] ss:$16 sps:$4 sm:$0xff]  }
 0x153   :  { %6525 = vmatpush1.bf16.msra.mxu0 %v9462_v35  ;;  %7181 = vmatpush1.bf16.msra.mxu1 %v9465_v36  ;;  %v9557_v35 = vld [vmem:[%s13788_s1 + $0xc68] ss:$16 sps:$4 sm:$0xff]   ;;  %v9562_v36 = vld [vmem:[%s13788_s1 + $0xc84] ss:$16 sps:$4 sm:$0xff]  }
 0x154   :  { %6526 = vmatprep.subr.bf16.mxu0 %v9470_v37  ;;  %7182 = vmatprep.subr.bf16.mxu1 %v9473_v38  ;;  %v9565_v37 = vld [vmem:[%s13788_s1 + $0xc8c] ss:$16 sps:$4 sm:$0xff]   ;;  %v9560_v38 = vld [vmem:[%s13788_s1 + $0xc80] ss:$16 sps:$4 sm:$0xff]  }
 0x157   :  { %6527 = vmatpush1.bf16.msra.mxu0 %v9468_v39  ;;  %7183 = vmatpush1.bf16.msra.mxu1 %v9471_v40  ;;  %v9563_v39 = vld [vmem:[%s13788_s1 + $0xc88] ss:$16 sps:$4 sm:$0xff]   ;;  %v9568_v40 = vld [vmem:[%s13788_s1 + $0xca4] ss:$16 sps:$4 sm:$0xff]  }
 0x158   :  { %6528 = vmatprep.subr.bf16.mxu0 %v9476_v41  ;;  %7184 = vmatprep.subr.bf16.mxu1 %v9479_v42  ;;  %v9571_v41 = vld [vmem:[%s13788_s1 + $0xcac] ss:$16 sps:$4 sm:$0xff]   ;;  %v9566_v42 = vld [vmem:[%s13788_s1 + $0xca0] ss:$16 sps:$4 sm:$0xff]  }
 0x15b   :  { %6529 = vmatpush1.bf16.msra.mxu0 %v9474_v43  ;;  %7185 = vmatpush1.bf16.msra.mxu1 %v9477_v44  ;;  %v9569_v43 = vld [vmem:[%s13788_s1 + $0xca8] ss:$16 sps:$4 sm:$0xff]   ;;  %v9574_v44 = vld [vmem:[%s13788_s1 + $0xcc4] ss:$16 sps:$4 sm:$0xff]  }
 0x15c   :  { %6530 = vmatprep.subr.bf16.mxu0 %v9482_v45  ;;  %7186 = vmatprep.subr.bf16.mxu1 %v9485_v46  ;;  %v9577_v45 = vld [vmem:[%s13788_s1 + $0xccc] ss:$16 sps:$4 sm:$0xff]   ;;  %v9572_v46 = vld [vmem:[%s13788_s1 + $0xcc0] ss:$16 sps:$4 sm:$0xff]  }
 0x15f   :  { %6531 = vmatpush1.bf16.msra.mxu0 %v9480_v47  ;;  %7187 = vmatpush1.bf16.msra.mxu1 %v9483_v48  ;;  %v9575_v47 = vld [vmem:[%s13788_s1 + $0xcc8] ss:$16 sps:$4 sm:$0xff]   ;;  %v9580_v48 = vld [vmem:[%s13788_s1 + $0xce4] ss:$16 sps:$4 sm:$0xff]  }
 0x160   :  { %6532 = vmatprep.subr.bf16.mxu0 %v9488_v49  ;;  %7188 = vmatprep.subr.bf16.mxu1 %v9491_v50  ;;  %v9583_v49 = vld [vmem:[%s13788_s1 + $0xcec] ss:$16 sps:$4 sm:$0xff]   ;;  %v9578_v50 = vld [vmem:[%s13788_s1 + $0xce0] ss:$16 sps:$4 sm:$0xff]  }
 0x163   :  { %6533 = vmatpush1.bf16.msra.mxu0 %v9486_v51  ;;  %7189 = vmatpush1.bf16.msra.mxu1 %v9489_v52  ;;  %v9581_v51 = vld [vmem:[%s13788_s1 + $0xce8] ss:$16 sps:$4 sm:$0xff]   ;;  %v9586_v52 = vld [vmem:[%s13788_s1 + $0xd04] ss:$16 sps:$4 sm:$0xff]  }
 0x164   :  { %6534 = vmatprep.subr.bf16.mxu0 %v9494_v53  ;;  %7190 = vmatprep.subr.bf16.mxu1 %v9497_v54  ;;  %v9589_v53 = vld [vmem:[%s13788_s1 + $0xd0c] ss:$16 sps:$4 sm:$0xff]   ;;  %v9584_v54 = vld [vmem:[%s13788_s1 + $0xd00] ss:$16 sps:$4 sm:$0xff]  }
 0x167   :  { %6535 = vmatpush1.bf16.msra.mxu0 %v9492_v55  ;;  %7191 = vmatpush1.bf16.msra.mxu1 %v9495_v56  ;;  %v9587_v55 = vld [vmem:[%s13788_s1 + $0xd08] ss:$16 sps:$4 sm:$0xff]   ;;  %v9592_v56 = vld [vmem:[%s13788_s1 + $0xd24] ss:$16 sps:$4 sm:$0xff]  }
 0x168   :  { %6536 = vmatprep.subr.bf16.mxu0 %v9500_v57  ;;  %7192 = vmatprep.subr.bf16.mxu1 %v9503_v58  ;;  %v9595_v57 = vld [vmem:[%s13788_s1 + $0xd2c] ss:$16 sps:$4 sm:$0xff]   ;;  %v9590_v58 = vld [vmem:[%s13788_s1 + $0xd20] ss:$16 sps:$4 sm:$0xff]  }
 0x16b   :  { %6537 = vmatpush1.bf16.msra.mxu0 %v9498_v59  ;;  %7193 = vmatpush1.bf16.msra.mxu1 %v9501_v60  ;;  %v9593_v59 = vld [vmem:[%s13788_s1 + $0xd28] ss:$16 sps:$4 sm:$0xff]   ;;  %v9598_v60 = vld [vmem:[%s13788_s1 + $0xd44] ss:$16 sps:$4 sm:$0xff]  }
 0x16c   :  { %6538 = vmatprep.subr.bf16.mxu0 %v9506_v61  ;;  %7194 = vmatprep.subr.bf16.mxu1 %v9509_v62  ;;  %v9601_v61 = vld [vmem:[%s13788_s1 + $0xd4c] ss:$16 sps:$4 sm:$0xff]   ;;  %v9596_v62 = vld [vmem:[%s13788_s1 + $0xd40] ss:$16 sps:$4 sm:$0xff]  }
 0x16f   :  { %6539 = vmatpush1.bf16.msra.mxu0 %v9504_v63  ;;  %7195 = vmatpush1.bf16.msra.mxu1 %v9507_v0  ;;  %v9599_v63 = vld [vmem:[%s13788_s1 + $0xd48] ss:$16 sps:$4 sm:$0xff]   ;;  %v9604_v0 = vld [vmem:[%s13788_s1 + $0xd64] ss:$16 sps:$4 sm:$0xff]  }
 0x170   :  { %6540 = vmatprep.subr.bf16.mxu0 %v9512_v1  ;;  %7196 = vmatprep.subr.bf16.mxu1 %v9515_v2  ;;  %v9607_v1 = vld [vmem:[%s13788_s1 + $0xd6c] ss:$16 sps:$4 sm:$0xff]   ;;  %v9602_v2 = vld [vmem:[%s13788_s1 + $0xd60] ss:$16 sps:$4 sm:$0xff]  }
 0x173   :  { %6541 = vmatpush1.bf16.msra.mxu0 %v9510_v3  ;;  %7197 = vmatpush1.bf16.msra.mxu1 %v9513_v4  ;;  %v9605_v3 = vld [vmem:[%s13788_s1 + $0xd68] ss:$16 sps:$4 sm:$0xff]   ;;  %v9610_v4 = vld [vmem:[%s13788_s1 + $0xd84] ss:$16 sps:$4 sm:$0xff]  }
 0x174   :  { %6542 = vmatprep.subr.bf16.mxu0 %v9518_v5  ;;  %7198 = vmatprep.subr.bf16.mxu1 %v9521_v6  ;;  %v9613_v5 = vld [vmem:[%s13788_s1 + $0xd8c] ss:$16 sps:$4 sm:$0xff]   ;;  %v9608_v6 = vld [vmem:[%s13788_s1 + $0xd80] ss:$16 sps:$4 sm:$0xff]  }
 0x177   :  { %6543 = vmatpush1.bf16.msra.mxu0 %v9516_v7  ;;  %7199 = vmatpush1.bf16.msra.mxu1 %v9519_v8  ;;  %v9611_v7 = vld [vmem:[%s13788_s1 + $0xd88] ss:$16 sps:$4 sm:$0xff]   ;;  %v9616_v8 = vld [vmem:[%s13788_s1 + $0xda4] ss:$16 sps:$4 sm:$0xff]  }
 0x178   :  { %6544 = vmatprep.subr.bf16.mxu0 %v9524_v9  ;;  %7200 = vmatprep.subr.bf16.mxu1 %v9527_v10  ;;  %v9619_v9 = vld [vmem:[%s13788_s1 + $0xdac] ss:$16 sps:$4 sm:$0xff]   ;;  %v9614_v10 = vld [vmem:[%s13788_s1 + $0xda0] ss:$16 sps:$4 sm:$0xff]  }
 0x17b   :  { %6545 = vmatpush1.bf16.msra.mxu0 %v9522_v12  ;;  %7201 = vmatpush1.bf16.msra.mxu1 %v9525_v13  ;;  %v9617_v12 = vld [vmem:[%s13788_s1 + $0xda8] ss:$16 sps:$4 sm:$0xff]   ;;  %v9622_v13 = vld [vmem:[%s13788_s1 + $0xdc4] ss:$16 sps:$4 sm:$0xff]  }
 0x17c   :  { %6546 = vmatprep.subr.bf16.mxu0 %v9530_v15  ;;  %7202 = vmatprep.subr.bf16.mxu1 %v9533_v11  ;;  %v9625_v15 = vld [vmem:[%s13788_s1 + $0xdcc] ss:$16 sps:$4 sm:$0xff]   ;;  %v9620_v11 = vld [vmem:[%s13788_s1 + $0xdc0] ss:$16 sps:$4 sm:$0xff]  }
 0x17f   :  { %6547 = vmatpush1.bf16.msra.mxu0 %v9528_v17  ;;  %7203 = vmatpush1.bf16.msra.mxu1 %v9531_v14  ;;  %v9623_v17 = vld [vmem:[%s13788_s1 + $0xdc8] ss:$16 sps:$4 sm:$0xff]   ;;  %v9628_v14 = vld [vmem:[%s13788_s1 + $0xde4] ss:$16 sps:$4 sm:$0xff]  }
 0x180   :  { %6557 = vmatprep.subr.bf16.mxu0 %v9538_v19  ;;  %7213 = vmatprep.subr.bf16.mxu1 %v9541_v20  ;;  %v9631_v19 = vld [vmem:[%s13788_s1 + $0xdec] ss:$16 sps:$4 sm:$0xff]   ;;  %v9626_v20 = vld [vmem:[%s13788_s1 + $0xde0] ss:$16 sps:$4 sm:$0xff]  }
 0x182   :  { %6549 = vmatmul.mubr.bf16.vlgmr.msra.gmra.mrb[0].mxu0 %v7777_v16  ;;  %7205 = vmatmul.mubr.bf16.vlgmr.msra.gmra.mrb[0].mxu1 %v7777_v16  ;;  %v9629_v16 = vld [vmem:[%s13788_s1 + $0xde8] ss:$16 sps:$4 sm:$0xff]  }
 0x183   :  { %6558 = vmatpush1.bf16.msra.mxu0 %v9536_v22  ;;  %7214 = vmatpush1.bf16.msra.mxu1 %v9539_v23  ;;  %v9636_v22 = vld [vmem:[%s13788_s1 + $0xe04] ss:$16 sps:$4 sm:$0xff]   ;;  %v9639_v23 = vld [vmem:[%s13788_s1 + $0xe0c] ss:$16 sps:$4 sm:$0xff]  }
 0x184   :  { %6559 = vmatprep.subr.bf16.mxu0 %v9544_v24  ;;  %7215 = vmatprep.subr.bf16.mxu1 %v9547_v18  ;;  %v11955_v24 = vld [vmem:[%s13789_s0 + $0x38] sm:$0xff]  ;;  %v7779_v18 = vcombine.low %v11754_v21, %v11754_v21 }
 0x185   :  { %6589 = vmatprep.mubr.bf16.mxu0 %v7780_v25  ;;  %7245 = vmatprep.mubr.bf16.mxu1 %v7780_v25  ;;  %v9634_v25 = vld [vmem:[%s13788_s1 + $0xe00] ss:$16 sps:$4 sm:$0xff]   ;;  %v9645_v21 = vld [vmem:[%s13788_s1 + $0xe2c] ss:$16 sps:$4 sm:$0xff]  }
 0x187   :  { %6560 = vmatpush1.bf16.msra.mxu0 %v9542_v26  ;;  %7216 = vmatpush1.bf16.msra.mxu1 %v9545_v27  ;;  %v9637_v26 = vld [vmem:[%s13788_s1 + $0xe08] ss:$16 sps:$4 sm:$0xff]   ;;  %v9642_v27 = vld [vmem:[%s13788_s1 + $0xe24] ss:$16 sps:$4 sm:$0xff]  }
 0x188   :  { %6561 = vmatprep.subr.bf16.mxu0 %v9550_v28  ;;  %7217 = vmatprep.subr.bf16.mxu1 %v9553_v29  ;;  %v7782_v28 = vcombine.high %v11955_v24, %v11955_v24  ;;  %v9640_v29 = vld [vmem:[%s13788_s1 + $0xe20] ss:$16 sps:$4 sm:$0xff]  }
 0x18b   :  { %6562 = vmatpush1.bf16.msra.mxu0 %v9548_v30  ;;  %7218 = vmatpush1.bf16.msra.mxu1 %v9551_v31  ;;  %v9643_v30 = vld [vmem:[%s13788_s1 + $0xe28] ss:$16 sps:$4 sm:$0xff]   ;;  %v9648_v31 = vld [vmem:[%s13788_s1 + $0xe44] ss:$16 sps:$4 sm:$0xff]  }
 0x18c   :  { %6563 = vmatprep.subr.bf16.mxu0 %v9556_v32  ;;  %7219 = vmatprep.subr.bf16.mxu1 %v9559_v33  ;;  %v9651_v32 = vld [vmem:[%s13788_s1 + $0xe4c] ss:$16 sps:$4 sm:$0xff]   ;;  %v9646_v33 = vld [vmem:[%s13788_s1 + $0xe40] ss:$16 sps:$4 sm:$0xff]  }
 0x18f   :  { %6564 = vmatpush1.bf16.msra.mxu0 %v9554_v34  ;;  %7220 = vmatpush1.bf16.msra.mxu1 %v9557_v35  ;;  %v9649_v34 = vld [vmem:[%s13788_s1 + $0xe48] ss:$16 sps:$4 sm:$0xff]   ;;  %v9654_v35 = vld [vmem:[%s13788_s1 + $0xe64] ss:$16 sps:$4 sm:$0xff]  }
 0x190   :  { %6565 = vmatprep.subr.bf16.mxu0 %v9562_v36  ;;  %7221 = vmatprep.subr.bf16.mxu1 %v9565_v37  ;;  %v9657_v36 = vld [vmem:[%s13788_s1 + $0xe6c] ss:$16 sps:$4 sm:$0xff]   ;;  %v9652_v37 = vld [vmem:[%s13788_s1 + $0xe60] ss:$16 sps:$4 sm:$0xff]  }
 0x193   :  { %6566 = vmatpush1.bf16.msra.mxu0 %v9560_v38  ;;  %7222 = vmatpush1.bf16.msra.mxu1 %v9563_v39  ;;  %v9655_v38 = vld [vmem:[%s13788_s1 + $0xe68] ss:$16 sps:$4 sm:$0xff]   ;;  %v9660_v39 = vld [vmem:[%s13788_s1 + $0xe84] ss:$16 sps:$4 sm:$0xff]  }
 0x194   :  { %6567 = vmatprep.subr.bf16.mxu0 %v9568_v40  ;;  %7223 = vmatprep.subr.bf16.mxu1 %v9571_v41  ;;  %v9663_v40 = vld [vmem:[%s13788_s1 + $0xe8c] ss:$16 sps:$4 sm:$0xff]   ;;  %v9658_v41 = vld [vmem:[%s13788_s1 + $0xe80] ss:$16 sps:$4 sm:$0xff]  }
 0x197   :  { %6568 = vmatpush1.bf16.msra.mxu0 %v9566_v42  ;;  %7224 = vmatpush1.bf16.msra.mxu1 %v9569_v43  ;;  %v9661_v42 = vld [vmem:[%s13788_s1 + $0xe88] ss:$16 sps:$4 sm:$0xff]   ;;  %v9666_v43 = vld [vmem:[%s13788_s1 + $0xea4] ss:$16 sps:$4 sm:$0xff]  }
 0x198   :  { %6569 = vmatprep.subr.bf16.mxu0 %v9574_v44  ;;  %7225 = vmatprep.subr.bf16.mxu1 %v9577_v45  ;;  %v9669_v44 = vld [vmem:[%s13788_s1 + $0xeac] ss:$16 sps:$4 sm:$0xff]   ;;  %v9664_v45 = vld [vmem:[%s13788_s1 + $0xea0] ss:$16 sps:$4 sm:$0xff]  }
 0x19b   :  { %6570 = vmatpush1.bf16.msra.mxu0 %v9572_v46  ;;  %7226 = vmatpush1.bf16.msra.mxu1 %v9575_v47  ;;  %v9667_v46 = vld [vmem:[%s13788_s1 + $0xea8] ss:$16 sps:$4 sm:$0xff]   ;;  %v9672_v47 = vld [vmem:[%s13788_s1 + $0xec4] ss:$16 sps:$4 sm:$0xff]  }
 0x19c   :  { %6571 = vmatprep.subr.bf16.mxu0 %v9580_v48  ;;  %7227 = vmatprep.subr.bf16.mxu1 %v9583_v49  ;;  %v9675_v48 = vld [vmem:[%s13788_s1 + $0xecc] ss:$16 sps:$4 sm:$0xff]   ;;  %v9670_v49 = vld [vmem:[%s13788_s1 + $0xec0] ss:$16 sps:$4 sm:$0xff]  }
 0x19f   :  { %6572 = vmatpush1.bf16.msra.mxu0 %v9578_v50  ;;  %7228 = vmatpush1.bf16.msra.mxu1 %v9581_v51  ;;  %v9673_v50 = vld [vmem:[%s13788_s1 + $0xec8] ss:$16 sps:$4 sm:$0xff]   ;;  %v9678_v51 = vld [vmem:[%s13788_s1 + $0xee4] ss:$16 sps:$4 sm:$0xff]  }
 0x1a0   :  { %6573 = vmatprep.subr.bf16.mxu0 %v9586_v52  ;;  %7229 = vmatprep.subr.bf16.mxu1 %v9589_v53  ;;  %v9681_v52 = vld [vmem:[%s13788_s1 + $0xeec] ss:$16 sps:$4 sm:$0xff]   ;;  %v9676_v53 = vld [vmem:[%s13788_s1 + $0xee0] ss:$16 sps:$4 sm:$0xff]  }
 0x1a3   :  { %6574 = vmatpush1.bf16.msra.mxu0 %v9584_v54  ;;  %7230 = vmatpush1.bf16.msra.mxu1 %v9587_v55  ;;  %v9679_v54 = vld [vmem:[%s13788_s1 + $0xee8] ss:$16 sps:$4 sm:$0xff]   ;;  %v9684_v55 = vld [vmem:[%s13788_s1 + $0xf04] ss:$16 sps:$4 sm:$0xff]  }
 0x1a4   :  { %6575 = vmatprep.subr.bf16.mxu0 %v9592_v56  ;;  %7231 = vmatprep.subr.bf16.mxu1 %v9595_v57  ;;  %v9687_v56 = vld [vmem:[%s13788_s1 + $0xf0c] ss:$16 sps:$4 sm:$0xff]   ;;  %v9682_v57 = vld [vmem:[%s13788_s1 + $0xf00] ss:$16 sps:$4 sm:$0xff]  }
 0x1a7   :  { %6576 = vmatpush1.bf16.msra.mxu0 %v9590_v58  ;;  %7232 = vmatpush1.bf16.msra.mxu1 %v9593_v59  ;;  %v9685_v58 = vld [vmem:[%s13788_s1 + $0xf08] ss:$16 sps:$4 sm:$0xff]   ;;  %v9690_v59 = vld [vmem:[%s13788_s1 + $0xf24] ss:$16 sps:$4 sm:$0xff]  }
 0x1a8   :  { %6577 = vmatprep.subr.bf16.mxu0 %v9598_v60  ;;  %7233 = vmatprep.subr.bf16.mxu1 %v9601_v61  ;;  %v9693_v60 = vld [vmem:[%s13788_s1 + $0xf2c] ss:$16 sps:$4 sm:$0xff]   ;;  %v9688_v61 = vld [vmem:[%s13788_s1 + $0xf20] ss:$16 sps:$4 sm:$0xff]  }
 0x1ab   :  { %6578 = vmatpush1.bf16.msra.mxu0 %v9596_v62  ;;  %7234 = vmatpush1.bf16.msra.mxu1 %v9599_v63  ;;  %v9691_v62 = vld [vmem:[%s13788_s1 + $0xf28] ss:$16 sps:$4 sm:$0xff]   ;;  %v9696_v63 = vld [vmem:[%s13788_s1 + $0xf44] ss:$16 sps:$4 sm:$0xff]  }
 0x1ac   :  { %6579 = vmatprep.subr.bf16.mxu0 %v9604_v0  ;;  %7235 = vmatprep.subr.bf16.mxu1 %v9607_v1  ;;  %v9699_v0 = vld [vmem:[%s13788_s1 + $0xf4c] ss:$16 sps:$4 sm:$0xff]   ;;  %v9694_v1 = vld [vmem:[%s13788_s1 + $0xf40] ss:$16 sps:$4 sm:$0xff]  }
 0x1af   :  { %6580 = vmatpush1.bf16.msra.mxu0 %v9602_v2  ;;  %7236 = vmatpush1.bf16.msra.mxu1 %v9605_v3  ;;  %v9697_v2 = vld [vmem:[%s13788_s1 + $0xf48] ss:$16 sps:$4 sm:$0xff]   ;;  %v9702_v3 = vld [vmem:[%s13788_s1 + $0xf64] ss:$16 sps:$4 sm:$0xff]  }
 0x1b0   :  { %6581 = vmatprep.subr.bf16.mxu0 %v9610_v4  ;;  %7237 = vmatprep.subr.bf16.mxu1 %v9613_v5  ;;  %v9705_v4 = vld [vmem:[%s13788_s1 + $0xf6c] ss:$16 sps:$4 sm:$0xff]   ;;  %v9700_v5 = vld [vmem:[%s13788_s1 + $0xf60] ss:$16 sps:$4 sm:$0xff]  }
 0x1b3   :  { %6582 = vmatpush1.bf16.msra.mxu0 %v9608_v6  ;;  %7238 = vmatpush1.bf16.msra.mxu1 %v9611_v7  ;;  %v9703_v6 = vld [vmem:[%s13788_s1 + $0xf68] ss:$16 sps:$4 sm:$0xff]   ;;  %v9708_v7 = vld [vmem:[%s13788_s1 + $0xf84] ss:$16 sps:$4 sm:$0xff]  }
 0x1b4   :  { %6583 = vmatprep.subr.bf16.mxu0 %v9616_v8  ;;  %7239 = vmatprep.subr.bf16.mxu1 %v9619_v9  ;;  %v9711_v8 = vld [vmem:[%s13788_s1 + $0xf8c] ss:$16 sps:$4 sm:$0xff]   ;;  %v9706_v9 = vld [vmem:[%s13788_s1 + $0xf80] ss:$16 sps:$4 sm:$0xff]  }
 0x1b7   :  { %6584 = vmatpush1.bf16.msra.mxu0 %v9614_v10  ;;  %7240 = vmatpush1.bf16.msra.mxu1 %v9617_v12  ;;  %v9709_v10 = vld [vmem:[%s13788_s1 + $0xf88] ss:$16 sps:$4 sm:$0xff]   ;;  %v9714_v12 = vld [vmem:[%s13788_s1 + $0xfa4] ss:$16 sps:$4 sm:$0xff]  }
 0x1b8   :  { %6585 = vmatprep.subr.bf16.mxu0 %v9622_v13  ;;  %7241 = vmatprep.subr.bf16.mxu1 %v9625_v15  ;;  %v9717_v13 = vld [vmem:[%s13788_s1 + $0xfac] ss:$16 sps:$4 sm:$0xff]   ;;  %v9712_v15 = vld [vmem:[%s13788_s1 + $0xfa0] ss:$16 sps:$4 sm:$0xff]  }
 0x1bb   :  { %6586 = vmatpush1.bf16.msra.mxu0 %v9620_v11  ;;  %7242 = vmatpush1.bf16.msra.mxu1 %v9623_v17  ;;  %v9715_v11 = vld [vmem:[%s13788_s1 + $0xfa8] ss:$16 sps:$4 sm:$0xff]   ;;  %v9720_v17 = vld [vmem:[%s13788_s1 + $0xfc4] ss:$16 sps:$4 sm:$0xff]  }
 0x1bc   :  { %6587 = vmatprep.subr.bf16.mxu0 %v9628_v14  ;;  %7243 = vmatprep.subr.bf16.mxu1 %v9631_v19  ;;  %v9723_v14 = vld [vmem:[%s13788_s1 + $0xfcc] ss:$16 sps:$4 sm:$0xff]   ;;  %v9718_v19 = vld [vmem:[%s13788_s1 + $0xfc0] ss:$16 sps:$4 sm:$0xff]  }
 0x1bf   :  { %6588 = vmatpush1.bf16.msra.mxu0 %v9626_v20  ;;  %7244 = vmatpush1.bf16.msra.mxu1 %v9629_v16  ;;  %v9721_v20 = vld [vmem:[%s13788_s1 + $0xfc8] ss:$16 sps:$4 sm:$0xff]   ;;  %v9726_v16 = vld [vmem:[%s13788_s1 + $0xfe4] ss:$16 sps:$4 sm:$0xff]  }
 0x1c0   :  { %6598 = vmatprep.subr.bf16.mxu0 %v9636_v22  ;;  %7254 = vmatprep.subr.bf16.mxu1 %v9639_v23  ;;  %v9729_v22 = vld [vmem:[%s13788_s1 + $0xfec] ss:$16 sps:$4 sm:$0xff]   ;;  %v9724_v23 = vld [vmem:[%s13788_s1 + $0xfe0] ss:$16 sps:$4 sm:$0xff]  }
 0x1c2   :  { %6590 = vmatmul.mubr.bf16.vlgmr.msra.gmra.mrb[0].mxu0 %v7779_v18  ;;  %7246 = vmatmul.mubr.bf16.vlgmr.msra.gmra.mrb[0].mxu1 %v7779_v18  ;;  %v9727_v18 = vld [vmem:[%s13788_s1 + $0xfe8] ss:$16 sps:$4 sm:$0xff]  }
 0x1c3   :  { %6599 = vmatpush1.bf16.msra.mxu0 %v9634_v25  ;;  %7255 = vmatpush1.bf16.msra.mxu1 %v9637_v26  ;;  %v9734_v25 = vld [vmem:[%s13788_s1 + $0x1004] ss:$16 sps:$4 sm:$0xff]   ;;  %v9737_v26 = vld [vmem:[%s13788_s1 + $0x100c] ss:$16 sps:$4 sm:$0xff]  }
 0x1c4   :  { %6600 = vmatprep.subr.bf16.mxu0 %v9642_v27  ;;  %7256 = vmatprep.subr.bf16.mxu1 %v9645_v21  ;;  %v12156_v27 = vld [vmem:[%s13789_s0 + $0x40] sm:$0xff]  ;;  %v7781_v21 = vcombine.low %v11955_v24, %v11955_v24  ;;  %v9743_v24 = vld [vmem:[%s13788_s1 + $0x102c] ss:$16 sps:$4 sm:$0xff]  }
 0x1c5   :  { %6630 = vmatprep.mubr.bf16.mxu0 %v7782_v28  ;;  %7286 = vmatprep.mubr.bf16.mxu1 %v7782_v28  ;;  %v9732_v28 = vld [vmem:[%s13788_s1 + $0x1000] ss:$16 sps:$4 sm:$0xff]  }
 0x1c7   :  { %6601 = vmatpush1.bf16.msra.mxu0 %v9640_v29  ;;  %7257 = vmatpush1.bf16.msra.mxu1 %v9643_v30  ;;  %v9735_v29 = vld [vmem:[%s13788_s1 + $0x1008] ss:$16 sps:$4 sm:$0xff]   ;;  %v9740_v30 = vld [vmem:[%s13788_s1 + $0x1024] ss:$16 sps:$4 sm:$0xff]  }
 0x1c8   :  { %6602 = vmatprep.subr.bf16.mxu0 %v9648_v31  ;;  %7258 = vmatprep.subr.bf16.mxu1 %v9651_v32  ;;  %v7784_v31 = vcombine.high %v12156_v27, %v12156_v27  ;;  %v9738_v32 = vld [vmem:[%s13788_s1 + $0x1020] ss:$16 sps:$4 sm:$0xff]  }
 0x1cb   :  { %6603 = vmatpush1.bf16.msra.mxu0 %v9646_v33  ;;  %7259 = vmatpush1.bf16.msra.mxu1 %v9649_v34  ;;  %v9741_v33 = vld [vmem:[%s13788_s1 + $0x1028] ss:$16 sps:$4 sm:$0xff]   ;;  %v9746_v34 = vld [vmem:[%s13788_s1 + $0x1044] ss:$16 sps:$4 sm:$0xff]  }
 0x1cc   :  { %6604 = vmatprep.subr.bf16.mxu0 %v9654_v35  ;;  %7260 = vmatprep.subr.bf16.mxu1 %v9657_v36  ;;  %v9749_v35 = vld [vmem:[%s13788_s1 + $0x104c] ss:$16 sps:$4 sm:$0xff]   ;;  %v9744_v36 = vld [vmem:[%s13788_s1 + $0x1040] ss:$16 sps:$4 sm:$0xff]  }
 0x1cf   :  { %6605 = vmatpush1.bf16.msra.mxu0 %v9652_v37  ;;  %7261 = vmatpush1.bf16.msra.mxu1 %v9655_v38  ;;  %v9747_v37 = vld [vmem:[%s13788_s1 + $0x1048] ss:$16 sps:$4 sm:$0xff]   ;;  %v9752_v38 = vld [vmem:[%s13788_s1 + $0x1064] ss:$16 sps:$4 sm:$0xff]  }
 0x1d0   :  { %6606 = vmatprep.subr.bf16.mxu0 %v9660_v39  ;;  %7262 = vmatprep.subr.bf16.mxu1 %v9663_v40  ;;  %v9755_v39 = vld [vmem:[%s13788_s1 + $0x106c] ss:$16 sps:$4 sm:$0xff]   ;;  %v9750_v40 = vld [vmem:[%s13788_s1 + $0x1060] ss:$16 sps:$4 sm:$0xff]  }
 0x1d3   :  { %6607 = vmatpush1.bf16.msra.mxu0 %v9658_v41  ;;  %7263 = vmatpush1.bf16.msra.mxu1 %v9661_v42  ;;  %v9753_v41 = vld [vmem:[%s13788_s1 + $0x1068] ss:$16 sps:$4 sm:$0xff]   ;;  %v9758_v42 = vld [vmem:[%s13788_s1 + $0x1084] ss:$16 sps:$4 sm:$0xff]  }
 0x1d4   :  { %6608 = vmatprep.subr.bf16.mxu0 %v9666_v43  ;;  %7264 = vmatprep.subr.bf16.mxu1 %v9669_v44  ;;  %v9761_v43 = vld [vmem:[%s13788_s1 + $0x108c] ss:$16 sps:$4 sm:$0xff]   ;;  %v9756_v44 = vld [vmem:[%s13788_s1 + $0x1080] ss:$16 sps:$4 sm:$0xff]  }
 0x1d7   :  { %6609 = vmatpush1.bf16.msra.mxu0 %v9664_v45  ;;  %7265 = vmatpush1.bf16.msra.mxu1 %v9667_v46  ;;  %v9759_v45 = vld [vmem:[%s13788_s1 + $0x1088] ss:$16 sps:$4 sm:$0xff]   ;;  %v9764_v46 = vld [vmem:[%s13788_s1 + $0x10a4] ss:$16 sps:$4 sm:$0xff]  }
 0x1d8   :  { %6610 = vmatprep.subr.bf16.mxu0 %v9672_v47  ;;  %7266 = vmatprep.subr.bf16.mxu1 %v9675_v48  ;;  %v9767_v47 = vld [vmem:[%s13788_s1 + $0x10ac] ss:$16 sps:$4 sm:$0xff]   ;;  %v9762_v48 = vld [vmem:[%s13788_s1 + $0x10a0] ss:$16 sps:$4 sm:$0xff]  }
 0x1db   :  { %6611 = vmatpush1.bf16.msra.mxu0 %v9670_v49  ;;  %7267 = vmatpush1.bf16.msra.mxu1 %v9673_v50  ;;  %v9765_v49 = vld [vmem:[%s13788_s1 + $0x10a8] ss:$16 sps:$4 sm:$0xff]   ;;  %v9770_v50 = vld [vmem:[%s13788_s1 + $0x10c4] ss:$16 sps:$4 sm:$0xff]  }
 0x1dc   :  { %6612 = vmatprep.subr.bf16.mxu0 %v9678_v51  ;;  %7268 = vmatprep.subr.bf16.mxu1 %v9681_v52  ;;  %v9773_v51 = vld [vmem:[%s13788_s1 + $0x10cc] ss:$16 sps:$4 sm:$0xff]   ;;  %v9768_v52 = vld [vmem:[%s13788_s1 + $0x10c0] ss:$16 sps:$4 sm:$0xff]  }
 0x1df   :  { %6613 = vmatpush1.bf16.msra.mxu0 %v9676_v53  ;;  %7269 = vmatpush1.bf16.msra.mxu1 %v9679_v54  ;;  %v9771_v53 = vld [vmem:[%s13788_s1 + $0x10c8] ss:$16 sps:$4 sm:$0xff]   ;;  %v9776_v54 = vld [vmem:[%s13788_s1 + $0x10e4] ss:$16 sps:$4 sm:$0xff]  }
 0x1e0   :  { %6614 = vmatprep.subr.bf16.mxu0 %v9684_v55  ;;  %7270 = vmatprep.subr.bf16.mxu1 %v9687_v56  ;;  %v9779_v55 = vld [vmem:[%s13788_s1 + $0x10ec] ss:$16 sps:$4 sm:$0xff]   ;;  %v9774_v56 = vld [vmem:[%s13788_s1 + $0x10e0] ss:$16 sps:$4 sm:$0xff]  }
 0x1e3   :  { %6615 = vmatpush1.bf16.msra.mxu0 %v9682_v57  ;;  %7271 = vmatpush1.bf16.msra.mxu1 %v9685_v58  ;;  %v9777_v57 = vld [vmem:[%s13788_s1 + $0x10e8] ss:$16 sps:$4 sm:$0xff]   ;;  %v9782_v58 = vld [vmem:[%s13788_s1 + $0x1104] ss:$16 sps:$4 sm:$0xff]  }
 0x1e4   :  { %6616 = vmatprep.subr.bf16.mxu0 %v9690_v59  ;;  %7272 = vmatprep.subr.bf16.mxu1 %v9693_v60  ;;  %v9785_v59 = vld [vmem:[%s13788_s1 + $0x110c] ss:$16 sps:$4 sm:$0xff]   ;;  %v9780_v60 = vld [vmem:[%s13788_s1 + $0x1100] ss:$16 sps:$4 sm:$0xff]  }
 0x1e7   :  { %6617 = vmatpush1.bf16.msra.mxu0 %v9688_v61  ;;  %7273 = vmatpush1.bf16.msra.mxu1 %v9691_v62  ;;  %v9783_v61 = vld [vmem:[%s13788_s1 + $0x1108] ss:$16 sps:$4 sm:$0xff]   ;;  %v9788_v62 = vld [vmem:[%s13788_s1 + $0x1124] ss:$16 sps:$4 sm:$0xff]  }
 0x1e8   :  { %6618 = vmatprep.subr.bf16.mxu0 %v9696_v63  ;;  %7274 = vmatprep.subr.bf16.mxu1 %v9699_v0  ;;  %v9791_v63 = vld [vmem:[%s13788_s1 + $0x112c] ss:$16 sps:$4 sm:$0xff]   ;;  %v9786_v0 = vld [vmem:[%s13788_s1 + $0x1120] ss:$16 sps:$4 sm:$0xff]  }
 0x1eb   :  { %6619 = vmatpush1.bf16.msra.mxu0 %v9694_v1  ;;  %7275 = vmatpush1.bf16.msra.mxu1 %v9697_v2  ;;  %v9789_v1 = vld [vmem:[%s13788_s1 + $0x1128] ss:$16 sps:$4 sm:$0xff]   ;;  %v9794_v2 = vld [vmem:[%s13788_s1 + $0x1144] ss:$16 sps:$4 sm:$0xff]  }
 0x1ec   :  { %6620 = vmatprep.subr.bf16.mxu0 %v9702_v3  ;;  %7276 = vmatprep.subr.bf16.mxu1 %v9705_v4  ;;  %v9797_v3 = vld [vmem:[%s13788_s1 + $0x114c] ss:$16 sps:$4 sm:$0xff]   ;;  %v9792_v4 = vld [vmem:[%s13788_s1 + $0x1140] ss:$16 sps:$4 sm:$0xff]  }
 0x1ef   :  { %6621 = vmatpush1.bf16.msra.mxu0 %v9700_v5  ;;  %7277 = vmatpush1.bf16.msra.mxu1 %v9703_v6  ;;  %v9795_v5 = vld [vmem:[%s13788_s1 + $0x1148] ss:$16 sps:$4 sm:$0xff]   ;;  %v9800_v6 = vld [vmem:[%s13788_s1 + $0x1164] ss:$16 sps:$4 sm:$0xff]  }
 0x1f0   :  { %6622 = vmatprep.subr.bf16.mxu0 %v9708_v7  ;;  %7278 = vmatprep.subr.bf16.mxu1 %v9711_v8  ;;  %v9803_v7 = vld [vmem:[%s13788_s1 + $0x116c] ss:$16 sps:$4 sm:$0xff]   ;;  %v9798_v8 = vld [vmem:[%s13788_s1 + $0x1160] ss:$16 sps:$4 sm:$0xff]  }
 0x1f3   :  { %6623 = vmatpush1.bf16.msra.mxu0 %v9706_v9  ;;  %7279 = vmatpush1.bf16.msra.mxu1 %v9709_v10  ;;  %v9801_v9 = vld [vmem:[%s13788_s1 + $0x1168] ss:$16 sps:$4 sm:$0xff]   ;;  %v9806_v10 = vld [vmem:[%s13788_s1 + $0x1184] ss:$16 sps:$4 sm:$0xff]  }
 0x1f4   :  { %6624 = vmatprep.subr.bf16.mxu0 %v9714_v12  ;;  %7280 = vmatprep.subr.bf16.mxu1 %v9717_v13  ;;  %v9809_v12 = vld [vmem:[%s13788_s1 + $0x118c] ss:$16 sps:$4 sm:$0xff]   ;;  %v9804_v13 = vld [vmem:[%s13788_s1 + $0x1180] ss:$16 sps:$4 sm:$0xff]  }
 0x1f7   :  { %6625 = vmatpush1.bf16.msra.mxu0 %v9712_v15  ;;  %7281 = vmatpush1.bf16.msra.mxu1 %v9715_v11  ;;  %v9807_v15 = vld [vmem:[%s13788_s1 + $0x1188] ss:$16 sps:$4 sm:$0xff]   ;;  %v9812_v11 = vld [vmem:[%s13788_s1 + $0x11a4] ss:$16 sps:$4 sm:$0xff]  }
 0x1f8   :  { %6626 = vmatprep.subr.bf16.mxu0 %v9720_v17  ;;  %7282 = vmatprep.subr.bf16.mxu1 %v9723_v14  ;;  %v9815_v17 = vld [vmem:[%s13788_s1 + $0x11ac] ss:$16 sps:$4 sm:$0xff]   ;;  %v9810_v14 = vld [vmem:[%s13788_s1 + $0x11a0] ss:$16 sps:$4 sm:$0xff]  }
 0x1fb   :  { %6627 = vmatpush1.bf16.msra.mxu0 %v9718_v19  ;;  %7283 = vmatpush1.bf16.msra.mxu1 %v9721_v20  ;;  %v9813_v19 = vld [vmem:[%s13788_s1 + $0x11a8] ss:$16 sps:$4 sm:$0xff]   ;;  %v9818_v20 = vld [vmem:[%s13788_s1 + $0x11c4] ss:$16 sps:$4 sm:$0xff]  }
 0x1fc   :  { %6628 = vmatprep.subr.bf16.mxu0 %v9726_v16  ;;  %7284 = vmatprep.subr.bf16.mxu1 %v9729_v22  ;;  %v9821_v16 = vld [vmem:[%s13788_s1 + $0x11cc] ss:$16 sps:$4 sm:$0xff]   ;;  %v9816_v22 = vld [vmem:[%s13788_s1 + $0x11c0] ss:$16 sps:$4 sm:$0xff]  }
 0x1ff   :  { %6629 = vmatpush1.bf16.msra.mxu0 %v9724_v23  ;;  %7285 = vmatpush1.bf16.msra.mxu1 %v9727_v18  ;;  %v9819_v23 = vld [vmem:[%s13788_s1 + $0x11c8] ss:$16 sps:$4 sm:$0xff]   ;;  %v9824_v18 = vld [vmem:[%s13788_s1 + $0x11e4] ss:$16 sps:$4 sm:$0xff]  }
 0x200   :  { %6639 = vmatprep.subr.bf16.mxu0 %v9734_v25  ;;  %7295 = vmatprep.subr.bf16.mxu1 %v9737_v26  ;;  %v9827_v25 = vld [vmem:[%s13788_s1 + $0x11ec] ss:$16 sps:$4 sm:$0xff]   ;;  %v9822_v26 = vld [vmem:[%s13788_s1 + $0x11e0] ss:$16 sps:$4 sm:$0xff]  }
 0x202   :  { %6631 = vmatmul.mubr.bf16.vlgmr.msra.gmra.mrb[0].mxu0 %v7781_v21  ;;  %7287 = vmatmul.mubr.bf16.vlgmr.msra.gmra.mrb[0].mxu1 %v7781_v21  ;;  %v9825_v21 = vld [vmem:[%s13788_s1 + $0x11e8] ss:$16 sps:$4 sm:$0xff]  }
 0x203   :  { %6640 = vmatpush1.bf16.msra.mxu0 %v9732_v28  ;;  %7296 = vmatpush1.bf16.msra.mxu1 %v9735_v29  ;;  %v9832_v28 = vld [vmem:[%s13788_s1 + $0x1204] ss:$16 sps:$4 sm:$0xff]   ;;  %v9835_v29 = vld [vmem:[%s13788_s1 + $0x120c] ss:$16 sps:$4 sm:$0xff]  }
 0x204   :  { %6641 = vmatprep.subr.bf16.mxu0 %v9740_v30  ;;  %7297 = vmatprep.subr.bf16.mxu1 %v9743_v24  ;;  %v12357_v30 = vld [vmem:[%s13789_s0 + $0x48] sm:$0xff]  ;;  %v7783_v24 = vcombine.low %v12156_v27, %v12156_v27 }
 0x205   :  { %6671 = vmatprep.mubr.bf16.mxu0 %v7784_v31  ;;  %7327 = vmatprep.mubr.bf16.mxu1 %v7784_v31  ;;  %v9830_v31 = vld [vmem:[%s13788_s1 + $0x1200] ss:$16 sps:$4 sm:$0xff]   ;;  %v9841_v27 = vld [vmem:[%s13788_s1 + $0x122c] ss:$16 sps:$4 sm:$0xff]  }
 0x207   :  { %6642 = vmatpush1.bf16.msra.mxu0 %v9738_v32  ;;  %7298 = vmatpush1.bf16.msra.mxu1 %v9741_v33  ;;  %v9833_v32 = vld [vmem:[%s13788_s1 + $0x1208] ss:$16 sps:$4 sm:$0xff]   ;;  %v9838_v33 = vld [vmem:[%s13788_s1 + $0x1224] ss:$16 sps:$4 sm:$0xff]  }
 0x208   :  { %6643 = vmatprep.subr.bf16.mxu0 %v9746_v34  ;;  %7299 = vmatprep.subr.bf16.mxu1 %v9749_v35  ;;  %v7786_v34 = vcombine.high %v12357_v30, %v12357_v30  ;;  %v9836_v35 = vld [vmem:[%s13788_s1 + $0x1220] ss:$16 sps:$4 sm:$0xff]  }
 0x20b   :  { %6644 = vmatpush1.bf16.msra.mxu0 %v9744_v36  ;;  %7300 = vmatpush1.bf16.msra.mxu1 %v9747_v37  ;;  %v9839_v36 = vld [vmem:[%s13788_s1 + $0x1228] ss:$16 sps:$4 sm:$0xff]   ;;  %v9844_v37 = vld [vmem:[%s13788_s1 + $0x1244] ss:$16 sps:$4 sm:$0xff]  }
 0x20c   :  { %6645 = vmatprep.subr.bf16.mxu0 %v9752_v38  ;;  %7301 = vmatprep.subr.bf16.mxu1 %v9755_v39  ;;  %v9847_v38 = vld [vmem:[%s13788_s1 + $0x124c] ss:$16 sps:$4 sm:$0xff]   ;;  %v9842_v39 = vld [vmem:[%s13788_s1 + $0x1240] ss:$16 sps:$4 sm:$0xff]  }
 0x20f   :  { %6646 = vmatpush1.bf16.msra.mxu0 %v9750_v40  ;;  %7302 = vmatpush1.bf16.msra.mxu1 %v9753_v41  ;;  %v9845_v40 = vld [vmem:[%s13788_s1 + $0x1248] ss:$16 sps:$4 sm:$0xff]   ;;  %v9850_v41 = vld [vmem:[%s13788_s1 + $0x1264] ss:$16 sps:$4 sm:$0xff]  }
 0x210   :  { %6647 = vmatprep.subr.bf16.mxu0 %v9758_v42  ;;  %7303 = vmatprep.subr.bf16.mxu1 %v9761_v43  ;;  %v9853_v42 = vld [vmem:[%s13788_s1 + $0x126c] ss:$16 sps:$4 sm:$0xff]   ;;  %v9848_v43 = vld [vmem:[%s13788_s1 + $0x1260] ss:$16 sps:$4 sm:$0xff]  }
 0x213   :  { %6648 = vmatpush1.bf16.msra.mxu0 %v9756_v44  ;;  %7304 = vmatpush1.bf16.msra.mxu1 %v9759_v45  ;;  %v9851_v44 = vld [vmem:[%s13788_s1 + $0x1268] ss:$16 sps:$4 sm:$0xff]   ;;  %v9856_v45 = vld [vmem:[%s13788_s1 + $0x1284] ss:$16 sps:$4 sm:$0xff]  }
 0x214   :  { %6649 = vmatprep.subr.bf16.mxu0 %v9764_v46  ;;  %7305 = vmatprep.subr.bf16.mxu1 %v9767_v47  ;;  %v9859_v46 = vld [vmem:[%s13788_s1 + $0x128c] ss:$16 sps:$4 sm:$0xff]   ;;  %v9854_v47 = vld [vmem:[%s13788_s1 + $0x1280] ss:$16 sps:$4 sm:$0xff]  }
 0x217   :  { %6650 = vmatpush1.bf16.msra.mxu0 %v9762_v48  ;;  %7306 = vmatpush1.bf16.msra.mxu1 %v9765_v49  ;;  %v9857_v48 = vld [vmem:[%s13788_s1 + $0x1288] ss:$16 sps:$4 sm:$0xff]   ;;  %v9862_v49 = vld [vmem:[%s13788_s1 + $0x12a4] ss:$16 sps:$4 sm:$0xff]  }
 0x218   :  { %6651 = vmatprep.subr.bf16.mxu0 %v9770_v50  ;;  %7307 = vmatprep.subr.bf16.mxu1 %v9773_v51  ;;  %v9865_v50 = vld [vmem:[%s13788_s1 + $0x12ac] ss:$16 sps:$4 sm:$0xff]   ;;  %v9860_v51 = vld [vmem:[%s13788_s1 + $0x12a0] ss:$16 sps:$4 sm:$0xff]  }
 0x21b   :  { %6652 = vmatpush1.bf16.msra.mxu0 %v9768_v52  ;;  %7308 = vmatpush1.bf16.msra.mxu1 %v9771_v53  ;;  %v9863_v52 = vld [vmem:[%s13788_s1 + $0x12a8] ss:$16 sps:$4 sm:$0xff]   ;;  %v9868_v53 = vld [vmem:[%s13788_s1 + $0x12c4] ss:$16 sps:$4 sm:$0xff]  }
 0x21c   :  { %6653 = vmatprep.subr.bf16.mxu0 %v9776_v54  ;;  %7309 = vmatprep.subr.bf16.mxu1 %v9779_v55  ;;  %v9871_v54 = vld [vmem:[%s13788_s1 + $0x12cc] ss:$16 sps:$4 sm:$0xff]   ;;  %v9866_v55 = vld [vmem:[%s13788_s1 + $0x12c0] ss:$16 sps:$4 sm:$0xff]  }
 0x21f   :  { %6654 = vmatpush1.bf16.msra.mxu0 %v9774_v56  ;;  %7310 = vmatpush1.bf16.msra.mxu1 %v9777_v57  ;;  %v9869_v56 = vld [vmem:[%s13788_s1 + $0x12c8] ss:$16 sps:$4 sm:$0xff]   ;;  %v9874_v57 = vld [vmem:[%s13788_s1 + $0x12e4] ss:$16 sps:$4 sm:$0xff]  }
 0x220   :  { %6655 = vmatprep.subr.bf16.mxu0 %v9782_v58  ;;  %7311 = vmatprep.subr.bf16.mxu1 %v9785_v59  ;;  %v9877_v58 = vld [vmem:[%s13788_s1 + $0x12ec] ss:$16 sps:$4 sm:$0xff]   ;;  %v9872_v59 = vld [vmem:[%s13788_s1 + $0x12e0] ss:$16 sps:$4 sm:$0xff]  }
 0x223   :  { %6656 = vmatpush1.bf16.msra.mxu0 %v9780_v60  ;;  %7312 = vmatpush1.bf16.msra.mxu1 %v9783_v61  ;;  %v9875_v60 = vld [vmem:[%s13788_s1 + $0x12e8] ss:$16 sps:$4 sm:$0xff]   ;;  %v9880_v61 = vld [vmem:[%s13788_s1 + $0x1304] ss:$16 sps:$4 sm:$0xff]  }
 0x224   :  { %6657 = vmatprep.subr.bf16.mxu0 %v9788_v62  ;;  %7313 = vmatprep.subr.bf16.mxu1 %v9791_v63  ;;  %v9883_v62 = vld [vmem:[%s13788_s1 + $0x130c] ss:$16 sps:$4 sm:$0xff]   ;;  %v9878_v63 = vld [vmem:[%s13788_s1 + $0x1300] ss:$16 sps:$4 sm:$0xff]  }
 0x227   :  { %6658 = vmatpush1.bf16.msra.mxu0 %v9786_v0  ;;  %7314 = vmatpush1.bf16.msra.mxu1 %v9789_v1  ;;  %v9881_v0 = vld [vmem:[%s13788_s1 + $0x1308] ss:$16 sps:$4 sm:$0xff]   ;;  %v9886_v1 = vld [vmem:[%s13788_s1 + $0x1324] ss:$16 sps:$4 sm:$0xff]  }
 0x228   :  { %6659 = vmatprep.subr.bf16.mxu0 %v9794_v2  ;;  %7315 = vmatprep.subr.bf16.mxu1 %v9797_v3  ;;  %v9889_v2 = vld [vmem:[%s13788_s1 + $0x132c] ss:$16 sps:$4 sm:$0xff]   ;;  %v9884_v3 = vld [vmem:[%s13788_s1 + $0x1320] ss:$16 sps:$4 sm:$0xff]  }
 0x22b   :  { %6660 = vmatpush1.bf16.msra.mxu0 %v9792_v4  ;;  %7316 = vmatpush1.bf16.msra.mxu1 %v9795_v5  ;;  %v9887_v4 = vld [vmem:[%s13788_s1 + $0x1328] ss:$16 sps:$4 sm:$0xff]   ;;  %v9892_v5 = vld [vmem:[%s13788_s1 + $0x1344] ss:$16 sps:$4 sm:$0xff]  }
 0x22c   :  { %6661 = vmatprep.subr.bf16.mxu0 %v9800_v6  ;;  %7317 = vmatprep.subr.bf16.mxu1 %v9803_v7  ;;  %v9895_v6 = vld [vmem:[%s13788_s1 + $0x134c] ss:$16 sps:$4 sm:$0xff]   ;;  %v9890_v7 = vld [vmem:[%s13788_s1 + $0x1340] ss:$16 sps:$4 sm:$0xff]  }
 0x22f   :  { %6662 = vmatpush1.bf16.msra.mxu0 %v9798_v8  ;;  %7318 = vmatpush1.bf16.msra.mxu1 %v9801_v9  ;;  %v9893_v8 = vld [vmem:[%s13788_s1 + $0x1348] ss:$16 sps:$4 sm:$0xff]   ;;  %v9898_v9 = vld [vmem:[%s13788_s1 + $0x1364] ss:$16 sps:$4 sm:$0xff]  }
 0x230   :  { %6663 = vmatprep.subr.bf16.mxu0 %v9806_v10  ;;  %7319 = vmatprep.subr.bf16.mxu1 %v9809_v12  ;;  %v9901_v10 = vld [vmem:[%s13788_s1 + $0x136c] ss:$16 sps:$4 sm:$0xff]   ;;  %v9896_v12 = vld [vmem:[%s13788_s1 + $0x1360] ss:$16 sps:$4 sm:$0xff]  }
 0x233   :  { %6664 = vmatpush1.bf16.msra.mxu0 %v9804_v13  ;;  %7320 = vmatpush1.bf16.msra.mxu1 %v9807_v15  ;;  %v9899_v13 = vld [vmem:[%s13788_s1 + $0x1368] ss:$16 sps:$4 sm:$0xff]   ;;  %v9904_v15 = vld [vmem:[%s13788_s1 + $0x1384] ss:$16 sps:$4 sm:$0xff]  }
 0x234   :  { %6665 = vmatprep.subr.bf16.mxu0 %v9812_v11  ;;  %7321 = vmatprep.subr.bf16.mxu1 %v9815_v17  ;;  %v9907_v11 = vld [vmem:[%s13788_s1 + $0x138c] ss:$16 sps:$4 sm:$0xff]   ;;  %v9902_v17 = vld [vmem:[%s13788_s1 + $0x1380] ss:$16 sps:$4 sm:$0xff]  }
 0x237   :  { %6666 = vmatpush1.bf16.msra.mxu0 %v9810_v14  ;;  %7322 = vmatpush1.bf16.msra.mxu1 %v9813_v19  ;;  %v9905_v14 = vld [vmem:[%s13788_s1 + $0x1388] ss:$16 sps:$4 sm:$0xff]   ;;  %v9910_v19 = vld [vmem:[%s13788_s1 + $0x13a4] ss:$16 sps:$4 sm:$0xff]  }
 0x238   :  { %6667 = vmatprep.subr.bf16.mxu0 %v9818_v20  ;;  %7323 = vmatprep.subr.bf16.mxu1 %v9821_v16  ;;  %v9913_v20 = vld [vmem:[%s13788_s1 + $0x13ac] ss:$16 sps:$4 sm:$0xff]   ;;  %v9908_v16 = vld [vmem:[%s13788_s1 + $0x13a0] ss:$16 sps:$4 sm:$0xff]  }
 0x23b   :  { %6668 = vmatpush1.bf16.msra.mxu0 %v9816_v22  ;;  %7324 = vmatpush1.bf16.msra.mxu1 %v9819_v23  ;;  %v9911_v22 = vld [vmem:[%s13788_s1 + $0x13a8] ss:$16 sps:$4 sm:$0xff]   ;;  %v9916_v23 = vld [vmem:[%s13788_s1 + $0x13c4] ss:$16 sps:$4 sm:$0xff]  }
 0x23c   :  { %6669 = vmatprep.subr.bf16.mxu0 %v9824_v18  ;;  %7325 = vmatprep.subr.bf16.mxu1 %v9827_v25  ;;  %v9919_v18 = vld [vmem:[%s13788_s1 + $0x13cc] ss:$16 sps:$4 sm:$0xff]   ;;  %v9914_v25 = vld [vmem:[%s13788_s1 + $0x13c0] ss:$16 sps:$4 sm:$0xff]  }
 0x23f   :  { %6670 = vmatpush1.bf16.msra.mxu0 %v9822_v26  ;;  %7326 = vmatpush1.bf16.msra.mxu1 %v9825_v21  ;;  %v9917_v26 = vld [vmem:[%s13788_s1 + $0x13c8] ss:$16 sps:$4 sm:$0xff]   ;;  %v9922_v21 = vld [vmem:[%s13788_s1 + $0x13e4] ss:$16 sps:$4 sm:$0xff]  }
 0x240   :  { %6680 = vmatprep.subr.bf16.mxu0 %v9832_v28  ;;  %7336 = vmatprep.subr.bf16.mxu1 %v9835_v29  ;;  %v9925_v28 = vld [vmem:[%s13788_s1 + $0x13ec] ss:$16 sps:$4 sm:$0xff]   ;;  %v9920_v29 = vld [vmem:[%s13788_s1 + $0x13e0] ss:$16 sps:$4 sm:$0xff]  }
 0x242   :  { %6672 = vmatmul.mubr.bf16.vlgmr.msra.gmra.mrb[0].mxu0 %v7783_v24  ;;  %7328 = vmatmul.mubr.bf16.vlgmr.msra.gmra.mrb[0].mxu1 %v7783_v24  ;;  %v9923_v24 = vld [vmem:[%s13788_s1 + $0x13e8] ss:$16 sps:$4 sm:$0xff]  }
 0x243   :  { %6681 = vmatpush1.bf16.msra.mxu0 %v9830_v31  ;;  %7337 = vmatpush1.bf16.msra.mxu1 %v9833_v32  ;;  %v9930_v31 = vld [vmem:[%s13788_s1 + $0x1404] ss:$16 sps:$4 sm:$0xff]   ;;  %v9933_v32 = vld [vmem:[%s13788_s1 + $0x140c] ss:$16 sps:$4 sm:$0xff]  }
 0x244   :  { %6682 = vmatprep.subr.bf16.mxu0 %v9838_v33  ;;  %7338 = vmatprep.subr.bf16.mxu1 %v9841_v27  ;;  %v7785_v33 = vcombine.low %v12357_v30, %v12357_v30  ;;  %v12560_v27 = vld [vmem:[%s13789_s0 + $0x50] sm:$0xff] }
 0x245   :  { %6712 = vmatprep.mubr.bf16.mxu0 %v7786_v34  ;;  %7368 = vmatprep.mubr.bf16.mxu1 %v7786_v34  ;;  %v9928_v34 = vld [vmem:[%s13788_s1 + $0x1400] ss:$16 sps:$4 sm:$0xff]   ;;  %v9936_v30 = vld [vmem:[%s13788_s1 + $0x1424] ss:$16 sps:$4 sm:$0xff]  }
 0x247   :  { %6683 = vmatpush1.bf16.msra.mxu0 %v9836_v35  ;;  %7339 = vmatpush1.bf16.msra.mxu1 %v9839_v36  ;;  %v9931_v35 = vld [vmem:[%s13788_s1 + $0x1408] ss:$16 sps:$4 sm:$0xff]   ;;  %v9939_v36 = vld [vmem:[%s13788_s1 + $0x142c] ss:$16 sps:$4 sm:$0xff]  }
 0x248   :  { %6684 = vmatprep.subr.bf16.mxu0 %v9844_v37  ;;  %7340 = vmatprep.subr.bf16.mxu1 %v9847_v38  ;;  %v7788_v37 = vcombine.high %v12560_v27, %v12560_v27  ;;  %v9934_v38 = vld [vmem:[%s13788_s1 + $0x1420] ss:$16 sps:$4 sm:$0xff]  }
 0x24b   :  { %6685 = vmatpush1.bf16.msra.mxu0 %v9842_v39  ;;  %7341 = vmatpush1.bf16.msra.mxu1 %v9845_v40  ;;  %v9937_v39 = vld [vmem:[%s13788_s1 + $0x1428] ss:$16 sps:$4 sm:$0xff]   ;;  %v9942_v40 = vld [vmem:[%s13788_s1 + $0x1444] ss:$16 sps:$4 sm:$0xff]  }
 0x24c   :  { %6686 = vmatprep.subr.bf16.mxu0 %v9850_v41  ;;  %7342 = vmatprep.subr.bf16.mxu1 %v9853_v42  ;;  %v9945_v41 = vld [vmem:[%s13788_s1 + $0x144c] ss:$16 sps:$4 sm:$0xff]   ;;  %v9940_v42 = vld [vmem:[%s13788_s1 + $0x1440] ss:$16 sps:$4 sm:$0xff]  }
 0x24f   :  { %6687 = vmatpush1.bf16.msra.mxu0 %v9848_v43  ;;  %7343 = vmatpush1.bf16.msra.mxu1 %v9851_v44  ;;  %v9943_v43 = vld [vmem:[%s13788_s1 + $0x1448] ss:$16 sps:$4 sm:$0xff]   ;;  %v9948_v44 = vld [vmem:[%s13788_s1 + $0x1464] ss:$16 sps:$4 sm:$0xff]  }
 0x250   :  { %6688 = vmatprep.subr.bf16.mxu0 %v9856_v45  ;;  %7344 = vmatprep.subr.bf16.mxu1 %v9859_v46  ;;  %v9951_v45 = vld [vmem:[%s13788_s1 + $0x146c] ss:$16 sps:$4 sm:$0xff]   ;;  %v9946_v46 = vld [vmem:[%s13788_s1 + $0x1460] ss:$16 sps:$4 sm:$0xff]  }
 0x253   :  { %6689 = vmatpush1.bf16.msra.mxu0 %v9854_v47  ;;  %7345 = vmatpush1.bf16.msra.mxu1 %v9857_v48  ;;  %v9949_v47 = vld [vmem:[%s13788_s1 + $0x1468] ss:$16 sps:$4 sm:$0xff]   ;;  %v9954_v48 = vld [vmem:[%s13788_s1 + $0x1484] ss:$16 sps:$4 sm:$0xff]  }
 0x254   :  { %6690 = vmatprep.subr.bf16.mxu0 %v9862_v49  ;;  %7346 = vmatprep.subr.bf16.mxu1 %v9865_v50  ;;  %v9957_v49 = vld [vmem:[%s13788_s1 + $0x148c] ss:$16 sps:$4 sm:$0xff]   ;;  %v9952_v50 = vld [vmem:[%s13788_s1 + $0x1480] ss:$16 sps:$4 sm:$0xff]  }
 0x257   :  { %6691 = vmatpush1.bf16.msra.mxu0 %v9860_v51  ;;  %7347 = vmatpush1.bf16.msra.mxu1 %v9863_v52  ;;  %v9955_v51 = vld [vmem:[%s13788_s1 + $0x1488] ss:$16 sps:$4 sm:$0xff]   ;;  %v9960_v52 = vld [vmem:[%s13788_s1 + $0x14a4] ss:$16 sps:$4 sm:$0xff]  }
 0x258   :  { %6692 = vmatprep.subr.bf16.mxu0 %v9868_v53  ;;  %7348 = vmatprep.subr.bf16.mxu1 %v9871_v54  ;;  %v9963_v53 = vld [vmem:[%s13788_s1 + $0x14ac] ss:$16 sps:$4 sm:$0xff]   ;;  %v9958_v54 = vld [vmem:[%s13788_s1 + $0x14a0] ss:$16 sps:$4 sm:$0xff]  }
 0x25b   :  { %6693 = vmatpush1.bf16.msra.mxu0 %v9866_v55  ;;  %7349 = vmatpush1.bf16.msra.mxu1 %v9869_v56  ;;  %v9961_v55 = vld [vmem:[%s13788_s1 + $0x14a8] ss:$16 sps:$4 sm:$0xff]   ;;  %v9966_v56 = vld [vmem:[%s13788_s1 + $0x14c4] ss:$16 sps:$4 sm:$0xff]  }
 0x25c   :  { %6694 = vmatprep.subr.bf16.mxu0 %v9874_v57  ;;  %7350 = vmatprep.subr.bf16.mxu1 %v9877_v58  ;;  %v9969_v57 = vld [vmem:[%s13788_s1 + $0x14cc] ss:$16 sps:$4 sm:$0xff]   ;;  %v9964_v58 = vld [vmem:[%s13788_s1 + $0x14c0] ss:$16 sps:$4 sm:$0xff]  }
 0x25f   :  { %6695 = vmatpush1.bf16.msra.mxu0 %v9872_v59  ;;  %7351 = vmatpush1.bf16.msra.mxu1 %v9875_v60  ;;  %v9967_v59 = vld [vmem:[%s13788_s1 + $0x14c8] ss:$16 sps:$4 sm:$0xff]   ;;  %v9972_v60 = vld [vmem:[%s13788_s1 + $0x14e4] ss:$16 sps:$4 sm:$0xff]  }
 0x260   :  { %6696 = vmatprep.subr.bf16.mxu0 %v9880_v61  ;;  %7352 = vmatprep.subr.bf16.mxu1 %v9883_v62  ;;  %v9975_v61 = vld [vmem:[%s13788_s1 + $0x14ec] ss:$16 sps:$4 sm:$0xff]   ;;  %v9970_v62 = vld [vmem:[%s13788_s1 + $0x14e0] ss:$16 sps:$4 sm:$0xff]  }
 0x263   :  { %6697 = vmatpush1.bf16.msra.mxu0 %v9878_v63  ;;  %7353 = vmatpush1.bf16.msra.mxu1 %v9881_v0  ;;  %v9973_v63 = vld [vmem:[%s13788_s1 + $0x14e8] ss:$16 sps:$4 sm:$0xff]   ;;  %v9978_v0 = vld [vmem:[%s13788_s1 + $0x1504] ss:$16 sps:$4 sm:$0xff]  }
 0x264   :  { %6698 = vmatprep.subr.bf16.mxu0 %v9886_v1  ;;  %7354 = vmatprep.subr.bf16.mxu1 %v9889_v2  ;;  %v9981_v1 = vld [vmem:[%s13788_s1 + $0x150c] ss:$16 sps:$4 sm:$0xff]   ;;  %v9976_v2 = vld [vmem:[%s13788_s1 + $0x1500] ss:$16 sps:$4 sm:$0xff]  }
 0x267   :  { %6699 = vmatpush1.bf16.msra.mxu0 %v9884_v3  ;;  %7355 = vmatpush1.bf16.msra.mxu1 %v9887_v4  ;;  %v9979_v3 = vld [vmem:[%s13788_s1 + $0x1508] ss:$16 sps:$4 sm:$0xff]   ;;  %v9984_v4 = vld [vmem:[%s13788_s1 + $0x1524] ss:$16 sps:$4 sm:$0xff]  }
 0x268   :  { %6700 = vmatprep.subr.bf16.mxu0 %v9892_v5  ;;  %7356 = vmatprep.subr.bf16.mxu1 %v9895_v6  ;;  %v9987_v5 = vld [vmem:[%s13788_s1 + $0x152c] ss:$16 sps:$4 sm:$0xff]   ;;  %v9982_v6 = vld [vmem:[%s13788_s1 + $0x1520] ss:$16 sps:$4 sm:$0xff]  }
 0x26b   :  { %6701 = vmatpush1.bf16.msra.mxu0 %v9890_v7  ;;  %7357 = vmatpush1.bf16.msra.mxu1 %v9893_v8  ;;  %v9985_v7 = vld [vmem:[%s13788_s1 + $0x1528] ss:$16 sps:$4 sm:$0xff]   ;;  %v9990_v8 = vld [vmem:[%s13788_s1 + $0x1544] ss:$16 sps:$4 sm:$0xff]  }
 0x26c   :  { %6702 = vmatprep.subr.bf16.mxu0 %v9898_v9  ;;  %7358 = vmatprep.subr.bf16.mxu1 %v9901_v10  ;;  %v9993_v9 = vld [vmem:[%s13788_s1 + $0x154c] ss:$16 sps:$4 sm:$0xff]   ;;  %v9988_v10 = vld [vmem:[%s13788_s1 + $0x1540] ss:$16 sps:$4 sm:$0xff]  }
 0x26f   :  { %6703 = vmatpush1.bf16.msra.mxu0 %v9896_v12  ;;  %7359 = vmatpush1.bf16.msra.mxu1 %v9899_v13  ;;  %v9991_v12 = vld [vmem:[%s13788_s1 + $0x1548] ss:$16 sps:$4 sm:$0xff]   ;;  %v9996_v13 = vld [vmem:[%s13788_s1 + $0x1564] ss:$16 sps:$4 sm:$0xff]  }
 0x270   :  { %6704 = vmatprep.subr.bf16.mxu0 %v9904_v15  ;;  %7360 = vmatprep.subr.bf16.mxu1 %v9907_v11  ;;  %v9999_v15 = vld [vmem:[%s13788_s1 + $0x156c] ss:$16 sps:$4 sm:$0xff]   ;;  %v9994_v11 = vld [vmem:[%s13788_s1 + $0x1560] ss:$16 sps:$4 sm:$0xff]  }
 0x273   :  { %6705 = vmatpush1.bf16.msra.mxu0 %v9902_v17  ;;  %7361 = vmatpush1.bf16.msra.mxu1 %v9905_v14  ;;  %v9997_v17 = vld [vmem:[%s13788_s1 + $0x1568] ss:$16 sps:$4 sm:$0xff]   ;;  %v10002_v14 = vld [vmem:[%s13788_s1 + $0x1584] ss:$16 sps:$4 sm:$0xff]  }
 0x274   :  { %6706 = vmatprep.subr.bf16.mxu0 %v9910_v19  ;;  %7362 = vmatprep.subr.bf16.mxu1 %v9913_v20  ;;  %v10005_v19 = vld [vmem:[%s13788_s1 + $0x158c] ss:$16 sps:$4 sm:$0xff]   ;;  %v10000_v20 = vld [vmem:[%s13788_s1 + $0x1580] ss:$16 sps:$4 sm:$0xff]  }
 0x277   :  { %6707 = vmatpush1.bf16.msra.mxu0 %v9908_v16  ;;  %7363 = vmatpush1.bf16.msra.mxu1 %v9911_v22  ;;  %v10003_v16 = vld [vmem:[%s13788_s1 + $0x1588] ss:$16 sps:$4 sm:$0xff]   ;;  %v10008_v22 = vld [vmem:[%s13788_s1 + $0x15a4] ss:$16 sps:$4 sm:$0xff]  }
 0x278   :  { %6708 = vmatprep.subr.bf16.mxu0 %v9916_v23  ;;  %7364 = vmatprep.subr.bf16.mxu1 %v9919_v18  ;;  %v10011_v23 = vld [vmem:[%s13788_s1 + $0x15ac] ss:$16 sps:$4 sm:$0xff]   ;;  %v10006_v18 = vld [vmem:[%s13788_s1 + $0x15a0] ss:$16 sps:$4 sm:$0xff]  }
 0x27b   :  { %6709 = vmatpush1.bf16.msra.mxu0 %v9914_v25  ;;  %7365 = vmatpush1.bf16.msra.mxu1 %v9917_v26  ;;  %v10009_v25 = vld [vmem:[%s13788_s1 + $0x15a8] ss:$16 sps:$4 sm:$0xff]   ;;  %v10014_v26 = vld [vmem:[%s13788_s1 + $0x15c4] ss:$16 sps:$4 sm:$0xff]  }
 0x27c   :  { %6710 = vmatprep.subr.bf16.mxu0 %v9922_v21  ;;  %7366 = vmatprep.subr.bf16.mxu1 %v9925_v28  ;;  %v10017_v21 = vld [vmem:[%s13788_s1 + $0x15cc] ss:$16 sps:$4 sm:$0xff]   ;;  %v10012_v28 = vld [vmem:[%s13788_s1 + $0x15c0] ss:$16 sps:$4 sm:$0xff]  }
 0x27f   :  { %6711 = vmatpush1.bf16.msra.mxu0 %v9920_v29  ;;  %7367 = vmatpush1.bf16.msra.mxu1 %v9923_v24  ;;  %v10015_v29 = vld [vmem:[%s13788_s1 + $0x15c8] ss:$16 sps:$4 sm:$0xff]   ;;  %v10020_v24 = vld [vmem:[%s13788_s1 + $0x15e4] ss:$16 sps:$4 sm:$0xff]  }
 0x280   :  { %6721 = vmatprep.subr.bf16.mxu0 %v9930_v31  ;;  %7377 = vmatprep.subr.bf16.mxu1 %v9933_v32  ;;  %v10023_v31 = vld [vmem:[%s13788_s1 + $0x15ec] ss:$16 sps:$4 sm:$0xff]   ;;  %v10018_v32 = vld [vmem:[%s13788_s1 + $0x15e0] ss:$16 sps:$4 sm:$0xff]  }
 0x282   :  { %6713 = vmatmul.mubr.bf16.vlgmr.msra.gmra.mrb[0].mxu0 %v7785_v33  ;;  %7369 = vmatmul.mubr.bf16.vlgmr.msra.gmra.mrb[0].mxu1 %v7785_v33  ;;  %v10021_v33 = vld [vmem:[%s13788_s1 + $0x15e8] ss:$16 sps:$4 sm:$0xff]  }
 0x283   :  { %6722 = vmatpush1.bf16.msra.mxu0 %v9928_v34  ;;  %7378 = vmatpush1.bf16.msra.mxu1 %v9931_v35  ;;  %v10028_v34 = vld [vmem:[%s13788_s1 + $0x1604] ss:$16 sps:$4 sm:$0xff]   ;;  %v10031_v35 = vld [vmem:[%s13788_s1 + $0x160c] ss:$16 sps:$4 sm:$0xff]  }
 0x284   :  { %6723 = vmatprep.subr.bf16.mxu0 %v9936_v30  ;;  %7379 = vmatprep.subr.bf16.mxu1 %v9939_v36  ;;  %v7787_v30 = vcombine.low %v12560_v27, %v12560_v27  ;;  %v12761_v36 = vld [vmem:[%s13789_s0 + $0x58] sm:$0xff]  ;;  %v10034_v27 = vld [vmem:[%s13788_s1 + $0x1624] ss:$16 sps:$4 sm:$0xff]  }
 0x285   :  { %6753 = vmatprep.mubr.bf16.mxu0 %v7788_v37  ;;  %7409 = vmatprep.mubr.bf16.mxu1 %v7788_v37  ;;  %v10026_v37 = vld [vmem:[%s13788_s1 + $0x1600] ss:$16 sps:$4 sm:$0xff]  }
 0x287   :  { %6724 = vmatpush1.bf16.msra.mxu0 %v9934_v38  ;;  %7380 = vmatpush1.bf16.msra.mxu1 %v9937_v39  ;;  %v10029_v38 = vld [vmem:[%s13788_s1 + $0x1608] ss:$16 sps:$4 sm:$0xff]   ;;  %v10037_v39 = vld [vmem:[%s13788_s1 + $0x162c] ss:$16 sps:$4 sm:$0xff]  }
 0x288   :  { %6725 = vmatprep.subr.bf16.mxu0 %v9942_v40  ;;  %7381 = vmatprep.subr.bf16.mxu1 %v9945_v41  ;;  %v7790_v40 = vcombine.high %v12761_v36, %v12761_v36  ;;  %v10032_v41 = vld [vmem:[%s13788_s1 + $0x1620] ss:$16 sps:$4 sm:$0xff]  }
 0x28b   :  { %6726 = vmatpush1.bf16.msra.mxu0 %v9940_v42  ;;  %7382 = vmatpush1.bf16.msra.mxu1 %v9943_v43  ;;  %v10035_v42 = vld [vmem:[%s13788_s1 + $0x1628] ss:$16 sps:$4 sm:$0xff]   ;;  %v10040_v43 = vld [vmem:[%s13788_s1 + $0x1644] ss:$16 sps:$4 sm:$0xff]  }
 0x28c   :  { %6727 = vmatprep.subr.bf16.mxu0 %v9948_v44  ;;  %7383 = vmatprep.subr.bf16.mxu1 %v9951_v45  ;;  %v10043_v44 = vld [vmem:[%s13788_s1 + $0x164c] ss:$16 sps:$4 sm:$0xff]   ;;  %v10038_v45 = vld [vmem:[%s13788_s1 + $0x1640] ss:$16 sps:$4 sm:$0xff]  }
 0x28f   :  { %6728 = vmatpush1.bf16.msra.mxu0 %v9946_v46  ;;  %7384 = vmatpush1.bf16.msra.mxu1 %v9949_v47  ;;  %v10041_v46 = vld [vmem:[%s13788_s1 + $0x1648] ss:$16 sps:$4 sm:$0xff]   ;;  %v10046_v47 = vld [vmem:[%s13788_s1 + $0x1664] ss:$16 sps:$4 sm:$0xff]  }
 0x290   :  { %6729 = vmatprep.subr.bf16.mxu0 %v9954_v48  ;;  %7385 = vmatprep.subr.bf16.mxu1 %v9957_v49  ;;  %v10049_v48 = vld [vmem:[%s13788_s1 + $0x166c] ss:$16 sps:$4 sm:$0xff]   ;;  %v10044_v49 = vld [vmem:[%s13788_s1 + $0x1660] ss:$16 sps:$4 sm:$0xff]  }
 0x293   :  { %6730 = vmatpush1.bf16.msra.mxu0 %v9952_v50  ;;  %7386 = vmatpush1.bf16.msra.mxu1 %v9955_v51  ;;  %v10047_v50 = vld [vmem:[%s13788_s1 + $0x1668] ss:$16 sps:$4 sm:$0xff]   ;;  %v10052_v51 = vld [vmem:[%s13788_s1 + $0x1684] ss:$16 sps:$4 sm:$0xff]  }
 0x294   :  { %6731 = vmatprep.subr.bf16.mxu0 %v9960_v52  ;;  %7387 = vmatprep.subr.bf16.mxu1 %v9963_v53  ;;  %v10055_v52 = vld [vmem:[%s13788_s1 + $0x168c] ss:$16 sps:$4 sm:$0xff]   ;;  %v10050_v53 = vld [vmem:[%s13788_s1 + $0x1680] ss:$16 sps:$4 sm:$0xff]  }
 0x297   :  { %6732 = vmatpush1.bf16.msra.mxu0 %v9958_v54  ;;  %7388 = vmatpush1.bf16.msra.mxu1 %v9961_v55  ;;  %v10053_v54 = vld [vmem:[%s13788_s1 + $0x1688] ss:$16 sps:$4 sm:$0xff]   ;;  %v10058_v55 = vld [vmem:[%s13788_s1 + $0x16a4] ss:$16 sps:$4 sm:$0xff]  }
 0x298   :  { %6733 = vmatprep.subr.bf16.mxu0 %v9966_v56  ;;  %7389 = vmatprep.subr.bf16.mxu1 %v9969_v57  ;;  %v10061_v56 = vld [vmem:[%s13788_s1 + $0x16ac] ss:$16 sps:$4 sm:$0xff]   ;;  %v10056_v57 = vld [vmem:[%s13788_s1 + $0x16a0] ss:$16 sps:$4 sm:$0xff]  }
 0x29b   :  { %6734 = vmatpush1.bf16.msra.mxu0 %v9964_v58  ;;  %7390 = vmatpush1.bf16.msra.mxu1 %v9967_v59  ;;  %v10059_v58 = vld [vmem:[%s13788_s1 + $0x16a8] ss:$16 sps:$4 sm:$0xff]   ;;  %v10064_v59 = vld [vmem:[%s13788_s1 + $0x16c4] ss:$16 sps:$4 sm:$0xff]  }
 0x29c   :  { %6735 = vmatprep.subr.bf16.mxu0 %v9972_v60  ;;  %7391 = vmatprep.subr.bf16.mxu1 %v9975_v61  ;;  %v10067_v60 = vld [vmem:[%s13788_s1 + $0x16cc] ss:$16 sps:$4 sm:$0xff]   ;;  %v10062_v61 = vld [vmem:[%s13788_s1 + $0x16c0] ss:$16 sps:$4 sm:$0xff]  }
 0x29f   :  { %6736 = vmatpush1.bf16.msra.mxu0 %v9970_v62  ;;  %7392 = vmatpush1.bf16.msra.mxu1 %v9973_v63  ;;  %v10065_v62 = vld [vmem:[%s13788_s1 + $0x16c8] ss:$16 sps:$4 sm:$0xff]   ;;  %v10070_v63 = vld [vmem:[%s13788_s1 + $0x16e4] ss:$16 sps:$4 sm:$0xff]  }
 0x2a0   :  { %6737 = vmatprep.subr.bf16.mxu0 %v9978_v0  ;;  %7393 = vmatprep.subr.bf16.mxu1 %v9981_v1  ;;  %v10073_v0 = vld [vmem:[%s13788_s1 + $0x16ec] ss:$16 sps:$4 sm:$0xff]   ;;  %v10068_v1 = vld [vmem:[%s13788_s1 + $0x16e0] ss:$16 sps:$4 sm:$0xff]  }
 0x2a3   :  { %6738 = vmatpush1.bf16.msra.mxu0 %v9976_v2  ;;  %7394 = vmatpush1.bf16.msra.mxu1 %v9979_v3  ;;  %v10071_v2 = vld [vmem:[%s13788_s1 + $0x16e8] ss:$16 sps:$4 sm:$0xff]   ;;  %v10076_v3 = vld [vmem:[%s13788_s1 + $0x1704] ss:$16 sps:$4 sm:$0xff]  }
 0x2a4   :  { %6739 = vmatprep.subr.bf16.mxu0 %v9984_v4  ;;  %7395 = vmatprep.subr.bf16.mxu1 %v9987_v5  ;;  %v10079_v4 = vld [vmem:[%s13788_s1 + $0x170c] ss:$16 sps:$4 sm:$0xff]   ;;  %v10074_v5 = vld [vmem:[%s13788_s1 + $0x1700] ss:$16 sps:$4 sm:$0xff]  }
 0x2a7   :  { %6740 = vmatpush1.bf16.msra.mxu0 %v9982_v6  ;;  %7396 = vmatpush1.bf16.msra.mxu1 %v9985_v7  ;;  %v10077_v6 = vld [vmem:[%s13788_s1 + $0x1708] ss:$16 sps:$4 sm:$0xff]   ;;  %v10082_v7 = vld [vmem:[%s13788_s1 + $0x1724] ss:$16 sps:$4 sm:$0xff]  }
 0x2a8   :  { %6741 = vmatprep.subr.bf16.mxu0 %v9990_v8  ;;  %7397 = vmatprep.subr.bf16.mxu1 %v9993_v9  ;;  %v10085_v8 = vld [vmem:[%s13788_s1 + $0x172c] ss:$16 sps:$4 sm:$0xff]   ;;  %v10080_v9 = vld [vmem:[%s13788_s1 + $0x1720] ss:$16 sps:$4 sm:$0xff]  }
 0x2ab   :  { %6742 = vmatpush1.bf16.msra.mxu0 %v9988_v10  ;;  %7398 = vmatpush1.bf16.msra.mxu1 %v9991_v12  ;;  %v10083_v10 = vld [vmem:[%s13788_s1 + $0x1728] ss:$16 sps:$4 sm:$0xff]   ;;  %v10088_v12 = vld [vmem:[%s13788_s1 + $0x1744] ss:$16 sps:$4 sm:$0xff]  }
 0x2ac   :  { %6743 = vmatprep.subr.bf16.mxu0 %v9996_v13  ;;  %7399 = vmatprep.subr.bf16.mxu1 %v9999_v15  ;;  %v10091_v13 = vld [vmem:[%s13788_s1 + $0x174c] ss:$16 sps:$4 sm:$0xff]   ;;  %v10086_v15 = vld [vmem:[%s13788_s1 + $0x1740] ss:$16 sps:$4 sm:$0xff]  }
 0x2af   :  { %6744 = vmatpush1.bf16.msra.mxu0 %v9994_v11  ;;  %7400 = vmatpush1.bf16.msra.mxu1 %v9997_v17  ;;  %v10089_v11 = vld [vmem:[%s13788_s1 + $0x1748] ss:$16 sps:$4 sm:$0xff]   ;;  %v10094_v17 = vld [vmem:[%s13788_s1 + $0x1764] ss:$16 sps:$4 sm:$0xff]  }
 0x2b0   :  { %6745 = vmatprep.subr.bf16.mxu0 %v10002_v14  ;;  %7401 = vmatprep.subr.bf16.mxu1 %v10005_v19  ;;  %v10097_v14 = vld [vmem:[%s13788_s1 + $0x176c] ss:$16 sps:$4 sm:$0xff]   ;;  %v10092_v19 = vld [vmem:[%s13788_s1 + $0x1760] ss:$16 sps:$4 sm:$0xff]  }
 0x2b3   :  { %6746 = vmatpush1.bf16.msra.mxu0 %v10000_v20  ;;  %7402 = vmatpush1.bf16.msra.mxu1 %v10003_v16  ;;  %v10095_v20 = vld [vmem:[%s13788_s1 + $0x1768] ss:$16 sps:$4 sm:$0xff]   ;;  %v10100_v16 = vld [vmem:[%s13788_s1 + $0x1784] ss:$16 sps:$4 sm:$0xff]  }
 0x2b4   :  { %6747 = vmatprep.subr.bf16.mxu0 %v10008_v22  ;;  %7403 = vmatprep.subr.bf16.mxu1 %v10011_v23  ;;  %v10103_v22 = vld [vmem:[%s13788_s1 + $0x178c] ss:$16 sps:$4 sm:$0xff]   ;;  %v10098_v23 = vld [vmem:[%s13788_s1 + $0x1780] ss:$16 sps:$4 sm:$0xff]  }
 0x2b7   :  { %6748 = vmatpush1.bf16.msra.mxu0 %v10006_v18  ;;  %7404 = vmatpush1.bf16.msra.mxu1 %v10009_v25  ;;  %v10101_v18 = vld [vmem:[%s13788_s1 + $0x1788] ss:$16 sps:$4 sm:$0xff]   ;;  %v10106_v25 = vld [vmem:[%s13788_s1 + $0x17a4] ss:$16 sps:$4 sm:$0xff]  }
 0x2b8   :  { %6749 = vmatprep.subr.bf16.mxu0 %v10014_v26  ;;  %7405 = vmatprep.subr.bf16.mxu1 %v10017_v21  ;;  %v10109_v26 = vld [vmem:[%s13788_s1 + $0x17ac] ss:$16 sps:$4 sm:$0xff]   ;;  %v10104_v21 = vld [vmem:[%s13788_s1 + $0x17a0] ss:$16 sps:$4 sm:$0xff]  }
 0x2bb   :  { %6750 = vmatpush1.bf16.msra.mxu0 %v10012_v28  ;;  %7406 = vmatpush1.bf16.msra.mxu1 %v10015_v29  ;;  %v10107_v28 = vld [vmem:[%s13788_s1 + $0x17a8] ss:$16 sps:$4 sm:$0xff]   ;;  %v10112_v29 = vld [vmem:[%s13788_s1 + $0x17c4] ss:$16 sps:$4 sm:$0xff]  }
 0x2bc   :  { %6751 = vmatprep.subr.bf16.mxu0 %v10020_v24  ;;  %7407 = vmatprep.subr.bf16.mxu1 %v10023_v31  ;;  %v10115_v24 = vld [vmem:[%s13788_s1 + $0x17cc] ss:$16 sps:$4 sm:$0xff]   ;;  %v10110_v31 = vld [vmem:[%s13788_s1 + $0x17c0] ss:$16 sps:$4 sm:$0xff]  }
 0x2bf   :  { %6752 = vmatpush1.bf16.msra.mxu0 %v10018_v32  ;;  %7408 = vmatpush1.bf16.msra.mxu1 %v10021_v33  ;;  %v10113_v32 = vld [vmem:[%s13788_s1 + $0x17c8] ss:$16 sps:$4 sm:$0xff]   ;;  %v10118_v33 = vld [vmem:[%s13788_s1 + $0x17e4] ss:$16 sps:$4 sm:$0xff]  }
 0x2c0   :  { %6762 = vmatprep.subr.bf16.mxu0 %v10028_v34  ;;  %7418 = vmatprep.subr.bf16.mxu1 %v10031_v35  ;;  %v10121_v34 = vld [vmem:[%s13788_s1 + $0x17ec] ss:$16 sps:$4 sm:$0xff]   ;;  %v10116_v35 = vld [vmem:[%s13788_s1 + $0x17e0] ss:$16 sps:$4 sm:$0xff]  }
 0x2c2   :  { %6754 = vmatmul.mubr.bf16.vlgmr.msra.gmra.mrb[0].mxu0 %v7787_v30  ;;  %7410 = vmatmul.mubr.bf16.vlgmr.msra.gmra.mrb[0].mxu1 %v7787_v30  ;;  %v10119_v30 = vld [vmem:[%s13788_s1 + $0x17e8] ss:$16 sps:$4 sm:$0xff]  }
 0x2c3   :  { %6763 = vmatpush1.bf16.msra.mxu0 %v10026_v37  ;;  %7419 = vmatpush1.bf16.msra.mxu1 %v10029_v38  ;;  %v10126_v37 = vld [vmem:[%s13788_s1 + $0x1804] ss:$16 sps:$4 sm:$0xff]   ;;  %v10129_v38 = vld [vmem:[%s13788_s1 + $0x180c] ss:$16 sps:$4 sm:$0xff]  }
 0x2c4   :  { %6764 = vmatprep.subr.bf16.mxu0 %v10034_v27  ;;  %7420 = vmatprep.subr.bf16.mxu1 %v10037_v39  ;;  %v7789_v27 = vcombine.low %v12761_v36, %v12761_v36  ;;  %v12962_v39 = vld [vmem:[%s13789_s0 + $0x60] sm:$0xff] }
 0x2c5   :  { %6794 = vmatprep.mubr.bf16.mxu0 %v7790_v40  ;;  %7450 = vmatprep.mubr.bf16.mxu1 %v7790_v40  ;;  %v10124_v40 = vld [vmem:[%s13788_s1 + $0x1800] ss:$16 sps:$4 sm:$0xff]   ;;  %v10132_v36 = vld [vmem:[%s13788_s1 + $0x1824] ss:$16 sps:$4 sm:$0xff]  }
 0x2c7   :  { %6765 = vmatpush1.bf16.msra.mxu0 %v10032_v41  ;;  %7421 = vmatpush1.bf16.msra.mxu1 %v10035_v42  ;;  %v10127_v41 = vld [vmem:[%s13788_s1 + $0x1808] ss:$16 sps:$4 sm:$0xff]   ;;  %v10135_v42 = vld [vmem:[%s13788_s1 + $0x182c] ss:$16 sps:$4 sm:$0xff]  }
 0x2c8   :  { %6766 = vmatprep.subr.bf16.mxu0 %v10040_v43  ;;  %7422 = vmatprep.subr.bf16.mxu1 %v10043_v44  ;;  %v7792_v43 = vcombine.high %v12962_v39, %v12962_v39  ;;  %v10130_v44 = vld [vmem:[%s13788_s1 + $0x1820] ss:$16 sps:$4 sm:$0xff]  }
 0x2cb   :  { %6767 = vmatpush1.bf16.msra.mxu0 %v10038_v45  ;;  %7423 = vmatpush1.bf16.msra.mxu1 %v10041_v46  ;;  %v10133_v45 = vld [vmem:[%s13788_s1 + $0x1828] ss:$16 sps:$4 sm:$0xff]   ;;  %v10138_v46 = vld [vmem:[%s13788_s1 + $0x1844] ss:$16 sps:$4 sm:$0xff]  }
 0x2cc   :  { %6768 = vmatprep.subr.bf16.mxu0 %v10046_v47  ;;  %7424 = vmatprep.subr.bf16.mxu1 %v10049_v48  ;;  %v10141_v47 = vld [vmem:[%s13788_s1 + $0x184c] ss:$16 sps:$4 sm:$0xff]   ;;  %v10136_v48 = vld [vmem:[%s13788_s1 + $0x1840] ss:$16 sps:$4 sm:$0xff]  }
 0x2cf   :  { %6769 = vmatpush1.bf16.msra.mxu0 %v10044_v49  ;;  %7425 = vmatpush1.bf16.msra.mxu1 %v10047_v50  ;;  %v10139_v49 = vld [vmem:[%s13788_s1 + $0x1848] ss:$16 sps:$4 sm:$0xff]   ;;  %v10144_v50 = vld [vmem:[%s13788_s1 + $0x1864] ss:$16 sps:$4 sm:$0xff]  }
 0x2d0   :  { %6770 = vmatprep.subr.bf16.mxu0 %v10052_v51  ;;  %7426 = vmatprep.subr.bf16.mxu1 %v10055_v52  ;;  %v10147_v51 = vld [vmem:[%s13788_s1 + $0x186c] ss:$16 sps:$4 sm:$0xff]   ;;  %v10142_v52 = vld [vmem:[%s13788_s1 + $0x1860] ss:$16 sps:$4 sm:$0xff]  }
 0x2d3   :  { %6771 = vmatpush1.bf16.msra.mxu0 %v10050_v53  ;;  %7427 = vmatpush1.bf16.msra.mxu1 %v10053_v54  ;;  %v10145_v53 = vld [vmem:[%s13788_s1 + $0x1868] ss:$16 sps:$4 sm:$0xff]   ;;  %v10150_v54 = vld [vmem:[%s13788_s1 + $0x1884] ss:$16 sps:$4 sm:$0xff]  }
 0x2d4   :  { %6772 = vmatprep.subr.bf16.mxu0 %v10058_v55  ;;  %7428 = vmatprep.subr.bf16.mxu1 %v10061_v56  ;;  %v10153_v55 = vld [vmem:[%s13788_s1 + $0x188c] ss:$16 sps:$4 sm:$0xff]   ;;  %v10148_v56 = vld [vmem:[%s13788_s1 + $0x1880] ss:$16 sps:$4 sm:$0xff]  }
 0x2d7   :  { %6773 = vmatpush1.bf16.msra.mxu0 %v10056_v57  ;;  %7429 = vmatpush1.bf16.msra.mxu1 %v10059_v58  ;;  %v10151_v57 = vld [vmem:[%s13788_s1 + $0x1888] ss:$16 sps:$4 sm:$0xff]   ;;  %v10156_v58 = vld [vmem:[%s13788_s1 + $0x18a4] ss:$16 sps:$4 sm:$0xff]  }
 0x2d8   :  { %6774 = vmatprep.subr.bf16.mxu0 %v10064_v59  ;;  %7430 = vmatprep.subr.bf16.mxu1 %v10067_v60  ;;  %v10159_v59 = vld [vmem:[%s13788_s1 + $0x18ac] ss:$16 sps:$4 sm:$0xff]   ;;  %v10154_v60 = vld [vmem:[%s13788_s1 + $0x18a0] ss:$16 sps:$4 sm:$0xff]  }
 0x2db   :  { %6775 = vmatpush1.bf16.msra.mxu0 %v10062_v61  ;;  %7431 = vmatpush1.bf16.msra.mxu1 %v10065_v62  ;;  %v10157_v61 = vld [vmem:[%s13788_s1 + $0x18a8] ss:$16 sps:$4 sm:$0xff]   ;;  %v10162_v62 = vld [vmem:[%s13788_s1 + $0x18c4] ss:$16 sps:$4 sm:$0xff]  }
 0x2dc   :  { %6776 = vmatprep.subr.bf16.mxu0 %v10070_v63  ;;  %7432 = vmatprep.subr.bf16.mxu1 %v10073_v0  ;;  %v10165_v63 = vld [vmem:[%s13788_s1 + $0x18cc] ss:$16 sps:$4 sm:$0xff]   ;;  %v10160_v0 = vld [vmem:[%s13788_s1 + $0x18c0] ss:$16 sps:$4 sm:$0xff]  }
 0x2df   :  { %6777 = vmatpush1.bf16.msra.mxu0 %v10068_v1  ;;  %7433 = vmatpush1.bf16.msra.mxu1 %v10071_v2  ;;  %v10163_v1 = vld [vmem:[%s13788_s1 + $0x18c8] ss:$16 sps:$4 sm:$0xff]   ;;  %v10168_v2 = vld [vmem:[%s13788_s1 + $0x18e4] ss:$16 sps:$4 sm:$0xff]  }
 0x2e0   :  { %6778 = vmatprep.subr.bf16.mxu0 %v10076_v3  ;;  %7434 = vmatprep.subr.bf16.mxu1 %v10079_v4  ;;  %v10171_v3 = vld [vmem:[%s13788_s1 + $0x18ec] ss:$16 sps:$4 sm:$0xff]   ;;  %v10166_v4 = vld [vmem:[%s13788_s1 + $0x18e0] ss:$16 sps:$4 sm:$0xff]  }
 0x2e3   :  { %6779 = vmatpush1.bf16.msra.mxu0 %v10074_v5  ;;  %7435 = vmatpush1.bf16.msra.mxu1 %v10077_v6  ;;  %v10169_v5 = vld [vmem:[%s13788_s1 + $0x18e8] ss:$16 sps:$4 sm:$0xff]   ;;  %v10174_v6 = vld [vmem:[%s13788_s1 + $0x1904] ss:$16 sps:$4 sm:$0xff]  }
 0x2e4   :  { %6780 = vmatprep.subr.bf16.mxu0 %v10082_v7  ;;  %7436 = vmatprep.subr.bf16.mxu1 %v10085_v8  ;;  %v10177_v7 = vld [vmem:[%s13788_s1 + $0x190c] ss:$16 sps:$4 sm:$0xff]   ;;  %v10172_v8 = vld [vmem:[%s13788_s1 + $0x1900] ss:$16 sps:$4 sm:$0xff]  }
 0x2e7   :  { %6781 = vmatpush1.bf16.msra.mxu0 %v10080_v9  ;;  %7437 = vmatpush1.bf16.msra.mxu1 %v10083_v10  ;;  %v10175_v9 = vld [vmem:[%s13788_s1 + $0x1908] ss:$16 sps:$4 sm:$0xff]   ;;  %v10180_v10 = vld [vmem:[%s13788_s1 + $0x1924] ss:$16 sps:$4 sm:$0xff]  }
 0x2e8   :  { %6782 = vmatprep.subr.bf16.mxu0 %v10088_v12  ;;  %7438 = vmatprep.subr.bf16.mxu1 %v10091_v13  ;;  %v10183_v12 = vld [vmem:[%s13788_s1 + $0x192c] ss:$16 sps:$4 sm:$0xff]   ;;  %v10178_v13 = vld [vmem:[%s13788_s1 + $0x1920] ss:$16 sps:$4 sm:$0xff]  }
 0x2eb   :  { %6783 = vmatpush1.bf16.msra.mxu0 %v10086_v15  ;;  %7439 = vmatpush1.bf16.msra.mxu1 %v10089_v11  ;;  %v10181_v15 = vld [vmem:[%s13788_s1 + $0x1928] ss:$16 sps:$4 sm:$0xff]   ;;  %v10186_v11 = vld [vmem:[%s13788_s1 + $0x1944] ss:$16 sps:$4 sm:$0xff]  }
 0x2ec   :  { %6784 = vmatprep.subr.bf16.mxu0 %v10094_v17  ;;  %7440 = vmatprep.subr.bf16.mxu1 %v10097_v14  ;;  %v10189_v17 = vld [vmem:[%s13788_s1 + $0x194c] ss:$16 sps:$4 sm:$0xff]   ;;  %v10184_v14 = vld [vmem:[%s13788_s1 + $0x1940] ss:$16 sps:$4 sm:$0xff]  }
 0x2ef   :  { %6785 = vmatpush1.bf16.msra.mxu0 %v10092_v19  ;;  %7441 = vmatpush1.bf16.msra.mxu1 %v10095_v20  ;;  %v10187_v19 = vld [vmem:[%s13788_s1 + $0x1948] ss:$16 sps:$4 sm:$0xff]   ;;  %v10192_v20 = vld [vmem:[%s13788_s1 + $0x1964] ss:$16 sps:$4 sm:$0xff]  }
 0x2f0   :  { %6786 = vmatprep.subr.bf16.mxu0 %v10100_v16  ;;  %7442 = vmatprep.subr.bf16.mxu1 %v10103_v22  ;;  %v10195_v16 = vld [vmem:[%s13788_s1 + $0x196c] ss:$16 sps:$4 sm:$0xff]   ;;  %v10190_v22 = vld [vmem:[%s13788_s1 + $0x1960] ss:$16 sps:$4 sm:$0xff]  }
 0x2f3   :  { %6787 = vmatpush1.bf16.msra.mxu0 %v10098_v23  ;;  %7443 = vmatpush1.bf16.msra.mxu1 %v10101_v18  ;;  %v10193_v23 = vld [vmem:[%s13788_s1 + $0x1968] ss:$16 sps:$4 sm:$0xff]   ;;  %v10198_v18 = vld [vmem:[%s13788_s1 + $0x1984] ss:$16 sps:$4 sm:$0xff]  }
 0x2f4   :  { %6788 = vmatprep.subr.bf16.mxu0 %v10106_v25  ;;  %7444 = vmatprep.subr.bf16.mxu1 %v10109_v26  ;;  %v10201_v25 = vld [vmem:[%s13788_s1 + $0x198c] ss:$16 sps:$4 sm:$0xff]   ;;  %v10196_v26 = vld [vmem:[%s13788_s1 + $0x1980] ss:$16 sps:$4 sm:$0xff]  }
 0x2f7   :  { %6789 = vmatpush1.bf16.msra.mxu0 %v10104_v21  ;;  %7445 = vmatpush1.bf16.msra.mxu1 %v10107_v28  ;;  %v10199_v21 = vld [vmem:[%s13788_s1 + $0x1988] ss:$16 sps:$4 sm:$0xff]   ;;  %v10204_v28 = vld [vmem:[%s13788_s1 + $0x19a4] ss:$16 sps:$4 sm:$0xff]  }
 0x2f8   :  { %6790 = vmatprep.subr.bf16.mxu0 %v10112_v29  ;;  %7446 = vmatprep.subr.bf16.mxu1 %v10115_v24  ;;  %v10207_v29 = vld [vmem:[%s13788_s1 + $0x19ac] ss:$16 sps:$4 sm:$0xff]   ;;  %v10202_v24 = vld [vmem:[%s13788_s1 + $0x19a0] ss:$16 sps:$4 sm:$0xff]  }
 0x2fb   :  { %6791 = vmatpush1.bf16.msra.mxu0 %v10110_v31  ;;  %7447 = vmatpush1.bf16.msra.mxu1 %v10113_v32  ;;  %v10205_v31 = vld [vmem:[%s13788_s1 + $0x19a8] ss:$16 sps:$4 sm:$0xff]   ;;  %v10210_v32 = vld [vmem:[%s13788_s1 + $0x19c4] ss:$16 sps:$4 sm:$0xff]  }
 0x2fc   :  { %6792 = vmatprep.subr.bf16.mxu0 %v10118_v33  ;;  %7448 = vmatprep.subr.bf16.mxu1 %v10121_v34  ;;  %v10213_v33 = vld [vmem:[%s13788_s1 + $0x19cc] ss:$16 sps:$4 sm:$0xff]   ;;  %v10208_v34 = vld [vmem:[%s13788_s1 + $0x19c0] ss:$16 sps:$4 sm:$0xff]  }
 0x2ff   :  { %6793 = vmatpush1.bf16.msra.mxu0 %v10116_v35  ;;  %7449 = vmatpush1.bf16.msra.mxu1 %v10119_v30  ;;  %v10211_v35 = vld [vmem:[%s13788_s1 + $0x19c8] ss:$16 sps:$4 sm:$0xff]   ;;  %v10216_v30 = vld [vmem:[%s13788_s1 + $0x19e4] ss:$16 sps:$4 sm:$0xff]  }
 0x300   :  { %6803 = vmatprep.subr.bf16.mxu0 %v10126_v37  ;;  %7459 = vmatprep.subr.bf16.mxu1 %v10129_v38  ;;  %v10219_v37 = vld [vmem:[%s13788_s1 + $0x19ec] ss:$16 sps:$4 sm:$0xff]   ;;  %v10214_v38 = vld [vmem:[%s13788_s1 + $0x19e0] ss:$16 sps:$4 sm:$0xff]  }
 0x302   :  { %6795 = vmatmul.mubr.bf16.vlgmr.msra.gmra.mrb[0].mxu0 %v7789_v27  ;;  %7451 = vmatmul.mubr.bf16.vlgmr.msra.gmra.mrb[0].mxu1 %v7789_v27  ;;  %v10217_v27 = vld [vmem:[%s13788_s1 + $0x19e8] ss:$16 sps:$4 sm:$0xff]  }
 0x303   :  { %6804 = vmatpush1.bf16.msra.mxu0 %v10124_v40  ;;  %7460 = vmatpush1.bf16.msra.mxu1 %v10127_v41  ;;  %v10224_v40 = vld [vmem:[%s13788_s1 + $0x1a04] ss:$16 sps:$4 sm:$0xff]   ;;  %v10227_v41 = vld [vmem:[%s13788_s1 + $0x1a0c] ss:$16 sps:$4 sm:$0xff]  }
 0x304   :  { %6805 = vmatprep.subr.bf16.mxu0 %v10132_v36  ;;  %7461 = vmatprep.subr.bf16.mxu1 %v10135_v42  ;;  %v7791_v36 = vcombine.low %v12962_v39, %v12962_v39  ;;  %v13163_v42 = vld [vmem:[%s13789_s0 + $0x68] sm:$0xff]  ;;  %v10230_v39 = vld [vmem:[%s13788_s1 + $0x1a24] ss:$16 sps:$4 sm:$0xff]  }
 0x305   :  { %6835 = vmatprep.mubr.bf16.mxu0 %v7792_v43  ;;  %7491 = vmatprep.mubr.bf16.mxu1 %v7792_v43  ;;  %v10222_v43 = vld [vmem:[%s13788_s1 + $0x1a00] ss:$16 sps:$4 sm:$0xff]  }
 0x307   :  { %6806 = vmatpush1.bf16.msra.mxu0 %v10130_v44  ;;  %7462 = vmatpush1.bf16.msra.mxu1 %v10133_v45  ;;  %v10225_v44 = vld [vmem:[%s13788_s1 + $0x1a08] ss:$16 sps:$4 sm:$0xff]   ;;  %v10233_v45 = vld [vmem:[%s13788_s1 + $0x1a2c] ss:$16 sps:$4 sm:$0xff]  }
 0x308   :  { %6807 = vmatprep.subr.bf16.mxu0 %v10138_v46  ;;  %7463 = vmatprep.subr.bf16.mxu1 %v10141_v47  ;;  %v7794_v46 = vcombine.high %v13163_v42, %v13163_v42  ;;  %v10228_v47 = vld [vmem:[%s13788_s1 + $0x1a20] ss:$16 sps:$4 sm:$0xff]  }
 0x30b   :  { %6808 = vmatpush1.bf16.msra.mxu0 %v10136_v48  ;;  %7464 = vmatpush1.bf16.msra.mxu1 %v10139_v49  ;;  %v10231_v48 = vld [vmem:[%s13788_s1 + $0x1a28] ss:$16 sps:$4 sm:$0xff]   ;;  %v10236_v49 = vld [vmem:[%s13788_s1 + $0x1a44] ss:$16 sps:$4 sm:$0xff]  }
 0x30c   :  { %6809 = vmatprep.subr.bf16.mxu0 %v10144_v50  ;;  %7465 = vmatprep.subr.bf16.mxu1 %v10147_v51  ;;  %v10239_v50 = vld [vmem:[%s13788_s1 + $0x1a4c] ss:$16 sps:$4 sm:$0xff]   ;;  %v10234_v51 = vld [vmem:[%s13788_s1 + $0x1a40] ss:$16 sps:$4 sm:$0xff]  }
 0x30f   :  { %6810 = vmatpush1.bf16.msra.mxu0 %v10142_v52  ;;  %7466 = vmatpush1.bf16.msra.mxu1 %v10145_v53  ;;  %v10237_v52 = vld [vmem:[%s13788_s1 + $0x1a48] ss:$16 sps:$4 sm:$0xff]   ;;  %v10242_v53 = vld [vmem:[%s13788_s1 + $0x1a64] ss:$16 sps:$4 sm:$0xff]  }
 0x310   :  { %6811 = vmatprep.subr.bf16.mxu0 %v10150_v54  ;;  %7467 = vmatprep.subr.bf16.mxu1 %v10153_v55  ;;  %v10245_v54 = vld [vmem:[%s13788_s1 + $0x1a6c] ss:$16 sps:$4 sm:$0xff]   ;;  %v10240_v55 = vld [vmem:[%s13788_s1 + $0x1a60] ss:$16 sps:$4 sm:$0xff]  }
 0x313   :  { %6812 = vmatpush1.bf16.msra.mxu0 %v10148_v56  ;;  %7468 = vmatpush1.bf16.msra.mxu1 %v10151_v57  ;;  %v10243_v56 = vld [vmem:[%s13788_s1 + $0x1a68] ss:$16 sps:$4 sm:$0xff]   ;;  %v10248_v57 = vld [vmem:[%s13788_s1 + $0x1a84] ss:$16 sps:$4 sm:$0xff]  }
 0x314   :  { %6813 = vmatprep.subr.bf16.mxu0 %v10156_v58  ;;  %7469 = vmatprep.subr.bf16.mxu1 %v10159_v59  ;;  %v10251_v58 = vld [vmem:[%s13788_s1 + $0x1a8c] ss:$16 sps:$4 sm:$0xff]   ;;  %v10246_v59 = vld [vmem:[%s13788_s1 + $0x1a80] ss:$16 sps:$4 sm:$0xff]  }
 0x317   :  { %6814 = vmatpush1.bf16.msra.mxu0 %v10154_v60  ;;  %7470 = vmatpush1.bf16.msra.mxu1 %v10157_v61  ;;  %v10249_v60 = vld [vmem:[%s13788_s1 + $0x1a88] ss:$16 sps:$4 sm:$0xff]   ;;  %v10254_v61 = vld [vmem:[%s13788_s1 + $0x1aa4] ss:$16 sps:$4 sm:$0xff]  }
 0x318   :  { %6815 = vmatprep.subr.bf16.mxu0 %v10162_v62  ;;  %7471 = vmatprep.subr.bf16.mxu1 %v10165_v63  ;;  %v10257_v62 = vld [vmem:[%s13788_s1 + $0x1aac] ss:$16 sps:$4 sm:$0xff]   ;;  %v10252_v63 = vld [vmem:[%s13788_s1 + $0x1aa0] ss:$16 sps:$4 sm:$0xff]  }
 0x31b   :  { %6816 = vmatpush1.bf16.msra.mxu0 %v10160_v0  ;;  %7472 = vmatpush1.bf16.msra.mxu1 %v10163_v1  ;;  %v10255_v0 = vld [vmem:[%s13788_s1 + $0x1aa8] ss:$16 sps:$4 sm:$0xff]   ;;  %v10260_v1 = vld [vmem:[%s13788_s1 + $0x1ac4] ss:$16 sps:$4 sm:$0xff]  }
 0x31c   :  { %6817 = vmatprep.subr.bf16.mxu0 %v10168_v2  ;;  %7473 = vmatprep.subr.bf16.mxu1 %v10171_v3  ;;  %v10263_v2 = vld [vmem:[%s13788_s1 + $0x1acc] ss:$16 sps:$4 sm:$0xff]   ;;  %v10258_v3 = vld [vmem:[%s13788_s1 + $0x1ac0] ss:$16 sps:$4 sm:$0xff]  }
 0x31f   :  { %6818 = vmatpush1.bf16.msra.mxu0 %v10166_v4  ;;  %7474 = vmatpush1.bf16.msra.mxu1 %v10169_v5  ;;  %v10261_v4 = vld [vmem:[%s13788_s1 + $0x1ac8] ss:$16 sps:$4 sm:$0xff]   ;;  %v10266_v5 = vld [vmem:[%s13788_s1 + $0x1ae4] ss:$16 sps:$4 sm:$0xff]  }
 0x320   :  { %6819 = vmatprep.subr.bf16.mxu0 %v10174_v6  ;;  %7475 = vmatprep.subr.bf16.mxu1 %v10177_v7  ;;  %v10269_v6 = vld [vmem:[%s13788_s1 + $0x1aec] ss:$16 sps:$4 sm:$0xff]   ;;  %v10264_v7 = vld [vmem:[%s13788_s1 + $0x1ae0] ss:$16 sps:$4 sm:$0xff]  }
 0x323   :  { %6820 = vmatpush1.bf16.msra.mxu0 %v10172_v8  ;;  %7476 = vmatpush1.bf16.msra.mxu1 %v10175_v9  ;;  %v10267_v8 = vld [vmem:[%s13788_s1 + $0x1ae8] ss:$16 sps:$4 sm:$0xff]   ;;  %v10272_v9 = vld [vmem:[%s13788_s1 + $0x1b04] ss:$16 sps:$4 sm:$0xff]  }
 0x324   :  { %6821 = vmatprep.subr.bf16.mxu0 %v10180_v10  ;;  %7477 = vmatprep.subr.bf16.mxu1 %v10183_v12  ;;  %v10275_v10 = vld [vmem:[%s13788_s1 + $0x1b0c] ss:$16 sps:$4 sm:$0xff]   ;;  %v10270_v12 = vld [vmem:[%s13788_s1 + $0x1b00] ss:$16 sps:$4 sm:$0xff]  }
 0x327   :  { %6822 = vmatpush1.bf16.msra.mxu0 %v10178_v13  ;;  %7478 = vmatpush1.bf16.msra.mxu1 %v10181_v15  ;;  %v10273_v13 = vld [vmem:[%s13788_s1 + $0x1b08] ss:$16 sps:$4 sm:$0xff]   ;;  %v10278_v15 = vld [vmem:[%s13788_s1 + $0x1b24] ss:$16 sps:$4 sm:$0xff]  }
 0x328   :  { %6823 = vmatprep.subr.bf16.mxu0 %v10186_v11  ;;  %7479 = vmatprep.subr.bf16.mxu1 %v10189_v17  ;;  %v10281_v11 = vld [vmem:[%s13788_s1 + $0x1b2c] ss:$16 sps:$4 sm:$0xff]   ;;  %v10276_v17 = vld [vmem:[%s13788_s1 + $0x1b20] ss:$16 sps:$4 sm:$0xff]  }
 0x32b   :  { %6824 = vmatpush1.bf16.msra.mxu0 %v10184_v14  ;;  %7480 = vmatpush1.bf16.msra.mxu1 %v10187_v19  ;;  %v10279_v14 = vld [vmem:[%s13788_s1 + $0x1b28] ss:$16 sps:$4 sm:$0xff]   ;;  %v10284_v19 = vld [vmem:[%s13788_s1 + $0x1b44] ss:$16 sps:$4 sm:$0xff]  }
 0x32c   :  { %6825 = vmatprep.subr.bf16.mxu0 %v10192_v20  ;;  %7481 = vmatprep.subr.bf16.mxu1 %v10195_v16  ;;  %v10287_v20 = vld [vmem:[%s13788_s1 + $0x1b4c] ss:$16 sps:$4 sm:$0xff]   ;;  %v10282_v16 = vld [vmem:[%s13788_s1 + $0x1b40] ss:$16 sps:$4 sm:$0xff]  }
 0x32f   :  { %6826 = vmatpush1.bf16.msra.mxu0 %v10190_v22  ;;  %7482 = vmatpush1.bf16.msra.mxu1 %v10193_v23  ;;  %v10285_v22 = vld [vmem:[%s13788_s1 + $0x1b48] ss:$16 sps:$4 sm:$0xff]   ;;  %v10290_v23 = vld [vmem:[%s13788_s1 + $0x1b64] ss:$16 sps:$4 sm:$0xff]  }
 0x330   :  { %6827 = vmatprep.subr.bf16.mxu0 %v10198_v18  ;;  %7483 = vmatprep.subr.bf16.mxu1 %v10201_v25  ;;  %v10293_v18 = vld [vmem:[%s13788_s1 + $0x1b6c] ss:$16 sps:$4 sm:$0xff]   ;;  %v10288_v25 = vld [vmem:[%s13788_s1 + $0x1b60] ss:$16 sps:$4 sm:$0xff]  }
 0x333   :  { %6828 = vmatpush1.bf16.msra.mxu0 %v10196_v26  ;;  %7484 = vmatpush1.bf16.msra.mxu1 %v10199_v21  ;;  %v10291_v26 = vld [vmem:[%s13788_s1 + $0x1b68] ss:$16 sps:$4 sm:$0xff]   ;;  %v10296_v21 = vld [vmem:[%s13788_s1 + $0x1b84] ss:$16 sps:$4 sm:$0xff]  }
 0x334   :  { %6829 = vmatprep.subr.bf16.mxu0 %v10204_v28  ;;  %7485 = vmatprep.subr.bf16.mxu1 %v10207_v29  ;;  %v10299_v28 = vld [vmem:[%s13788_s1 + $0x1b8c] ss:$16 sps:$4 sm:$0xff]   ;;  %v10294_v29 = vld [vmem:[%s13788_s1 + $0x1b80] ss:$16 sps:$4 sm:$0xff]  }
 0x337   :  { %6830 = vmatpush1.bf16.msra.mxu0 %v10202_v24  ;;  %7486 = vmatpush1.bf16.msra.mxu1 %v10205_v31  ;;  %v10297_v24 = vld [vmem:[%s13788_s1 + $0x1b88] ss:$16 sps:$4 sm:$0xff]   ;;  %v10302_v31 = vld [vmem:[%s13788_s1 + $0x1ba4] ss:$16 sps:$4 sm:$0xff]  }
 0x338   :  { %6831 = vmatprep.subr.bf16.mxu0 %v10210_v32  ;;  %7487 = vmatprep.subr.bf16.mxu1 %v10213_v33  ;;  %v10305_v32 = vld [vmem:[%s13788_s1 + $0x1bac] ss:$16 sps:$4 sm:$0xff]   ;;  %v10300_v33 = vld [vmem:[%s13788_s1 + $0x1ba0] ss:$16 sps:$4 sm:$0xff]  }
 0x33b   :  { %6832 = vmatpush1.bf16.msra.mxu0 %v10208_v34  ;;  %7488 = vmatpush1.bf16.msra.mxu1 %v10211_v35  ;;  %v10303_v34 = vld [vmem:[%s13788_s1 + $0x1ba8] ss:$16 sps:$4 sm:$0xff]   ;;  %v10308_v35 = vld [vmem:[%s13788_s1 + $0x1bc4] ss:$16 sps:$4 sm:$0xff]  }
 0x33c   :  { %6833 = vmatprep.subr.bf16.mxu0 %v10216_v30  ;;  %7489 = vmatprep.subr.bf16.mxu1 %v10219_v37  ;;  %v10311_v30 = vld [vmem:[%s13788_s1 + $0x1bcc] ss:$16 sps:$4 sm:$0xff]   ;;  %v10306_v37 = vld [vmem:[%s13788_s1 + $0x1bc0] ss:$16 sps:$4 sm:$0xff]  }
 0x33f   :  { %6834 = vmatpush1.bf16.msra.mxu0 %v10214_v38  ;;  %7490 = vmatpush1.bf16.msra.mxu1 %v10217_v27  ;;  %v10309_v38 = vld [vmem:[%s13788_s1 + $0x1bc8] ss:$16 sps:$4 sm:$0xff]   ;;  %v10314_v27 = vld [vmem:[%s13788_s1 + $0x1be4] ss:$16 sps:$4 sm:$0xff]  }
 0x340   :  { %6844 = vmatprep.subr.bf16.mxu0 %v10224_v40  ;;  %7500 = vmatprep.subr.bf16.mxu1 %v10227_v41  ;;  %v10317_v40 = vld [vmem:[%s13788_s1 + $0x1bec] ss:$16 sps:$4 sm:$0xff]   ;;  %v10312_v41 = vld [vmem:[%s13788_s1 + $0x1be0] ss:$16 sps:$4 sm:$0xff]  }
 0x342   :  { %6836 = vmatmul.mubr.bf16.vlgmr.msra.gmra.mrb[0].mxu0 %v7791_v36  ;;  %7492 = vmatmul.mubr.bf16.vlgmr.msra.gmra.mrb[0].mxu1 %v7791_v36  ;;  %v10315_v36 = vld [vmem:[%s13788_s1 + $0x1be8] ss:$16 sps:$4 sm:$0xff]  }
 0x343   :  { %6845 = vmatpush1.bf16.msra.mxu0 %v10222_v43  ;;  %7501 = vmatpush1.bf16.msra.mxu1 %v10225_v44  ;;  %v10322_v43 = vld [vmem:[%s13788_s1 + $0x1c04] ss:$16 sps:$4 sm:$0xff]   ;;  %v10325_v44 = vld [vmem:[%s13788_s1 + $0x1c0c] ss:$16 sps:$4 sm:$0xff]  }
 0x344   :  { %6846 = vmatprep.subr.bf16.mxu0 %v10230_v39  ;;  %7502 = vmatprep.subr.bf16.mxu1 %v10233_v45  ;;  %v7793_v39 = vcombine.low %v13163_v42, %v13163_v42  ;;  %v13364_v45 = vld [vmem:[%s13789_s0 + $0x70] sm:$0xff] }
 0x345   :  { %6876 = vmatprep.mubr.bf16.mxu0 %v7794_v46  ;;  %7532 = vmatprep.mubr.bf16.mxu1 %v7794_v46  ;;  %v10320_v46 = vld [vmem:[%s13788_s1 + $0x1c00] ss:$16 sps:$4 sm:$0xff]   ;;  %v10328_v42 = vld [vmem:[%s13788_s1 + $0x1c24] ss:$16 sps:$4 sm:$0xff]  }
 0x347   :  { %6847 = vmatpush1.bf16.msra.mxu0 %v10228_v47  ;;  %7503 = vmatpush1.bf16.msra.mxu1 %v10231_v48  ;;  %v10323_v47 = vld [vmem:[%s13788_s1 + $0x1c08] ss:$16 sps:$4 sm:$0xff]   ;;  %v10331_v48 = vld [vmem:[%s13788_s1 + $0x1c2c] ss:$16 sps:$4 sm:$0xff]  }
 0x348   :  { %6848 = vmatprep.subr.bf16.mxu0 %v10236_v49  ;;  %7504 = vmatprep.subr.bf16.mxu1 %v10239_v50  ;;  %v7796_v49 = vcombine.high %v13364_v45, %v13364_v45  ;;  %v10326_v50 = vld [vmem:[%s13788_s1 + $0x1c20] ss:$16 sps:$4 sm:$0xff]  }
 0x34b   :  { %6849 = vmatpush1.bf16.msra.mxu0 %v10234_v51  ;;  %7505 = vmatpush1.bf16.msra.mxu1 %v10237_v52  ;;  %v10329_v51 = vld [vmem:[%s13788_s1 + $0x1c28] ss:$16 sps:$4 sm:$0xff]   ;;  %v10334_v52 = vld [vmem:[%s13788_s1 + $0x1c44] ss:$16 sps:$4 sm:$0xff]  }
 0x34c   :  { %6850 = vmatprep.subr.bf16.mxu0 %v10242_v53  ;;  %7506 = vmatprep.subr.bf16.mxu1 %v10245_v54  ;;  %v10337_v53 = vld [vmem:[%s13788_s1 + $0x1c4c] ss:$16 sps:$4 sm:$0xff]   ;;  %v10332_v54 = vld [vmem:[%s13788_s1 + $0x1c40] ss:$16 sps:$4 sm:$0xff]  }
 0x34f   :  { %6851 = vmatpush1.bf16.msra.mxu0 %v10240_v55  ;;  %7507 = vmatpush1.bf16.msra.mxu1 %v10243_v56  ;;  %v10335_v55 = vld [vmem:[%s13788_s1 + $0x1c48] ss:$16 sps:$4 sm:$0xff]   ;;  %v10340_v56 = vld [vmem:[%s13788_s1 + $0x1c64] ss:$16 sps:$4 sm:$0xff]  }
 0x350   :  { %6852 = vmatprep.subr.bf16.mxu0 %v10248_v57  ;;  %7508 = vmatprep.subr.bf16.mxu1 %v10251_v58  ;;  %v10343_v57 = vld [vmem:[%s13788_s1 + $0x1c6c] ss:$16 sps:$4 sm:$0xff]   ;;  %v10338_v58 = vld [vmem:[%s13788_s1 + $0x1c60] ss:$16 sps:$4 sm:$0xff]  }
 0x353   :  { %6853 = vmatpush1.bf16.msra.mxu0 %v10246_v59  ;;  %7509 = vmatpush1.bf16.msra.mxu1 %v10249_v60  ;;  %v10341_v59 = vld [vmem:[%s13788_s1 + $0x1c68] ss:$16 sps:$4 sm:$0xff]   ;;  %v10346_v60 = vld [vmem:[%s13788_s1 + $0x1c84] ss:$16 sps:$4 sm:$0xff]  }
 0x354   :  { %6854 = vmatprep.subr.bf16.mxu0 %v10254_v61  ;;  %7510 = vmatprep.subr.bf16.mxu1 %v10257_v62  ;;  %v10349_v61 = vld [vmem:[%s13788_s1 + $0x1c8c] ss:$16 sps:$4 sm:$0xff]   ;;  %v10344_v62 = vld [vmem:[%s13788_s1 + $0x1c80] ss:$16 sps:$4 sm:$0xff]  }
 0x357   :  { %6855 = vmatpush1.bf16.msra.mxu0 %v10252_v63  ;;  %7511 = vmatpush1.bf16.msra.mxu1 %v10255_v0  ;;  %v10347_v63 = vld [vmem:[%s13788_s1 + $0x1c88] ss:$16 sps:$4 sm:$0xff]   ;;  %v10352_v0 = vld [vmem:[%s13788_s1 + $0x1ca4] ss:$16 sps:$4 sm:$0xff]  }
 0x358   :  { %6856 = vmatprep.subr.bf16.mxu0 %v10260_v1  ;;  %7512 = vmatprep.subr.bf16.mxu1 %v10263_v2  ;;  %v10355_v1 = vld [vmem:[%s13788_s1 + $0x1cac] ss:$16 sps:$4 sm:$0xff]   ;;  %v10350_v2 = vld [vmem:[%s13788_s1 + $0x1ca0] ss:$16 sps:$4 sm:$0xff]  }
 0x35b   :  { %6857 = vmatpush1.bf16.msra.mxu0 %v10258_v3  ;;  %7513 = vmatpush1.bf16.msra.mxu1 %v10261_v4  ;;  %v10353_v3 = vld [vmem:[%s13788_s1 + $0x1ca8] ss:$16 sps:$4 sm:$0xff]   ;;  %v10358_v4 = vld [vmem:[%s13788_s1 + $0x1cc4] ss:$16 sps:$4 sm:$0xff]  }
 0x35c   :  { %6858 = vmatprep.subr.bf16.mxu0 %v10266_v5  ;;  %7514 = vmatprep.subr.bf16.mxu1 %v10269_v6  ;;  %v10361_v5 = vld [vmem:[%s13788_s1 + $0x1ccc] ss:$16 sps:$4 sm:$0xff]   ;;  %v10356_v6 = vld [vmem:[%s13788_s1 + $0x1cc0] ss:$16 sps:$4 sm:$0xff]  }
 0x35f   :  { %6859 = vmatpush1.bf16.msra.mxu0 %v10264_v7  ;;  %7515 = vmatpush1.bf16.msra.mxu1 %v10267_v8  ;;  %v10359_v7 = vld [vmem:[%s13788_s1 + $0x1cc8] ss:$16 sps:$4 sm:$0xff]   ;;  %v10364_v8 = vld [vmem:[%s13788_s1 + $0x1ce4] ss:$16 sps:$4 sm:$0xff]  }
 0x360   :  { %6860 = vmatprep.subr.bf16.mxu0 %v10272_v9  ;;  %7516 = vmatprep.subr.bf16.mxu1 %v10275_v10  ;;  %v10367_v9 = vld [vmem:[%s13788_s1 + $0x1cec] ss:$16 sps:$4 sm:$0xff]   ;;  %v10362_v10 = vld [vmem:[%s13788_s1 + $0x1ce0] ss:$16 sps:$4 sm:$0xff]  }
 0x363   :  { %6861 = vmatpush1.bf16.msra.mxu0 %v10270_v12  ;;  %7517 = vmatpush1.bf16.msra.mxu1 %v10273_v13  ;;  %v10365_v12 = vld [vmem:[%s13788_s1 + $0x1ce8] ss:$16 sps:$4 sm:$0xff]   ;;  %v10370_v13 = vld [vmem:[%s13788_s1 + $0x1d04] ss:$16 sps:$4 sm:$0xff]  }
 0x364   :  { %6862 = vmatprep.subr.bf16.mxu0 %v10278_v15  ;;  %7518 = vmatprep.subr.bf16.mxu1 %v10281_v11  ;;  %v10373_v15 = vld [vmem:[%s13788_s1 + $0x1d0c] ss:$16 sps:$4 sm:$0xff]   ;;  %v10368_v11 = vld [vmem:[%s13788_s1 + $0x1d00] ss:$16 sps:$4 sm:$0xff]  }
 0x367   :  { %6863 = vmatpush1.bf16.msra.mxu0 %v10276_v17  ;;  %7519 = vmatpush1.bf16.msra.mxu1 %v10279_v14  ;;  %v10371_v17 = vld [vmem:[%s13788_s1 + $0x1d08] ss:$16 sps:$4 sm:$0xff]   ;;  %v10376_v14 = vld [vmem:[%s13788_s1 + $0x1d24] ss:$16 sps:$4 sm:$0xff]  }
 0x368   :  { %6864 = vmatprep.subr.bf16.mxu0 %v10284_v19  ;;  %7520 = vmatprep.subr.bf16.mxu1 %v10287_v20  ;;  %v10379_v19 = vld [vmem:[%s13788_s1 + $0x1d2c] ss:$16 sps:$4 sm:$0xff]   ;;  %v10374_v20 = vld [vmem:[%s13788_s1 + $0x1d20] ss:$16 sps:$4 sm:$0xff]  }
 0x36b   :  { %6865 = vmatpush1.bf16.msra.mxu0 %v10282_v16  ;;  %7521 = vmatpush1.bf16.msra.mxu1 %v10285_v22  ;;  %v10377_v16 = vld [vmem:[%s13788_s1 + $0x1d28] ss:$16 sps:$4 sm:$0xff]   ;;  %v10382_v22 = vld [vmem:[%s13788_s1 + $0x1d44] ss:$16 sps:$4 sm:$0xff]  }
 0x36c   :  { %6866 = vmatprep.subr.bf16.mxu0 %v10290_v23  ;;  %7522 = vmatprep.subr.bf16.mxu1 %v10293_v18  ;;  %v10385_v23 = vld [vmem:[%s13788_s1 + $0x1d4c] ss:$16 sps:$4 sm:$0xff]   ;;  %v10380_v18 = vld [vmem:[%s13788_s1 + $0x1d40] ss:$16 sps:$4 sm:$0xff]  }
 0x36f   :  { %6867 = vmatpush1.bf16.msra.mxu0 %v10288_v25  ;;  %7523 = vmatpush1.bf16.msra.mxu1 %v10291_v26  ;;  %v10383_v25 = vld [vmem:[%s13788_s1 + $0x1d48] ss:$16 sps:$4 sm:$0xff]   ;;  %v10388_v26 = vld [vmem:[%s13788_s1 + $0x1d64] ss:$16 sps:$4 sm:$0xff]  }
 0x370   :  { %6868 = vmatprep.subr.bf16.mxu0 %v10296_v21  ;;  %7524 = vmatprep.subr.bf16.mxu1 %v10299_v28  ;;  %v10391_v21 = vld [vmem:[%s13788_s1 + $0x1d6c] ss:$16 sps:$4 sm:$0xff]   ;;  %v10386_v28 = vld [vmem:[%s13788_s1 + $0x1d60] ss:$16 sps:$4 sm:$0xff]  }
 0x373   :  { %6869 = vmatpush1.bf16.msra.mxu0 %v10294_v29  ;;  %7525 = vmatpush1.bf16.msra.mxu1 %v10297_v24  ;;  %v10389_v29 = vld [vmem:[%s13788_s1 + $0x1d68] ss:$16 sps:$4 sm:$0xff]   ;;  %v10394_v24 = vld [vmem:[%s13788_s1 + $0x1d84] ss:$16 sps:$4 sm:$0xff]  }
 0x374   :  { %6870 = vmatprep.subr.bf16.mxu0 %v10302_v31  ;;  %7526 = vmatprep.subr.bf16.mxu1 %v10305_v32  ;;  %v10397_v31 = vld [vmem:[%s13788_s1 + $0x1d8c] ss:$16 sps:$4 sm:$0xff]   ;;  %v10392_v32 = vld [vmem:[%s13788_s1 + $0x1d80] ss:$16 sps:$4 sm:$0xff]  }
 0x377   :  { %6871 = vmatpush1.bf16.msra.mxu0 %v10300_v33  ;;  %7527 = vmatpush1.bf16.msra.mxu1 %v10303_v34  ;;  %v10395_v33 = vld [vmem:[%s13788_s1 + $0x1d88] ss:$16 sps:$4 sm:$0xff]   ;;  %v10400_v34 = vld [vmem:[%s13788_s1 + $0x1da4] ss:$16 sps:$4 sm:$0xff]  }
 0x378   :  { %6872 = vmatprep.subr.bf16.mxu0 %v10308_v35  ;;  %7528 = vmatprep.subr.bf16.mxu1 %v10311_v30  ;;  %v10403_v35 = vld [vmem:[%s13788_s1 + $0x1dac] ss:$16 sps:$4 sm:$0xff]   ;;  %v10398_v30 = vld [vmem:[%s13788_s1 + $0x1da0] ss:$16 sps:$4 sm:$0xff]  }
 0x37b   :  { %6873 = vmatpush1.bf16.msra.mxu0 %v10306_v37  ;;  %7529 = vmatpush1.bf16.msra.mxu1 %v10309_v38  ;;  %v10401_v37 = vld [vmem:[%s13788_s1 + $0x1da8] ss:$16 sps:$4 sm:$0xff]   ;;  %v10406_v38 = vld [vmem:[%s13788_s1 + $0x1dc4] ss:$16 sps:$4 sm:$0xff]  }
 0x37c   :  { %6874 = vmatprep.subr.bf16.mxu0 %v10314_v27  ;;  %7530 = vmatprep.subr.bf16.mxu1 %v10317_v40  ;;  %v10409_v27 = vld [vmem:[%s13788_s1 + $0x1dcc] ss:$16 sps:$4 sm:$0xff]   ;;  %v10404_v40 = vld [vmem:[%s13788_s1 + $0x1dc0] ss:$16 sps:$4 sm:$0xff]  }
 0x37f   :  { %6875 = vmatpush1.bf16.msra.mxu0 %v10312_v41  ;;  %7531 = vmatpush1.bf16.msra.mxu1 %v10315_v36  ;;  %v10407_v41 = vld [vmem:[%s13788_s1 + $0x1dc8] ss:$16 sps:$4 sm:$0xff]   ;;  %v10412_v36 = vld [vmem:[%s13788_s1 + $0x1de4] ss:$16 sps:$4 sm:$0xff]  }
 0x380   :  { %6885 = vmatprep.subr.bf16.mxu0 %v10322_v43  ;;  %7541 = vmatprep.subr.bf16.mxu1 %v10325_v44  ;;  %v10415_v43 = vld [vmem:[%s13788_s1 + $0x1dec] ss:$16 sps:$4 sm:$0xff]   ;;  %v10410_v44 = vld [vmem:[%s13788_s1 + $0x1de0] ss:$16 sps:$4 sm:$0xff]  }
 0x382   :  { %6877 = vmatmul.mubr.bf16.vlgmr.msra.gmra.mrb[0].mxu0 %v7793_v39  ;;  %7533 = vmatmul.mubr.bf16.vlgmr.msra.gmra.mrb[0].mxu1 %v7793_v39  ;;  %v10413_v39 = vld [vmem:[%s13788_s1 + $0x1de8] ss:$16 sps:$4 sm:$0xff]  }
 0x383   :  { %6886 = vmatpush1.bf16.msra.mxu0 %v10320_v46  ;;  %7542 = vmatpush1.bf16.msra.mxu1 %v10323_v47  ;;  %v10420_v46 = vld [vmem:[%s13788_s1 + $0x1e04] ss:$16 sps:$4 sm:$0xff]   ;;  %v10423_v47 = vld [vmem:[%s13788_s1 + $0x1e0c] ss:$16 sps:$4 sm:$0xff]  }
 0x384   :  { %6887 = vmatprep.subr.bf16.mxu0 %v10328_v42  ;;  %7543 = vmatprep.subr.bf16.mxu1 %v10331_v48  ;;  %v7795_v42 = vcombine.low %v13364_v45, %v13364_v45  ;;  %v13565_v48 = vld [vmem:[%s13789_s0 + $0x78] sm:$0xff]  ;;  %v10426_v45 = vld [vmem:[%s13788_s1 + $0x1e24] ss:$16 sps:$4 sm:$0xff]  }
 0x385   :  { %6917 = vmatprep.mubr.bf16.mxu0 %v7796_v49  ;;  %7573 = vmatprep.mubr.bf16.mxu1 %v7796_v49  ;;  %v10418_v49 = vld [vmem:[%s13788_s1 + $0x1e00] ss:$16 sps:$4 sm:$0xff]  }
 0x387   :  { %6888 = vmatpush1.bf16.msra.mxu0 %v10326_v50  ;;  %7544 = vmatpush1.bf16.msra.mxu1 %v10329_v51  ;;  %v10421_v50 = vld [vmem:[%s13788_s1 + $0x1e08] ss:$16 sps:$4 sm:$0xff]   ;;  %v10429_v51 = vld [vmem:[%s13788_s1 + $0x1e2c] ss:$16 sps:$4 sm:$0xff]  }
 0x388   :  { %6889 = vmatprep.subr.bf16.mxu0 %v10334_v52  ;;  %7545 = vmatprep.subr.bf16.mxu1 %v10337_v53  ;;  %v7798_v52 = vcombine.high %v13565_v48, %v13565_v48  ;;  %v10424_v53 = vld [vmem:[%s13788_s1 + $0x1e20] ss:$16 sps:$4 sm:$0xff]  }
 0x38b   :  { %6890 = vmatpush1.bf16.msra.mxu0 %v10332_v54  ;;  %7546 = vmatpush1.bf16.msra.mxu1 %v10335_v55  ;;  %v10427_v54 = vld [vmem:[%s13788_s1 + $0x1e28] ss:$16 sps:$4 sm:$0xff]   ;;  %v10432_v55 = vld [vmem:[%s13788_s1 + $0x1e44] ss:$16 sps:$4 sm:$0xff]  }
 0x38c   :  { %6891 = vmatprep.subr.bf16.mxu0 %v10340_v56  ;;  %7547 = vmatprep.subr.bf16.mxu1 %v10343_v57  ;;  %v10435_v56 = vld [vmem:[%s13788_s1 + $0x1e4c] ss:$16 sps:$4 sm:$0xff]   ;;  %v10430_v57 = vld [vmem:[%s13788_s1 + $0x1e40] ss:$16 sps:$4 sm:$0xff]  }
 0x38f   :  { %6892 = vmatpush1.bf16.msra.mxu0 %v10338_v58  ;;  %7548 = vmatpush1.bf16.msra.mxu1 %v10341_v59  ;;  %v10433_v58 = vld [vmem:[%s13788_s1 + $0x1e48] ss:$16 sps:$4 sm:$0xff]   ;;  %v10438_v59 = vld [vmem:[%s13788_s1 + $0x1e64] ss:$16 sps:$4 sm:$0xff]  }
 0x390   :  { %6893 = vmatprep.subr.bf16.mxu0 %v10346_v60  ;;  %7549 = vmatprep.subr.bf16.mxu1 %v10349_v61  ;;  %v10441_v60 = vld [vmem:[%s13788_s1 + $0x1e6c] ss:$16 sps:$4 sm:$0xff]   ;;  %v10436_v61 = vld [vmem:[%s13788_s1 + $0x1e60] ss:$16 sps:$4 sm:$0xff]  }
 0x393   :  { %6894 = vmatpush1.bf16.msra.mxu0 %v10344_v62  ;;  %7550 = vmatpush1.bf16.msra.mxu1 %v10347_v63  ;;  %v10439_v62 = vld [vmem:[%s13788_s1 + $0x1e68] ss:$16 sps:$4 sm:$0xff]   ;;  %v10444_v63 = vld [vmem:[%s13788_s1 + $0x1e84] ss:$16 sps:$4 sm:$0xff]  }
 0x394   :  { %6895 = vmatprep.subr.bf16.mxu0 %v10352_v0  ;;  %7551 = vmatprep.subr.bf16.mxu1 %v10355_v1  ;;  %v10447_v0 = vld [vmem:[%s13788_s1 + $0x1e8c] ss:$16 sps:$4 sm:$0xff]   ;;  %v10442_v1 = vld [vmem:[%s13788_s1 + $0x1e80] ss:$16 sps:$4 sm:$0xff]  }
 0x397   :  { %6896 = vmatpush1.bf16.msra.mxu0 %v10350_v2  ;;  %7552 = vmatpush1.bf16.msra.mxu1 %v10353_v3  ;;  %v10445_v2 = vld [vmem:[%s13788_s1 + $0x1e88] ss:$16 sps:$4 sm:$0xff]   ;;  %v10450_v3 = vld [vmem:[%s13788_s1 + $0x1ea4] ss:$16 sps:$4 sm:$0xff]  }
 0x398   :  { %6897 = vmatprep.subr.bf16.mxu0 %v10358_v4  ;;  %7553 = vmatprep.subr.bf16.mxu1 %v10361_v5  ;;  %v10453_v4 = vld [vmem:[%s13788_s1 + $0x1eac] ss:$16 sps:$4 sm:$0xff]   ;;  %v10448_v5 = vld [vmem:[%s13788_s1 + $0x1ea0] ss:$16 sps:$4 sm:$0xff]  }
 0x39b   :  { %6898 = vmatpush1.bf16.msra.mxu0 %v10356_v6  ;;  %7554 = vmatpush1.bf16.msra.mxu1 %v10359_v7  ;;  %v10451_v6 = vld [vmem:[%s13788_s1 + $0x1ea8] ss:$16 sps:$4 sm:$0xff]   ;;  %v10456_v7 = vld [vmem:[%s13788_s1 + $0x1ec4] ss:$16 sps:$4 sm:$0xff]  }
 0x39c   :  { %6899 = vmatprep.subr.bf16.mxu0 %v10364_v8  ;;  %7555 = vmatprep.subr.bf16.mxu1 %v10367_v9  ;;  %v10459_v8 = vld [vmem:[%s13788_s1 + $0x1ecc] ss:$16 sps:$4 sm:$0xff]   ;;  %v10454_v9 = vld [vmem:[%s13788_s1 + $0x1ec0] ss:$16 sps:$4 sm:$0xff]  }
 0x39f   :  { %6900 = vmatpush1.bf16.msra.mxu0 %v10362_v10  ;;  %7556 = vmatpush1.bf16.msra.mxu1 %v10365_v12  ;;  %v10457_v10 = vld [vmem:[%s13788_s1 + $0x1ec8] ss:$16 sps:$4 sm:$0xff]   ;;  %v10462_v12 = vld [vmem:[%s13788_s1 + $0x1ee4] ss:$16 sps:$4 sm:$0xff]  }
 0x3a0   :  { %6901 = vmatprep.subr.bf16.mxu0 %v10370_v13  ;;  %7557 = vmatprep.subr.bf16.mxu1 %v10373_v15  ;;  %v10465_v13 = vld [vmem:[%s13788_s1 + $0x1eec] ss:$16 sps:$4 sm:$0xff]   ;;  %v10460_v15 = vld [vmem:[%s13788_s1 + $0x1ee0] ss:$16 sps:$4 sm:$0xff]  }
 0x3a3   :  { %6902 = vmatpush1.bf16.msra.mxu0 %v10368_v11  ;;  %7558 = vmatpush1.bf16.msra.mxu1 %v10371_v17  ;;  %v10463_v11 = vld [vmem:[%s13788_s1 + $0x1ee8] ss:$16 sps:$4 sm:$0xff]   ;;  %v10468_v17 = vld [vmem:[%s13788_s1 + $0x1f04] ss:$16 sps:$4 sm:$0xff]  }
 0x3a4   :  { %6903 = vmatprep.subr.bf16.mxu0 %v10376_v14  ;;  %7559 = vmatprep.subr.bf16.mxu1 %v10379_v19  ;;  %v10471_v14 = vld [vmem:[%s13788_s1 + $0x1f0c] ss:$16 sps:$4 sm:$0xff]   ;;  %v10466_v19 = vld [vmem:[%s13788_s1 + $0x1f00] ss:$16 sps:$4 sm:$0xff]  }
 0x3a7   :  { %6904 = vmatpush1.bf16.msra.mxu0 %v10374_v20  ;;  %7560 = vmatpush1.bf16.msra.mxu1 %v10377_v16  ;;  %v10469_v20 = vld [vmem:[%s13788_s1 + $0x1f08] ss:$16 sps:$4 sm:$0xff]   ;;  %v10474_v16 = vld [vmem:[%s13788_s1 + $0x1f24] ss:$16 sps:$4 sm:$0xff]  }
 0x3a8   :  { %6905 = vmatprep.subr.bf16.mxu0 %v10382_v22  ;;  %7561 = vmatprep.subr.bf16.mxu1 %v10385_v23  ;;  %v10477_v22 = vld [vmem:[%s13788_s1 + $0x1f2c] ss:$16 sps:$4 sm:$0xff]   ;;  %v10472_v23 = vld [vmem:[%s13788_s1 + $0x1f20] ss:$16 sps:$4 sm:$0xff]  }
 0x3ab   :  { %6906 = vmatpush1.bf16.msra.mxu0 %v10380_v18  ;;  %7562 = vmatpush1.bf16.msra.mxu1 %v10383_v25  ;;  %v10475_v18 = vld [vmem:[%s13788_s1 + $0x1f28] ss:$16 sps:$4 sm:$0xff]   ;;  %v10480_v25 = vld [vmem:[%s13788_s1 + $0x1f44] ss:$16 sps:$4 sm:$0xff]  }
 0x3ac   :  { %6907 = vmatprep.subr.bf16.mxu0 %v10388_v26  ;;  %7563 = vmatprep.subr.bf16.mxu1 %v10391_v21  ;;  %v10483_v26 = vld [vmem:[%s13788_s1 + $0x1f4c] ss:$16 sps:$4 sm:$0xff]   ;;  %v10478_v21 = vld [vmem:[%s13788_s1 + $0x1f40] ss:$16 sps:$4 sm:$0xff]  }
 0x3af   :  { %6908 = vmatpush1.bf16.msra.mxu0 %v10386_v28  ;;  %7564 = vmatpush1.bf16.msra.mxu1 %v10389_v29  ;;  %v10481_v28 = vld [vmem:[%s13788_s1 + $0x1f48] ss:$16 sps:$4 sm:$0xff]   ;;  %v10486_v29 = vld [vmem:[%s13788_s1 + $0x1f64] ss:$16 sps:$4 sm:$0xff]  }
 0x3b0   :  { %6909 = vmatprep.subr.bf16.mxu0 %v10394_v24  ;;  %7565 = vmatprep.subr.bf16.mxu1 %v10397_v31  ;;  %v10489_v24 = vld [vmem:[%s13788_s1 + $0x1f6c] ss:$16 sps:$4 sm:$0xff]   ;;  %v10484_v31 = vld [vmem:[%s13788_s1 + $0x1f60] ss:$16 sps:$4 sm:$0xff]  }
 0x3b3   :  { %6910 = vmatpush1.bf16.msra.mxu0 %v10392_v32  ;;  %7566 = vmatpush1.bf16.msra.mxu1 %v10395_v33  ;;  %v10487_v32 = vld [vmem:[%s13788_s1 + $0x1f68] ss:$16 sps:$4 sm:$0xff]   ;;  %v10492_v33 = vld [vmem:[%s13788_s1 + $0x1f84] ss:$16 sps:$4 sm:$0xff]  }
 0x3b4   :  { %6911 = vmatprep.subr.bf16.mxu0 %v10400_v34  ;;  %7567 = vmatprep.subr.bf16.mxu1 %v10403_v35  ;;  %v10495_v34 = vld [vmem:[%s13788_s1 + $0x1f8c] ss:$16 sps:$4 sm:$0xff]   ;;  %v10490_v35 = vld [vmem:[%s13788_s1 + $0x1f80] ss:$16 sps:$4 sm:$0xff]  }
 0x3b7   :  { %6912 = vmatpush1.bf16.msra.mxu0 %v10398_v30  ;;  %7568 = vmatpush1.bf16.msra.mxu1 %v10401_v37  ;;  %v10493_v30 = vld [vmem:[%s13788_s1 + $0x1f88] ss:$16 sps:$4 sm:$0xff]   ;;  %v10498_v37 = vld [vmem:[%s13788_s1 + $0x1fa4] ss:$16 sps:$4 sm:$0xff]  }
 0x3b8   :  { %6913 = vmatprep.subr.bf16.mxu0 %v10406_v38  ;;  %7569 = vmatprep.subr.bf16.mxu1 %v10409_v27  ;;  %v10501_v38 = vld [vmem:[%s13788_s1 + $0x1fac] ss:$16 sps:$4 sm:$0xff]   ;;  %v10496_v27 = vld [vmem:[%s13788_s1 + $0x1fa0] ss:$16 sps:$4 sm:$0xff]  }
 0x3bb   :  { %6914 = vmatpush1.bf16.msra.mxu0 %v10404_v40  ;;  %7570 = vmatpush1.bf16.msra.mxu1 %v10407_v41  ;;  %v10499_v40 = vld [vmem:[%s13788_s1 + $0x1fa8] ss:$16 sps:$4 sm:$0xff]   ;;  %v10504_v41 = vld [vmem:[%s13788_s1 + $0x1fc4] ss:$16 sps:$4 sm:$0xff]  }
 0x3bc   :  { %6915 = vmatprep.subr.bf16.mxu0 %v10412_v36  ;;  %7571 = vmatprep.subr.bf16.mxu1 %v10415_v43  ;;  %v10507_v36 = vld [vmem:[%s13788_s1 + $0x1fcc] ss:$16 sps:$4 sm:$0xff]   ;;  %v10502_v43 = vld [vmem:[%s13788_s1 + $0x1fc0] ss:$16 sps:$4 sm:$0xff]  }
 0x3bf   :  { %6916 = vmatpush1.bf16.msra.mxu0 %v10410_v44  ;;  %7572 = vmatpush1.bf16.msra.mxu1 %v10413_v39  ;;  %v10505_v44 = vld [vmem:[%s13788_s1 + $0x1fc8] ss:$16 sps:$4 sm:$0xff]   ;;  %v10510_v39 = vld [vmem:[%s13788_s1 + $0x1fe4] ss:$16 sps:$4 sm:$0xff]  }
 0x3c0   :  { %6926 = vmatprep.subr.bf16.mxu0 %v10420_v46  ;;  %7582 = vmatprep.subr.bf16.mxu1 %v10423_v47  ;;  %v10513_v46 = vld [vmem:[%s13788_s1 + $0x1fec] ss:$16 sps:$4 sm:$0xff]   ;;  %v10508_v47 = vld [vmem:[%s13788_s1 + $0x1fe0] ss:$16 sps:$4 sm:$0xff]  }
 0x3c2   :  { %6918 = vmatmul.mubr.bf16.vlgmr.msra.gmra.mrb[0].mxu0 %v7795_v42  ;;  %7574 = vmatmul.mubr.bf16.vlgmr.msra.gmra.mrb[0].mxu1 %v7795_v42  ;;  %v10511_v42 = vld [vmem:[%s13788_s1 + $0x1fe8] ss:$16 sps:$4 sm:$0xff]  }
 0x3c3   :  { %6927 = vmatpush1.bf16.msra.mxu0 %v10418_v49  ;;  %7583 = vmatpush1.bf16.msra.mxu1 %v10421_v50  ;;  %v7797_v49 = vcombine.low %v13565_v48, %v13565_v48  ;;  %v1059_v50 = vlaneseq }
 0x3c4   :  { %6928 = vmatprep.subr.bf16.mxu0 %v10426_v45  ;;  %7584 = vmatprep.subr.bf16.mxu1 %v10429_v51 }
 0x3c5   :  { %6958 = vmatprep.mubr.bf16.mxu0 %v7798_v52  ;;  %7614 = vmatprep.mubr.bf16.mxu1 %v7798_v52  ;;  %v1060_v45 = vshrl.u32 %v1059_v50, 7  ;;  %vm7694_vm0 = vcmp.lt.s32.totalorder %v1059_v50, 512 }
 0x3c7   :  { %6929 = vmatpush1.bf16.msra.mxu0 %v10424_v53  ;;  %7585 = vmatpush1.bf16.msra.mxu1 %v10427_v54  ;;  %v1061_v51 = vsub.s32 0, %v1060_v45  ;;  %v1069_v52 = vsub.s32 2, %v1060_v45  ;;  %v1057_v53 = vld [vmem:[%s13790_s2] sm:$0xf]  ;;  %v10516_v54 = vmov 1966171168  }
 0x3c8   :  { %6930 = vmatprep.subr.bf16.mxu0 %v10432_v55  ;;  %7586 = vmatprep.subr.bf16.mxu1 %v10435_v56  ;;  %v7670_v55 = vunpack.c.l.s4 %v10516_v54  ;;  %v1065_v56 = vsub.s32 1, %v1060_v45 }
 0x3ca   :  { %v7671_v48 = vunpack.c.0.s8 %v7670_v55 }
 0x3cb   :  { %6931 = vmatpush1.bf16.msra.mxu0 %v10430_v57  ;;  %7587 = vmatpush1.bf16.msra.mxu1 %v10433_v58  ;;  %v1073_v57 = vsub.s32 3, %v1060_v45  ;;  %v1062_v58 = vrot.slane %v1057_v53, %v1061_v51 }
 0x3cc   :  { %6932 = vmatprep.subr.bf16.mxu0 %v10438_v59  ;;  %7588 = vmatprep.subr.bf16.mxu1 %v10441_v60  ;;  %v1070_v59 = vrot.slane %v1057_v53, %v1069_v52  ;;  %v1066_v60 = vrot.slane %v1057_v53, %v1065_v56 }
 0x3cf   :  { %6933 = vmatpush1.bf16.msra.mxu0 %v10436_v61  ;;  %7589 = vmatpush1.bf16.msra.mxu1 %v10439_v62  ;;  %v1074_v61 = vrot.slane %v1057_v53, %v1073_v57 }
 0x3d0   :  { %6934 = vmatprep.subr.bf16.mxu0 %v10444_v63  ;;  %7590 = vmatprep.subr.bf16.mxu1 %v10447_v0 }
 0x3d3   :  { %6935 = vmatpush1.bf16.msra.mxu0 %v10442_v1  ;;  %7591 = vmatpush1.bf16.msra.mxu1 %v10445_v2 }
 0x3d4   :  { %6936 = vmatprep.subr.bf16.mxu0 %v10450_v3  ;;  %7592 = vmatprep.subr.bf16.mxu1 %v10453_v4  ;;  %v13761_v4 = vsub.s32 %v7671_v48, %v1060_v45 }
 0x3d7   :  { %6937 = vmatpush1.bf16.msra.mxu0 %v10448_v5  ;;  %7593 = vmatpush1.bf16.msra.mxu1 %v10451_v6 }
 0x3d8   :  { %6938 = vmatprep.subr.bf16.mxu0 %v10456_v7  ;;  %7594 = vmatprep.subr.bf16.mxu1 %v10459_v8 }
 0x3db   :  { %6939 = vmatpush1.bf16.msra.mxu0 %v10454_v9  ;;  %7595 = vmatpush1.bf16.msra.mxu1 %v10457_v10 }
 0x3dc   :  { %6940 = vmatprep.subr.bf16.mxu0 %v10462_v12  ;;  %7596 = vmatprep.subr.bf16.mxu1 %v10465_v13 }
 0x3df   :  { %6941 = vmatpush1.bf16.msra.mxu0 %v10460_v15  ;;  %7597 = vmatpush1.bf16.msra.mxu1 %v10463_v11 }
 0x3e0   :  { %6942 = vmatprep.subr.bf16.mxu0 %v10468_v17  ;;  %7598 = vmatprep.subr.bf16.mxu1 %v10471_v14 }
 0x3e3   :  { %6943 = vmatpush1.bf16.msra.mxu0 %v10466_v19  ;;  %7599 = vmatpush1.bf16.msra.mxu1 %v10469_v20 }
 0x3e4   :  { %6944 = vmatprep.subr.bf16.mxu0 %v10474_v16  ;;  %7600 = vmatprep.subr.bf16.mxu1 %v10477_v22 }
 0x3e7   :  { %6945 = vmatpush1.bf16.msra.mxu0 %v10472_v23  ;;  %7601 = vmatpush1.bf16.msra.mxu1 %v10475_v18 }
 0x3e8   :  { %6946 = vmatprep.subr.bf16.mxu0 %v10480_v25  ;;  %7602 = vmatprep.subr.bf16.mxu1 %v10483_v26 }
 0x3eb   :  { %6947 = vmatpush1.bf16.msra.mxu0 %v10478_v21  ;;  %7603 = vmatpush1.bf16.msra.mxu1 %v10481_v28 }
 0x3ec   :  { %6948 = vmatprep.subr.bf16.mxu0 %v10486_v29  ;;  %7604 = vmatprep.subr.bf16.mxu1 %v10489_v24 }
 0x3ef   :  { %6949 = vmatpush1.bf16.msra.mxu0 %v10484_v31  ;;  %7605 = vmatpush1.bf16.msra.mxu1 %v10487_v32 }
 0x3f0   :  { %6950 = vmatprep.subr.bf16.mxu0 %v10492_v33  ;;  %7606 = vmatprep.subr.bf16.mxu1 %v10495_v34 }
 0x3f3   :  { %6951 = vmatpush1.bf16.msra.mxu0 %v10490_v35  ;;  %7607 = vmatpush1.bf16.msra.mxu1 %v10493_v30 }
 0x3f4   :  { %6952 = vmatprep.subr.bf16.mxu0 %v10498_v37  ;;  %7608 = vmatprep.subr.bf16.mxu1 %v10501_v38 }
 0x3f7   :  { %6953 = vmatpush1.bf16.msra.mxu0 %v10496_v27  ;;  %7609 = vmatpush1.bf16.msra.mxu1 %v10499_v40 }
 0x3f8   :  { %6954 = vmatprep.subr.bf16.mxu0 %v10504_v41  ;;  %7610 = vmatprep.subr.bf16.mxu1 %v10507_v36 }
 0x3fb   :  { %6955 = vmatpush1.bf16.msra.mxu0 %v10502_v43  ;;  %7611 = vmatpush1.bf16.msra.mxu1 %v10505_v44 }
 0x3fc   :  { %6956 = vmatprep.subr.bf16.mxu0 %v10510_v39  ;;  %7612 = vmatprep.subr.bf16.mxu1 %v10513_v46 }
 0x3ff   :  { %6957 = vmatpush1.bf16.msra.mxu0 %v10508_v47  ;;  %7613 = vmatpush1.bf16.msra.mxu1 %v10511_v42 }
 0x402   :  { %6959 = vmatmul.mubr.bf16.vlgmr.msra.gmra.mrb[0].mxu0 %v7797_v49  ;;  %7615 = vmatmul.mubr.bf16.vlgmr.msra.gmra.mrb[0].mxu1 %v7797_v49 }
 0x4d5   :  { %v6960_v62 = vpop.f32.mrb[0].mxu0  ;;  %v7616_v63 = vpop.f32.mrb[0].mxu1 }
 0x4d6   :  { %v8823_v0 = vadd.f32 %v6960_v62, %v1062_v58  ;;  %v8825_v1 = vadd.f32 %v7616_v63, %v1070_v59  ;;  %v6962_v2 = vpop.f32.mrb[1].mxu0  ;;  %v7618_v3 = vpop.f32.mrb[1].mxu1 }
 0x4d7   :  { %v8824_v5 = vadd.f32 %v6962_v2, %v1066_v60  ;;  %v8826_v6 = vadd.f32 %v7618_v3, %v1074_v61  ;;  %v6964_v7 = vpop.f32.mrb[2].mxu0  ;;  %v7620_v8 = vpop.f32.mrb[2].mxu1 }
 0x4d8   :  { %7623 = vst [vmem:[%s13791_s3] sm:$0xff] %v8823_v0  ;;  %v7639_v9 = vrot.slane %v8823_v0, 4  ;;  %v7697_v10 = vmul.f32 %v8823_v0, %v8823_v0  ;;  %7625 = vst [vmem:[%s13791_s3 + $0x10] sm:$0xff] %v8825_v1  ;;  %v7651_v12 = vrot.slane %v8825_v1, 4  ;;  %v7699_v13 = vmul.f32 %v8825_v1, %v8825_v1  ;;  %v6965_v15 = vpop.f32.mrb[3].mxu0  ;;  %v7621_v11 = vpop.f32.mrb[3].mxu1 }
 0x4d9   :  { %7624 = vst [vmem:[%s13791_s3 + $0x8] sm:$0xff] %v8824_v5  ;;  %v7645_v17 = vrot.slane %v8824_v5, 4  ;;  %v7698_v14 = vmul.f32 %v8824_v5, %v8824_v5  ;;  %7626 = vst [vmem:[%s13791_s3 + $0x18] sm:$0xff] %v8826_v6  ;;  %v7657_v19 = vrot.slane %v8826_v6, 4  ;;  %v7700_v20 = vmul.f32 %v8826_v6, %v8826_v6 }
 0x4da   :  { %v7640_v16 = vadd.f32 %v8823_v0, %v7639_v9  ;;  %v7701_v22 = vrot.slane %v7697_v10, 4  ;;  %v7652_v23 = vadd.f32 %v8825_v1, %v7651_v12  ;;  %v7713_v18 = vrot.slane %v7699_v13, 4 }
 0x4db   :  { %v7646_v25 = vadd.f32 %v8824_v5, %v7645_v17  ;;  %v7707_v26 = vrot.slane %v7698_v14, 4  ;;  %v7658_v21 = vadd.f32 %v8826_v6, %v7657_v19  ;;  %v7719_v28 = vrot.slane %v7700_v20, 4 }
 0x4dc   :  { %v7641_v29 = vrot.slane %v7640_v16, 2  ;;  %v7702_v24 = vadd.f32 %v7701_v22, %v7697_v10  ;;  %v7653_v31 = vrot.slane %v7652_v23, 2  ;;  %v7714_v32 = vadd.f32 %v7713_v18, %v7699_v13 }
 0x4dd   :  { %v7647_v33 = vrot.slane %v7646_v25, 2  ;;  %v7708_v34 = vadd.f32 %v7707_v26, %v7698_v14  ;;  %v7659_v35 = vrot.slane %v7658_v21, 2  ;;  %v7720_v30 = vadd.f32 %v7719_v28, %v7700_v20 }
 0x4de   :  { %v7642_v37 = vadd.f32 %v7641_v29, %v7640_v16  ;;  %v7703_v38 = vrot.slane %v7702_v24, 2  ;;  %v7654_v27 = vadd.f32 %v7653_v31, %v7652_v23  ;;  %v7715_v40 = vrot.slane %v7714_v32, 2 }
 0x4df   :  { %v7648_v41 = vadd.f32 %v7647_v33, %v7646_v25  ;;  %v7709_v36 = vrot.slane %v7708_v34, 2  ;;  %v7660_v43 = vadd.f32 %v7659_v35, %v7658_v21  ;;  %v7721_v44 = vrot.slane %v7720_v30, 2 }
 0x4e0   :  { %v7643_v39 = vrot.slane %v7642_v37, 1  ;;  %v7704_v46 = vadd.f32 %v7703_v38, %v7702_v24  ;;  %v7655_v47 = vrot.slane %v7654_v27, 1  ;;  %v7716_v42 = vadd.f32 %v7715_v40, %v7714_v32 }
 0x4e1   :  { %v7649_v49 = vrot.slane %v7648_v41, 1  ;;  %v7710_v45 = vadd.f32 %v7709_v36, %v7708_v34  ;;  %v7661_v51 = vrot.slane %v7660_v43, 1  ;;  %v7722_v52 = vadd.f32 %v7721_v44, %v7720_v30 }
 0x4e2   :  { %v7644_v53 = vadd.f32 %v7643_v39, %v7642_v37  ;;  %v7705_v54 = vrot.slane %v7704_v46, 1  ;;  %v7656_v55 = vadd.f32 %v7655_v47, %v7654_v27  ;;  %v7717_v56 = vrot.slane %v7716_v42, 1 }
 0x4e3   :  { %v7650_v57 = vadd.f32 %v7649_v49, %v7648_v41  ;;  %v7711_v58 = vrot.slane %v7710_v45, 1  ;;  %v7662_v59 = vadd.f32 %v7661_v51, %v7660_v43  ;;  %v7723_v48 = vrot.slane %v7722_v52, 1 }
 0x4e4   :  { %v7706_v60 = vadd.f32 %v7705_v54, %v7704_v46  ;;  %v7718_v61 = vadd.f32 %v7717_v56, %v7716_v42 }
 0x4e5   :  { %v7667_v62 = vcombine.low %v7644_v53, %v7650_v57  ;;  %v7712_v63 = vadd.f32 %v7711_v58, %v7710_v45  ;;  %v7668_v0 = vcombine.low %v7656_v55, %v7662_v59  ;;  %v7724_v1 = vadd.f32 %v7723_v48, %v7722_v52 }
 0x4e7   :  { %v7675_v2 = vrot.slane %v7667_v62, %v13761_v4  ;;  %v7729_v3 = vcombine.low %v7706_v60, %v7712_v63  ;;  %v7682_v5 = vrot.slane %v7668_v0, %v13761_v4  ;;  %v7730_v6 = vcombine.low %v7718_v61, %v7724_v1 }
 0x4e9   :  { %v7737_v7 = vrot.slane %v7729_v3, %v13761_v4  ;;  %v7683_v8 = vcombine.low %v7675_v2, %v7682_v5  ;;  %v7744_v9 = vrot.slane %v7730_v6, %v13761_v4 }
 0x4eb   :  { %v7690_v10 = vrot.slane %v7683_v8, %v13761_v4  ;;  %v7745_v12 = vcombine.low %v7737_v7, %v7744_v9 }
 0x4ed   :  { %7696 = vst.msk [vmem:[%s13792_s4] sm:$0xf] %vm7694_vm0, %v7690_v10  ;;  %v7752_v13 = vrot.slane %v7745_v12, %v13761_v4 }
 0x4ef   :  { %7754 = vst.msk [vmem:[%s13793_s5] sm:$0xf] %vm7694_vm0, %v7752_v13 }

// kernel: discriminator_forward.15
= control target key start
LH: loop header
LB: loop body
LE: loop exit
PB: predicated region body
PF: predicated region fallthrough
CT: control target
= control target key end

     0   :  { %s9207_s1 = inlined_call_operand.vmem [shape: bf16[8192,128], index: 1, kind: input, shape index: {}]   ;;  %s9208_s0 = inlined_call_operand.vmem [shape: bf16[8,8192], index: 0, kind: input, shape index: {}]   ;;  %s9209_s2 = inlined_call_operand.vmem [shape: f32[1,128], index: 2, kind: input, shape index: {}]   ;;  %s9210_s3 = inlined_call_operand.vmem [shape: f32[8,128], index: 3, kind: output, shape index: {}]  }
   0x1   :  { %v6945_v0 = vld [vmem:[%s9207_s1 + $0x40] sm:$0xff]   ;;  %v6949_v4 = vld [vmem:[%s9207_s1 + $0x48] sm:$0xff]   ;;  %v6953_v8 = vld [vmem:[%s9207_s1 + $0x50] sm:$0xff]  }
   0x2   :  { %v6946_v1 = vld [vmem:[%s9207_s1 + $0xc0] sm:$0xff]   ;;  %6241 = vmatprep.subr.bf16.mxu0 %v6945_v0  ;;  %v6950_v5 = vld [vmem:[%s9207_s1 + $0xc8] sm:$0xff]   ;;  %v6954_v9 = vld [vmem:[%s9207_s1 + $0xd0] sm:$0xff]  }
   0x3   :  { %v6947_v2 = vld [vmem:[%s9207_s1] sm:$0xff]   ;;  %6263 = vmatprep.subr.bf16.mxu1 %v6946_v1  ;;  %v6951_v6 = vld [vmem:[%s9207_s1 + $0x8] sm:$0xff]   ;;  %v6955_v10 = vld [vmem:[%s9207_s1 + $0x10] sm:$0xff]  }
   0x4   :  { %v6948_v3 = vld [vmem:[%s9207_s1 + $0x80] sm:$0xff]   ;;  %6242 = vmatpush3.bf16.msra.mxu0 %v6947_v2  ;;  %v6952_v7 = vld [vmem:[%s9207_s1 + $0x88] sm:$0xff]   ;;  %v6956_v11 = vld [vmem:[%s9207_s1 + $0x90] sm:$0xff]  }
   0x5   :  { %6264 = vmatpush3.bf16.msra.mxu1 %v6948_v3  ;;  %6243 = vmatprep.subr.bf16.mxu0 %v6949_v4  ;;  %v6957_v12 = vld [vmem:[%s9207_s1 + $0x58] sm:$0xff]   ;;  %v6961_v16 = vld [vmem:[%s9207_s1 + $0x60] sm:$0xff]   ;;  %v6965_v20 = vld [vmem:[%s9207_s1 + $0x68] sm:$0xff]  }
   0x6   :  { %6265 = vmatprep.subr.bf16.mxu1 %v6950_v5  ;;  %v6958_v13 = vld [vmem:[%s9207_s1 + $0xd8] sm:$0xff]   ;;  %v6962_v17 = vld [vmem:[%s9207_s1 + $0xe0] sm:$0xff]   ;;  %v6966_v21 = vld [vmem:[%s9207_s1 + $0xe8] sm:$0xff]  }
   0x7   :  { %v6959_v14 = vld [vmem:[%s9207_s1 + $0x18] sm:$0xff]   ;;  %v6963_v18 = vld [vmem:[%s9207_s1 + $0x20] sm:$0xff]   ;;  %v6967_v22 = vld [vmem:[%s9207_s1 + $0x28] sm:$0xff]  }
   0x8   :  { %6244 = vmatpush3.bf16.msra.mxu0 %v6951_v6  ;;  %v6960_v15 = vld [vmem:[%s9207_s1 + $0x98] sm:$0xff]   ;;  %v6964_v19 = vld [vmem:[%s9207_s1 + $0xa0] sm:$0xff]   ;;  %v6968_v23 = vld [vmem:[%s9207_s1 + $0xa8] sm:$0xff]  }
   0x9   :  { %6266 = vmatpush3.bf16.msra.mxu1 %v6952_v7  ;;  %6245 = vmatprep.subr.bf16.mxu0 %v6953_v8  ;;  %v6969_v24 = vld [vmem:[%s9207_s1 + $0x70] sm:$0xff]   ;;  %v6973_v28 = vld [vmem:[%s9207_s1 + $0x78] sm:$0xff]   ;;  %v15_v32 = vld [vmem:[%s9208_s0] sm:$0xff] }
   0xa   :  { %6267 = vmatprep.subr.bf16.mxu1 %v6954_v9  ;;  %v6970_v25 = vld [vmem:[%s9207_s1 + $0xf0] sm:$0xff]   ;;  %v6974_v29 = vld [vmem:[%s9207_s1 + $0xf8] sm:$0xff]   ;;  %v16_v33 = vld [vmem:[%s9208_s0 + $0x8] sm:$0xff]  ;;  %v5665_v34 = vcombine.low %v15_v32, %v15_v32  ;;  %v5666_v35 = vcombine.high %v15_v32, %v15_v32 }
   0xb   :  { %v6971_v26 = vld [vmem:[%s9207_s1 + $0x30] sm:$0xff]   ;;  %v6975_v30 = vld [vmem:[%s9207_s1 + $0x38] sm:$0xff]   ;;  %v5667_v36 = vcombine.low %v16_v33, %v16_v33  ;;  %v5668_v37 = vcombine.high %v16_v33, %v16_v33  ;;  %v6981_v38 = vld [vmem:[%s9207_s1 + $0x140] sm:$0xff]  }
   0xc   :  { %6246 = vmatpush3.bf16.msra.mxu0 %v6955_v10  ;;  %v6972_v27 = vld [vmem:[%s9207_s1 + $0xb0] sm:$0xff]   ;;  %v6976_v31 = vld [vmem:[%s9207_s1 + $0xb8] sm:$0xff]   ;;  %v6982_v39 = vld [vmem:[%s9207_s1 + $0x1c0] sm:$0xff]   ;;  %4406 = vmatprep.mubr.bf16.mxu0 %v5666_v35 }
   0xd   :  { %6268 = vmatpush3.bf16.msra.mxu1 %v6956_v11  ;;  %6247 = vmatprep.subr.bf16.mxu0 %v6957_v12  ;;  %v6983_v40 = vld [vmem:[%s9207_s1 + $0x100] sm:$0xff]   ;;  %v6985_v42 = vld [vmem:[%s9207_s1 + $0x148] sm:$0xff]   ;;  %v6989_v46 = vld [vmem:[%s9207_s1 + $0x150] sm:$0xff]  }
   0xe   :  { %6269 = vmatprep.subr.bf16.mxu1 %v6958_v13  ;;  %4446 = vmatprep.mubr.bf16.mxu1 %v5668_v37  ;;  %v6984_v41 = vld [vmem:[%s9207_s1 + $0x180] sm:$0xff]   ;;  %v6986_v43 = vld [vmem:[%s9207_s1 + $0x1c8] sm:$0xff]   ;;  %v6990_v47 = vld [vmem:[%s9207_s1 + $0x1d0] sm:$0xff]  }
   0xf   :  { %v6987_v44 = vld [vmem:[%s9207_s1 + $0x108] sm:$0xff]   ;;  %v6991_v48 = vld [vmem:[%s9207_s1 + $0x110] sm:$0xff]   ;;  %v6993_v50 = vld [vmem:[%s9207_s1 + $0x158] sm:$0xff]  }
  0x10   :  { %6248 = vmatpush3.bf16.msra.mxu0 %v6959_v14  ;;  %v6988_v45 = vld [vmem:[%s9207_s1 + $0x188] sm:$0xff]   ;;  %v6992_v49 = vld [vmem:[%s9207_s1 + $0x190] sm:$0xff]   ;;  %v6994_v51 = vld [vmem:[%s9207_s1 + $0x1d8] sm:$0xff]  }
  0x11   :  { %6270 = vmatpush3.bf16.msra.mxu1 %v6960_v15  ;;  %6249 = vmatprep.subr.bf16.mxu0 %v6961_v16  ;;  %v6995_v52 = vld [vmem:[%s9207_s1 + $0x118] sm:$0xff]   ;;  %v6997_v54 = vld [vmem:[%s9207_s1 + $0x160] sm:$0xff]   ;;  %v7001_v58 = vld [vmem:[%s9207_s1 + $0x168] sm:$0xff]  }
  0x12   :  { %6271 = vmatprep.subr.bf16.mxu1 %v6962_v17  ;;  %v6996_v53 = vld [vmem:[%s9207_s1 + $0x198] sm:$0xff]   ;;  %v6998_v55 = vld [vmem:[%s9207_s1 + $0x1e0] sm:$0xff]   ;;  %v7002_v59 = vld [vmem:[%s9207_s1 + $0x1e8] sm:$0xff]  }
  0x13   :  { %v6999_v56 = vld [vmem:[%s9207_s1 + $0x120] sm:$0xff]   ;;  %v7003_v60 = vld [vmem:[%s9207_s1 + $0x128] sm:$0xff]   ;;  %v7005_v62 = vld [vmem:[%s9207_s1 + $0x170] sm:$0xff]  }
  0x14   :  { %6250 = vmatpush3.bf16.msra.mxu0 %v6963_v18  ;;  %v7000_v57 = vld [vmem:[%s9207_s1 + $0x1a0] sm:$0xff]   ;;  %v7004_v61 = vld [vmem:[%s9207_s1 + $0x1a8] sm:$0xff]   ;;  %v7006_v63 = vld [vmem:[%s9207_s1 + $0x1f0] sm:$0xff]  }
  0x15   :  { %6272 = vmatpush3.bf16.msra.mxu1 %v6964_v19  ;;  %6251 = vmatprep.subr.bf16.mxu0 %v6965_v20  ;;  %v7007_v0 = vld [vmem:[%s9207_s1 + $0x130] sm:$0xff]   ;;  %v7009_v2 = vld [vmem:[%s9207_s1 + $0x178] sm:$0xff]   ;;  %v7017_v12 = vld [vmem:[%s9207_s1 + $0x240] sm:$0xff]  }
  0x16   :  { %6273 = vmatprep.subr.bf16.mxu1 %v6966_v21  ;;  %v7008_v1 = vld [vmem:[%s9207_s1 + $0x1b0] sm:$0xff]   ;;  %v7010_v3 = vld [vmem:[%s9207_s1 + $0x1f8] sm:$0xff]   ;;  %v7018_v13 = vld [vmem:[%s9207_s1 + $0x2c0] sm:$0xff]  }
  0x17   :  { %v7011_v4 = vld [vmem:[%s9207_s1 + $0x138] sm:$0xff]   ;;  %v17_v6 = vld [vmem:[%s9208_s0 + $0x10] sm:$0xff]  ;;  %v7019_v14 = vld [vmem:[%s9207_s1 + $0x200] sm:$0xff]  }
  0x18   :  { %6252 = vmatpush3.bf16.msra.mxu0 %v6967_v22  ;;  %v7012_v5 = vld [vmem:[%s9207_s1 + $0x1b8] sm:$0xff]   ;;  %v5669_v7 = vcombine.low %v17_v6, %v17_v6  ;;  %v5670_v8 = vcombine.high %v17_v6, %v17_v6  ;;  %v7020_v15 = vld [vmem:[%s9207_s1 + $0x280] sm:$0xff]   ;;  %v7021_v16 = vld [vmem:[%s9207_s1 + $0x248] sm:$0xff]  }
  0x19   :  { %6274 = vmatpush3.bf16.msra.mxu1 %v6968_v23  ;;  %6253 = vmatprep.subr.bf16.mxu0 %v6969_v24  ;;  %v18_v9 = vld [vmem:[%s9208_s0 + $0x18] sm:$0xff]  ;;  %v7022_v17 = vld [vmem:[%s9207_s1 + $0x2c8] sm:$0xff]   ;;  %v7025_v20 = vld [vmem:[%s9207_s1 + $0x250] sm:$0xff]  }
  0x1a   :  { %6275 = vmatprep.subr.bf16.mxu1 %v6970_v25  ;;  %v5671_v10 = vcombine.low %v18_v9, %v18_v9  ;;  %v5672_v11 = vcombine.high %v18_v9, %v18_v9  ;;  %v7023_v18 = vld [vmem:[%s9207_s1 + $0x208] sm:$0xff]   ;;  %v7026_v21 = vld [vmem:[%s9207_s1 + $0x2d0] sm:$0xff]   ;;  %v7029_v24 = vld [vmem:[%s9207_s1 + $0x258] sm:$0xff]  }
  0x1b   :  { %v7024_v19 = vld [vmem:[%s9207_s1 + $0x288] sm:$0xff]   ;;  %v7027_v22 = vld [vmem:[%s9207_s1 + $0x210] sm:$0xff]   ;;  %v7030_v25 = vld [vmem:[%s9207_s1 + $0x2d8] sm:$0xff]  }
  0x1c   :  { %6254 = vmatpush3.bf16.msra.mxu0 %v6971_v26  ;;  %v7028_v23 = vld [vmem:[%s9207_s1 + $0x290] sm:$0xff]   ;;  %v7031_v26 = vld [vmem:[%s9207_s1 + $0x218] sm:$0xff]   ;;  %v7037_v32 = vld [vmem:[%s9207_s1 + $0x268] sm:$0xff]  }
  0x1d   :  { %6276 = vmatpush3.bf16.msra.mxu1 %v6972_v27  ;;  %6255 = vmatprep.subr.bf16.mxu0 %v6973_v28  ;;  %v7032_v27 = vld [vmem:[%s9207_s1 + $0x298] sm:$0xff]   ;;  %v7033_v28 = vld [vmem:[%s9207_s1 + $0x260] sm:$0xff]   ;;  %v7038_v33 = vld [vmem:[%s9207_s1 + $0x2e8] sm:$0xff]  }
  0x1e   :  { %6277 = vmatprep.subr.bf16.mxu1 %v6974_v29  ;;  %v7034_v29 = vld [vmem:[%s9207_s1 + $0x2e0] sm:$0xff]   ;;  %v7040_v35 = vld [vmem:[%s9207_s1 + $0x2a8] sm:$0xff]   ;;  %v7042_v37 = vld [vmem:[%s9207_s1 + $0x2f0] sm:$0xff]  }
  0x1f   :  { %v7073_v6 = vld [vmem:[%s9207_s1 + $0x368] sm:$0xff]  }
  0x20   :  { %6256 = vmatpush3.bf16.msra.mxu0 %v6975_v30  ;;  %v7035_v30 = vld [vmem:[%s9207_s1 + $0x220] sm:$0xff]   ;;  %v7076_v9 = vld [vmem:[%s9207_s1 + $0x3a8] sm:$0xff]  }
  0x21   :  { %6278 = vmatpush3.bf16.msra.mxu1 %v6976_v31  ;;  %6285 = vmatprep.subr.bf16.mxu0 %v6981_v38  ;;  %v7036_v31 = vld [vmem:[%s9207_s1 + $0x2a0] sm:$0xff]   ;;  %v7043_v38 = vld [vmem:[%s9207_s1 + $0x230] sm:$0xff]  }
  0x22   :  { %6307 = vmatprep.subr.bf16.mxu1 %v6982_v39  ;;  %v7044_v39 = vld [vmem:[%s9207_s1 + $0x2b0] sm:$0xff]  }
  0x23   :  { %4407 = vmatmul.mubr.bf16.vlgmr.msra.gmra.mrb[0].mxu0 %v5665_v34  ;;  %v7039_v34 = vld [vmem:[%s9207_s1 + $0x228] sm:$0xff]  }
  0x24   :  { %4447 = vmatmul.mubr.bf16.vlgmr.msra.gmra.mrb[0].mxu1 %v5667_v36  ;;  %6286 = vmatpush3.bf16.msra.mxu0 %v6983_v40  ;;  %v7041_v36 = vld [vmem:[%s9207_s1 + $0x270] sm:$0xff]   ;;  %v7045_v40 = vld [vmem:[%s9207_s1 + $0x278] sm:$0xff]  }
  0x25   :  { %6308 = vmatpush3.bf16.msra.mxu1 %v6984_v41  ;;  %6287 = vmatprep.subr.bf16.mxu0 %v6985_v42  ;;  %v7046_v41 = vld [vmem:[%s9207_s1 + $0x2f8] sm:$0xff]  }
  0x26   :  { %6309 = vmatprep.subr.bf16.mxu1 %v6986_v43  ;;  %4486 = vmatprep.mubr.bf16.mxu0 %v5670_v8  ;;  %v7047_v42 = vld [vmem:[%s9207_s1 + $0x238] sm:$0xff]   ;;  %v7075_v8 = vld [vmem:[%s9207_s1 + $0x328] sm:$0xff]  }
  0x27   :  { %4526 = vmatprep.mubr.bf16.mxu1 %v5672_v11  ;;  %v7048_v43 = vld [vmem:[%s9207_s1 + $0x2b8] sm:$0xff]   ;;  %v7078_v11 = vld [vmem:[%s9207_s1 + $0x3f0] sm:$0xff]  }
  0x28   :  { %6288 = vmatpush3.bf16.msra.mxu0 %v6987_v44  ;;  %v19_v44 = vld [vmem:[%s9208_s0 + $0x20] sm:$0xff] }
  0x29   :  { %6310 = vmatpush3.bf16.msra.mxu1 %v6988_v45  ;;  %6289 = vmatprep.subr.bf16.mxu0 %v6989_v46  ;;  %v20_v45 = vld [vmem:[%s9208_s0 + $0x28] sm:$0xff]  ;;  %v5673_v46 = vcombine.low %v19_v44, %v19_v44 }
  0x2a   :  { %6311 = vmatprep.subr.bf16.mxu1 %v6990_v47  ;;  %v5674_v47 = vcombine.high %v19_v44, %v19_v44  ;;  %v7109_v44 = vld [vmem:[%s9207_s1 + $0x468] sm:$0xff]  }
  0x2c   :  { %6290 = vmatpush3.bf16.msra.mxu0 %v6991_v48  ;;  %v5675_v48 = vcombine.low %v20_v45, %v20_v45 }
  0x2d   :  { %6312 = vmatpush3.bf16.msra.mxu1 %v6992_v49  ;;  %6291 = vmatprep.subr.bf16.mxu0 %v6993_v50  ;;  %v5676_v49 = vcombine.high %v20_v45, %v20_v45  ;;  %v7053_v50 = vld [vmem:[%s9207_s1 + $0x340] sm:$0xff]   ;;  %v7110_v45 = vld [vmem:[%s9207_s1 + $0x4e8] sm:$0xff]  }
  0x2e   :  { %6313 = vmatprep.subr.bf16.mxu1 %v6994_v51  ;;  %v7054_v51 = vld [vmem:[%s9207_s1 + $0x3c0] sm:$0xff]  }
  0x30   :  { %6292 = vmatpush3.bf16.msra.mxu0 %v6995_v52  ;;  %v7055_v52 = vld [vmem:[%s9207_s1 + $0x300] sm:$0xff]  }
  0x31   :  { %6314 = vmatpush3.bf16.msra.mxu1 %v6996_v53  ;;  %6293 = vmatprep.subr.bf16.mxu0 %v6997_v54  ;;  %v7056_v53 = vld [vmem:[%s9207_s1 + $0x380] sm:$0xff]   ;;  %v7057_v54 = vld [vmem:[%s9207_s1 + $0x348] sm:$0xff]  }
  0x32   :  { %6315 = vmatprep.subr.bf16.mxu1 %v6998_v55  ;;  %v7058_v55 = vld [vmem:[%s9207_s1 + $0x3c8] sm:$0xff]  }
  0x34   :  { %6294 = vmatpush3.bf16.msra.mxu0 %v6999_v56  ;;  %v7059_v56 = vld [vmem:[%s9207_s1 + $0x308] sm:$0xff]  }
  0x35   :  { %6316 = vmatpush3.bf16.msra.mxu1 %v7000_v57  ;;  %6295 = vmatprep.subr.bf16.mxu0 %v7001_v58  ;;  %v7060_v57 = vld [vmem:[%s9207_s1 + $0x388] sm:$0xff]   ;;  %v7061_v58 = vld [vmem:[%s9207_s1 + $0x350] sm:$0xff]  }
  0x36   :  { %6317 = vmatprep.subr.bf16.mxu1 %v7002_v59  ;;  %v7062_v59 = vld [vmem:[%s9207_s1 + $0x3d0] sm:$0xff]  }
  0x38   :  { %6296 = vmatpush3.bf16.msra.mxu0 %v7003_v60  ;;  %v7063_v60 = vld [vmem:[%s9207_s1 + $0x310] sm:$0xff]  }
  0x39   :  { %6318 = vmatpush3.bf16.msra.mxu1 %v7004_v61  ;;  %6297 = vmatprep.subr.bf16.mxu0 %v7005_v62  ;;  %v7064_v61 = vld [vmem:[%s9207_s1 + $0x390] sm:$0xff]   ;;  %v7065_v62 = vld [vmem:[%s9207_s1 + $0x358] sm:$0xff]  }
  0x3a   :  { %6319 = vmatprep.subr.bf16.mxu1 %v7006_v63  ;;  %v7066_v63 = vld [vmem:[%s9207_s1 + $0x3d8] sm:$0xff]  }
  0x3c   :  { %6298 = vmatpush3.bf16.msra.mxu0 %v7007_v0  ;;  %v7067_v0 = vld [vmem:[%s9207_s1 + $0x318] sm:$0xff]  }
  0x3d   :  { %6320 = vmatpush3.bf16.msra.mxu1 %v7008_v1  ;;  %6299 = vmatprep.subr.bf16.mxu0 %v7009_v2  ;;  %v7068_v1 = vld [vmem:[%s9207_s1 + $0x398] sm:$0xff]   ;;  %v7069_v2 = vld [vmem:[%s9207_s1 + $0x360] sm:$0xff]  }
  0x3e   :  { %6321 = vmatprep.subr.bf16.mxu1 %v7010_v3  ;;  %v7070_v3 = vld [vmem:[%s9207_s1 + $0x3e0] sm:$0xff]  }
  0x40   :  { %6300 = vmatpush3.bf16.msra.mxu0 %v7011_v4  ;;  %v7071_v4 = vld [vmem:[%s9207_s1 + $0x320] sm:$0xff]  }
  0x41   :  { %6322 = vmatpush3.bf16.msra.mxu1 %v7012_v5  ;;  %6329 = vmatprep.subr.bf16.mxu0 %v7017_v12  ;;  %v7072_v5 = vld [vmem:[%s9207_s1 + $0x3a0] sm:$0xff]   ;;  %v7079_v12 = vld [vmem:[%s9207_s1 + $0x330] sm:$0xff]  }
  0x42   :  { %6351 = vmatprep.subr.bf16.mxu1 %v7018_v13  ;;  %v7080_v13 = vld [vmem:[%s9207_s1 + $0x3b0] sm:$0xff]  }
  0x43   :  { %4487 = vmatmul.mubr.bf16.vlgmr.msra.gmra.mrb[4].mxu0 %v5669_v7  ;;  %v7074_v7 = vld [vmem:[%s9207_s1 + $0x3e8] sm:$0xff]  }
  0x44   :  { %4527 = vmatmul.mubr.bf16.vlgmr.msra.gmra.mrb[4].mxu1 %v5671_v10  ;;  %6330 = vmatpush3.bf16.msra.mxu0 %v7019_v14  ;;  %v7077_v10 = vld [vmem:[%s9207_s1 + $0x370] sm:$0xff]   ;;  %v7081_v14 = vld [vmem:[%s9207_s1 + $0x378] sm:$0xff]  }
  0x45   :  { %6352 = vmatpush3.bf16.msra.mxu1 %v7020_v15  ;;  %6331 = vmatprep.subr.bf16.mxu0 %v7021_v16  ;;  %v7082_v15 = vld [vmem:[%s9207_s1 + $0x3f8] sm:$0xff]  }
  0x46   :  { %6353 = vmatprep.subr.bf16.mxu1 %v7022_v17  ;;  %4566 = vmatprep.mubr.bf16.mxu0 %v5674_v47  ;;  %v7083_v16 = vld [vmem:[%s9207_s1 + $0x338] sm:$0xff]   ;;  %v7112_v47 = vld [vmem:[%s9207_s1 + $0x4a8] sm:$0xff]  }
  0x47   :  { %4606 = vmatprep.mubr.bf16.mxu1 %v5676_v49  ;;  %v7084_v17 = vld [vmem:[%s9207_s1 + $0x3b8] sm:$0xff]   ;;  %v7114_v49 = vld [vmem:[%s9207_s1 + $0x4f0] sm:$0xff]  }
  0x48   :  { %6332 = vmatpush3.bf16.msra.mxu0 %v7023_v18  ;;  %v21_v18 = vld [vmem:[%s9208_s0 + $0x30] sm:$0xff] }
  0x49   :  { %6354 = vmatpush3.bf16.msra.mxu1 %v7024_v19  ;;  %6333 = vmatprep.subr.bf16.mxu0 %v7025_v20  ;;  %v22_v19 = vld [vmem:[%s9208_s0 + $0x38] sm:$0xff]  ;;  %v5677_v20 = vcombine.low %v21_v18, %v21_v18 }
  0x4a   :  { %6355 = vmatprep.subr.bf16.mxu1 %v7026_v21  ;;  %v5678_v21 = vcombine.high %v21_v18, %v21_v18  ;;  %v7145_v18 = vld [vmem:[%s9207_s1 + $0x568] sm:$0xff]  }
  0x4c   :  { %6334 = vmatpush3.bf16.msra.mxu0 %v7027_v22  ;;  %v5679_v22 = vcombine.low %v22_v19, %v22_v19 }
  0x4d   :  { %6356 = vmatpush3.bf16.msra.mxu1 %v7028_v23  ;;  %6335 = vmatprep.subr.bf16.mxu0 %v7029_v24  ;;  %v7089_v23 = vld [vmem:[%s9207_s1 + $0x440] sm:$0xff]   ;;  %v5680_v24 = vcombine.high %v22_v19, %v22_v19  ;;  %v7146_v19 = vld [vmem:[%s9207_s1 + $0x5e8] sm:$0xff]  }
  0x4e   :  { %6357 = vmatprep.subr.bf16.mxu1 %v7030_v25  ;;  %v7090_v25 = vld [vmem:[%s9207_s1 + $0x4c0] sm:$0xff]  }
  0x50   :  { %6336 = vmatpush3.bf16.msra.mxu0 %v7031_v26  ;;  %v7091_v26 = vld [vmem:[%s9207_s1 + $0x400] sm:$0xff]  }
  0x51   :  { %6358 = vmatpush3.bf16.msra.mxu1 %v7032_v27  ;;  %6337 = vmatprep.subr.bf16.mxu0 %v7033_v28  ;;  %v7092_v27 = vld [vmem:[%s9207_s1 + $0x480] sm:$0xff]   ;;  %v7093_v28 = vld [vmem:[%s9207_s1 + $0x448] sm:$0xff]  }
  0x52   :  { %6359 = vmatprep.subr.bf16.mxu1 %v7034_v29  ;;  %v7094_v29 = vld [vmem:[%s9207_s1 + $0x4c8] sm:$0xff]  }
  0x54   :  { %6338 = vmatpush3.bf16.msra.mxu0 %v7035_v30  ;;  %v7095_v30 = vld [vmem:[%s9207_s1 + $0x408] sm:$0xff]  }
  0x55   :  { %6360 = vmatpush3.bf16.msra.mxu1 %v7036_v31  ;;  %6339 = vmatprep.subr.bf16.mxu0 %v7037_v32  ;;  %v7096_v31 = vld [vmem:[%s9207_s1 + $0x488] sm:$0xff]   ;;  %v7097_v32 = vld [vmem:[%s9207_s1 + $0x450] sm:$0xff]  }
  0x56   :  { %6361 = vmatprep.subr.bf16.mxu1 %v7038_v33  ;;  %v7098_v33 = vld [vmem:[%s9207_s1 + $0x4d0] sm:$0xff]  }
  0x58   :  { %6340 = vmatpush3.bf16.msra.mxu0 %v7039_v34  ;;  %v7099_v34 = vld [vmem:[%s9207_s1 + $0x410] sm:$0xff]  }
  0x59   :  { %6362 = vmatpush3.bf16.msra.mxu1 %v7040_v35  ;;  %6341 = vmatprep.subr.bf16.mxu0 %v7041_v36  ;;  %v7100_v35 = vld [vmem:[%s9207_s1 + $0x490] sm:$0xff]   ;;  %v7101_v36 = vld [vmem:[%s9207_s1 + $0x458] sm:$0xff]  }
  0x5a   :  { %6363 = vmatprep.subr.bf16.mxu1 %v7042_v37  ;;  %v7102_v37 = vld [vmem:[%s9207_s1 + $0x4d8] sm:$0xff]  }
  0x5c   :  { %6342 = vmatpush3.bf16.msra.mxu0 %v7043_v38  ;;  %v7103_v38 = vld [vmem:[%s9207_s1 + $0x418] sm:$0xff]  }
  0x5d   :  { %6364 = vmatpush3.bf16.msra.mxu1 %v7044_v39  ;;  %6343 = vmatprep.subr.bf16.mxu0 %v7045_v40  ;;  %v7104_v39 = vld [vmem:[%s9207_s1 + $0x498] sm:$0xff]   ;;  %v7105_v40 = vld [vmem:[%s9207_s1 + $0x460] sm:$0xff]  }
  0x5e   :  { %6365 = vmatprep.subr.bf16.mxu1 %v7046_v41  ;;  %v7106_v41 = vld [vmem:[%s9207_s1 + $0x4e0] sm:$0xff]  }
  0x60   :  { %6344 = vmatpush3.bf16.msra.mxu0 %v7047_v42  ;;  %v7107_v42 = vld [vmem:[%s9207_s1 + $0x420] sm:$0xff]  }
  0x61   :  { %6366 = vmatpush3.bf16.msra.mxu1 %v7048_v43  ;;  %6373 = vmatprep.subr.bf16.mxu0 %v7053_v50  ;;  %v7108_v43 = vld [vmem:[%s9207_s1 + $0x4a0] sm:$0xff]   ;;  %v7115_v50 = vld [vmem:[%s9207_s1 + $0x430] sm:$0xff]  }
  0x62   :  { %6395 = vmatprep.subr.bf16.mxu1 %v7054_v51  ;;  %v7116_v51 = vld [vmem:[%s9207_s1 + $0x4b0] sm:$0xff]  }
  0x63   :  { %4567 = vmatmul.mubr.bf16.vlgmr.msra.gmra.mrb[8].mxu0 %v5673_v46  ;;  %v7111_v46 = vld [vmem:[%s9207_s1 + $0x428] sm:$0xff]  }
  0x64   :  { %4607 = vmatmul.mubr.bf16.vlgmr.msra.gmra.mrb[8].mxu1 %v5675_v48  ;;  %6374 = vmatpush3.bf16.msra.mxu0 %v7055_v52  ;;  %v7113_v48 = vld [vmem:[%s9207_s1 + $0x470] sm:$0xff]   ;;  %v7117_v52 = vld [vmem:[%s9207_s1 + $0x478] sm:$0xff]  }
  0x65   :  { %6396 = vmatpush3.bf16.msra.mxu1 %v7056_v53  ;;  %6375 = vmatprep.subr.bf16.mxu0 %v7057_v54  ;;  %v7118_v53 = vld [vmem:[%s9207_s1 + $0x4f8] sm:$0xff]  }
  0x66   :  { %6397 = vmatprep.subr.bf16.mxu1 %v7058_v55  ;;  %4646 = vmatprep.mubr.bf16.mxu0 %v5678_v21  ;;  %v7119_v54 = vld [vmem:[%s9207_s1 + $0x438] sm:$0xff]   ;;  %v7148_v21 = vld [vmem:[%s9207_s1 + $0x5a8] sm:$0xff]  }
  0x67   :  { %4686 = vmatprep.mubr.bf16.mxu1 %v5680_v24  ;;  %v7120_v55 = vld [vmem:[%s9207_s1 + $0x4b8] sm:$0xff]   ;;  %v7151_v24 = vld [vmem:[%s9207_s1 + $0x530] sm:$0xff]  }
  0x68   :  { %6376 = vmatpush3.bf16.msra.mxu0 %v7059_v56  ;;  %v23_v56 = vld [vmem:[%s9208_s0 + $0x40] sm:$0xff] }
  0x69   :  { %6398 = vmatpush3.bf16.msra.mxu1 %v7060_v57  ;;  %6377 = vmatprep.subr.bf16.mxu0 %v7061_v58  ;;  %v5681_v57 = vcombine.low %v23_v56, %v23_v56  ;;  %v5682_v58 = vcombine.high %v23_v56, %v23_v56  ;;  %v7181_v56 = vld [vmem:[%s9207_s1 + $0x668] sm:$0xff]  }
  0x6a   :  { %6399 = vmatprep.subr.bf16.mxu1 %v7062_v59  ;;  %v24_v59 = vld [vmem:[%s9208_s0 + $0x48] sm:$0xff] }
  0x6c   :  { %6378 = vmatpush3.bf16.msra.mxu0 %v7063_v60  ;;  %v5683_v60 = vcombine.low %v24_v59, %v24_v59 }
  0x6d   :  { %6400 = vmatpush3.bf16.msra.mxu1 %v7064_v61  ;;  %6379 = vmatprep.subr.bf16.mxu0 %v7065_v62  ;;  %v5684_v61 = vcombine.high %v24_v59, %v24_v59  ;;  %v7125_v62 = vld [vmem:[%s9207_s1 + $0x540] sm:$0xff]   ;;  %v7184_v59 = vld [vmem:[%s9207_s1 + $0x6a8] sm:$0xff]  }
  0x6e   :  { %6401 = vmatprep.subr.bf16.mxu1 %v7066_v63  ;;  %v7126_v63 = vld [vmem:[%s9207_s1 + $0x5c0] sm:$0xff]  }
  0x70   :  { %6380 = vmatpush3.bf16.msra.mxu0 %v7067_v0  ;;  %v7127_v0 = vld [vmem:[%s9207_s1 + $0x500] sm:$0xff]  }
  0x71   :  { %6402 = vmatpush3.bf16.msra.mxu1 %v7068_v1  ;;  %6381 = vmatprep.subr.bf16.mxu0 %v7069_v2  ;;  %v7128_v1 = vld [vmem:[%s9207_s1 + $0x580] sm:$0xff]   ;;  %v7129_v2 = vld [vmem:[%s9207_s1 + $0x548] sm:$0xff]  }
  0x72   :  { %6403 = vmatprep.subr.bf16.mxu1 %v7070_v3  ;;  %v7130_v3 = vld [vmem:[%s9207_s1 + $0x5c8] sm:$0xff]  }
  0x74   :  { %6382 = vmatpush3.bf16.msra.mxu0 %v7071_v4  ;;  %v7131_v4 = vld [vmem:[%s9207_s1 + $0x508] sm:$0xff]  }
  0x75   :  { %6404 = vmatpush3.bf16.msra.mxu1 %v7072_v5  ;;  %6383 = vmatprep.subr.bf16.mxu0 %v7073_v6  ;;  %v7132_v5 = vld [vmem:[%s9207_s1 + $0x588] sm:$0xff]   ;;  %v7133_v6 = vld [vmem:[%s9207_s1 + $0x550] sm:$0xff]  }
  0x76   :  { %6405 = vmatprep.subr.bf16.mxu1 %v7074_v7  ;;  %v7134_v7 = vld [vmem:[%s9207_s1 + $0x5d0] sm:$0xff]  }
  0x78   :  { %6384 = vmatpush3.bf16.msra.mxu0 %v7075_v8  ;;  %v7135_v8 = vld [vmem:[%s9207_s1 + $0x510] sm:$0xff]  }
  0x79   :  { %6406 = vmatpush3.bf16.msra.mxu1 %v7076_v9  ;;  %6385 = vmatprep.subr.bf16.mxu0 %v7077_v10  ;;  %v7136_v9 = vld [vmem:[%s9207_s1 + $0x590] sm:$0xff]   ;;  %v7137_v10 = vld [vmem:[%s9207_s1 + $0x558] sm:$0xff]  }
  0x7a   :  { %6407 = vmatprep.subr.bf16.mxu1 %v7078_v11  ;;  %v7138_v11 = vld [vmem:[%s9207_s1 + $0x5d8] sm:$0xff]  }
  0x7c   :  { %6386 = vmatpush3.bf16.msra.mxu0 %v7079_v12  ;;  %v7139_v12 = vld [vmem:[%s9207_s1 + $0x518] sm:$0xff]  }
  0x7d   :  { %6408 = vmatpush3.bf16.msra.mxu1 %v7080_v13  ;;  %6387 = vmatprep.subr.bf16.mxu0 %v7081_v14  ;;  %v7140_v13 = vld [vmem:[%s9207_s1 + $0x598] sm:$0xff]   ;;  %v7141_v14 = vld [vmem:[%s9207_s1 + $0x560] sm:$0xff]  }
  0x7e   :  { %6409 = vmatprep.subr.bf16.mxu1 %v7082_v15  ;;  %v7142_v15 = vld [vmem:[%s9207_s1 + $0x5e0] sm:$0xff]  }
  0x80   :  { %6388 = vmatpush3.bf16.msra.mxu0 %v7083_v16  ;;  %v7143_v16 = vld [vmem:[%s9207_s1 + $0x520] sm:$0xff]  }
  0x81   :  { %6410 = vmatpush3.bf16.msra.mxu1 %v7084_v17  ;;  %6417 = vmatprep.subr.bf16.mxu0 %v7089_v23  ;;  %v7144_v17 = vld [vmem:[%s9207_s1 + $0x5a0] sm:$0xff]   ;;  %v7150_v23 = vld [vmem:[%s9207_s1 + $0x5f0] sm:$0xff]  }
  0x82   :  { %6439 = vmatprep.subr.bf16.mxu1 %v7090_v25  ;;  %v7152_v25 = vld [vmem:[%s9207_s1 + $0x5b0] sm:$0xff]  }
  0x83   :  { %4647 = vmatmul.mubr.bf16.vlgmr.msra.gmra.mrb[12].mxu0 %v5677_v20  ;;  %v7147_v20 = vld [vmem:[%s9207_s1 + $0x528] sm:$0xff]  }
  0x84   :  { %4687 = vmatmul.mubr.bf16.vlgmr.msra.gmra.mrb[12].mxu1 %v5679_v22  ;;  %6418 = vmatpush3.bf16.msra.mxu0 %v7091_v26  ;;  %v7149_v22 = vld [vmem:[%s9207_s1 + $0x570] sm:$0xff]   ;;  %v7153_v26 = vld [vmem:[%s9207_s1 + $0x578] sm:$0xff]  }
  0x85   :  { %6440 = vmatpush3.bf16.msra.mxu1 %v7092_v27  ;;  %6419 = vmatprep.subr.bf16.mxu0 %v7093_v28  ;;  %v7154_v27 = vld [vmem:[%s9207_s1 + $0x5f8] sm:$0xff]  }
  0x86   :  { %6441 = vmatprep.subr.bf16.mxu1 %v7094_v29  ;;  %4726 = vmatprep.mubr.bf16.mxu0 %v5682_v58  ;;  %v7155_v28 = vld [vmem:[%s9207_s1 + $0x538] sm:$0xff]   ;;  %v7183_v58 = vld [vmem:[%s9207_s1 + $0x628] sm:$0xff]  }
  0x87   :  { %4766 = vmatprep.mubr.bf16.mxu1 %v5684_v61  ;;  %v7156_v29 = vld [vmem:[%s9207_s1 + $0x5b8] sm:$0xff]   ;;  %v7186_v61 = vld [vmem:[%s9207_s1 + $0x6f0] sm:$0xff]  }
  0x88   :  { %6420 = vmatpush3.bf16.msra.mxu0 %v7095_v30  ;;  %v25_v30 = vld [vmem:[%s9208_s0 + $0x50] sm:$0xff] }
  0x89   :  { %6442 = vmatpush3.bf16.msra.mxu1 %v7096_v31  ;;  %6421 = vmatprep.subr.bf16.mxu0 %v7097_v32  ;;  %v26_v31 = vld [vmem:[%s9208_s0 + $0x58] sm:$0xff]  ;;  %v5685_v32 = vcombine.low %v25_v30, %v25_v30 }
  0x8a   :  { %6443 = vmatprep.subr.bf16.mxu1 %v7098_v33  ;;  %v5686_v33 = vcombine.high %v25_v30, %v25_v30  ;;  %v7216_v30 = vld [vmem:[%s9207_s1 + $0x7a0] sm:$0xff]  }
  0x8c   :  { %6422 = vmatpush3.bf16.msra.mxu0 %v7099_v34  ;;  %v5687_v34 = vcombine.low %v26_v31, %v26_v31 }
  0x8d   :  { %6444 = vmatpush3.bf16.msra.mxu1 %v7100_v35  ;;  %6423 = vmatprep.subr.bf16.mxu0 %v7101_v36  ;;  %v5688_v35 = vcombine.high %v26_v31, %v26_v31  ;;  %v7161_v36 = vld [vmem:[%s9207_s1 + $0x640] sm:$0xff]  }
  0x8e   :  { %6445 = vmatprep.subr.bf16.mxu1 %v7102_v37  ;;  %v7162_v37 = vld [vmem:[%s9207_s1 + $0x6c0] sm:$0xff]  }
  0x90   :  { %6424 = vmatpush3.bf16.msra.mxu0 %v7103_v38  ;;  %v7163_v38 = vld [vmem:[%s9207_s1 + $0x600] sm:$0xff]  }
  0x91   :  { %6446 = vmatpush3.bf16.msra.mxu1 %v7104_v39  ;;  %6425 = vmatprep.subr.bf16.mxu0 %v7105_v40  ;;  %v7164_v39 = vld [vmem:[%s9207_s1 + $0x680] sm:$0xff]   ;;  %v7165_v40 = vld [vmem:[%s9207_s1 + $0x648] sm:$0xff]  }
  0x92   :  { %6447 = vmatprep.subr.bf16.mxu1 %v7106_v41  ;;  %v7166_v41 = vld [vmem:[%s9207_s1 + $0x6c8] sm:$0xff]  }
  0x94   :  { %6426 = vmatpush3.bf16.msra.mxu0 %v7107_v42  ;;  %v7167_v42 = vld [vmem:[%s9207_s1 + $0x608] sm:$0xff]  }
  0x95   :  { %6448 = vmatpush3.bf16.msra.mxu1 %v7108_v43  ;;  %6427 = vmatprep.subr.bf16.mxu0 %v7109_v44  ;;  %v7168_v43 = vld [vmem:[%s9207_s1 + $0x688] sm:$0xff]   ;;  %v7169_v44 = vld [vmem:[%s9207_s1 + $0x650] sm:$0xff]  }
  0x96   :  { %6449 = vmatprep.subr.bf16.mxu1 %v7110_v45  ;;  %v7170_v45 = vld [vmem:[%s9207_s1 + $0x6d0] sm:$0xff]  }
  0x98   :  { %6428 = vmatpush3.bf16.msra.mxu0 %v7111_v46  ;;  %v7171_v46 = vld [vmem:[%s9207_s1 + $0x610] sm:$0xff]  }
  0x99   :  { %6450 = vmatpush3.bf16.msra.mxu1 %v7112_v47  ;;  %6429 = vmatprep.subr.bf16.mxu0 %v7113_v48  ;;  %v7172_v47 = vld [vmem:[%s9207_s1 + $0x690] sm:$0xff]   ;;  %v7173_v48 = vld [vmem:[%s9207_s1 + $0x658] sm:$0xff]  }
  0x9a   :  { %6451 = vmatprep.subr.bf16.mxu1 %v7114_v49  ;;  %v7174_v49 = vld [vmem:[%s9207_s1 + $0x6d8] sm:$0xff]  }
  0x9c   :  { %6430 = vmatpush3.bf16.msra.mxu0 %v7115_v50  ;;  %v7175_v50 = vld [vmem:[%s9207_s1 + $0x618] sm:$0xff]  }
  0x9d   :  { %6452 = vmatpush3.bf16.msra.mxu1 %v7116_v51  ;;  %6431 = vmatprep.subr.bf16.mxu0 %v7117_v52  ;;  %v7176_v51 = vld [vmem:[%s9207_s1 + $0x698] sm:$0xff]   ;;  %v7177_v52 = vld [vmem:[%s9207_s1 + $0x660] sm:$0xff]  }
  0x9e   :  { %6453 = vmatprep.subr.bf16.mxu1 %v7118_v53  ;;  %v7178_v53 = vld [vmem:[%s9207_s1 + $0x6e0] sm:$0xff]  }
  0xa0   :  { %6432 = vmatpush3.bf16.msra.mxu0 %v7119_v54  ;;  %v7179_v54 = vld [vmem:[%s9207_s1 + $0x620] sm:$0xff]  }
  0xa1   :  { %6454 = vmatpush3.bf16.msra.mxu1 %v7120_v55  ;;  %6461 = vmatprep.subr.bf16.mxu0 %v7125_v62  ;;  %v7180_v55 = vld [vmem:[%s9207_s1 + $0x6a0] sm:$0xff]   ;;  %v7187_v62 = vld [vmem:[%s9207_s1 + $0x630] sm:$0xff]  }
  0xa2   :  { %6483 = vmatprep.subr.bf16.mxu1 %v7126_v63  ;;  %v7188_v63 = vld [vmem:[%s9207_s1 + $0x6b0] sm:$0xff]  }
  0xa3   :  { %4727 = vmatmul.mubr.bf16.vlgmr.msra.gmra.mrb[16].mxu0 %v5681_v57  ;;  %v7182_v57 = vld [vmem:[%s9207_s1 + $0x6e8] sm:$0xff]  }
  0xa4   :  { %4767 = vmatmul.mubr.bf16.vlgmr.msra.gmra.mrb[16].mxu1 %v5683_v60  ;;  %6462 = vmatpush3.bf16.msra.mxu0 %v7127_v0  ;;  %v7185_v60 = vld [vmem:[%s9207_s1 + $0x670] sm:$0xff]   ;;  %v7189_v0 = vld [vmem:[%s9207_s1 + $0x678] sm:$0xff]  }
  0xa5   :  { %6484 = vmatpush3.bf16.msra.mxu1 %v7128_v1  ;;  %6463 = vmatprep.subr.bf16.mxu0 %v7129_v2  ;;  %v7190_v1 = vld [vmem:[%s9207_s1 + $0x6f8] sm:$0xff]  }
  0xa6   :  { %6485 = vmatprep.subr.bf16.mxu1 %v7130_v3  ;;  %4806 = vmatprep.mubr.bf16.mxu0 %v5686_v33  ;;  %v7191_v2 = vld [vmem:[%s9207_s1 + $0x638] sm:$0xff]  }
  0xa7   :  { %4846 = vmatprep.mubr.bf16.mxu1 %v5688_v35  ;;  %v7192_v3 = vld [vmem:[%s9207_s1 + $0x6b8] sm:$0xff]  }
  0xa8   :  { %6464 = vmatpush3.bf16.msra.mxu0 %v7131_v4  ;;  %v27_v4 = vld [vmem:[%s9208_s0 + $0x60] sm:$0xff] }
  0xa9   :  { %6486 = vmatpush3.bf16.msra.mxu1 %v7132_v5  ;;  %6465 = vmatprep.subr.bf16.mxu0 %v7133_v6  ;;  %v28_v5 = vld [vmem:[%s9208_s0 + $0x68] sm:$0xff]  ;;  %v5689_v6 = vcombine.low %v27_v4, %v27_v4 }
  0xaa   :  { %6487 = vmatprep.subr.bf16.mxu1 %v7134_v7  ;;  %v5690_v7 = vcombine.high %v27_v4, %v27_v4  ;;  %v7240_v4 = vld [vmem:[%s9207_s1 + $0x888] sm:$0xff]  }
  0xac   :  { %6466 = vmatpush3.bf16.msra.mxu0 %v7135_v8  ;;  %v5691_v8 = vcombine.low %v28_v5, %v28_v5 }
  0xad   :  { %6488 = vmatpush3.bf16.msra.mxu1 %v7136_v9  ;;  %6467 = vmatprep.subr.bf16.mxu0 %v7137_v10  ;;  %v7197_v9 = vld [vmem:[%s9207_s1 + $0x740] sm:$0xff]   ;;  %v5692_v10 = vcombine.high %v28_v5, %v28_v5  ;;  %v7241_v5 = vld [vmem:[%s9207_s1 + $0x850] sm:$0xff]  }
  0xae   :  { %6489 = vmatprep.subr.bf16.mxu1 %v7138_v11  ;;  %v7198_v11 = vld [vmem:[%s9207_s1 + $0x7c0] sm:$0xff]  }
  0xb0   :  { %6468 = vmatpush3.bf16.msra.mxu0 %v7139_v12  ;;  %v7199_v12 = vld [vmem:[%s9207_s1 + $0x700] sm:$0xff]  }
  0xb1   :  { %6490 = vmatpush3.bf16.msra.mxu1 %v7140_v13  ;;  %6469 = vmatprep.subr.bf16.mxu0 %v7141_v14  ;;  %v7200_v13 = vld [vmem:[%s9207_s1 + $0x780] sm:$0xff]   ;;  %v7201_v14 = vld [vmem:[%s9207_s1 + $0x748] sm:$0xff]  }
  0xb2   :  { %6491 = vmatprep.subr.bf16.mxu1 %v7142_v15  ;;  %v7202_v15 = vld [vmem:[%s9207_s1 + $0x7c8] sm:$0xff]  }
  0xb4   :  { %6470 = vmatpush3.bf16.msra.mxu0 %v7143_v16  ;;  %v7203_v16 = vld [vmem:[%s9207_s1 + $0x708] sm:$0xff]  }
  0xb5   :  { %6492 = vmatpush3.bf16.msra.mxu1 %v7144_v17  ;;  %6471 = vmatprep.subr.bf16.mxu0 %v7145_v18  ;;  %v7204_v17 = vld [vmem:[%s9207_s1 + $0x788] sm:$0xff]   ;;  %v7205_v18 = vld [vmem:[%s9207_s1 + $0x750] sm:$0xff]  }
  0xb6   :  { %6493 = vmatprep.subr.bf16.mxu1 %v7146_v19  ;;  %v7206_v19 = vld [vmem:[%s9207_s1 + $0x7d0] sm:$0xff]  }
  0xb8   :  { %6472 = vmatpush3.bf16.msra.mxu0 %v7147_v20  ;;  %v7207_v20 = vld [vmem:[%s9207_s1 + $0x710] sm:$0xff]  }
  0xb9   :  { %6494 = vmatpush3.bf16.msra.mxu1 %v7148_v21  ;;  %6473 = vmatprep.subr.bf16.mxu0 %v7149_v22  ;;  %v7208_v21 = vld [vmem:[%s9207_s1 + $0x790] sm:$0xff]   ;;  %v7209_v22 = vld [vmem:[%s9207_s1 + $0x758] sm:$0xff]  }
  0xba   :  { %6495 = vmatprep.subr.bf16.mxu1 %v7150_v23  ;;  %v7210_v23 = vld [vmem:[%s9207_s1 + $0x7d8] sm:$0xff]  }
  0xbc   :  { %6474 = vmatpush3.bf16.msra.mxu0 %v7151_v24  ;;  %v7211_v24 = vld [vmem:[%s9207_s1 + $0x718] sm:$0xff]  }
  0xbd   :  { %6496 = vmatpush3.bf16.msra.mxu1 %v7152_v25  ;;  %6475 = vmatprep.subr.bf16.mxu0 %v7153_v26  ;;  %v7212_v25 = vld [vmem:[%s9207_s1 + $0x798] sm:$0xff]   ;;  %v7213_v26 = vld [vmem:[%s9207_s1 + $0x760] sm:$0xff]  }
  0xbe   :  { %6497 = vmatprep.subr.bf16.mxu1 %v7154_v27  ;;  %v7214_v27 = vld [vmem:[%s9207_s1 + $0x7e0] sm:$0xff]  }
  0xc0   :  { %6476 = vmatpush3.bf16.msra.mxu0 %v7155_v28  ;;  %v7215_v28 = vld [vmem:[%s9207_s1 + $0x720] sm:$0xff]  }
  0xc1   :  { %6498 = vmatpush3.bf16.msra.mxu1 %v7156_v29  ;;  %6505 = vmatprep.subr.bf16.mxu0 %v7161_v36 }
  0xc2   :  { %6527 = vmatprep.subr.bf16.mxu1 %v7162_v37  ;;  %v7217_v37 = vld [vmem:[%s9207_s1 + $0x768] sm:$0xff]  }
  0xc3   :  { %4807 = vmatmul.mubr.bf16.vlgmr.msra.gmra.mrb[20].mxu0 %v5685_v32  ;;  %v5664_v32 = vld [vmem:[%s9209_s2] ss:$0 sm:$0xff] }
  0xc4   :  { %4847 = vmatmul.mubr.bf16.vlgmr.msra.gmra.mrb[20].mxu1 %v5687_v34  ;;  %6506 = vmatpush3.bf16.msra.mxu0 %v7163_v38 }
  0xc5   :  { %6528 = vmatpush3.bf16.msra.mxu1 %v7164_v39  ;;  %6507 = vmatprep.subr.bf16.mxu0 %v7165_v40  ;;  %v7218_v39 = vld [vmem:[%s9207_s1 + $0x7e8] sm:$0xff]  }
  0xc6   :  { %6529 = vmatprep.subr.bf16.mxu1 %v7166_v41  ;;  %4886 = vmatprep.mubr.bf16.mxu0 %v5690_v7  ;;  %v7243_v7 = vld [vmem:[%s9207_s1 + $0x810] sm:$0xff]  }
  0xc7   :  { %4926 = vmatprep.mubr.bf16.mxu1 %v5692_v10  ;;  %v7246_v10 = vld [vmem:[%s9207_s1 + $0x8d8] sm:$0xff]  }
  0xc8   :  { %6508 = vmatpush3.bf16.msra.mxu0 %v7167_v42  ;;  %v7219_v42 = vld [vmem:[%s9207_s1 + $0x728] sm:$0xff]  }
  0xc9   :  { %6530 = vmatpush3.bf16.msra.mxu1 %v7168_v43  ;;  %6509 = vmatprep.subr.bf16.mxu0 %v7169_v44  ;;  %v7220_v44 = vld [vmem:[%s9207_s1 + $0x7a8] sm:$0xff]  }
  0xca   :  { %6531 = vmatprep.subr.bf16.mxu1 %v7170_v45 }
  0xcc   :  { %6510 = vmatpush3.bf16.msra.mxu0 %v7171_v46 }
  0xcd   :  { %6532 = vmatpush3.bf16.msra.mxu1 %v7172_v47  ;;  %6511 = vmatprep.subr.bf16.mxu0 %v7173_v48  ;;  %v7221_v47 = vld [vmem:[%s9207_s1 + $0x770] sm:$0xff]  }
  0xce   :  { %6533 = vmatprep.subr.bf16.mxu1 %v7174_v49  ;;  %v7222_v48 = vld [vmem:[%s9207_s1 + $0x7f0] sm:$0xff]  }
  0xcf   :  { %v7223_v49 = vld [vmem:[%s9207_s1 + $0x730] sm:$0xff]  }
  0xd0   :  { %6512 = vmatpush3.bf16.msra.mxu0 %v7175_v50  ;;  %v7224_v50 = vld [vmem:[%s9207_s1 + $0x7b0] sm:$0xff]  }
  0xd1   :  { %6534 = vmatpush3.bf16.msra.mxu1 %v7176_v51  ;;  %6513 = vmatprep.subr.bf16.mxu0 %v7177_v52  ;;  %v7225_v51 = vld [vmem:[%s9207_s1 + $0x778] sm:$0xff]  }
  0xd2   :  { %6535 = vmatprep.subr.bf16.mxu1 %v7178_v53  ;;  %v7226_v52 = vld [vmem:[%s9207_s1 + $0x7f8] sm:$0xff]  }
  0xd3   :  { %v7227_v53 = vld [vmem:[%s9207_s1 + $0x738] sm:$0xff]  }
  0xd4   :  { %6514 = vmatpush3.bf16.msra.mxu0 %v7179_v54  ;;  %v7228_v54 = vld [vmem:[%s9207_s1 + $0x7b8] sm:$0xff]  }
  0xd5   :  { %6536 = vmatpush3.bf16.msra.mxu1 %v7180_v55  ;;  %6515 = vmatprep.subr.bf16.mxu0 %v7181_v56  ;;  %v29_v55 = vld [vmem:[%s9208_s0 + $0x70] sm:$0xff]  ;;  %v30_v56 = vld [vmem:[%s9208_s0 + $0x78] sm:$0xff] }
  0xd6   :  { %6537 = vmatprep.subr.bf16.mxu1 %v7182_v57  ;;  %v5693_v57 = vcombine.low %v29_v55, %v29_v55 }
  0xd8   :  { %6516 = vmatpush3.bf16.msra.mxu0 %v7183_v58  ;;  %v5694_v58 = vcombine.high %v29_v55, %v29_v55  ;;  %v7277_v55 = vld [vmem:[%s9207_s1 + $0x950] sm:$0xff]  }
  0xd9   :  { %6538 = vmatpush3.bf16.msra.mxu1 %v7184_v59  ;;  %6517 = vmatprep.subr.bf16.mxu0 %v7185_v60  ;;  %v5695_v59 = vcombine.low %v30_v56, %v30_v56  ;;  %v5696_v60 = vcombine.high %v30_v56, %v30_v56  ;;  %v7278_v56 = vld [vmem:[%s9207_s1 + $0x9d0] sm:$0xff]  }
  0xda   :  { %6539 = vmatprep.subr.bf16.mxu1 %v7186_v61  ;;  %v7233_v61 = vld [vmem:[%s9207_s1 + $0x840] sm:$0xff]  }
  0xdc   :  { %6518 = vmatpush3.bf16.msra.mxu0 %v7187_v62  ;;  %v7234_v62 = vld [vmem:[%s9207_s1 + $0x8c0] sm:$0xff]  }
  0xdd   :  { %6540 = vmatpush3.bf16.msra.mxu1 %v7188_v63  ;;  %6519 = vmatprep.subr.bf16.mxu0 %v7189_v0  ;;  %v7235_v63 = vld [vmem:[%s9207_s1 + $0x800] sm:$0xff]  }
  0xde   :  { %6541 = vmatprep.subr.bf16.mxu1 %v7190_v1  ;;  %v7236_v0 = vld [vmem:[%s9207_s1 + $0x880] sm:$0xff]   ;;  %v7237_v1 = vld [vmem:[%s9207_s1 + $0x848] sm:$0xff]  }
  0xe0   :  { %6520 = vmatpush3.bf16.msra.mxu0 %v7191_v2  ;;  %v7238_v2 = vld [vmem:[%s9207_s1 + $0x8c8] sm:$0xff]  }
  0xe1   :  { %6542 = vmatpush3.bf16.msra.mxu1 %v7192_v3  ;;  %6549 = vmatprep.subr.bf16.mxu0 %v7197_v9  ;;  %v7239_v3 = vld [vmem:[%s9207_s1 + $0x808] sm:$0xff]   ;;  %v7245_v9 = vld [vmem:[%s9207_s1 + $0x858] sm:$0xff]  }
  0xe2   :  { %6571 = vmatprep.subr.bf16.mxu1 %v7198_v11  ;;  %v7247_v11 = vld [vmem:[%s9207_s1 + $0x818] sm:$0xff]  }
  0xe3   :  { %4887 = vmatmul.mubr.bf16.vlgmr.msra.gmra.mrb[24].mxu0 %v5689_v6  ;;  %v7242_v6 = vld [vmem:[%s9207_s1 + $0x8d0] sm:$0xff]  }
  0xe4   :  { %4927 = vmatmul.mubr.bf16.vlgmr.msra.gmra.mrb[24].mxu1 %v5691_v8  ;;  %6550 = vmatpush3.bf16.msra.mxu0 %v7199_v12  ;;  %v7244_v8 = vld [vmem:[%s9207_s1 + $0x890] sm:$0xff]   ;;  %v7248_v12 = vld [vmem:[%s9207_s1 + $0x898] sm:$0xff]  }
  0xe5   :  { %6572 = vmatpush3.bf16.msra.mxu1 %v7200_v13  ;;  %6551 = vmatprep.subr.bf16.mxu0 %v7201_v14  ;;  %v7249_v13 = vld [vmem:[%s9207_s1 + $0x860] sm:$0xff]  }
  0xe6   :  { %6573 = vmatprep.subr.bf16.mxu1 %v7202_v15  ;;  %4966 = vmatprep.mubr.bf16.mxu0 %v5694_v58  ;;  %v7250_v14 = vld [vmem:[%s9207_s1 + $0x8e0] sm:$0xff]   ;;  %v7280_v58 = vld [vmem:[%s9207_s1 + $0x990] sm:$0xff]  }
  0xe7   :  { %5006 = vmatprep.mubr.bf16.mxu1 %v5696_v60  ;;  %v7251_v15 = vld [vmem:[%s9207_s1 + $0x820] sm:$0xff]   ;;  %v7282_v60 = vld [vmem:[%s9207_s1 + $0x9d8] sm:$0xff]  }
  0xe8   :  { %6552 = vmatpush3.bf16.msra.mxu0 %v7203_v16 }
  0xe9   :  { %6574 = vmatpush3.bf16.msra.mxu1 %v7204_v17  ;;  %6553 = vmatprep.subr.bf16.mxu0 %v7205_v18  ;;  %v7252_v17 = vld [vmem:[%s9207_s1 + $0x8a0] sm:$0xff]  }
  0xea   :  { %6575 = vmatprep.subr.bf16.mxu1 %v7206_v19 }
  0xec   :  { %6554 = vmatpush3.bf16.msra.mxu0 %v7207_v20 }
  0xed   :  { %6576 = vmatpush3.bf16.msra.mxu1 %v7208_v21  ;;  %6555 = vmatprep.subr.bf16.mxu0 %v7209_v22 }
  0xee   :  { %6577 = vmatprep.subr.bf16.mxu1 %v7210_v23  ;;  %v7253_v23 = vld [vmem:[%s9207_s1 + $0x868] sm:$0xff]  }
  0xf0   :  { %6556 = vmatpush3.bf16.msra.mxu0 %v7211_v24 }
  0xf1   :  { %6578 = vmatpush3.bf16.msra.mxu1 %v7212_v25  ;;  %6557 = vmatprep.subr.bf16.mxu0 %v7213_v26  ;;  %v7254_v25 = vld [vmem:[%s9207_s1 + $0x8e8] sm:$0xff]  }
  0xf2   :  { %6579 = vmatprep.subr.bf16.mxu1 %v7214_v27 }
  0xf4   :  { %6558 = vmatpush3.bf16.msra.mxu0 %v7215_v28  ;;  %v7255_v28 = vld [vmem:[%s9207_s1 + $0x828] sm:$0xff]  }
  0xf5   :  { %6580 = vmatpush3.bf16.msra.mxu1 %v7216_v30  ;;  %6559 = vmatprep.subr.bf16.mxu0 %v7217_v37  ;;  %v7256_v30 = vld [vmem:[%s9207_s1 + $0x8a8] sm:$0xff]   ;;  %v7261_v37 = vld [vmem:[%s9207_s1 + $0x878] sm:$0xff]  }
  0xf6   :  { %v6257_v29 = vpop.f32.mrb[0].mxu0  ;;  %6581 = vmatprep.subr.bf16.mxu1 %v7218_v39  ;;  %v7263_v39 = vld [vmem:[%s9207_s1 + $0x838] sm:$0xff]  }
  0xf7   :  { %v6279_v31 = vpop.f32.mrb[0].mxu1  ;;  %v6258_v33 = vpop.f32.mrb[1].mxu0 }
  0xf8   :  { %v6280_v34 = vpop.f32.mrb[1].mxu1  ;;  %v6259_v35 = vadd.f32 %v6258_v33, %v6257_v29  ;;  %v6260_v38 = vpop.f32.mrb[2].mxu0  ;;  %6560 = vmatpush3.bf16.msra.mxu0 %v7219_v42  ;;  %v7257_v33 = vld [vmem:[%s9207_s1 + $0x870] sm:$0xff]   ;;  %v32_v42 = vld [vmem:[%s9208_s0 + $0x88] sm:$0xff] }
  0xf9   :  { %v6281_v36 = vadd.f32 %v6280_v34, %v6279_v31  ;;  %v6282_v40 = vpop.f32.mrb[2].mxu1  ;;  %v6261_v43 = vpop.f32.mrb[3].mxu0  ;;  %6582 = vmatpush3.bf16.msra.mxu1 %v7220_v44  ;;  %6561 = vmatprep.subr.bf16.mxu0 %v7221_v47  ;;  %v7258_v34 = vld [vmem:[%s9207_s1 + $0x8f0] sm:$0xff]   ;;  %v7262_v38 = vld [vmem:[%s9207_s1 + $0x8f8] sm:$0xff]   ;;  %v7269_v47 = vld [vmem:[%s9207_s1 + $0x940] sm:$0xff]  }
  0xfa   :  { %v4409_v41 = vadd.f32 %v6259_v35, %v5664_v32  ;;  %v6283_v45 = vpop.f32.mrb[3].mxu1  ;;  %6583 = vmatprep.subr.bf16.mxu1 %v7222_v48  ;;  %v7259_v35 = vld [vmem:[%s9207_s1 + $0x830] sm:$0xff]   ;;  %v7264_v40 = vld [vmem:[%s9207_s1 + $0x8b8] sm:$0xff]   ;;  %v7270_v48 = vld [vmem:[%s9207_s1 + $0x9c0] sm:$0xff]  }
  0xfb   :  { %v5699_v45 = vcombine.low %v32_v42, %v32_v42 }
  0xfc   :  { %v8334_v46 = vadd.f32 %v6281_v36, %v4409_v41  ;;  %6562 = vmatpush3.bf16.msra.mxu0 %v7223_v49  ;;  %v7260_v36 = vld [vmem:[%s9207_s1 + $0x8b0] sm:$0xff]   ;;  %v31_v41 = vld [vmem:[%s9208_s0 + $0x80] sm:$0xff] }
  0xfd   :  { %6584 = vmatpush3.bf16.msra.mxu1 %v7224_v50  ;;  %6563 = vmatprep.subr.bf16.mxu0 %v7225_v51  ;;  %v5697_v43 = vcombine.low %v31_v41, %v31_v41  ;;  %v5698_v44 = vcombine.high %v31_v41, %v31_v41  ;;  %v7271_v49 = vld [vmem:[%s9207_s1 + $0x900] sm:$0xff]   ;;  %v7273_v51 = vld [vmem:[%s9207_s1 + $0x948] sm:$0xff]   ;;  %v7313_v41 = vld [vmem:[%s9207_s1 + $0xa50] sm:$0xff]  }
  0xfe   :  { %6585 = vmatprep.subr.bf16.mxu1 %v7226_v52  ;;  %v7272_v50 = vld [vmem:[%s9207_s1 + $0x980] sm:$0xff]   ;;  %v7274_v52 = vld [vmem:[%s9207_s1 + $0x9c8] sm:$0xff]  }
 0x100   :  { %6564 = vmatpush3.bf16.msra.mxu0 %v7227_v53  ;;  %v7275_v53 = vld [vmem:[%s9207_s1 + $0x908] sm:$0xff]  }
 0x101   :  { %6586 = vmatpush3.bf16.msra.mxu1 %v7228_v54  ;;  %6593 = vmatprep.subr.bf16.mxu0 %v7233_v61  ;;  %v7276_v54 = vld [vmem:[%s9207_s1 + $0x988] sm:$0xff]   ;;  %v7283_v61 = vld [vmem:[%s9207_s1 + $0x918] sm:$0xff]  }
 0x102   :  { %6615 = vmatprep.subr.bf16.mxu1 %v7234_v62  ;;  %v7284_v62 = vld [vmem:[%s9207_s1 + $0x998] sm:$0xff]  }
 0x103   :  { %4967 = vmatmul.mubr.bf16.vlgmr.msra.gmra.mrb[28].mxu0 %v5693_v57  ;;  %v7279_v57 = vld [vmem:[%s9207_s1 + $0x910] sm:$0xff]  }
 0x104   :  { %5007 = vmatmul.mubr.bf16.vlgmr.msra.gmra.mrb[28].mxu1 %v5695_v59  ;;  %6594 = vmatpush3.bf16.msra.mxu0 %v7235_v63  ;;  %v7281_v59 = vld [vmem:[%s9207_s1 + $0x958] sm:$0xff]   ;;  %v7285_v63 = vld [vmem:[%s9207_s1 + $0x960] sm:$0xff]  }
 0x105   :  { %6616 = vmatpush3.bf16.msra.mxu1 %v7236_v0  ;;  %6595 = vmatprep.subr.bf16.mxu0 %v7237_v1  ;;  %v7286_v0 = vld [vmem:[%s9207_s1 + $0x9e0] sm:$0xff]  }
 0x106   :  { %6617 = vmatprep.subr.bf16.mxu1 %v7238_v2  ;;  %5046 = vmatprep.mubr.bf16.mxu0 %v5698_v44  ;;  %v7287_v2 = vld [vmem:[%s9207_s1 + $0x920] sm:$0xff]   ;;  %v7316_v44 = vld [vmem:[%s9207_s1 + $0xa90] sm:$0xff]  }
 0x108   :  { %6596 = vmatpush3.bf16.msra.mxu0 %v7239_v3 }
 0x109   :  { %6618 = vmatpush3.bf16.msra.mxu1 %v7240_v4  ;;  %6597 = vmatprep.subr.bf16.mxu0 %v7241_v5  ;;  %v7288_v4 = vld [vmem:[%s9207_s1 + $0x9a0] sm:$0xff]  }
 0x10a   :  { %6619 = vmatprep.subr.bf16.mxu1 %v7242_v6 }
 0x10c   :  { %6598 = vmatpush3.bf16.msra.mxu0 %v7243_v7 }
 0x10d   :  { %6620 = vmatpush3.bf16.msra.mxu1 %v7244_v8  ;;  %6599 = vmatprep.subr.bf16.mxu0 %v7245_v9  ;;  %v7289_v8 = vld [vmem:[%s9207_s1 + $0x968] sm:$0xff]  }
 0x10e   :  { %6621 = vmatprep.subr.bf16.mxu1 %v7246_v10  ;;  %v7290_v10 = vld [vmem:[%s9207_s1 + $0x9e8] sm:$0xff]  }
 0x110   :  { %6600 = vmatpush3.bf16.msra.mxu0 %v7247_v11 }
 0x111   :  { %6622 = vmatpush3.bf16.msra.mxu1 %v7248_v12  ;;  %6601 = vmatprep.subr.bf16.mxu0 %v7249_v13 }
 0x112   :  { %6623 = vmatprep.subr.bf16.mxu1 %v7250_v14  ;;  %v7291_v14 = vld [vmem:[%s9207_s1 + $0x928] sm:$0xff]  }
 0x114   :  { %6602 = vmatpush3.bf16.msra.mxu0 %v7251_v15  ;;  %v7292_v15 = vld [vmem:[%s9207_s1 + $0x9a8] sm:$0xff]  }
 0x115   :  { %6624 = vmatpush3.bf16.msra.mxu1 %v7252_v17  ;;  %6603 = vmatprep.subr.bf16.mxu0 %v7253_v23  ;;  %v7297_v23 = vld [vmem:[%s9207_s1 + $0x978] sm:$0xff]  }
 0x116   :  { %v6301_v16 = vpop.f32.mrb[4].mxu0  ;;  %6625 = vmatprep.subr.bf16.mxu1 %v7254_v25  ;;  %v7299_v25 = vld [vmem:[%s9207_s1 + $0x938] sm:$0xff]  }
 0x117   :  { %v6323_v18 = vpop.f32.mrb[4].mxu1  ;;  %v6302_v19 = vpop.f32.mrb[5].mxu0 }
 0x118   :  { %v6324_v20 = vpop.f32.mrb[5].mxu1  ;;  %v6303_v21 = vadd.f32 %v6302_v19, %v6301_v16  ;;  %v6304_v24 = vpop.f32.mrb[6].mxu0  ;;  %6604 = vmatpush3.bf16.msra.mxu0 %v7255_v28  ;;  %v7293_v19 = vld [vmem:[%s9207_s1 + $0x970] sm:$0xff]   ;;  %v34_v28 = vld [vmem:[%s9208_s0 + $0x98] sm:$0xff] }
 0x119   :  { %v6325_v22 = vadd.f32 %v6324_v20, %v6323_v18  ;;  %v6326_v26 = vpop.f32.mrb[6].mxu1  ;;  %v6305_v29 = vpop.f32.mrb[7].mxu0  ;;  %6626 = vmatpush3.bf16.msra.mxu1 %v7256_v30  ;;  %6605 = vmatprep.subr.bf16.mxu0 %v7257_v33  ;;  %v7294_v20 = vld [vmem:[%s9207_s1 + $0x9f0] sm:$0xff]   ;;  %v7298_v24 = vld [vmem:[%s9207_s1 + $0x9f8] sm:$0xff]   ;;  %v5704_v33 = vcombine.high %v34_v28, %v34_v28 }
 0x11a   :  { %v4489_v27 = vadd.f32 %v6303_v21, %v8334_v46  ;;  %v6327_v31 = vpop.f32.mrb[7].mxu1  ;;  %6627 = vmatprep.subr.bf16.mxu1 %v7258_v34  ;;  %v5700_v46 = vcombine.high %v32_v42, %v32_v42  ;;  %v7295_v21 = vld [vmem:[%s9207_s1 + $0x930] sm:$0xff]   ;;  %v7300_v26 = vld [vmem:[%s9207_s1 + $0x9b8] sm:$0xff]   ;;  %v7306_v34 = vld [vmem:[%s9207_s1 + $0xac0] sm:$0xff]  }
 0x11b   :  { %v5703_v31 = vcombine.low %v34_v28, %v34_v28  ;;  %v7314_v42 = vld [vmem:[%s9207_s1 + $0xad0] sm:$0xff]  }
 0x11c   :  { %v8439_v32 = vadd.f32 %v6325_v22, %v4489_v27  ;;  %6606 = vmatpush3.bf16.msra.mxu0 %v7259_v35  ;;  %5086 = vmatprep.mubr.bf16.mxu1 %v5700_v46  ;;  %v7296_v22 = vld [vmem:[%s9207_s1 + $0x9b0] sm:$0xff]   ;;  %v7307_v35 = vld [vmem:[%s9207_s1 + $0xa00] sm:$0xff]   ;;  %v7318_v46 = vld [vmem:[%s9207_s1 + $0xad8] sm:$0xff]  }
 0x11d   :  { %6628 = vmatpush3.bf16.msra.mxu1 %v7260_v36  ;;  %6607 = vmatprep.subr.bf16.mxu0 %v7261_v37  ;;  %v33_v27 = vld [vmem:[%s9208_s0 + $0x90] sm:$0xff]  ;;  %v7308_v36 = vld [vmem:[%s9207_s1 + $0xa80] sm:$0xff]   ;;  %v7309_v37 = vld [vmem:[%s9207_s1 + $0xa48] sm:$0xff]  }
 0x11e   :  { %6629 = vmatprep.subr.bf16.mxu1 %v7262_v38  ;;  %v5701_v29 = vcombine.low %v33_v27, %v33_v27  ;;  %v5702_v30 = vcombine.high %v33_v27, %v33_v27  ;;  %v7310_v38 = vld [vmem:[%s9207_s1 + $0xac8] sm:$0xff]   ;;  %v7349_v27 = vld [vmem:[%s9207_s1 + $0xb50] sm:$0xff]  }
 0x11f   :  { %v7350_v28 = vld [vmem:[%s9207_s1 + $0xbd0] sm:$0xff]  }
 0x120   :  { %6608 = vmatpush3.bf16.msra.mxu0 %v7263_v39  ;;  %v7311_v39 = vld [vmem:[%s9207_s1 + $0xa08] sm:$0xff]  }
 0x121   :  { %6630 = vmatpush3.bf16.msra.mxu1 %v7264_v40  ;;  %6637 = vmatprep.subr.bf16.mxu0 %v7269_v47  ;;  %v7312_v40 = vld [vmem:[%s9207_s1 + $0xa88] sm:$0xff]   ;;  %v7319_v47 = vld [vmem:[%s9207_s1 + $0xa18] sm:$0xff]  }
 0x122   :  { %6659 = vmatprep.subr.bf16.mxu1 %v7270_v48  ;;  %v7320_v48 = vld [vmem:[%s9207_s1 + $0xa98] sm:$0xff]  }
 0x123   :  { %5047 = vmatmul.mubr.bf16.vlgmr.msra.gmra.mrb[32].mxu0 %v5697_v43  ;;  %v7315_v43 = vld [vmem:[%s9207_s1 + $0xa10] sm:$0xff]  }
 0x124   :  { %5087 = vmatmul.mubr.bf16.vlgmr.msra.gmra.mrb[32].mxu1 %v5699_v45  ;;  %6638 = vmatpush3.bf16.msra.mxu0 %v7271_v49  ;;  %v7317_v45 = vld [vmem:[%s9207_s1 + $0xa58] sm:$0xff]   ;;  %v7321_v49 = vld [vmem:[%s9207_s1 + $0xa60] sm:$0xff]  }
 0x125   :  { %6660 = vmatpush3.bf16.msra.mxu1 %v7272_v50  ;;  %6639 = vmatprep.subr.bf16.mxu0 %v7273_v51  ;;  %v7322_v50 = vld [vmem:[%s9207_s1 + $0xae0] sm:$0xff]  }
 0x126   :  { %6661 = vmatprep.subr.bf16.mxu1 %v7274_v52  ;;  %5126 = vmatprep.mubr.bf16.mxu0 %v5702_v30  ;;  %v7323_v52 = vld [vmem:[%s9207_s1 + $0xa20] sm:$0xff]   ;;  %v7352_v30 = vld [vmem:[%s9207_s1 + $0xb90] sm:$0xff]  }
 0x127   :  { %5166 = vmatprep.mubr.bf16.mxu1 %v5704_v33  ;;  %v7355_v33 = vld [vmem:[%s9207_s1 + $0xb18] sm:$0xff]  }
 0x128   :  { %6640 = vmatpush3.bf16.msra.mxu0 %v7275_v53 }
 0x129   :  { %6662 = vmatpush3.bf16.msra.mxu1 %v7276_v54  ;;  %6641 = vmatprep.subr.bf16.mxu0 %v7277_v55  ;;  %v7324_v54 = vld [vmem:[%s9207_s1 + $0xaa0] sm:$0xff]  }
 0x12a   :  { %6663 = vmatprep.subr.bf16.mxu1 %v7278_v56 }
 0x12c   :  { %6642 = vmatpush3.bf16.msra.mxu0 %v7279_v57  ;;  %v7325_v57 = vld [vmem:[%s9207_s1 + $0xa68] sm:$0xff]  }
 0x12d   :  { %6664 = vmatpush3.bf16.msra.mxu1 %v7280_v58  ;;  %6643 = vmatprep.subr.bf16.mxu0 %v7281_v59 }
 0x12e   :  { %6665 = vmatprep.subr.bf16.mxu1 %v7282_v60  ;;  %v7326_v60 = vld [vmem:[%s9207_s1 + $0xae8] sm:$0xff]  }
 0x130   :  { %6644 = vmatpush3.bf16.msra.mxu0 %v7283_v61 }
 0x131   :  { %6666 = vmatpush3.bf16.msra.mxu1 %v7284_v62  ;;  %6645 = vmatprep.subr.bf16.mxu0 %v7285_v63  ;;  %v7327_v63 = vld [vmem:[%s9207_s1 + $0xa28] sm:$0xff]  }
 0x132   :  { %6667 = vmatprep.subr.bf16.mxu1 %v7286_v0 }
 0x134   :  { %6646 = vmatpush3.bf16.msra.mxu0 %v7287_v2 }
 0x135   :  { %6668 = vmatpush3.bf16.msra.mxu1 %v7288_v4  ;;  %6647 = vmatprep.subr.bf16.mxu0 %v7289_v8  ;;  %v7329_v4 = vld [vmem:[%s9207_s1 + $0xa70] sm:$0xff]  }
 0x136   :  { %v6345_v1 = vpop.f32.mrb[8].mxu0  ;;  %6669 = vmatprep.subr.bf16.mxu1 %v7290_v10  ;;  %v7332_v8 = vld [vmem:[%s9207_s1 + $0xab0] sm:$0xff]   ;;  %v7334_v10 = vld [vmem:[%s9207_s1 + $0xaf8] sm:$0xff]  }
 0x137   :  { %v6367_v3 = vpop.f32.mrb[8].mxu1  ;;  %v6346_v5 = vpop.f32.mrb[9].mxu0 }
 0x138   :  { %v6347_v6 = vadd.f32 %v6346_v5, %v6345_v1  ;;  %v6368_v7 = vpop.f32.mrb[9].mxu1  ;;  %v6348_v11 = vpop.f32.mrb[10].mxu0  ;;  %6648 = vmatpush3.bf16.msra.mxu0 %v7291_v14  ;;  %v7328_v1 = vld [vmem:[%s9207_s1 + $0xaa8] sm:$0xff]  }
 0x139   :  { %v6369_v9 = vadd.f32 %v6368_v7, %v6367_v3  ;;  %v6370_v13 = vpop.f32.mrb[10].mxu1  ;;  %v6349_v16 = vpop.f32.mrb[11].mxu0  ;;  %6670 = vmatpush3.bf16.msra.mxu1 %v7292_v15  ;;  %6649 = vmatprep.subr.bf16.mxu0 %v7293_v19  ;;  %v7331_v7 = vld [vmem:[%s9207_s1 + $0xa30] sm:$0xff]   ;;  %v7335_v11 = vld [vmem:[%s9207_s1 + $0xa38] sm:$0xff]   ;;  %v7341_v19 = vld [vmem:[%s9207_s1 + $0xb40] sm:$0xff]  }
 0x13a   :  { %v4569_v12 = vadd.f32 %v6347_v6, %v8439_v32  ;;  %v6371_v18 = vpop.f32.mrb[11].mxu1  ;;  %6671 = vmatprep.subr.bf16.mxu1 %v7294_v20  ;;  %v7305_v32 = vld [vmem:[%s9207_s1 + $0xa40] sm:$0xff]   ;;  %v7330_v6 = vld [vmem:[%s9207_s1 + $0xaf0] sm:$0xff]   ;;  %v36_v16 = vld [vmem:[%s9208_s0 + $0xa8] sm:$0xff] }
 0x13b   :  { %v35_v13 = vld [vmem:[%s9208_s0 + $0xa0] sm:$0xff]  ;;  %v5708_v18 = vcombine.high %v36_v16, %v36_v16 }
 0x13c   :  { %v8544_v17 = vadd.f32 %v6369_v9, %v4569_v12  ;;  %6650 = vmatpush3.bf16.msra.mxu0 %v7295_v21  ;;  %v7333_v9 = vld [vmem:[%s9207_s1 + $0xa78] sm:$0xff]   ;;  %v5705_v14 = vcombine.low %v35_v13, %v35_v13  ;;  %v5706_v15 = vcombine.high %v35_v13, %v35_v13  ;;  %v7342_v20 = vld [vmem:[%s9207_s1 + $0xbc0] sm:$0xff]   ;;  %v7385_v13 = vld [vmem:[%s9207_s1 + $0xc50] sm:$0xff]  }
 0x13d   :  { %6672 = vmatpush3.bf16.msra.mxu1 %v7296_v22  ;;  %6651 = vmatprep.subr.bf16.mxu0 %v7297_v23  ;;  %v7336_v12 = vld [vmem:[%s9207_s1 + $0xab8] sm:$0xff]   ;;  %v7343_v21 = vld [vmem:[%s9207_s1 + $0xb00] sm:$0xff]   ;;  %v7345_v23 = vld [vmem:[%s9207_s1 + $0xb48] sm:$0xff]  }
 0x13e   :  { %6673 = vmatprep.subr.bf16.mxu1 %v7298_v24  ;;  %v7344_v22 = vld [vmem:[%s9207_s1 + $0xb80] sm:$0xff]   ;;  %v7346_v24 = vld [vmem:[%s9207_s1 + $0xbc8] sm:$0xff]  }
 0x140   :  { %6652 = vmatpush3.bf16.msra.mxu0 %v7299_v25  ;;  %v7347_v25 = vld [vmem:[%s9207_s1 + $0xb08] sm:$0xff]  }
 0x141   :  { %6674 = vmatpush3.bf16.msra.mxu1 %v7300_v26  ;;  %6681 = vmatprep.subr.bf16.mxu0 %v7305_v32  ;;  %v7348_v26 = vld [vmem:[%s9207_s1 + $0xb88] sm:$0xff]   ;;  %v7354_v32 = vld [vmem:[%s9207_s1 + $0xbd8] sm:$0xff]  }
 0x142   :  { %6703 = vmatprep.subr.bf16.mxu1 %v7306_v34  ;;  %v7356_v34 = vld [vmem:[%s9207_s1 + $0xb98] sm:$0xff]  }
 0x143   :  { %5127 = vmatmul.mubr.bf16.vlgmr.msra.gmra.mrb[36].mxu0 %v5701_v29  ;;  %v7351_v29 = vld [vmem:[%s9207_s1 + $0xb10] sm:$0xff]  }
 0x144   :  { %5167 = vmatmul.mubr.bf16.vlgmr.msra.gmra.mrb[36].mxu1 %v5703_v31  ;;  %6682 = vmatpush3.bf16.msra.mxu0 %v7307_v35  ;;  %v7353_v31 = vld [vmem:[%s9207_s1 + $0xb58] sm:$0xff]   ;;  %v7357_v35 = vld [vmem:[%s9207_s1 + $0xb60] sm:$0xff]  }
 0x145   :  { %6704 = vmatpush3.bf16.msra.mxu1 %v7308_v36  ;;  %6683 = vmatprep.subr.bf16.mxu0 %v7309_v37  ;;  %v7358_v36 = vld [vmem:[%s9207_s1 + $0xbe0] sm:$0xff]  }
 0x146   :  { %6705 = vmatprep.subr.bf16.mxu1 %v7310_v38  ;;  %5206 = vmatprep.mubr.bf16.mxu0 %v5706_v15  ;;  %v7359_v38 = vld [vmem:[%s9207_s1 + $0xb20] sm:$0xff]   ;;  %v7387_v15 = vld [vmem:[%s9207_s1 + $0xc10] sm:$0xff]  }
 0x147   :  { %5246 = vmatprep.mubr.bf16.mxu1 %v5708_v18  ;;  %v7390_v18 = vld [vmem:[%s9207_s1 + $0xcd8] sm:$0xff]  }
 0x148   :  { %6684 = vmatpush3.bf16.msra.mxu0 %v7311_v39 }
 0x149   :  { %6706 = vmatpush3.bf16.msra.mxu1 %v7312_v40  ;;  %6685 = vmatprep.subr.bf16.mxu0 %v7313_v41  ;;  %v7360_v40 = vld [vmem:[%s9207_s1 + $0xba0] sm:$0xff]  }
 0x14a   :  { %6707 = vmatprep.subr.bf16.mxu1 %v7314_v42 }
 0x14c   :  { %6686 = vmatpush3.bf16.msra.mxu0 %v7315_v43  ;;  %v7361_v43 = vld [vmem:[%s9207_s1 + $0xb68] sm:$0xff]  }
 0x14d   :  { %6708 = vmatpush3.bf16.msra.mxu1 %v7316_v44  ;;  %6687 = vmatprep.subr.bf16.mxu0 %v7317_v45 }
 0x14e   :  { %6709 = vmatprep.subr.bf16.mxu1 %v7318_v46  ;;  %v7362_v46 = vld [vmem:[%s9207_s1 + $0xbe8] sm:$0xff]  }
 0x150   :  { %6688 = vmatpush3.bf16.msra.mxu0 %v7319_v47 }
 0x151   :  { %6710 = vmatpush3.bf16.msra.mxu1 %v7320_v48  ;;  %6689 = vmatprep.subr.bf16.mxu0 %v7321_v49  ;;  %v7363_v49 = vld [vmem:[%s9207_s1 + $0xb28] sm:$0xff]  }
 0x152   :  { %6711 = vmatprep.subr.bf16.mxu1 %v7322_v50 }
 0x154   :  { %6690 = vmatpush3.bf16.msra.mxu0 %v7323_v52 }
 0x155   :  { %6712 = vmatpush3.bf16.msra.mxu1 %v7324_v54  ;;  %6691 = vmatprep.subr.bf16.mxu0 %v7325_v57  ;;  %v7365_v54 = vld [vmem:[%s9207_s1 + $0xb70] sm:$0xff]  }
 0x156   :  { %v6389_v51 = vpop.f32.mrb[12].mxu0  ;;  %6713 = vmatprep.subr.bf16.mxu1 %v7326_v60  ;;  %v7367_v57 = vld [vmem:[%s9207_s1 + $0xb30] sm:$0xff]   ;;  %v7370_v60 = vld [vmem:[%s9207_s1 + $0xbf8] sm:$0xff]  }
 0x157   :  { %v6411_v53 = vpop.f32.mrb[12].mxu1  ;;  %v6390_v55 = vpop.f32.mrb[13].mxu0 }
 0x158   :  { %v6412_v56 = vpop.f32.mrb[13].mxu1  ;;  %v6391_v58 = vadd.f32 %v6390_v55, %v6389_v51  ;;  %v6392_v61 = vpop.f32.mrb[14].mxu0  ;;  %6692 = vmatpush3.bf16.msra.mxu0 %v7327_v63  ;;  %v7364_v51 = vld [vmem:[%s9207_s1 + $0xba8] sm:$0xff]   ;;  %v37_v63 = vld [vmem:[%s9208_s0 + $0xb0] sm:$0xff] }
 0x159   :  { %v6413_v59 = vadd.f32 %v6412_v56, %v6411_v53  ;;  %v6414_v62 = vpop.f32.mrb[14].mxu1  ;;  %v6393_v2 = vpop.f32.mrb[15].mxu0  ;;  %6714 = vmatpush3.bf16.msra.mxu1 %v7328_v1  ;;  %6693 = vmatprep.subr.bf16.mxu0 %v7329_v4  ;;  %v7366_v56 = vld [vmem:[%s9207_s1 + $0xbf0] sm:$0xff]   ;;  %v7371_v61 = vld [vmem:[%s9207_s1 + $0xb38] sm:$0xff]   ;;  %v5709_v1 = vcombine.low %v37_v63, %v37_v63 }
 0x15a   :  { %v4649_v0 = vadd.f32 %v6391_v58, %v8544_v17  ;;  %v6415_v3 = vpop.f32.mrb[15].mxu1  ;;  %6715 = vmatprep.subr.bf16.mxu1 %v7330_v6  ;;  %v5707_v17 = vcombine.low %v36_v16, %v36_v16  ;;  %v7368_v58 = vld [vmem:[%s9207_s1 + $0xbb0] sm:$0xff]   ;;  %v7372_v62 = vld [vmem:[%s9207_s1 + $0xbb8] sm:$0xff]   ;;  %v5710_v2 = vcombine.high %v37_v63, %v37_v63  ;;  %v7378_v6 = vld [vmem:[%s9207_s1 + $0xcc0] sm:$0xff]  }
 0x15b   :  { %v7388_v16 = vld [vmem:[%s9207_s1 + $0xc90] sm:$0xff]  }
 0x15c   :  { %v8652_v5 = vadd.f32 %v6413_v59, %v4649_v0  ;;  %6694 = vmatpush3.bf16.msra.mxu0 %v7331_v7  ;;  %v7369_v59 = vld [vmem:[%s9207_s1 + $0xb78] sm:$0xff]   ;;  %v7379_v7 = vld [vmem:[%s9207_s1 + $0xc00] sm:$0xff]   ;;  %v7421_v63 = vld [vmem:[%s9207_s1 + $0xd50] sm:$0xff]  }
 0x15d   :  { %6716 = vmatpush3.bf16.msra.mxu1 %v7332_v8  ;;  %6695 = vmatprep.subr.bf16.mxu0 %v7333_v9  ;;  %v38_v0 = vld [vmem:[%s9208_s0 + $0xb8] sm:$0xff]  ;;  %v7380_v8 = vld [vmem:[%s9207_s1 + $0xc80] sm:$0xff]   ;;  %v7381_v9 = vld [vmem:[%s9207_s1 + $0xc48] sm:$0xff]  }
 0x15e   :  { %6717 = vmatprep.subr.bf16.mxu1 %v7334_v10  ;;  %v5711_v3 = vcombine.low %v38_v0, %v38_v0  ;;  %v5712_v4 = vcombine.high %v38_v0, %v38_v0  ;;  %v7382_v10 = vld [vmem:[%s9207_s1 + $0xcc8] sm:$0xff]   ;;  %v7422_v0 = vld [vmem:[%s9207_s1 + $0xdd0] sm:$0xff]  }
 0x160   :  { %6696 = vmatpush3.bf16.msra.mxu0 %v7335_v11  ;;  %v7383_v11 = vld [vmem:[%s9207_s1 + $0xc08] sm:$0xff]  }
 0x161   :  { %6718 = vmatpush3.bf16.msra.mxu1 %v7336_v12  ;;  %6725 = vmatprep.subr.bf16.mxu0 %v7341_v19  ;;  %v7384_v12 = vld [vmem:[%s9207_s1 + $0xc88] sm:$0xff]   ;;  %v7391_v19 = vld [vmem:[%s9207_s1 + $0xc18] sm:$0xff]  }
 0x162   :  { %6747 = vmatprep.subr.bf16.mxu1 %v7342_v20  ;;  %v7392_v20 = vld [vmem:[%s9207_s1 + $0xc98] sm:$0xff]  }
 0x163   :  { %5207 = vmatmul.mubr.bf16.vlgmr.msra.gmra.mrb[40].mxu0 %v5705_v14  ;;  %v7386_v14 = vld [vmem:[%s9207_s1 + $0xcd0] sm:$0xff]  }
 0x164   :  { %5247 = vmatmul.mubr.bf16.vlgmr.msra.gmra.mrb[40].mxu1 %v5707_v17  ;;  %6726 = vmatpush3.bf16.msra.mxu0 %v7343_v21  ;;  %v7389_v17 = vld [vmem:[%s9207_s1 + $0xc58] sm:$0xff]   ;;  %v7393_v21 = vld [vmem:[%s9207_s1 + $0xc60] sm:$0xff]  }
 0x165   :  { %6748 = vmatpush3.bf16.msra.mxu1 %v7344_v22  ;;  %6727 = vmatprep.subr.bf16.mxu0 %v7345_v23  ;;  %v7394_v22 = vld [vmem:[%s9207_s1 + $0xce0] sm:$0xff]  }
 0x166   :  { %6749 = vmatprep.subr.bf16.mxu1 %v7346_v24  ;;  %5286 = vmatprep.mubr.bf16.mxu0 %v5710_v2  ;;  %v7395_v24 = vld [vmem:[%s9207_s1 + $0xc20] sm:$0xff]   ;;  %v7424_v2 = vld [vmem:[%s9207_s1 + $0xd90] sm:$0xff]  }
 0x167   :  { %5326 = vmatprep.mubr.bf16.mxu1 %v5712_v4  ;;  %v7426_v4 = vld [vmem:[%s9207_s1 + $0xdd8] sm:$0xff]  }
 0x168   :  { %6728 = vmatpush3.bf16.msra.mxu0 %v7347_v25 }
 0x169   :  { %6750 = vmatpush3.bf16.msra.mxu1 %v7348_v26  ;;  %6729 = vmatprep.subr.bf16.mxu0 %v7349_v27  ;;  %v7396_v26 = vld [vmem:[%s9207_s1 + $0xca0] sm:$0xff]  }
 0x16a   :  { %6751 = vmatprep.subr.bf16.mxu1 %v7350_v28 }
 0x16c   :  { %6730 = vmatpush3.bf16.msra.mxu0 %v7351_v29 }
 0x16d   :  { %6752 = vmatpush3.bf16.msra.mxu1 %v7352_v30  ;;  %6731 = vmatprep.subr.bf16.mxu0 %v7353_v31  ;;  %v7397_v30 = vld [vmem:[%s9207_s1 + $0xc68] sm:$0xff]  }
 0x16e   :  { %6753 = vmatprep.subr.bf16.mxu1 %v7354_v32  ;;  %v7398_v32 = vld [vmem:[%s9207_s1 + $0xce8] sm:$0xff]  }
 0x170   :  { %6732 = vmatpush3.bf16.msra.mxu0 %v7355_v33 }
 0x171   :  { %6754 = vmatpush3.bf16.msra.mxu1 %v7356_v34  ;;  %6733 = vmatprep.subr.bf16.mxu0 %v7357_v35 }
 0x172   :  { %6755 = vmatprep.subr.bf16.mxu1 %v7358_v36  ;;  %v7399_v36 = vld [vmem:[%s9207_s1 + $0xc28] sm:$0xff]  }
 0x174   :  { %6734 = vmatpush3.bf16.msra.mxu0 %v7359_v38 }
 0x175   :  { %6756 = vmatpush3.bf16.msra.mxu1 %v7360_v40  ;;  %6735 = vmatprep.subr.bf16.mxu0 %v7361_v43  ;;  %v7403_v43 = vld [vmem:[%s9207_s1 + $0xc30] sm:$0xff]  }
 0x176   :  { %v6433_v37 = vpop.f32.mrb[16].mxu0  ;;  %6757 = vmatprep.subr.bf16.mxu1 %v7362_v46  ;;  %v7406_v46 = vld [vmem:[%s9207_s1 + $0xcf8] sm:$0xff]  }
 0x177   :  { %v6455_v39 = vpop.f32.mrb[16].mxu1  ;;  %v6434_v41 = vpop.f32.mrb[17].mxu0 }
 0x178   :  { %v6456_v42 = vpop.f32.mrb[17].mxu1  ;;  %v6435_v44 = vadd.f32 %v6434_v41, %v6433_v37  ;;  %v6436_v47 = vpop.f32.mrb[18].mxu0  ;;  %6736 = vmatpush3.bf16.msra.mxu0 %v7363_v49  ;;  %v7400_v37 = vld [vmem:[%s9207_s1 + $0xca8] sm:$0xff]   ;;  %v7401_v41 = vld [vmem:[%s9207_s1 + $0xc70] sm:$0xff]   ;;  %v39_v49 = vld [vmem:[%s9208_s0 + $0xc0] sm:$0xff] }
 0x179   :  { %v6457_v45 = vadd.f32 %v6456_v42, %v6455_v39  ;;  %v6458_v48 = vpop.f32.mrb[18].mxu1  ;;  %v6437_v52 = vpop.f32.mrb[19].mxu0  ;;  %6758 = vmatpush3.bf16.msra.mxu1 %v7364_v51  ;;  %6737 = vmatprep.subr.bf16.mxu0 %v7365_v54  ;;  %v7402_v42 = vld [vmem:[%s9207_s1 + $0xcf0] sm:$0xff]   ;;  %v7407_v47 = vld [vmem:[%s9207_s1 + $0xc38] sm:$0xff]   ;;  %v5713_v51 = vcombine.low %v39_v49, %v39_v49  ;;  %v7413_v54 = vld [vmem:[%s9207_s1 + $0xd40] sm:$0xff]  }
 0x17a   :  { %v4729_v50 = vadd.f32 %v6435_v44, %v8652_v5  ;;  %v6459_v53 = vpop.f32.mrb[19].mxu1  ;;  %6759 = vmatprep.subr.bf16.mxu1 %v7366_v56  ;;  %v7377_v5 = vld [vmem:[%s9207_s1 + $0xc40] sm:$0xff]   ;;  %v7404_v44 = vld [vmem:[%s9207_s1 + $0xcb0] sm:$0xff]   ;;  %v7408_v48 = vld [vmem:[%s9207_s1 + $0xcb8] sm:$0xff]   ;;  %v5714_v52 = vcombine.high %v39_v49, %v39_v49 }
 0x17b   :  { %v7414_v56 = vld [vmem:[%s9207_s1 + $0xdc0] sm:$0xff]   ;;  %v7457_v49 = vld [vmem:[%s9207_s1 + $0xe50] sm:$0xff]  }
 0x17c   :  { %v8757_v55 = vadd.f32 %v6457_v45, %v4729_v50  ;;  %6738 = vmatpush3.bf16.msra.mxu0 %v7367_v57  ;;  %v7405_v45 = vld [vmem:[%s9207_s1 + $0xc78] sm:$0xff]   ;;  %v40_v50 = vld [vmem:[%s9208_s0 + $0xc8] sm:$0xff]  ;;  %v7415_v57 = vld [vmem:[%s9207_s1 + $0xd00] sm:$0xff]  }
 0x17d   :  { %6760 = vmatpush3.bf16.msra.mxu1 %v7368_v58  ;;  %6739 = vmatprep.subr.bf16.mxu0 %v7369_v59  ;;  %v5715_v53 = vcombine.low %v40_v50, %v40_v50  ;;  %v7416_v58 = vld [vmem:[%s9207_s1 + $0xd80] sm:$0xff]   ;;  %v7417_v59 = vld [vmem:[%s9207_s1 + $0xd48] sm:$0xff]  }
 0x17e   :  { %6761 = vmatprep.subr.bf16.mxu1 %v7370_v60  ;;  %v7418_v60 = vld [vmem:[%s9207_s1 + $0xdc8] sm:$0xff]  }
 0x180   :  { %6740 = vmatpush3.bf16.msra.mxu0 %v7371_v61  ;;  %v7419_v61 = vld [vmem:[%s9207_s1 + $0xd08] sm:$0xff]  }
 0x181   :  { %6762 = vmatpush3.bf16.msra.mxu1 %v7372_v62  ;;  %6769 = vmatprep.subr.bf16.mxu0 %v7377_v5  ;;  %v7420_v62 = vld [vmem:[%s9207_s1 + $0xd88] sm:$0xff]   ;;  %v7427_v5 = vld [vmem:[%s9207_s1 + $0xd18] sm:$0xff]  }
 0x182   :  { %6791 = vmatprep.subr.bf16.mxu1 %v7378_v6  ;;  %v7428_v6 = vld [vmem:[%s9207_s1 + $0xd98] sm:$0xff]  }
 0x183   :  { %5287 = vmatmul.mubr.bf16.vlgmr.msra.gmra.mrb[44].mxu0 %v5709_v1  ;;  %v7423_v1 = vld [vmem:[%s9207_s1 + $0xd10] sm:$0xff]  }
 0x184   :  { %5327 = vmatmul.mubr.bf16.vlgmr.msra.gmra.mrb[44].mxu1 %v5711_v3  ;;  %6770 = vmatpush3.bf16.msra.mxu0 %v7379_v7  ;;  %v7425_v3 = vld [vmem:[%s9207_s1 + $0xd58] sm:$0xff]   ;;  %v7429_v7 = vld [vmem:[%s9207_s1 + $0xd60] sm:$0xff]  }
 0x185   :  { %6792 = vmatpush3.bf16.msra.mxu1 %v7380_v8  ;;  %6771 = vmatprep.subr.bf16.mxu0 %v7381_v9  ;;  %v7430_v8 = vld [vmem:[%s9207_s1 + $0xde0] sm:$0xff]  }
 0x186   :  { %6793 = vmatprep.subr.bf16.mxu1 %v7382_v10  ;;  %5366 = vmatprep.mubr.bf16.mxu0 %v5714_v52  ;;  %v7431_v10 = vld [vmem:[%s9207_s1 + $0xd20] sm:$0xff]   ;;  %v7460_v52 = vld [vmem:[%s9207_s1 + $0xe90] sm:$0xff]  }
 0x188   :  { %6772 = vmatpush3.bf16.msra.mxu0 %v7383_v11 }
 0x189   :  { %6794 = vmatpush3.bf16.msra.mxu1 %v7384_v12  ;;  %6773 = vmatprep.subr.bf16.mxu0 %v7385_v13  ;;  %v7432_v12 = vld [vmem:[%s9207_s1 + $0xda0] sm:$0xff]  }
 0x18a   :  { %6795 = vmatprep.subr.bf16.mxu1 %v7386_v14 }
 0x18c   :  { %6774 = vmatpush3.bf16.msra.mxu0 %v7387_v15  ;;  %v7433_v15 = vld [vmem:[%s9207_s1 + $0xd68] sm:$0xff]  }
 0x18d   :  { %6796 = vmatpush3.bf16.msra.mxu1 %v7388_v16  ;;  %6775 = vmatprep.subr.bf16.mxu0 %v7389_v17 }
 0x18e   :  { %6797 = vmatprep.subr.bf16.mxu1 %v7390_v18  ;;  %v7434_v18 = vld [vmem:[%s9207_s1 + $0xde8] sm:$0xff]  }
 0x190   :  { %6776 = vmatpush3.bf16.msra.mxu0 %v7391_v19 }
 0x191   :  { %6798 = vmatpush3.bf16.msra.mxu1 %v7392_v20  ;;  %6777 = vmatprep.subr.bf16.mxu0 %v7393_v21  ;;  %v7435_v21 = vld [vmem:[%s9207_s1 + $0xd28] sm:$0xff]  }
 0x192   :  { %6799 = vmatprep.subr.bf16.mxu1 %v7394_v22 }
 0x194   :  { %6778 = vmatpush3.bf16.msra.mxu0 %v7395_v24 }
 0x195   :  { %6800 = vmatpush3.bf16.msra.mxu1 %v7396_v26  ;;  %6779 = vmatprep.subr.bf16.mxu0 %v7397_v30  ;;  %v7437_v26 = vld [vmem:[%s9207_s1 + $0xd70] sm:$0xff]  }
 0x196   :  { %v6477_v23 = vpop.f32.mrb[20].mxu0  ;;  %6801 = vmatprep.subr.bf16.mxu1 %v7398_v32  ;;  %v7440_v30 = vld [vmem:[%s9207_s1 + $0xdb0] sm:$0xff]   ;;  %v7442_v32 = vld [vmem:[%s9207_s1 + $0xdf8] sm:$0xff]  }
 0x197   :  { %v6499_v25 = vpop.f32.mrb[20].mxu1  ;;  %v6478_v27 = vpop.f32.mrb[21].mxu0 }
 0x198   :  { %v6479_v28 = vadd.f32 %v6478_v27, %v6477_v23  ;;  %v6500_v29 = vpop.f32.mrb[21].mxu1  ;;  %v6480_v33 = vpop.f32.mrb[22].mxu0  ;;  %6780 = vmatpush3.bf16.msra.mxu0 %v7399_v36  ;;  %v7436_v23 = vld [vmem:[%s9207_s1 + $0xda8] sm:$0xff]  }
 0x199   :  { %v6501_v31 = vadd.f32 %v6500_v29, %v6499_v25  ;;  %v6502_v35 = vpop.f32.mrb[22].mxu1  ;;  %v6481_v38 = vpop.f32.mrb[23].mxu0  ;;  %6802 = vmatpush3.bf16.msra.mxu1 %v7400_v37  ;;  %6781 = vmatprep.subr.bf16.mxu0 %v7401_v41  ;;  %v7439_v29 = vld [vmem:[%s9207_s1 + $0xd30] sm:$0xff]   ;;  %v7443_v33 = vld [vmem:[%s9207_s1 + $0xd38] sm:$0xff]   ;;  %v7449_v41 = vld [vmem:[%s9207_s1 + $0xe40] sm:$0xff]  }
 0x19a   :  { %v4809_v34 = vadd.f32 %v6479_v28, %v8757_v55  ;;  %v6503_v40 = vpop.f32.mrb[23].mxu1  ;;  %6803 = vmatprep.subr.bf16.mxu1 %v7402_v42  ;;  %v5716_v55 = vcombine.high %v40_v50, %v40_v50  ;;  %v7438_v28 = vld [vmem:[%s9207_s1 + $0xdf0] sm:$0xff]   ;;  %v42_v38 = vld [vmem:[%s9208_s0 + $0xd8] sm:$0xff]  ;;  %v7450_v42 = vld [vmem:[%s9207_s1 + $0xec0] sm:$0xff]  }
 0x19b   :  { %v41_v35 = vld [vmem:[%s9208_s0 + $0xd0] sm:$0xff]  ;;  %v5720_v40 = vcombine.high %v42_v38, %v42_v38 }
 0x19c   :  { %v8859_v39 = vadd.f32 %v6501_v31, %v4809_v34  ;;  %6782 = vmatpush3.bf16.msra.mxu0 %v7403_v43  ;;  %5406 = vmatprep.mubr.bf16.mxu1 %v5716_v55  ;;  %v7441_v31 = vld [vmem:[%s9207_s1 + $0xd78] sm:$0xff]   ;;  %v5717_v36 = vcombine.low %v41_v35, %v41_v35  ;;  %v5718_v37 = vcombine.high %v41_v35, %v41_v35  ;;  %v7451_v43 = vld [vmem:[%s9207_s1 + $0xe00] sm:$0xff]   ;;  %v7458_v50 = vld [vmem:[%s9207_s1 + $0xed0] sm:$0xff]  }
 0x19d   :  { %6804 = vmatpush3.bf16.msra.mxu1 %v7404_v44  ;;  %6783 = vmatprep.subr.bf16.mxu0 %v7405_v45  ;;  %v7444_v34 = vld [vmem:[%s9207_s1 + $0xdb8] sm:$0xff]   ;;  %v7452_v44 = vld [vmem:[%s9207_s1 + $0xe80] sm:$0xff]   ;;  %v7453_v45 = vld [vmem:[%s9207_s1 + $0xe48] sm:$0xff]  }
 0x19e   :  { %6805 = vmatprep.subr.bf16.mxu1 %v7406_v46  ;;  %v7454_v46 = vld [vmem:[%s9207_s1 + $0xec8] sm:$0xff]   ;;  %v7463_v55 = vld [vmem:[%s9207_s1 + $0xe18] sm:$0xff]   ;;  %v7493_v35 = vld [vmem:[%s9207_s1 + $0xf50] sm:$0xff]  }
 0x1a0   :  { %6784 = vmatpush3.bf16.msra.mxu0 %v7407_v47  ;;  %v7455_v47 = vld [vmem:[%s9207_s1 + $0xe08] sm:$0xff]  }
 0x1a1   :  { %6806 = vmatpush3.bf16.msra.mxu1 %v7408_v48  ;;  %6813 = vmatprep.subr.bf16.mxu0 %v7413_v54  ;;  %v7456_v48 = vld [vmem:[%s9207_s1 + $0xe88] sm:$0xff]   ;;  %v7462_v54 = vld [vmem:[%s9207_s1 + $0xed8] sm:$0xff]  }
 0x1a2   :  { %6835 = vmatprep.subr.bf16.mxu1 %v7414_v56  ;;  %v7464_v56 = vld [vmem:[%s9207_s1 + $0xe98] sm:$0xff]  }
 0x1a3   :  { %5367 = vmatmul.mubr.bf16.vlgmr.msra.gmra.mrb[48].mxu0 %v5713_v51  ;;  %v7459_v51 = vld [vmem:[%s9207_s1 + $0xe10] sm:$0xff]  }
 0x1a4   :  { %5407 = vmatmul.mubr.bf16.vlgmr.msra.gmra.mrb[48].mxu1 %v5715_v53  ;;  %6814 = vmatpush3.bf16.msra.mxu0 %v7415_v57  ;;  %v7461_v53 = vld [vmem:[%s9207_s1 + $0xe58] sm:$0xff]   ;;  %v7465_v57 = vld [vmem:[%s9207_s1 + $0xe60] sm:$0xff]  }
 0x1a5   :  { %6836 = vmatpush3.bf16.msra.mxu1 %v7416_v58  ;;  %6815 = vmatprep.subr.bf16.mxu0 %v7417_v59  ;;  %v7466_v58 = vld [vmem:[%s9207_s1 + $0xee0] sm:$0xff]  }
 0x1a6   :  { %6837 = vmatprep.subr.bf16.mxu1 %v7418_v60  ;;  %5446 = vmatprep.mubr.bf16.mxu0 %v5718_v37  ;;  %v7467_v60 = vld [vmem:[%s9207_s1 + $0xe20] sm:$0xff]   ;;  %v7495_v37 = vld [vmem:[%s9207_s1 + $0xf10] sm:$0xff]  }
 0x1a7   :  { %5486 = vmatprep.mubr.bf16.mxu1 %v5720_v40  ;;  %v7498_v40 = vld [vmem:[%s9207_s1 + $0xfd8] sm:$0xff]  }
 0x1a8   :  { %6816 = vmatpush3.bf16.msra.mxu0 %v7419_v61 }
 0x1a9   :  { %6838 = vmatpush3.bf16.msra.mxu1 %v7420_v62  ;;  %6817 = vmatprep.subr.bf16.mxu0 %v7421_v63  ;;  %v7468_v62 = vld [vmem:[%s9207_s1 + $0xea0] sm:$0xff]  }
 0x1aa   :  { %6839 = vmatprep.subr.bf16.mxu1 %v7422_v0 }
 0x1ac   :  { %6818 = vmatpush3.bf16.msra.mxu0 %v7423_v1  ;;  %v7469_v1 = vld [vmem:[%s9207_s1 + $0xe68] sm:$0xff]  }
 0x1ad   :  { %6840 = vmatpush3.bf16.msra.mxu1 %v7424_v2  ;;  %6819 = vmatprep.subr.bf16.mxu0 %v7425_v3 }
 0x1ae   :  { %6841 = vmatprep.subr.bf16.mxu1 %v7426_v4  ;;  %v7470_v4 = vld [vmem:[%s9207_s1 + $0xee8] sm:$0xff]  }
 0x1b0   :  { %6820 = vmatpush3.bf16.msra.mxu0 %v7427_v5 }
 0x1b1   :  { %6842 = vmatpush3.bf16.msra.mxu1 %v7428_v6  ;;  %6821 = vmatprep.subr.bf16.mxu0 %v7429_v7  ;;  %v7471_v7 = vld [vmem:[%s9207_s1 + $0xe28] sm:$0xff]  }
 0x1b2   :  { %6843 = vmatprep.subr.bf16.mxu1 %v7430_v8 }
 0x1b4   :  { %6822 = vmatpush3.bf16.msra.mxu0 %v7431_v10 }
 0x1b5   :  { %6844 = vmatpush3.bf16.msra.mxu1 %v7432_v12  ;;  %6823 = vmatprep.subr.bf16.mxu0 %v7433_v15  ;;  %v7473_v12 = vld [vmem:[%s9207_s1 + $0xe70] sm:$0xff]  }
 0x1b6   :  { %v6521_v9 = vpop.f32.mrb[24].mxu0  ;;  %6845 = vmatprep.subr.bf16.mxu1 %v7434_v18  ;;  %v7475_v15 = vld [vmem:[%s9207_s1 + $0xe30] sm:$0xff]   ;;  %v7478_v18 = vld [vmem:[%s9207_s1 + $0xef8] sm:$0xff]  }
 0x1b7   :  { %v6543_v11 = vpop.f32.mrb[24].mxu1  ;;  %v6522_v13 = vpop.f32.mrb[25].mxu0 }
 0x1b8   :  { %v6544_v14 = vpop.f32.mrb[25].mxu1  ;;  %v6523_v16 = vadd.f32 %v6522_v13, %v6521_v9  ;;  %v6524_v19 = vpop.f32.mrb[26].mxu0  ;;  %6824 = vmatpush3.bf16.msra.mxu0 %v7435_v21  ;;  %v7472_v9 = vld [vmem:[%s9207_s1 + $0xea8] sm:$0xff]   ;;  %v43_v21 = vld [vmem:[%s9208_s0 + $0xe0] sm:$0xff] }
 0x1b9   :  { %v6545_v17 = vadd.f32 %v6544_v14, %v6543_v11  ;;  %v6546_v20 = vpop.f32.mrb[26].mxu1  ;;  %v6525_v24 = vpop.f32.mrb[27].mxu0  ;;  %6846 = vmatpush3.bf16.msra.mxu1 %v7436_v23  ;;  %6825 = vmatprep.subr.bf16.mxu0 %v7437_v26  ;;  %v7474_v14 = vld [vmem:[%s9207_s1 + $0xef0] sm:$0xff]   ;;  %v7479_v19 = vld [vmem:[%s9207_s1 + $0xe38] sm:$0xff]   ;;  %v5721_v23 = vcombine.low %v43_v21, %v43_v21 }
 0x1ba   :  { %v4889_v22 = vadd.f32 %v6523_v16, %v8859_v39  ;;  %v6547_v25 = vpop.f32.mrb[27].mxu1  ;;  %6847 = vmatprep.subr.bf16.mxu1 %v7438_v28  ;;  %v5719_v39 = vcombine.low %v42_v38, %v42_v38  ;;  %v7476_v16 = vld [vmem:[%s9207_s1 + $0xeb0] sm:$0xff]   ;;  %v7480_v20 = vld [vmem:[%s9207_s1 + $0xeb8] sm:$0xff]   ;;  %v5722_v24 = vcombine.high %v43_v21, %v43_v21  ;;  %v7486_v28 = vld [vmem:[%s9207_s1 + $0xfc0] sm:$0xff]  }
 0x1bb   :  { %v7496_v38 = vld [vmem:[%s9207_s1 + $0xf90] sm:$0xff]  }
 0x1bc   :  { %v8967_v27 = vadd.f32 %v6545_v17, %v4889_v22  ;;  %6826 = vmatpush3.bf16.msra.mxu0 %v7439_v29  ;;  %v7477_v17 = vld [vmem:[%s9207_s1 + $0xe78] sm:$0xff]   ;;  %v44_v22 = vld [vmem:[%s9208_s0 + $0xe8] sm:$0xff]  ;;  %v7487_v29 = vld [vmem:[%s9207_s1 + $0xf00] sm:$0xff]  }
 0x1bd   :  { %6848 = vmatpush3.bf16.msra.mxu1 %v7440_v30  ;;  %6827 = vmatprep.subr.bf16.mxu0 %v7441_v31  ;;  %v5723_v25 = vcombine.low %v44_v22, %v44_v22  ;;  %v5724_v26 = vcombine.high %v44_v22, %v44_v22  ;;  %v7488_v30 = vld [vmem:[%s9207_s1 + $0xf80] sm:$0xff]   ;;  %v7489_v31 = vld [vmem:[%s9207_s1 + $0xf48] sm:$0xff]  }
 0x1be   :  { %6849 = vmatprep.subr.bf16.mxu1 %v7442_v32  ;;  %v7490_v32 = vld [vmem:[%s9207_s1 + $0xfc8] sm:$0xff]  }
 0x1c0   :  { %6828 = vmatpush3.bf16.msra.mxu0 %v7443_v33  ;;  %v7491_v33 = vld [vmem:[%s9207_s1 + $0xf08] sm:$0xff]  }
 0x1c1   :  { %6850 = vmatpush3.bf16.msra.mxu1 %v7444_v34  ;;  %6857 = vmatprep.subr.bf16.mxu0 %v7449_v41  ;;  %v7492_v34 = vld [vmem:[%s9207_s1 + $0xf88] sm:$0xff]   ;;  %v7499_v41 = vld [vmem:[%s9207_s1 + $0xf18] sm:$0xff]  }
 0x1c2   :  { %6879 = vmatprep.subr.bf16.mxu1 %v7450_v42  ;;  %v7500_v42 = vld [vmem:[%s9207_s1 + $0xf98] sm:$0xff]  }
 0x1c3   :  { %5447 = vmatmul.mubr.bf16.vlgmr.msra.gmra.mrb[52].mxu0 %v5717_v36  ;;  %v7494_v36 = vld [vmem:[%s9207_s1 + $0xfd0] sm:$0xff]  }
 0x1c4   :  { %5487 = vmatmul.mubr.bf16.vlgmr.msra.gmra.mrb[52].mxu1 %v5719_v39  ;;  %6858 = vmatpush3.bf16.msra.mxu0 %v7451_v43  ;;  %v7497_v39 = vld [vmem:[%s9207_s1 + $0xf58] sm:$0xff]   ;;  %v7501_v43 = vld [vmem:[%s9207_s1 + $0xf60] sm:$0xff]  }
 0x1c5   :  { %6880 = vmatpush3.bf16.msra.mxu1 %v7452_v44  ;;  %6859 = vmatprep.subr.bf16.mxu0 %v7453_v45  ;;  %v7502_v44 = vld [vmem:[%s9207_s1 + $0xfe0] sm:$0xff]  }
 0x1c6   :  { %6881 = vmatprep.subr.bf16.mxu1 %v7454_v46  ;;  %5526 = vmatprep.mubr.bf16.mxu0 %v5722_v24  ;;  %v7503_v45 = vld [vmem:[%s9207_s1 + $0xf20] sm:$0xff]  }
 0x1c7   :  { %5566 = vmatprep.mubr.bf16.mxu1 %v5724_v26 }
 0x1c8   :  { %6860 = vmatpush3.bf16.msra.mxu0 %v7455_v47  ;;  %v7504_v47 = vld [vmem:[%s9207_s1 + $0xfa0] sm:$0xff]  }
 0x1c9   :  { %6882 = vmatpush3.bf16.msra.mxu1 %v7456_v48  ;;  %6861 = vmatprep.subr.bf16.mxu0 %v7457_v49 }
 0x1ca   :  { %6883 = vmatprep.subr.bf16.mxu1 %v7458_v50 }
 0x1cc   :  { %6862 = vmatpush3.bf16.msra.mxu0 %v7459_v51 }
 0x1cd   :  { %6884 = vmatpush3.bf16.msra.mxu1 %v7460_v52  ;;  %6863 = vmatprep.subr.bf16.mxu0 %v7461_v53  ;;  %v7505_v53 = vld [vmem:[%s9207_s1 + $0xf68] sm:$0xff]  }
 0x1ce   :  { %6885 = vmatprep.subr.bf16.mxu1 %v7462_v54 }
 0x1d0   :  { %6864 = vmatpush3.bf16.msra.mxu0 %v7463_v55  ;;  %v7506_v55 = vld [vmem:[%s9207_s1 + $0xfe8] sm:$0xff]  }
 0x1d1   :  { %6886 = vmatpush3.bf16.msra.mxu1 %v7464_v56  ;;  %6865 = vmatprep.subr.bf16.mxu0 %v7465_v57 }
 0x1d2   :  { %6887 = vmatprep.subr.bf16.mxu1 %v7466_v58  ;;  %v7507_v58 = vld [vmem:[%s9207_s1 + $0xf28] sm:$0xff]  }
 0x1d4   :  { %6866 = vmatpush3.bf16.msra.mxu0 %v7467_v60  ;;  %v7508_v60 = vld [vmem:[%s9207_s1 + $0xfa8] sm:$0xff]  }
 0x1d5   :  { %6888 = vmatpush3.bf16.msra.mxu1 %v7468_v62  ;;  %6867 = vmatprep.subr.bf16.mxu0 %v7469_v1  ;;  %v7511_v1 = vld [vmem:[%s9207_s1 + $0xf30] sm:$0xff]  }
 0x1d6   :  { %v6565_v59 = vpop.f32.mrb[28].mxu0  ;;  %6889 = vmatprep.subr.bf16.mxu1 %v7470_v4  ;;  %v7514_v4 = vld [vmem:[%s9207_s1 + $0xff8] sm:$0xff]  }
 0x1d7   :  { %v6587_v61 = vpop.f32.mrb[28].mxu1  ;;  %v6566_v63 = vpop.f32.mrb[29].mxu0 }
 0x1d8   :  { %v6588_v0 = vpop.f32.mrb[29].mxu1  ;;  %v6567_v2 = vadd.f32 %v6566_v63, %v6565_v59  ;;  %v6568_v5 = vpop.f32.mrb[30].mxu0  ;;  %6868 = vmatpush3.bf16.msra.mxu0 %v7471_v7  ;;  %v7509_v63 = vld [vmem:[%s9207_s1 + $0xf70] sm:$0xff]  }
 0x1d9   :  { %v6589_v3 = vadd.f32 %v6588_v0, %v6587_v61  ;;  %v6590_v6 = vpop.f32.mrb[30].mxu1  ;;  %v6569_v10 = vpop.f32.mrb[31].mxu0  ;;  %6890 = vmatpush3.bf16.msra.mxu1 %v7472_v9  ;;  %6869 = vmatprep.subr.bf16.mxu0 %v7473_v12  ;;  %v7510_v0 = vld [vmem:[%s9207_s1 + $0xff0] sm:$0xff]   ;;  %v7515_v5 = vld [vmem:[%s9207_s1 + $0xf38] sm:$0xff]  }
 0x1da   :  { %v4969_v8 = vadd.f32 %v6567_v2, %v8967_v27  ;;  %v6591_v11 = vpop.f32.mrb[31].mxu1  ;;  %6891 = vmatprep.subr.bf16.mxu1 %v7474_v14  ;;  %v7485_v27 = vld [vmem:[%s9207_s1 + $0xf40] sm:$0xff]   ;;  %v7512_v2 = vld [vmem:[%s9207_s1 + $0xfb0] sm:$0xff]   ;;  %v7516_v6 = vld [vmem:[%s9207_s1 + $0xfb8] sm:$0xff]  }
 0x1db   :  { %v45_v7 = vld [vmem:[%s9208_s0 + $0xf0] sm:$0xff] }
 0x1dc   :  { %v9072_v13 = vadd.f32 %v6589_v3, %v4969_v8  ;;  %6870 = vmatpush3.bf16.msra.mxu0 %v7475_v15  ;;  %v7513_v3 = vld [vmem:[%s9207_s1 + $0xf78] sm:$0xff]   ;;  %v5725_v9 = vcombine.low %v45_v7, %v45_v7  ;;  %v5726_v10 = vcombine.high %v45_v7, %v45_v7 }
 0x1dd   :  { %6892 = vmatpush3.bf16.msra.mxu1 %v7476_v16  ;;  %6871 = vmatprep.subr.bf16.mxu0 %v7477_v17  ;;  %v46_v8 = vld [vmem:[%s9208_s0 + $0xf8] sm:$0xff] }
 0x1de   :  { %6893 = vmatprep.subr.bf16.mxu1 %v7478_v18  ;;  %v5727_v11 = vcombine.low %v46_v8, %v46_v8  ;;  %v5728_v12 = vcombine.high %v46_v8, %v46_v8 }
 0x1e0   :  { %6872 = vmatpush3.bf16.msra.mxu0 %v7479_v19 }
 0x1e1   :  { %6894 = vmatpush3.bf16.msra.mxu1 %v7480_v20  ;;  %6901 = vmatprep.subr.bf16.mxu0 %v7485_v27 }
 0x1e2   :  { %6923 = vmatprep.subr.bf16.mxu1 %v7486_v28 }
 0x1e3   :  { %5527 = vmatmul.mubr.bf16.vlgmr.msra.gmra.mrb[56].mxu0 %v5721_v23 }
 0x1e4   :  { %5567 = vmatmul.mubr.bf16.vlgmr.msra.gmra.mrb[56].mxu1 %v5723_v25  ;;  %6902 = vmatpush3.bf16.msra.mxu0 %v7487_v29 }
 0x1e5   :  { %6924 = vmatpush3.bf16.msra.mxu1 %v7488_v30  ;;  %6903 = vmatprep.subr.bf16.mxu0 %v7489_v31 }
 0x1e6   :  { %6925 = vmatprep.subr.bf16.mxu1 %v7490_v32  ;;  %5606 = vmatprep.mubr.bf16.mxu0 %v5726_v10 }
 0x1e7   :  { %5646 = vmatprep.mubr.bf16.mxu1 %v5728_v12 }
 0x1e8   :  { %6904 = vmatpush3.bf16.msra.mxu0 %v7491_v33 }
 0x1e9   :  { %6926 = vmatpush3.bf16.msra.mxu1 %v7492_v34  ;;  %6905 = vmatprep.subr.bf16.mxu0 %v7493_v35 }
 0x1ea   :  { %6927 = vmatprep.subr.bf16.mxu1 %v7494_v36 }
 0x1ec   :  { %6906 = vmatpush3.bf16.msra.mxu0 %v7495_v37 }
 0x1ed   :  { %6928 = vmatpush3.bf16.msra.mxu1 %v7496_v38  ;;  %6907 = vmatprep.subr.bf16.mxu0 %v7497_v39 }
 0x1ee   :  { %6929 = vmatprep.subr.bf16.mxu1 %v7498_v40 }
 0x1f0   :  { %6908 = vmatpush3.bf16.msra.mxu0 %v7499_v41 }
 0x1f1   :  { %6930 = vmatpush3.bf16.msra.mxu1 %v7500_v42  ;;  %6909 = vmatprep.subr.bf16.mxu0 %v7501_v43 }
 0x1f2   :  { %6931 = vmatprep.subr.bf16.mxu1 %v7502_v44 }
 0x1f4   :  { %6910 = vmatpush3.bf16.msra.mxu0 %v7503_v45 }
 0x1f5   :  { %6932 = vmatpush3.bf16.msra.mxu1 %v7504_v47  ;;  %6911 = vmatprep.subr.bf16.mxu0 %v7505_v53 }
 0x1f6   :  { %v6609_v46 = vpop.f32.mrb[32].mxu0  ;;  %6933 = vmatprep.subr.bf16.mxu1 %v7506_v55 }
 0x1f7   :  { %v6631_v48 = vpop.f32.mrb[32].mxu1  ;;  %v6610_v49 = vpop.f32.mrb[33].mxu0 }
 0x1f8   :  { %v6632_v50 = vpop.f32.mrb[33].mxu1  ;;  %v6611_v51 = vadd.f32 %v6610_v49, %v6609_v46  ;;  %v6612_v54 = vpop.f32.mrb[34].mxu0  ;;  %6912 = vmatpush3.bf16.msra.mxu0 %v7507_v58 }
 0x1f9   :  { %v6633_v52 = vadd.f32 %v6632_v50, %v6631_v48  ;;  %v6634_v56 = vpop.f32.mrb[34].mxu1  ;;  %v6613_v59 = vpop.f32.mrb[35].mxu0  ;;  %6934 = vmatpush3.bf16.msra.mxu1 %v7508_v60  ;;  %6913 = vmatprep.subr.bf16.mxu0 %v7509_v63 }
 0x1fa   :  { %v5049_v57 = vadd.f32 %v6611_v51, %v9072_v13  ;;  %v6635_v61 = vpop.f32.mrb[35].mxu1  ;;  %6935 = vmatprep.subr.bf16.mxu1 %v7510_v0 }
 0x1fc   :  { %v5089_v62 = vadd.f32 %v6633_v52, %v5049_v57  ;;  %6914 = vmatpush3.bf16.msra.mxu0 %v7511_v1 }
 0x1fd   :  { %6936 = vmatpush3.bf16.msra.mxu1 %v7512_v2  ;;  %6915 = vmatprep.subr.bf16.mxu0 %v7513_v3 }
 0x1fe   :  { %6937 = vmatprep.subr.bf16.mxu1 %v7514_v4 }
 0x200   :  { %6916 = vmatpush3.bf16.msra.mxu0 %v7515_v5 }
 0x201   :  { %6938 = vmatpush3.bf16.msra.mxu1 %v7516_v6 }
 0x203   :  { %5607 = vmatmul.mubr.bf16.vlgmr.msra.gmra.mrb[60].mxu0 %v5725_v9 }
 0x204   :  { %5647 = vmatmul.mubr.bf16.vlgmr.msra.gmra.mrb[60].mxu1 %v5727_v11 }
 0x216   :  { %v6653_v13 = vpop.f32.mrb[36].mxu0 }
 0x217   :  { %v6675_v14 = vpop.f32.mrb[36].mxu1  ;;  %v6654_v15 = vpop.f32.mrb[37].mxu0 }
 0x218   :  { %v6655_v16 = vadd.f32 %v6654_v15, %v6653_v13  ;;  %v6676_v17 = vpop.f32.mrb[37].mxu1  ;;  %v6656_v18 = vpop.f32.mrb[38].mxu0 }
 0x219   :  { %v6677_v19 = vadd.f32 %v6676_v17, %v6675_v14  ;;  %v6678_v20 = vpop.f32.mrb[38].mxu1  ;;  %v6657_v21 = vpop.f32.mrb[39].mxu0 }
 0x21a   :  { %v5129_v22 = vadd.f32 %v6655_v16, %v5089_v62  ;;  %v6679_v23 = vpop.f32.mrb[39].mxu1 }
 0x21c   :  { %v5169_v24 = vadd.f32 %v6677_v19, %v5129_v22 }
 0x236   :  { %v6697_v25 = vpop.f32.mrb[40].mxu0 }
 0x237   :  { %v6719_v26 = vpop.f32.mrb[40].mxu1  ;;  %v6698_v27 = vpop.f32.mrb[41].mxu0 }
 0x238   :  { %v6720_v28 = vpop.f32.mrb[41].mxu1  ;;  %v6699_v29 = vadd.f32 %v6698_v27, %v6697_v25  ;;  %v6700_v31 = vpop.f32.mrb[42].mxu0 }
 0x239   :  { %v6721_v30 = vadd.f32 %v6720_v28, %v6719_v26  ;;  %v6722_v32 = vpop.f32.mrb[42].mxu1  ;;  %v6701_v33 = vpop.f32.mrb[43].mxu0 }
 0x23a   :  { %v6723_v34 = vpop.f32.mrb[43].mxu1  ;;  %v5209_v35 = vadd.f32 %v6699_v29, %v5169_v24 }
 0x23c   :  { %v5249_v36 = vadd.f32 %v6721_v30, %v5209_v35 }
 0x256   :  { %v6741_v37 = vpop.f32.mrb[44].mxu0 }
 0x257   :  { %v6763_v38 = vpop.f32.mrb[44].mxu1  ;;  %v6742_v39 = vpop.f32.mrb[45].mxu0 }
 0x258   :  { %v6743_v40 = vadd.f32 %v6742_v39, %v6741_v37  ;;  %v6764_v41 = vpop.f32.mrb[45].mxu1  ;;  %v6744_v42 = vpop.f32.mrb[46].mxu0 }
 0x259   :  { %v6765_v43 = vadd.f32 %v6764_v41, %v6763_v38  ;;  %v6766_v44 = vpop.f32.mrb[46].mxu1  ;;  %v6745_v45 = vpop.f32.mrb[47].mxu0 }
 0x25a   :  { %v5289_v46 = vadd.f32 %v6743_v40, %v5249_v36  ;;  %v6767_v47 = vpop.f32.mrb[47].mxu1 }
 0x25c   :  { %v5329_v48 = vadd.f32 %v6765_v43, %v5289_v46 }
 0x276   :  { %v6785_v49 = vpop.f32.mrb[48].mxu0 }
 0x277   :  { %v6807_v50 = vpop.f32.mrb[48].mxu1  ;;  %v6786_v51 = vpop.f32.mrb[49].mxu0 }
 0x278   :  { %v6787_v52 = vadd.f32 %v6786_v51, %v6785_v49  ;;  %v6808_v53 = vpop.f32.mrb[49].mxu1  ;;  %v6788_v54 = vpop.f32.mrb[50].mxu0 }
 0x279   :  { %v6809_v55 = vadd.f32 %v6808_v53, %v6807_v50  ;;  %v6810_v56 = vpop.f32.mrb[50].mxu1  ;;  %v6789_v57 = vpop.f32.mrb[51].mxu0 }
 0x27a   :  { %v5369_v58 = vadd.f32 %v6787_v52, %v5329_v48  ;;  %v6811_v59 = vpop.f32.mrb[51].mxu1 }
 0x27c   :  { %v5409_v60 = vadd.f32 %v6809_v55, %v5369_v58 }
 0x296   :  { %v6829_v61 = vpop.f32.mrb[52].mxu0 }
 0x297   :  { %v6851_v62 = vpop.f32.mrb[52].mxu1  ;;  %v6830_v63 = vpop.f32.mrb[53].mxu0 }
 0x298   :  { %v6852_v0 = vpop.f32.mrb[53].mxu1  ;;  %v6831_v1 = vadd.f32 %v6830_v63, %v6829_v61  ;;  %v6832_v3 = vpop.f32.mrb[54].mxu0 }
 0x299   :  { %v6853_v2 = vadd.f32 %v6852_v0, %v6851_v62  ;;  %v6854_v4 = vpop.f32.mrb[54].mxu1  ;;  %v6833_v5 = vpop.f32.mrb[55].mxu0 }
 0x29a   :  { %v6855_v6 = vpop.f32.mrb[55].mxu1  ;;  %v5449_v7 = vadd.f32 %v6831_v1, %v5409_v60 }
 0x29c   :  { %v5489_v8 = vadd.f32 %v6853_v2, %v5449_v7 }
 0x2b6   :  { %v6873_v9 = vpop.f32.mrb[56].mxu0 }
 0x2b7   :  { %v6895_v10 = vpop.f32.mrb[56].mxu1  ;;  %v6874_v11 = vpop.f32.mrb[57].mxu0 }
 0x2b8   :  { %v6875_v12 = vadd.f32 %v6874_v11, %v6873_v9  ;;  %v6896_v13 = vpop.f32.mrb[57].mxu1  ;;  %v6876_v14 = vpop.f32.mrb[58].mxu0 }
 0x2b9   :  { %v6897_v15 = vadd.f32 %v6896_v13, %v6895_v10  ;;  %v6898_v16 = vpop.f32.mrb[58].mxu1  ;;  %v6877_v17 = vpop.f32.mrb[59].mxu0 }
 0x2ba   :  { %v5529_v18 = vadd.f32 %v6875_v12, %v5489_v8  ;;  %v6899_v19 = vpop.f32.mrb[59].mxu1 }
 0x2bc   :  { %v5569_v20 = vadd.f32 %v6897_v15, %v5529_v18 }
 0x2d6   :  { %v6917_v21 = vpop.f32.mrb[60].mxu0 }
 0x2d7   :  { %v6939_v22 = vpop.f32.mrb[60].mxu1  ;;  %v6918_v23 = vpop.f32.mrb[61].mxu0 }
 0x2d8   :  { %v6919_v24 = vadd.f32 %v6918_v23, %v6917_v21  ;;  %v6940_v25 = vpop.f32.mrb[61].mxu1  ;;  %v6920_v26 = vpop.f32.mrb[62].mxu0 }
 0x2d9   :  { %v6941_v27 = vadd.f32 %v6940_v25, %v6939_v22  ;;  %v6942_v28 = vpop.f32.mrb[62].mxu1  ;;  %v6921_v29 = vpop.f32.mrb[63].mxu0 }
 0x2da   :  { %v5609_v30 = vadd.f32 %v6919_v24, %v5569_v20  ;;  %v6943_v31 = vpop.f32.mrb[63].mxu1 }
 0x2dc   :  { %v5649_v32 = vadd.f32 %v6941_v27, %v5609_v30 }
 0x2de   :  { %v5654_v33 = vsub.f32 0.0, %v5649_v32 }
 0x2e0   :  { %v5655_v34 = vmul.f32 1.442695, %v5654_v33 }
 0x2e2   :  { %7521 = vpow2.f32 %v5655_v34 }
 0x2ec   :  { %v7522_v35 = vpop.eup %7521 }
 0x2ed   :  { %v5657_v36 = vadd.f32 1.0, %v7522_v35 }
 0x2ef   :  { %7523 = vrcp.f32 %v5657_v36 }
 0x2f9   :  { %v7524_v37 = vpop.eup %7523 }
 0x2fa   :  { %5659 = vst [vmem:[%s9210_s3] sm:$0xff] %v7524_v37 }

</bundles_post_ra>
